<compile_context>
chip_gen: v7x
topology: tpu7x:2x2x1
jax: 0.10.0
libtpu: 0.0.40
codegen_flags: <defaults>
</compile_context>

<pallas_src>
import math

import jax
import jax.numpy as jnp
from jax import lax
from jax.experimental import pallas as pl
from jax.experimental.pallas import tpu as pltpu

# ----------------------------- model config ---------------------------------
HIDDEN = 128                 # hidden size (fills all 128 lanes)
FFN = 4 * HIDDEN             # BERT intermediate size
NUM_LAYERS = 2               # small encoder depth
CTX_LEN = 8                  # context tokens
NUM_COLS = 4                 # table columns
COLS_PAD = 8                 # columns padded to 8 sublanes (lane/sublane-dense out)
TOK_PER_COL = 6              # tokens per linearized column (header + cell value)
SEQ_LEN = CTX_LEN + NUM_COLS * TOK_PER_COL   # 32
VOCAB = 128                  # one-hot embedding matmul is exactly one MXU tile
LN_EPS = 1e-12

BATCH = 8                    # examples per forward call
EX_PER_BLK = 4               # examples fused per grid step -> 128-row matmuls
BLK_ROWS = EX_PER_BLK * SEQ_LEN        # 128
POOL_ROWS = EX_PER_BLK * COLS_PAD      # 32

# power-of-two shifts/masks for in-kernel index math (avoid div/mod)
_SEQ_SHIFT = SEQ_LEN.bit_length() - 1          # 5
_COLS_SHIFT = COLS_PAD.bit_length() - 1        # 3
assert SEQ_LEN == 1 << _SEQ_SHIFT and COLS_PAD == 1 << _COLS_SHIFT
assert BATCH % EX_PER_BLK == 0


# ------------------------------ kernel helpers ------------------------------
def _layernorm(x, g, b):
    mu = jnp.mean(x, axis=-1, keepdims=True)
    var = jnp.mean((x - mu) * (x - mu), axis=-1, keepdims=True)
    return (x - mu) * lax.rsqrt(var + LN_EPS) * g + b


def _gelu(x):
    c = math.sqrt(2.0 / math.pi)
    return 0.5 * x * (1.0 + jnp.tanh(c * (x + 0.044715 * x * x * x)))


# --------------------------- fused encoder kernel ---------------------------
def fused_encoder_kernel(ids_ref, tok_emb_ref, posseg_ref, wqkv_ref, wo_ref,
                         w1_ref, w2_ref, ln_ref, out_ref):
    """Embedding + both encoder layers + column pooling for EX_PER_BLK examples.

    ids_ref    : (BLK_ROWS, 1)  int32   linearized token ids (4 examples stacked)
    tok_emb_ref: (VOCAB, H)     bf16    token embedding table
    posseg_ref : (BLK_ROWS, H)  f32     position + segment embedding (static, tiled)
    wqkv_ref   : (L, H, 3H)     bf16    fused Q/K/V (Q pre-scaled by 1/sqrt(H))
    wo_ref     : (L, H, H)      bf16    attention output projection
    w1_ref     : (L, H, FFN)    bf16    FFN up-projection
    w2_ref     : (L, FFN, H)    bf16    FFN down-projection
    ln_ref     : (2L*2, H) = (8, H) f32 rows = [g1,b1,g2,b2] per layer
    out_ref    : (POOL_ROWS, H) f32     padded column encodings
    """
    # --- fused embedding: one_hot(ids) @ tok_emb (one 128x128 MXU tile) -----
    ids = ids_ref[...]                                            # (BLK_ROWS, 1)
    vocab_iota = lax.broadcasted_iota(jnp.int32, (BLK_ROWS, VOCAB), 1)
    one_hot = jnp.where(vocab_iota == ids, 1.0, 0.0).astype(jnp.bfloat16)
    x = (jnp.dot(one_hot, tok_emb_ref[...],
                 preferred_element_type=jnp.float32)
         + posseg_ref[...])                                       # (BLK_ROWS, H) f32

    # --- block-diagonal "same example" mask for batched attention -----------
    row_ex = lax.broadcasted_iota(jnp.int32, (BLK_ROWS, BLK_ROWS), 0) >> _SEQ_SHIFT
    col_ex = lax.broadcasted_iota(jnp.int32, (BLK_ROWS, BLK_ROWS), 1) >> _SEQ_SHIFT
    same_ex = row_ex == col_ex

    ln = ln_ref[...]                                              # (8, H) one vreg load

    # Statically unrolled layer loop; x stays resident in vregs/VMEM.
    for li in range(NUM_LAYERS):
        # --- self attention (single head, fused QKV, bf16 MXU operands) -----
        qkv = jnp.dot(x.astype(jnp.bfloat16), wqkv_ref[li],
                      preferred_element_type=jnp.float32)          # (BLK_ROWS, 3H)
        q = qkv[:, 0 * HIDDEN:1 * HIDDEN]      # already scaled by 1/sqrt(H)
        k = qkv[:, 1 * HIDDEN:2 * HIDDEN]
        v = qkv[:, 2 * HIDDEN:3 * HIDDEN]

        # scores: contract on last dims (no explicit transpose)
        s = lax.dot_general(q.astype(jnp.bfloat16), k.astype(jnp.bfloat16),
                            (((1,), (1,)), ((), ())),
                            preferred_element_type=jnp.float32)    # (BLK_ROWS, BLK_ROWS)
        s = jnp.where(same_ex, s, -1e30)                           # per-example attention
        s = s - jnp.max(s, axis=-1, keepdims=True)
        p = jnp.exp(s)
        p = p * pl.reciprocal(jnp.sum(p, axis=-1, keepdims=True), approx=True)

        attn = jnp.dot(p.astype(jnp.bfloat16), v.astype(jnp.bfloat16),
                       preferred_element_type=jnp.float32)          # (BLK_ROWS, H)
        attn = jnp.dot(attn.astype(jnp.bfloat16), wo_ref[li],
                       preferred_element_type=jnp.float32)

        g1 = ln[4 * li + 0:4 * li + 1, :]
        b1 = ln[4 * li + 1:4 * li + 2, :]
        g2 = ln[4 * li + 2:4 * li + 3, :]
        b2 = ln[4 * li + 3:4 * li + 4, :]
        h = _layernorm(x + attn, g1, b1)                           # f32 elementwise

        # --- feed-forward ----------------------------------------------------
        ff = _gelu(jnp.dot(h.astype(jnp.bfloat16), w1_ref[li],
                           preferred_element_type=jnp.float32))
        ff = jnp.dot(ff.astype(jnp.bfloat16), w2_ref[li],
                     preferred_element_type=jnp.float32)
        x = _layernorm(h + ff, g2, b2)

    # --- column pooling epilogue (mask built from iotas, one MXU pass) -------
    # output row r -> (example e = r // COLS_PAD, column c = r % COLS_PAD)
    # token gt    -> (example e_tok = gt // SEQ_LEN, local lt = gt % SEQ_LEN)
    r = lax.broadcasted_iota(jnp.int32, (POOL_ROWS, BLK_ROWS), 0)
    gt = lax.broadcasted_iota(jnp.int32, (POOL_ROWS, BLK_ROWS), 1)
    ex_out = r >> _COLS_SHIFT
    col = r & (COLS_PAD - 1)
    ex_tok = gt >> _SEQ_SHIFT
    lt = gt & (SEQ_LEN - 1)
    start = CTX_LEN + col * TOK_PER_COL
    member = (ex_out == ex_tok) & (lt >= start) & (lt < start + TOK_PER_COL)
    mask = jnp.where(member, 1.0, 0.0).astype(jnp.bfloat16)        # (POOL_ROWS, BLK_ROWS)

    pooled = jnp.dot(mask, x.astype(jnp.bfloat16),
                     preferred_element_type=jnp.float32)           # (POOL_ROWS, H)
    # every real column has exactly TOK_PER_COL tokens; padded rows stay zero
    out_ref[...] = pooled * (1.0 / TOK_PER_COL)


def run_fused_encoder(ids_col, params):
    nblk = BATCH // EX_PER_BLK
    const3 = lambda i: (0, 0, 0)
    const2 = lambda i: (0, 0)
    grid_spec = pltpu.PrefetchScalarGridSpec(
        num_scalar_prefetch=0,
        grid=(nblk,),
        in_specs=[
            pl.BlockSpec((BLK_ROWS, 1), lambda i: (i, 0)),                  # ids
            pl.BlockSpec((VOCAB, HIDDEN), const2),                          # tok_emb
            pl.BlockSpec((BLK_ROWS, HIDDEN), const2),                       # pos+seg
            pl.BlockSpec((NUM_LAYERS, HIDDEN, 3 * HIDDEN), const3),         # wqkv
            pl.BlockSpec((NUM_LAYERS, HIDDEN, HIDDEN), const3),             # wo
            pl.BlockSpec((NUM_LAYERS, HIDDEN, FFN), const3),                # w1
            pl.BlockSpec((NUM_LAYERS, FFN, HIDDEN), const3),                # w2
            pl.BlockSpec((4 * NUM_LAYERS, HIDDEN), const2),                 # ln
        ],
        out_specs=pl.BlockSpec((POOL_ROWS, HIDDEN), lambda i: (i, 0)),
    )
    return pl.pallas_call(
        fused_encoder_kernel,
        out_shape=jax.ShapeDtypeStruct((BATCH * COLS_PAD, HIDDEN), jnp.float32),
        grid_spec=grid_spec,
        compiler_params=pltpu.CompilerParams(
            dimension_semantics=("parallel",)),       # both TCs on v7x
    )(ids_col, params["tok_emb"], params["posseg"], params["wqkv"],
      params["wo"], params["w1"], params["w2"], params["ln"])


# ------------------------------ parameter init -------------------------------
def init_params(key):
    def dense(k, shape, scale=0.02):
        return scale * jax.random.normal(k, shape, dtype=jnp.float32)

    keys = jax.random.split(key, 7)

    # fused QKV with the 1/sqrt(H) attention scale folded into the Q third
    wqkv = dense(keys[3], (NUM_LAYERS, HIDDEN, 3 * HIDDEN))
    wqkv = wqkv.at[:, :, :HIDDEN].multiply(1.0 / math.sqrt(HIDDEN))

    # LayerNorm params for BOTH layers packed into one (8, H) tile:
    # rows = [g1, b1, g2, b2] for layer 0, then layer 1
    ln = jnp.tile(jnp.array([1.0, 0.0, 1.0, 0.0], jnp.float32)[:, None],
                  (NUM_LAYERS, HIDDEN))                           # (8, H)

    # static position + segment embedding (context = seg 0, table tokens = seg 1),
    # pre-tiled for the EX_PER_BLK examples stacked per grid step
    pos_emb = dense(keys[1], (SEQ_LEN, HIDDEN))
    seg_emb = dense(keys[2], (2, HIDDEN))
    seg_ids = jnp.concatenate([
        jnp.zeros((CTX_LEN,), jnp.int32),
        jnp.ones((NUM_COLS * TOK_PER_COL,), jnp.int32)])
    posseg = jnp.tile(pos_emb + seg_emb[seg_ids], (EX_PER_BLK, 1))  # (BLK_ROWS, H) f32

    return {
        "tok_emb": dense(keys[0], (VOCAB, HIDDEN)).astype(jnp.bfloat16),
        "posseg":  posseg,
        "wqkv":    wqkv.astype(jnp.bfloat16),
        "wo":      dense(keys[4], (NUM_LAYERS, HIDDEN, HIDDEN)).astype(jnp.bfloat16),
        "w1":      dense(keys[5], (NUM_LAYERS, HIDDEN, FFN)).astype(jnp.bfloat16),
        "w2":      dense(keys[6], (NUM_LAYERS, FFN, HIDDEN)).astype(jnp.bfloat16),
        "ln":      ln,
    }


# ------------------------------ forward (Model) ------------------------------
def model_forward(params, tp_table_ids, tp_context_ids):
    """Mirrors Model.forward: encode(contexts, tables) -> column_encoding
    of shape [batch, NUM_COLS, HIDDEN].  Everything past the trivial
    linearization/concat happens inside ONE pallas_call."""
    # linearize: context tokens followed by flattened table-cell tokens
    table_flat = tp_table_ids.reshape(BATCH, -1)                        # (B, C*T)
    input_ids = jnp.concatenate([tp_context_ids, table_flat], axis=1)   # (B, S)
    ids_col = input_ids.reshape(BATCH * SEQ_LEN, 1).astype(jnp.int32)   # (B*S, 1)

    pooled = run_fused_encoder(ids_col, params)                         # (B*COLS_PAD, H)
    pooled = pooled.reshape(BATCH, COLS_PAD, HIDDEN)
    return pooled[:, :NUM_COLS, :]                                      # (B, C, H)


# ----------------------------------- main ------------------------------------
if __name__ == "__main__":
    key = jax.random.PRNGKey(0)
    k_param, k_ctx, k_tab = jax.random.split(key, 3)

    params = init_params(k_param)

    # Synthetic inputs standing in for (tp_context, tp_table): token ids.
    tp_context_ids = jax.random.randint(
        k_ctx, (BATCH, CTX_LEN), 0, VOCAB, jnp.int32)
    tp_table_ids = jax.random.randint(
        k_tab, (BATCH, NUM_COLS, TOK_PER_COL), 0, VOCAB, jnp.int32)

    column_encoding = model_forward(params, tp_table_ids, tp_context_ids)
    column_encoding = jax.block_until_ready(column_encoding)

    assert column_encoding.shape == (BATCH, NUM_COLS, HIDDEN)
    assert bool(jnp.all(jnp.isfinite(column_encoding)))
    print("KERNEL_OK")
</pallas_src>

<mosaic_0001>
module attributes {stable_mosaic.version = 11 : i64} {
  func.func @fused_encoder_kernel(%arg0: i32, %arg1: memref<128x1xi32, #tpu.memory_space<vmem>>, %arg2: memref<128x128xbf16, #tpu.memory_space<vmem>>, %arg3: memref<128x128xf32, #tpu.memory_space<vmem>>, %arg4: memref<2x128x384xbf16, #tpu.memory_space<vmem>>, %arg5: memref<2x128x128xbf16, #tpu.memory_space<vmem>>, %arg6: memref<2x128x512xbf16, #tpu.memory_space<vmem>>, %arg7: memref<2x512x128xbf16, #tpu.memory_space<vmem>>, %arg8: memref<8x128xf32, #tpu.memory_space<vmem>>, %arg9: memref<32x128xf32, #tpu.memory_space<vmem>>) attributes {dimension_semantics = [#tpu.dimension_semantics<parallel>], iteration_bounds = array<i64: 2>, scalar_prefetch = 0 : i64, scratch_operands = 0 : i64, tpu.core_type = #tpu.core_type<tc>, window_params = [{transform_indices = @transform_0, window_bounds = array<i64: 128, 1>}, {pipeline_mode = #tpu.pipeline_mode<synchronous>, transform_indices = @transform_1, window_bounds = array<i64: 128, 128>}, {pipeline_mode = #tpu.pipeline_mode<synchronous>, transform_indices = @transform_2, window_bounds = array<i64: 128, 128>}, {pipeline_mode = #tpu.pipeline_mode<synchronous>, transform_indices = @transform_3, window_bounds = array<i64: 2, 128, 384>}, {pipeline_mode = #tpu.pipeline_mode<synchronous>, transform_indices = @transform_4, window_bounds = array<i64: 2, 128, 128>}, {pipeline_mode = #tpu.pipeline_mode<synchronous>, transform_indices = @transform_5, window_bounds = array<i64: 2, 128, 512>}, {pipeline_mode = #tpu.pipeline_mode<synchronous>, transform_indices = @transform_6, window_bounds = array<i64: 2, 512, 128>}, {pipeline_mode = #tpu.pipeline_mode<synchronous>, transform_indices = @transform_7, window_bounds = array<i64: 8, 128>}, {transform_indices = @transform_8, window_bounds = array<i64: 32, 128>}]} {
    %c0 = arith.constant 0 : index
    %c0_0 = arith.constant 0 : index
    %0 = vector.load %arg1[%c0, %c0_0] : memref<128x1xi32, #tpu.memory_space<vmem>>, vector<128x1xi32>
    %1 = tpu.iota {dimensions = array<i32: 1>} : vector<128x128xi32>
    %2 = vector.broadcast %0 : vector<128x1xi32> to vector<128x128xi32>
    %3 = arith.cmpi eq, %1, %2 : vector<128x128xi32>
    %cst = arith.constant 1.000000e+00 : f32
    %cst_1 = arith.constant 0.000000e+00 : f32
    %4 = vector.broadcast %cst : f32 to vector<128x128xf32>
    %5 = vector.broadcast %cst_1 : f32 to vector<128x128xf32>
    %6 = arith.select %3, %4, %5 : vector<128x128xi1>, vector<128x128xf32>
    %7 = arith.truncf %6 : vector<128x128xf32> to vector<128x128xbf16>
    %c0_2 = arith.constant 0 : index
    %c0_3 = arith.constant 0 : index
    %8 = vector.load %arg2[%c0_2, %c0_3] : memref<128x128xbf16, #tpu.memory_space<vmem>>, vector<128x128xbf16>
    %cst_4 = arith.constant dense<0.000000e+00> : vector<128x128xf32>
    %9 = tpu.matmul %7, %8, %cst_4 {dimension_numbers = #tpu.dot_dimension_numbers<[1], [0], [0], [1], [0, 0, 1, 1], [], []>} : vector<128x128xbf16>, vector<128x128xbf16>, vector<128x128xf32> -> vector<128x128xf32>
    %c0_5 = arith.constant 0 : index
    %c0_6 = arith.constant 0 : index
    %10 = vector.load %arg3[%c0_5, %c0_6] : memref<128x128xf32, #tpu.memory_space<vmem>>, vector<128x128xf32>
    %11 = arith.addf %9, %10 : vector<128x128xf32>
    %12 = tpu.iota {dimensions = array<i32: 0>} : vector<128x128xi32>
    %c5_i32 = arith.constant 5 : i32
    %13 = vector.broadcast %c5_i32 : i32 to vector<128x128xi32>
    %14 = arith.shrsi %12, %13 : vector<128x128xi32>
    %15 = tpu.iota {dimensions = array<i32: 1>} : vector<128x128xi32>
    %c5_i32_7 = arith.constant 5 : i32
    %16 = vector.broadcast %c5_i32_7 : i32 to vector<128x128xi32>
    %17 = arith.shrsi %15, %16 : vector<128x128xi32>
    %18 = arith.cmpi eq, %14, %17 : vector<128x128xi32>
    %c0_8 = arith.constant 0 : index
    %c0_9 = arith.constant 0 : index
    %19 = vector.load %arg8[%c0_8, %c0_9] : memref<8x128xf32, #tpu.memory_space<vmem>>, vector<8x128xf32>
    %20 = arith.truncf %11 : vector<128x128xf32> to vector<128x128xbf16>
    %c0_10 = arith.constant 0 : index
    %c0_11 = arith.constant 0 : index
    %c0_12 = arith.constant 0 : index
    %21 = vector.load %arg4[%c0_10, %c0_11, %c0_12] : memref<2x128x384xbf16, #tpu.memory_space<vmem>>, vector<1x128x384xbf16>
    %22 = vector.shape_cast %21 : vector<1x128x384xbf16> to vector<128x384xbf16>
    %cst_13 = arith.constant dense<0.000000e+00> : vector<128x384xf32>
    %23 = tpu.matmul %20, %22, %cst_13 {dimension_numbers = #tpu.dot_dimension_numbers<[1], [0], [0], [1], [0, 0, 1, 1], [], []>} : vector<128x128xbf16>, vector<128x384xbf16>, vector<128x384xf32> -> vector<128x384xf32>
    %24 = vector.extract_strided_slice %23 {offsets = [0, 0], sizes = [128, 128], strides = [1, 1]} : vector<128x384xf32> to vector<128x128xf32>
    %25 = vector.extract_strided_slice %23 {offsets = [0, 128], sizes = [128, 128], strides = [1, 1]} : vector<128x384xf32> to vector<128x128xf32>
    %26 = vector.extract_strided_slice %23 {offsets = [0, 256], sizes = [128, 128], strides = [1, 1]} : vector<128x384xf32> to vector<128x128xf32>
    %27 = arith.truncf %24 : vector<128x128xf32> to vector<128x128xbf16>
    %28 = arith.truncf %25 : vector<128x128xf32> to vector<128x128xbf16>
    %cst_14 = arith.constant dense<0.000000e+00> : vector<128x128xf32>
    %29 = tpu.matmul %27, %28, %cst_14 {dimension_numbers = #tpu.dot_dimension_numbers<[1], [1], [0], [0], [0, 0, 1, 0], [], []>} : vector<128x128xbf16>, vector<128x128xbf16>, vector<128x128xf32> -> vector<128x128xf32>
    %cst_15 = arith.constant -1.000000e+30 : f32
    %30 = vector.broadcast %cst_15 : f32 to vector<128x128xf32>
    %31 = arith.select %18, %29, %30 : vector<128x128xi1>, vector<128x128xf32>
    %cst_16 = arith.constant dense<0xFF800000> : vector<128xf32>
    %32 = vector.multi_reduction <maximumf>, %31, %cst_16 [1] : vector<128x128xf32> to vector<128xf32>
    %33 = vector.shape_cast %32 : vector<128xf32> to vector<128x1xf32>
    %34 = vector.broadcast %33 : vector<128x1xf32> to vector<128x128xf32>
    %35 = arith.subf %31, %34 : vector<128x128xf32>
    %36 = math.exp %35 : vector<128x128xf32>
    %cst_17 = arith.constant dense<0.000000e+00> : vector<128xf32>
    %37 = vector.multi_reduction <add>, %36, %cst_17 [1] : vector<128x128xf32> to vector<128xf32>
    %38 = vector.shape_cast %37 : vector<128xf32> to vector<128x1xf32>
    %39 = tpu.reciprocal %38 {approx = true} : vector<128x1xf32> -> vector<128x1xf32>
    %40 = vector.broadcast %39 : vector<128x1xf32> to vector<128x128xf32>
    %41 = arith.mulf %36, %40 : vector<128x128xf32>
    %42 = arith.truncf %41 : vector<128x128xf32> to vector<128x128xbf16>
    %43 = arith.truncf %26 : vector<128x128xf32> to vector<128x128xbf16>
    %cst_18 = arith.constant dense<0.000000e+00> : vector<128x128xf32>
    %44 = tpu.matmul %42, %43, %cst_18 {dimension_numbers = #tpu.dot_dimension_numbers<[1], [0], [0], [1], [0, 0, 1, 1], [], []>} : vector<128x128xbf16>, vector<128x128xbf16>, vector<128x128xf32> -> vector<128x128xf32>
    %45 = arith.truncf %44 : vector<128x128xf32> to vector<128x128xbf16>
    %c0_19 = arith.constant 0 : index
    %c0_20 = arith.constant 0 : index
    %c0_21 = arith.constant 0 : index
    %46 = vector.load %arg5[%c0_19, %c0_20, %c0_21] : memref<2x128x128xbf16, #tpu.memory_space<vmem>>, vector<1x128x128xbf16>
    %47 = vector.shape_cast %46 : vector<1x128x128xbf16> to vector<128x128xbf16>
    %cst_22 = arith.constant dense<0.000000e+00> : vector<128x128xf32>
    %48 = tpu.matmul %45, %47, %cst_22 {dimension_numbers = #tpu.dot_dimension_numbers<[1], [0], [0], [1], [0, 0, 1, 1], [], []>} : vector<128x128xbf16>, vector<128x128xbf16>, vector<128x128xf32> -> vector<128x128xf32>
    %49 = vector.extract_strided_slice %19 {offsets = [0, 0], sizes = [1, 128], strides = [1, 1]} : vector<8x128xf32> to vector<1x128xf32>
    %50 = vector.extract_strided_slice %19 {offsets = [1, 0], sizes = [1, 128], strides = [1, 1]} : vector<8x128xf32> to vector<1x128xf32>
    %51 = vector.extract_strided_slice %19 {offsets = [2, 0], sizes = [1, 128], strides = [1, 1]} : vector<8x128xf32> to vector<1x128xf32>
    %52 = vector.extract_strided_slice %19 {offsets = [3, 0], sizes = [1, 128], strides = [1, 1]} : vector<8x128xf32> to vector<1x128xf32>
    %53 = arith.addf %11, %48 : vector<128x128xf32>
    %cst_23 = arith.constant dense<0.000000e+00> : vector<128xf32>
    %54 = vector.multi_reduction <add>, %53, %cst_23 [1] : vector<128x128xf32> to vector<128xf32>
    %55 = vector.shape_cast %54 : vector<128xf32> to vector<128x1xf32>
    %cst_24 = arith.constant 1.280000e+02 : f32
    %56 = vector.broadcast %cst_24 : f32 to vector<128x1xf32>
    %57 = arith.divf %55, %56 : vector<128x1xf32>
    %58 = vector.broadcast %57 : vector<128x1xf32> to vector<128x128xf32>
    %59 = arith.subf %53, %58 : vector<128x128xf32>
    %60 = vector.broadcast %57 : vector<128x1xf32> to vector<128x128xf32>
    %61 = arith.subf %53, %60 : vector<128x128xf32>
    %62 = arith.mulf %59, %61 : vector<128x128xf32>
    %cst_25 = arith.constant dense<0.000000e+00> : vector<128xf32>
    %63 = vector.multi_reduction <add>, %62, %cst_25 [1] : vector<128x128xf32> to vector<128xf32>
    %64 = vector.shape_cast %63 : vector<128xf32> to vector<128x1xf32>
    %cst_26 = arith.constant 1.280000e+02 : f32
    %65 = vector.broadcast %cst_26 : f32 to vector<128x1xf32>
    %66 = arith.divf %64, %65 : vector<128x1xf32>
    %67 = vector.broadcast %57 : vector<128x1xf32> to vector<128x128xf32>
    %68 = arith.subf %53, %67 : vector<128x128xf32>
    %cst_27 = arith.constant 9.99999996E-13 : f32
    %69 = vector.broadcast %cst_27 : f32 to vector<128x1xf32>
    %70 = arith.addf %66, %69 : vector<128x1xf32>
    %71 = math.rsqrt %70 : vector<128x1xf32>
    %72 = vector.broadcast %71 : vector<128x1xf32> to vector<128x128xf32>
    %73 = arith.mulf %68, %72 : vector<128x128xf32>
    %74 = vector.broadcast %49 : vector<1x128xf32> to vector<128x128xf32>
    %75 = arith.mulf %73, %74 : vector<128x128xf32>
    %76 = vector.broadcast %50 : vector<1x128xf32> to vector<128x128xf32>
    %77 = arith.addf %75, %76 : vector<128x128xf32>
    %78 = arith.truncf %77 : vector<128x128xf32> to vector<128x128xbf16>
    %c0_28 = arith.constant 0 : index
    %c0_29 = arith.constant 0 : index
    %c0_30 = arith.constant 0 : index
    %79 = vector.load %arg6[%c0_28, %c0_29, %c0_30] : memref<2x128x512xbf16, #tpu.memory_space<vmem>>, vector<1x128x512xbf16>
    %80 = vector.shape_cast %79 : vector<1x128x512xbf16> to vector<128x512xbf16>
    %cst_31 = arith.constant dense<0.000000e+00> : vector<128x512xf32>
    %81 = tpu.matmul %78, %80, %cst_31 {dimension_numbers = #tpu.dot_dimension_numbers<[1], [0], [0], [1], [0, 0, 1, 1], [], []>} : vector<128x128xbf16>, vector<128x512xbf16>, vector<128x512xf32> -> vector<128x512xf32>
    %cst_32 = arith.constant 5.000000e-01 : f32
    %82 = vector.broadcast %cst_32 : f32 to vector<128x512xf32>
    %83 = arith.mulf %82, %81 : vector<128x512xf32>
    %cst_33 = arith.constant 4.471500e-02 : f32
    %84 = vector.broadcast %cst_33 : f32 to vector<128x512xf32>
    %85 = arith.mulf %84, %81 : vector<128x512xf32>
    %86 = arith.mulf %85, %81 : vector<128x512xf32>
    %87 = arith.mulf %86, %81 : vector<128x512xf32>
    %88 = arith.addf %81, %87 : vector<128x512xf32>
    %cst_34 = arith.constant 0.797884583 : f32
    %89 = vector.broadcast %cst_34 : f32 to vector<128x512xf32>
    %90 = arith.mulf %89, %88 : vector<128x512xf32>
    %91 = math.tanh %90 : vector<128x512xf32>
    %cst_35 = arith.constant 1.000000e+00 : f32
    %92 = vector.broadcast %cst_35 : f32 to vector<128x512xf32>
    %93 = arith.addf %92, %91 : vector<128x512xf32>
    %94 = arith.mulf %83, %93 : vector<128x512xf32>
    %95 = arith.truncf %94 : vector<128x512xf32> to vector<128x512xbf16>
    %c0_36 = arith.constant 0 : index
    %c0_37 = arith.constant 0 : index
    %c0_38 = arith.constant 0 : index
    %96 = vector.load %arg7[%c0_36, %c0_37, %c0_38] : memref<2x512x128xbf16, #tpu.memory_space<vmem>>, vector<1x512x128xbf16>
    %97 = vector.shape_cast %96 : vector<1x512x128xbf16> to vector<512x128xbf16>
    %cst_39 = arith.constant dense<0.000000e+00> : vector<128x128xf32>
    %98 = tpu.matmul %95, %97, %cst_39 {dimension_numbers = #tpu.dot_dimension_numbers<[1], [0], [0], [1], [0, 0, 1, 1], [], []>} : vector<128x512xbf16>, vector<512x128xbf16>, vector<128x128xf32> -> vector<128x128xf32>
    %99 = arith.addf %77, %98 : vector<128x128xf32>
    %cst_40 = arith.constant dense<0.000000e+00> : vector<128xf32>
    %100 = vector.multi_reduction <add>, %99, %cst_40 [1] : vector<128x128xf32> to vector<128xf32>
    %101 = vector.shape_cast %100 : vector<128xf32> to vector<128x1xf32>
    %cst_41 = arith.constant 1.280000e+02 : f32
    %102 = vector.broadcast %cst_41 : f32 to vector<128x1xf32>
    %103 = arith.divf %101, %102 : vector<128x1xf32>
    %104 = vector.broadcast %103 : vector<128x1xf32> to vector<128x128xf32>
    %105 = arith.subf %99, %104 : vector<128x128xf32>
    %106 = vector.broadcast %103 : vector<128x1xf32> to vector<128x128xf32>
    %107 = arith.subf %99, %106 : vector<128x128xf32>
    %108 = arith.mulf %105, %107 : vector<128x128xf32>
    %cst_42 = arith.constant dense<0.000000e+00> : vector<128xf32>
    %109 = vector.multi_reduction <add>, %108, %cst_42 [1] : vector<128x128xf32> to vector<128xf32>
    %110 = vector.shape_cast %109 : vector<128xf32> to vector<128x1xf32>
    %cst_43 = arith.constant 1.280000e+02 : f32
    %111 = vector.broadcast %cst_43 : f32 to vector<128x1xf32>
    %112 = arith.divf %110, %111 : vector<128x1xf32>
    %113 = vector.broadcast %103 : vector<128x1xf32> to vector<128x128xf32>
    %114 = arith.subf %99, %113 : vector<128x128xf32>
    %cst_44 = arith.constant 9.99999996E-13 : f32
    %115 = vector.broadcast %cst_44 : f32 to vector<128x1xf32>
    %116 = arith.addf %112, %115 : vector<128x1xf32>
    %117 = math.rsqrt %116 : vector<128x1xf32>
    %118 = vector.broadcast %117 : vector<128x1xf32> to vector<128x128xf32>
    %119 = arith.mulf %114, %118 : vector<128x128xf32>
    %120 = vector.broadcast %51 : vector<1x128xf32> to vector<128x128xf32>
    %121 = arith.mulf %119, %120 : vector<128x128xf32>
    %122 = vector.broadcast %52 : vector<1x128xf32> to vector<128x128xf32>
    %123 = arith.addf %121, %122 : vector<128x128xf32>
    %124 = arith.truncf %123 : vector<128x128xf32> to vector<128x128xbf16>
    %c1 = arith.constant 1 : index
    %c0_45 = arith.constant 0 : index
    %c0_46 = arith.constant 0 : index
    %125 = vector.load %arg4[%c1, %c0_45, %c0_46] : memref<2x128x384xbf16, #tpu.memory_space<vmem>>, vector<1x128x384xbf16>
    %126 = vector.shape_cast %125 : vector<1x128x384xbf16> to vector<128x384xbf16>
    %cst_47 = arith.constant dense<0.000000e+00> : vector<128x384xf32>
    %127 = tpu.matmul %124, %126, %cst_47 {dimension_numbers = #tpu.dot_dimension_numbers<[1], [0], [0], [1], [0, 0, 1, 1], [], []>} : vector<128x128xbf16>, vector<128x384xbf16>, vector<128x384xf32> -> vector<128x384xf32>
    %128 = vector.extract_strided_slice %127 {offsets = [0, 0], sizes = [128, 128], strides = [1, 1]} : vector<128x384xf32> to vector<128x128xf32>
    %129 = vector.extract_strided_slice %127 {offsets = [0, 128], sizes = [128, 128], strides = [1, 1]} : vector<128x384xf32> to vector<128x128xf32>
    %130 = vector.extract_strided_slice %127 {offsets = [0, 256], sizes = [128, 128], strides = [1, 1]} : vector<128x384xf32> to vector<128x128xf32>
    %131 = arith.truncf %128 : vector<128x128xf32> to vector<128x128xbf16>
    %132 = arith.truncf %129 : vector<128x128xf32> to vector<128x128xbf16>
    %cst_48 = arith.constant dense<0.000000e+00> : vector<128x128xf32>
    %133 = tpu.matmul %131, %132, %cst_48 {dimension_numbers = #tpu.dot_dimension_numbers<[1], [1], [0], [0], [0, 0, 1, 0], [], []>} : vector<128x128xbf16>, vector<128x128xbf16>, vector<128x128xf32> -> vector<128x128xf32>
    %cst_49 = arith.constant -1.000000e+30 : f32
    %134 = vector.broadcast %cst_49 : f32 to vector<128x128xf32>
    %135 = arith.select %18, %133, %134 : vector<128x128xi1>, vector<128x128xf32>
    %cst_50 = arith.constant dense<0xFF800000> : vector<128xf32>
    %136 = vector.multi_reduction <maximumf>, %135, %cst_50 [1] : vector<128x128xf32> to vector<128xf32>
    %137 = vector.shape_cast %136 : vector<128xf32> to vector<128x1xf32>
    %138 = vector.broadcast %137 : vector<128x1xf32> to vector<128x128xf32>
    %139 = arith.subf %135, %138 : vector<128x128xf32>
    %140 = math.exp %139 : vector<128x128xf32>
    %cst_51 = arith.constant dense<0.000000e+00> : vector<128xf32>
    %141 = vector.multi_reduction <add>, %140, %cst_51 [1] : vector<128x128xf32> to vector<128xf32>
    %142 = vector.shape_cast %141 : vector<128xf32> to vector<128x1xf32>
    %143 = tpu.reciprocal %142 {approx = true} : vector<128x1xf32> -> vector<128x1xf32>
    %144 = vector.broadcast %143 : vector<128x1xf32> to vector<128x128xf32>
    %145 = arith.mulf %140, %144 : vector<128x128xf32>
    %146 = arith.truncf %145 : vector<128x128xf32> to vector<128x128xbf16>
    %147 = arith.truncf %130 : vector<128x128xf32> to vector<128x128xbf16>
    %cst_52 = arith.constant dense<0.000000e+00> : vector<128x128xf32>
    %148 = tpu.matmul %146, %147, %cst_52 {dimension_numbers = #tpu.dot_dimension_numbers<[1], [0], [0], [1], [0, 0, 1, 1], [], []>} : vector<128x128xbf16>, vector<128x128xbf16>, vector<128x128xf32> -> vector<128x128xf32>
    %149 = arith.truncf %148 : vector<128x128xf32> to vector<128x128xbf16>
    %c1_53 = arith.constant 1 : index
    %c0_54 = arith.constant 0 : index
    %c0_55 = arith.constant 0 : index
    %150 = vector.load %arg5[%c1_53, %c0_54, %c0_55] : memref<2x128x128xbf16, #tpu.memory_space<vmem>>, vector<1x128x128xbf16>
    %151 = vector.shape_cast %150 : vector<1x128x128xbf16> to vector<128x128xbf16>
    %cst_56 = arith.constant dense<0.000000e+00> : vector<128x128xf32>
    %152 = tpu.matmul %149, %151, %cst_56 {dimension_numbers = #tpu.dot_dimension_numbers<[1], [0], [0], [1], [0, 0, 1, 1], [], []>} : vector<128x128xbf16>, vector<128x128xbf16>, vector<128x128xf32> -> vector<128x128xf32>
    %153 = vector.extract_strided_slice %19 {offsets = [4, 0], sizes = [1, 128], strides = [1, 1]} : vector<8x128xf32> to vector<1x128xf32>
    %154 = vector.extract_strided_slice %19 {offsets = [5, 0], sizes = [1, 128], strides = [1, 1]} : vector<8x128xf32> to vector<1x128xf32>
    %155 = vector.extract_strided_slice %19 {offsets = [6, 0], sizes = [1, 128], strides = [1, 1]} : vector<8x128xf32> to vector<1x128xf32>
    %156 = vector.extract_strided_slice %19 {offsets = [7, 0], sizes = [1, 128], strides = [1, 1]} : vector<8x128xf32> to vector<1x128xf32>
    %157 = arith.addf %123, %152 : vector<128x128xf32>
    %cst_57 = arith.constant dense<0.000000e+00> : vector<128xf32>
    %158 = vector.multi_reduction <add>, %157, %cst_57 [1] : vector<128x128xf32> to vector<128xf32>
    %159 = vector.shape_cast %158 : vector<128xf32> to vector<128x1xf32>
    %cst_58 = arith.constant 1.280000e+02 : f32
    %160 = vector.broadcast %cst_58 : f32 to vector<128x1xf32>
    %161 = arith.divf %159, %160 : vector<128x1xf32>
    %162 = vector.broadcast %161 : vector<128x1xf32> to vector<128x128xf32>
    %163 = arith.subf %157, %162 : vector<128x128xf32>
    %164 = vector.broadcast %161 : vector<128x1xf32> to vector<128x128xf32>
    %165 = arith.subf %157, %164 : vector<128x128xf32>
    %166 = arith.mulf %163, %165 : vector<128x128xf32>
    %cst_59 = arith.constant dense<0.000000e+00> : vector<128xf32>
    %167 = vector.multi_reduction <add>, %166, %cst_59 [1] : vector<128x128xf32> to vector<128xf32>
    %168 = vector.shape_cast %167 : vector<128xf32> to vector<128x1xf32>
    %cst_60 = arith.constant 1.280000e+02 : f32
    %169 = vector.broadcast %cst_60 : f32 to vector<128x1xf32>
    %170 = arith.divf %168, %169 : vector<128x1xf32>
    %171 = vector.broadcast %161 : vector<128x1xf32> to vector<128x128xf32>
    %172 = arith.subf %157, %171 : vector<128x128xf32>
    %cst_61 = arith.constant 9.99999996E-13 : f32
    %173 = vector.broadcast %cst_61 : f32 to vector<128x1xf32>
    %174 = arith.addf %170, %173 : vector<128x1xf32>
    %175 = math.rsqrt %174 : vector<128x1xf32>
    %176 = vector.broadcast %175 : vector<128x1xf32> to vector<128x128xf32>
    %177 = arith.mulf %172, %176 : vector<128x128xf32>
    %178 = vector.broadcast %153 : vector<1x128xf32> to vector<128x128xf32>
    %179 = arith.mulf %177, %178 : vector<128x128xf32>
    %180 = vector.broadcast %154 : vector<1x128xf32> to vector<128x128xf32>
    %181 = arith.addf %179, %180 : vector<128x128xf32>
    %182 = arith.truncf %181 : vector<128x128xf32> to vector<128x128xbf16>
    %c1_62 = arith.constant 1 : index
    %c0_63 = arith.constant 0 : index
    %c0_64 = arith.constant 0 : index
    %183 = vector.load %arg6[%c1_62, %c0_63, %c0_64] : memref<2x128x512xbf16, #tpu.memory_space<vmem>>, vector<1x128x512xbf16>
    %184 = vector.shape_cast %183 : vector<1x128x512xbf16> to vector<128x512xbf16>
    %cst_65 = arith.constant dense<0.000000e+00> : vector<128x512xf32>
    %185 = tpu.matmul %182, %184, %cst_65 {dimension_numbers = #tpu.dot_dimension_numbers<[1], [0], [0], [1], [0, 0, 1, 1], [], []>} : vector<128x128xbf16>, vector<128x512xbf16>, vector<128x512xf32> -> vector<128x512xf32>
    %cst_66 = arith.constant 5.000000e-01 : f32
    %186 = vector.broadcast %cst_66 : f32 to vector<128x512xf32>
    %187 = arith.mulf %186, %185 : vector<128x512xf32>
    %cst_67 = arith.constant 4.471500e-02 : f32
    %188 = vector.broadcast %cst_67 : f32 to vector<128x512xf32>
    %189 = arith.mulf %188, %185 : vector<128x512xf32>
    %190 = arith.mulf %189, %185 : vector<128x512xf32>
    %191 = arith.mulf %190, %185 : vector<128x512xf32>
    %192 = arith.addf %185, %191 : vector<128x512xf32>
    %cst_68 = arith.constant 0.797884583 : f32
    %193 = vector.broadcast %cst_68 : f32 to vector<128x512xf32>
    %194 = arith.mulf %193, %192 : vector<128x512xf32>
    %195 = math.tanh %194 : vector<128x512xf32>
    %cst_69 = arith.constant 1.000000e+00 : f32
    %196 = vector.broadcast %cst_69 : f32 to vector<128x512xf32>
    %197 = arith.addf %196, %195 : vector<128x512xf32>
    %198 = arith.mulf %187, %197 : vector<128x512xf32>
    %199 = arith.truncf %198 : vector<128x512xf32> to vector<128x512xbf16>
    %c1_70 = arith.constant 1 : index
    %c0_71 = arith.constant 0 : index
    %c0_72 = arith.constant 0 : index
    %200 = vector.load %arg7[%c1_70, %c0_71, %c0_72] : memref<2x512x128xbf16, #tpu.memory_space<vmem>>, vector<1x512x128xbf16>
    %201 = vector.shape_cast %200 : vector<1x512x128xbf16> to vector<512x128xbf16>
    %cst_73 = arith.constant dense<0.000000e+00> : vector<128x128xf32>
    %202 = tpu.matmul %199, %201, %cst_73 {dimension_numbers = #tpu.dot_dimension_numbers<[1], [0], [0], [1], [0, 0, 1, 1], [], []>} : vector<128x512xbf16>, vector<512x128xbf16>, vector<128x128xf32> -> vector<128x128xf32>
    %203 = arith.addf %181, %202 : vector<128x128xf32>
    %cst_74 = arith.constant dense<0.000000e+00> : vector<128xf32>
    %204 = vector.multi_reduction <add>, %203, %cst_74 [1] : vector<128x128xf32> to vector<128xf32>
    %205 = vector.shape_cast %204 : vector<128xf32> to vector<128x1xf32>
    %cst_75 = arith.constant 1.280000e+02 : f32
    %206 = vector.broadcast %cst_75 : f32 to vector<128x1xf32>
    %207 = arith.divf %205, %206 : vector<128x1xf32>
    %208 = vector.broadcast %207 : vector<128x1xf32> to vector<128x128xf32>
    %209 = arith.subf %203, %208 : vector<128x128xf32>
    %210 = vector.broadcast %207 : vector<128x1xf32> to vector<128x128xf32>
    %211 = arith.subf %203, %210 : vector<128x128xf32>
    %212 = arith.mulf %209, %211 : vector<128x128xf32>
    %cst_76 = arith.constant dense<0.000000e+00> : vector<128xf32>
    %213 = vector.multi_reduction <add>, %212, %cst_76 [1] : vector<128x128xf32> to vector<128xf32>
    %214 = vector.shape_cast %213 : vector<128xf32> to vector<128x1xf32>
    %cst_77 = arith.constant 1.280000e+02 : f32
    %215 = vector.broadcast %cst_77 : f32 to vector<128x1xf32>
    %216 = arith.divf %214, %215 : vector<128x1xf32>
    %217 = vector.broadcast %207 : vector<128x1xf32> to vector<128x128xf32>
    %218 = arith.subf %203, %217 : vector<128x128xf32>
    %cst_78 = arith.constant 9.99999996E-13 : f32
    %219 = vector.broadcast %cst_78 : f32 to vector<128x1xf32>
    %220 = arith.addf %216, %219 : vector<128x1xf32>
    %221 = math.rsqrt %220 : vector<128x1xf32>
    %222 = vector.broadcast %221 : vector<128x1xf32> to vector<128x128xf32>
    %223 = arith.mulf %218, %222 : vector<128x128xf32>
    %224 = vector.broadcast %155 : vector<1x128xf32> to vector<128x128xf32>
    %225 = arith.mulf %223, %224 : vector<128x128xf32>
    %226 = vector.broadcast %156 : vector<1x128xf32> to vector<128x128xf32>
    %227 = arith.addf %225, %226 : vector<128x128xf32>
    %228 = tpu.iota {dimensions = array<i32: 0>} : vector<32x128xi32>
    %229 = tpu.iota {dimensions = array<i32: 1>} : vector<32x128xi32>
    %c3_i32 = arith.constant 3 : i32
    %230 = vector.broadcast %c3_i32 : i32 to vector<32x128xi32>
    %231 = arith.shrsi %228, %230 : vector<32x128xi32>
    %c7_i32 = arith.constant 7 : i32
    %232 = vector.broadcast %c7_i32 : i32 to vector<32x128xi32>
    %233 = arith.andi %228, %232 : vector<32x128xi32>
    %c5_i32_79 = arith.constant 5 : i32
    %234 = vector.broadcast %c5_i32_79 : i32 to vector<32x128xi32>
    %235 = arith.shrsi %229, %234 : vector<32x128xi32>
    %c31_i32 = arith.constant 31 : i32
    %236 = vector.broadcast %c31_i32 : i32 to vector<32x128xi32>
    %237 = arith.andi %229, %236 : vector<32x128xi32>
    %c6_i32 = arith.constant 6 : i32
    %238 = vector.broadcast %c6_i32 : i32 to vector<32x128xi32>
    %239 = arith.muli %233, %238 : vector<32x128xi32>
    %c8_i32 = arith.constant 8 : i32
    %240 = vector.broadcast %c8_i32 : i32 to vector<32x128xi32>
    %241 = arith.addi %240, %239 : vector<32x128xi32>
    %242 = arith.cmpi eq, %231, %235 : vector<32x128xi32>
    %243 = arith.cmpi sge, %237, %241 : vector<32x128xi32>
    %244 = arith.andi %242, %243 : vector<32x128xi1>
    %c6_i32_80 = arith.constant 6 : i32
    %245 = vector.broadcast %c6_i32_80 : i32 to vector<32x128xi32>
    %246 = arith.addi %241, %245 : vector<32x128xi32>
    %247 = arith.cmpi slt, %237, %246 : vector<32x128xi32>
    %248 = arith.andi %244, %247 : vector<32x128xi1>
    %cst_81 = arith.constant 1.000000e+00 : f32
    %cst_82 = arith.constant 0.000000e+00 : f32
    %249 = vector.broadcast %cst_81 : f32 to vector<32x128xf32>
    %250 = vector.broadcast %cst_82 : f32 to vector<32x128xf32>
    %251 = arith.select %248, %249, %250 : vector<32x128xi1>, vector<32x128xf32>
    %252 = arith.truncf %251 : vector<32x128xf32> to vector<32x128xbf16>
    %253 = arith.truncf %227 : vector<128x128xf32> to vector<128x128xbf16>
    %cst_83 = arith.constant dense<0.000000e+00> : vector<32x128xf32>
    %254 = tpu.matmul %252, %253, %cst_83 {dimension_numbers = #tpu.dot_dimension_numbers<[1], [0], [0], [1], [0, 0, 1, 1], [], []>} : vector<32x128xbf16>, vector<128x128xbf16>, vector<32x128xf32> -> vector<32x128xf32>
    %cst_84 = arith.constant 0.166666672 : f32
    %255 = vector.broadcast %cst_84 : f32 to vector<32x128xf32>
    %256 = arith.mulf %254, %255 : vector<32x128xf32>
    %c0_85 = arith.constant 0 : index
    %c0_86 = arith.constant 0 : index
    %257 = vector.load %arg9[%c0_85, %c0_86] : memref<32x128xf32, #tpu.memory_space<vmem>>, vector<32x128xf32>
    tpu.vector_store %arg9[%c0_85, %c0_86], %256 {strides = array<i32>} : memref<32x128xf32, #tpu.memory_space<vmem>>, vector<32x128xf32>,
    return
  }
  func.func @transform_0(%arg0: i32) -> (i32, i32) {
    %c0_i32 = arith.constant 0 : i32
    %c0_i32_0 = arith.constant 0 : i32
    return %arg0, %c0_i32 : i32, i32
  }
  func.func @transform_1(%arg0: i32) -> (i32, i32) {
    %c0_i32 = arith.constant 0 : i32
    %c0_i32_0 = arith.constant 0 : i32
    %c0_i32_1 = arith.constant 0 : i32
    return %c0_i32, %c0_i32_0 : i32, i32
  }
  func.func @transform_2(%arg0: i32) -> (i32, i32) {
    %c0_i32 = arith.constant 0 : i32
    %c0_i32_0 = arith.constant 0 : i32
    %c0_i32_1 = arith.constant 0 : i32
    return %c0_i32, %c0_i32_0 : i32, i32
  }
  func.func @transform_3(%arg0: i32) -> (i32, i32, i32) {
    %c0_i32 = arith.constant 0 : i32
    %c0_i32_0 = arith.constant 0 : i32
    %c0_i32_1 = arith.constant 0 : i32
    %c0_i32_2 = arith.constant 0 : i32
    return %c0_i32, %c0_i32_0, %c0_i32_1 : i32, i32, i32
  }
  func.func @transform_4(%arg0: i32) -> (i32, i32, i32) {
    %c0_i32 = arith.constant 0 : i32
    %c0_i32_0 = arith.constant 0 : i32
    %c0_i32_1 = arith.constant 0 : i32
    %c0_i32_2 = arith.constant 0 : i32
    return %c0_i32, %c0_i32_0, %c0_i32_1 : i32, i32, i32
  }
  func.func @transform_5(%arg0: i32) -> (i32, i32, i32) {
    %c0_i32 = arith.constant 0 : i32
    %c0_i32_0 = arith.constant 0 : i32
    %c0_i32_1 = arith.constant 0 : i32
    %c0_i32_2 = arith.constant 0 : i32
    return %c0_i32, %c0_i32_0, %c0_i32_1 : i32, i32, i32
  }
  func.func @transform_6(%arg0: i32) -> (i32, i32, i32) {
    %c0_i32 = arith.constant 0 : i32
    %c0_i32_0 = arith.constant 0 : i32
    %c0_i32_1 = arith.constant 0 : i32
    %c0_i32_2 = arith.constant 0 : i32
    return %c0_i32, %c0_i32_0, %c0_i32_1 : i32, i32, i32
  }
  func.func @transform_7(%arg0: i32) -> (i32, i32) {
    %c0_i32 = arith.constant 0 : i32
    %c0_i32_0 = arith.constant 0 : i32
    %c0_i32_1 = arith.constant 0 : i32
    return %c0_i32, %c0_i32_0 : i32, i32
  }
  func.func @transform_8(%arg0: i32) -> (i32, i32) {
    %c0_i32 = arith.constant 0 : i32
    %c0_i32_0 = arith.constant 0 : i32
    return %arg0, %c0_i32 : i32, i32
  }
}

</mosaic_0001>

<bundles_post_ra>
// kernel: tpu_custom_call.1
= control target key start
LH: loop header
LB: loop body
LE: loop exit
PB: predicated region body
PF: predicated region fallthrough
CT: control target
= control target key end

     0   :  { %s11916_s0 = inlined_call_operand.vmem [shape: s32[256,1], index: 0, kind: input, shape index: {}]   ;;  %s11917_s1 = inlined_call_operand.hbm [shape: bf16[128,128], index: 1, kind: input, shape index: {}]   ;;  %s11918_s2 = inlined_call_operand.vmem [shape: f32[128,128], index: 2, kind: input, shape index: {}]   ;;  %s11919_s3 = inlined_call_operand.hbm [shape: bf16[2,128,384], index: 3, kind: input, shape index: {}]   ;;  %s11920_s4 = inlined_call_operand.vmem [shape: bf16[2,128,128], index: 4, kind: input, shape index: {}]   ;;  %s11921_s5 = inlined_call_operand.hbm [shape: bf16[2,128,512], index: 5, kind: input, shape index: {}]   ;;  %s11922_s6 = inlined_call_operand.hbm [shape: bf16[2,512,128], index: 6, kind: input, shape index: {}]   ;;  %s11923_s7 = inlined_call_operand.vmem [shape: f32[8,128], index: 7, kind: input, shape index: {}]   ;;  %s11924_s8 = inlined_call_operand.hbm [shape: f32[64,128], index: 8, kind: output, shape index: {}]  }
   0x1   :  { %12076 = sst [smem:[#allocation95_spill]] %s11919_s3 }
   0x2   :  { %13 = vsyncpa [#allocation3], 0 }
   0x3   :  { %14 = vsyncpa [#allocation6], 0 }
   0x4   :  { %15 = vsyncpa [#allocation9], 0 }
   0x5   :  { %16 = vsyncpa [#allocation4], 0 }
   0x6   :  { %18 = vsyncpa [#allocation4 + $0x1], 0  ;;  %s8775_s27 = smov 0   ;;  %s8777_s28 = smov 0  }
   0x7   :  { %s8779_s29 = smov 0   ;;  %s8781_s30 = smov 0  }
   0x8 LB: > { %12077 = sst [smem:[#allocation15_spill]] %s8709_s29  ;;  %s8796_s9 = sadd.s32 4294967295, %s8713_s30   ;;  %s8713_s30 = sphi %s8781_s30, %s12413_s30   ;;  %s8709_s29 = sphi %s8779_s29, %s12418_s29   ;;  %s8705_s28 = sphi %s8777_s28, %s12417_s28   ;;  %s8701_s27 = sphi %s8775_s27, %s12416_s27  }
   0x9   : > { %s6697_s10 = sadd.s32 4294967294, %s8713_s30   ;;  %s8800_s11 = sadd.s32 1, %s8713_s30  }
   0xa   : > { %12078 = sst [smem:[#allocation16_spill]] %s8800_s11  ;;  %s204_s12 = sadd.s32 1, %s8709_s29 }
   0xb   : > { %s201_s13 = ssub.s32 %s8713_s30, %s8800_s11  ;;  %p214_p0 = scmp.ne.s32.totalorder %s8709_s29, %s8705_s28 }
   0xc   : > { %p202_p1 = scmp.eq.s32.totalorder %s201_s13, 0  ;;  %p215_p2 = scmp.eq.s32.totalorder %s8796_s9, 1 }
   0xd   : > { %p220_p3 = scmp.ne.s32.totalorder %s8705_s28, %s8701_s27  ;;  %p221_p4 = scmp.eq.s32.totalorder %s6697_s10, 1 }
   0xe   : > { %s8811_s14 = scalar_select %p202_p1, %s8709_s29, %s204_s12  }
   0xf   : > { %p8813_p5 = por %p215_p2, %p214_p0  ;;  %p8817_p6 = por %p221_p4, %p220_p3 }
  0x10   : > { %12079 = sst [smem:[#allocation17_spill]] %s8811_s14  ;;  %p6698_p7 = scmp.ge.s32.totalorder %s8713_s30, 1 }
  0x11   : > { %s12080_s15 = scalar_select %p8813_p5, 1, 0 }
  0x12   : > { %s12081_s16 = scalar_select %p8817_p6, 1, 0 }
  0x13   : > { %p228_p8 = scmp.lt.s32.totalorder %s8713_s30, 3  ;;  %p11925_p9 = scmp.eq.s32.totalorder %s8796_s9, 0 }
  0x14   : > { %s8715_s18 = smov [#allocation5]   ;;  %s8716_s21 = smov [#allocation2]  }
  0x15   : > { %p8824_p10 = pnand %p6698_p7, %p228_p8  ;;  %s256_s19 = sshll.u32 %s8715_s18, 4  ;;  %s257_s19 = int_to_ptr.vmem [resolvable:$true] %s256_s19 }
  0x16   : > { %s240_s22 = sshll.u32 %s8716_s21, 4  ;;  %s12084_s3 = sld [smem:[#allocation95_spill]]  ;;  %s8836_s22 = int_to_ptr.vmem [resolvable:$true] %s240_s22 }
  0x17   : > { %s12082_s17 = scalar_select %p8824_p10, 1, 0 }
  0x18   : > { %p7690_p11 = pneg %p8824_p10 }
  0x1a   : > { %p8832_p12 = pnand %p11925_p9, %p7690_p11 }
  0x1c   : > { %s8527_s25 = scalar_lea.hbm %s12084_s3, 6144  ;;  %p8846_p0 = pneg %p8832_p12 }
  0x1d   : > { %p8528_p13 = scmp.ne.s32.totalorder %s12084_s3, %s8527_s25  ;;  %p8534_p3 = scmp.lt.u32.totalorder %s8527_s25, %s12084_s3 }
  0x1f   : > { %p8530_p1 = pnand %p8846_p0, %p8528_p13 }
  0x21   : > { %p8531_p2 = pneg %p8530_p1 }
  0x23   : > { %p8536_p4 = pnand %p8534_p3, %p8531_p2 }
  0x25   : > { %8539 = shalt.err (!%p8536_p4)
}
  0x26   : > { %s8540_s21 = scalar_lea.vmem %s257_s19, 6144  ;;  %p8548_p9 = scmp.lt.s32.totalorder %s257_s19, %s257_s19 }
  0x27   : > { %p8541_p7 = scmp.ne.s32.totalorder %s257_s19, %s8540_s21  ;;  %p8549_p6 = scmp.lt.s32.totalorder %s8540_s21, %s8540_s21 }
  0x29   : > { %p8543_p8 = pnand %p8541_p7, %p8846_p0  ;;  %p8550_p5 = por %p8549_p6, %p8548_p9 }
  0x2b   : > { %p8544_p11 = pneg %p8543_p8 }
  0x2d   : > { %p8551_p10 = pnand %p8550_p5, %p8544_p11 }
  0x2f   : > { %8554 = shalt.err (!%p8551_p10)
}
  0x30   : > { %s8717_s23 = smov 192   ;;  %s8718_s24 = smov 12  }
  0x31   : > { %7696 = dma.hbm_to_vmem [thread:$0]  (!%p8832_p12), %s12084_s3, 6144, %s257_s19, [#allocation6], %s8717_s23, %s8717_s23, %s8718_s24  }
  0x32   : > { %s8555_s18 = scalar_lea.hbm %s11917_s1, 1024 }
  0x33   : > { %p8556_p13 = scmp.ne.s32.totalorder %s11917_s1, %s8555_s18  ;;  %p8562_p9 = scmp.lt.u32.totalorder %s8555_s18, %s11917_s1 }
  0x35   : > { %p8558_p5 = pnand %p8556_p13, %p8846_p0 }
  0x37   : > { %p8559_p6 = pneg %p8558_p5 }
  0x39   : > { %p8564_p10 = pnand %p8562_p9, %p8559_p6 }
  0x3b   : > { %8567 = shalt.err (!%p8564_p10)
}
  0x3c   : > { %s8568_s19 = scalar_lea.vmem %s8836_s22, 1024  ;;  %p8576_p4 = scmp.lt.s32.totalorder %s8836_s22, %s8836_s22 }
  0x3d   : > { %p8569_p1 = scmp.ne.s32.totalorder %s8836_s22, %s8568_s19  ;;  %p8577_p7 = scmp.lt.s32.totalorder %s8568_s19, %s8568_s19 }
  0x3f   : > { %p8571_p2 = pnand %p8569_p1, %p8846_p0  ;;  %p8578_p8 = por %p8577_p7, %p8576_p4 }
  0x41   : > { %p8572_p3 = pneg %p8571_p2 }
  0x43   : > { %p8579_p11 = pnand %p8578_p8, %p8572_p3 }
  0x45   : > { %8582 = shalt.err (!%p8579_p11)
}
  0x46   : > { %s11931_s29 = smov 64   ;;  %s11932_s11 = smov 4  }
  0x47   : > { %7693 = dma.hbm_to_vmem [thread:$0]  (!%p8832_p12), %s11917_s1, 1024, %s8836_s22, [#allocation3], %s11931_s29, %s11931_s29, %s11932_s11  }
  0x48   : > { %s8721_s24 = smov [#allocation7]   ;;  %s8583_s13 = scalar_lea.hbm %s11921_s5, 8192 }
  0x49   : > { %s272_s26 = sshll.u32 %s8721_s24, 4  ;;  %p8584_p13 = scmp.ne.s32.totalorder %s11921_s5, %s8583_s13  ;;  %s273_s26 = int_to_ptr.vmem [resolvable:$true] %s272_s26 }
  0x4a   : > { %p8590_p9 = scmp.lt.u32.totalorder %s8583_s13, %s11921_s5 }
  0x4b   : > { %p8586_p5 = pnand %p8584_p13, %p8846_p0 }
  0x4d   : > { %p8587_p6 = pneg %p8586_p5 }
  0x4f   : > { %p8592_p10 = pnand %p8590_p9, %p8587_p6 }
  0x51   : > { %8595 = shalt.err (!%p8592_p10)
}
  0x52   : > { %s8596_s22 = scalar_lea.vmem %s273_s26, 8192  ;;  %p8604_p4 = scmp.lt.s32.totalorder %s273_s26, %s273_s26 }
  0x53   : > { %p8597_p1 = scmp.ne.s32.totalorder %s273_s26, %s8596_s22  ;;  %p8605_p7 = scmp.lt.s32.totalorder %s8596_s22, %s8596_s22 }
  0x55   : > { %p8599_p2 = pnand %p8597_p1, %p8846_p0  ;;  %p8606_p8 = por %p8605_p7, %p8604_p4 }
  0x57   : > { %p8600_p3 = pneg %p8599_p2 }
  0x59   : > { %p8607_p11 = pnand %p8606_p8, %p8600_p3 }
  0x5b   : > { %8610 = shalt.err (!%p8607_p11)
}
  0x5c   : > { %s8722_s14 = smov 256   ;;  %s8723_s23 = smov 16  }
  0x5d   : > { %7699 = dma.hbm_to_vmem [thread:$0]  (!%p8832_p12), %s11921_s5, 8192, %s273_s26, [#allocation6], %s8722_s14, %s8722_s14, %s8723_s23  }
  0x5e   : > { %s8724_s25 = smov [#allocation8]   ;;  %s8611_s21 = scalar_lea.hbm %s11922_s6, 8192 }
  0x5f   : > { %s285_s10 = sshll.u32 %s8724_s25, 4  ;;  %p8612_p13 = scmp.ne.s32.totalorder %s11922_s6, %s8611_s21  ;;  %s286_s10 = int_to_ptr.vmem [resolvable:$true] %s285_s10 }
  0x60   : > { %p8618_p9 = scmp.lt.u32.totalorder %s8611_s21, %s11922_s6 }
  0x61   : > { %p8614_p5 = pnand %p8612_p13, %p8846_p0 }
  0x63   : > { %p8615_p6 = pneg %p8614_p5 }
  0x65   : > { %p8620_p10 = pnand %p8618_p9, %p8615_p6 }
  0x67   : > { %8623 = shalt.err (!%p8620_p10)
}
  0x68   : > { %s8624_s26 = scalar_lea.vmem %s286_s10, 8192  ;;  %p8632_p4 = scmp.lt.s32.totalorder %s286_s10, %s286_s10 }
  0x69   : > { %p8625_p1 = scmp.ne.s32.totalorder %s286_s10, %s8624_s26  ;;  %p8633_p7 = scmp.lt.s32.totalorder %s8624_s26, %s8624_s26 }
  0x6b   : > { %p8627_p2 = pnand %p8625_p1, %p8846_p0  ;;  %p8634_p8 = por %p8633_p7, %p8632_p4 }
  0x6d   : > { %p8628_p3 = pneg %p8627_p2 }
  0x6f   : > { %p8635_p11 = pnand %p8634_p8, %p8628_p3 }
  0x71   : > { %8638 = shalt.err (!%p8635_p11)
}
  0x72   : > { %s12086_s14 = smov 4   ;;  %s12087_s23 = smov 64  }
  0x73   : > { %7702 = dma.hbm_to_vmem [thread:$0]  (!%p8832_p12), %s11922_s6, 8192, %s286_s10, [#allocation9], %s12087_s23, %s12087_s23, %s12086_s14  }
  0x74   : > { %p12088_p13 = scmp.ne.s32.totalorder %s12082_s17, 0 }
  0x76   : > { %313 = sbr.rel (%p12088_p13) target bundleno = 5616 (0x15f0), region = 52 }
  0x7d   : > { %p12089_p0 = scmp.eq.s32.totalorder %s8796_s9, 0 }
  0x7f   : > { %8684 = dma.done.wait (%p12089_p0), [#allocation3], 1024   ;;  %p12090_p5 = pmov %p12089_p0 }
  0x80   : > { %p12091_p6 = pmov %p12089_p0 }
  0x81   : > { %8686 = vsyncadd (%p12090_p5), [#allocation3], 4294966272 }
  0x82   : > { %8688 = dma.done.wait (%p12091_p6), [#allocation6], 14336   ;;  %p12092_p9 = pmov %p12089_p0 }
  0x83   : > { %p12093_p10 = pmov %p12089_p0 }
  0x84   : > { %8690 = vsyncadd (%p12092_p9), [#allocation6], 4294952960 }
  0x85   : > { %8692 = dma.done.wait (%p12093_p10), [#allocation9], 8192   ;;  %p12094_p12 = pmov %p12089_p0 }
  0x86   : > { %s6710_s17 = sshll.u32 %s8796_s9, 4  ;;  %v11935_v0 = vmov 0   ;;  %v7764_v7 = vld [vmem:[#allocation2] sm:$0xff]   ;;  %v7765_v8 = vld [vmem:[#allocation2 + $0x8] sm:$0xff]   ;;  %v7766_v11 = vld [vmem:[#allocation2 + $0x10] sm:$0xff]   ;;  %v383_v38 = vlaneseq  ;;  %s356_s21 = sand.u32 1, %s8705_s28  }
  0x87   : > { %8694 = vsyncadd (%p12094_p12), [#allocation9], 4294959104  ;;  %7763 = vset.pattern.permute.xlu1 %v11935_v0  ;;  %7762 = vset.pattern.permute.xlu0 %v11935_v0  ;;  %p360_p1 = scmp.lt.s32.totalorder %s6710_s17, 31  ;;  %v7767_v14 = vld [vmem:[#allocation2 + $0x18] sm:$0xff]   ;;  %v7768_v17 = vld [vmem:[#allocation2 + $0x20] sm:$0xff]   ;;  %s6709_s19 = sshll.u32 %s356_s21, 5 }
  0x88   : > { %901 = vmatprep.mubr.bf16.mxu1 %v11935_v0  ;;  %7364 = vmatprep.subr.bf16.mxu0 %v7764_v7  ;;  %v7769_v20 = vld [vmem:[#allocation2 + $0x28] sm:$0xff]   ;;  %v7770_v23 = vld [vmem:[#allocation2 + $0x30] sm:$0xff]   ;;  %v7771_v24 = vld [vmem:[#allocation2 + $0x38] sm:$0xff]   ;;  %v8967_v41 = vand.u32 127, %v383_v38  ;;  %v11933_v45 = vmov 1.0|1.0  }
  0x89   : > { %s12420_s17 = smov (!%p360_p1, %s6710_s17), 31  ;;  %7365 = vmatpush3.bf16.msra.mxu0 %v7764_v7  ;;  %v7772_v25 = vld [vmem:[#allocation5 + $0x4] ss:$12 sps:$4 sm:$0xff]   ;;  %v7774_v26 = vld [vmem:[#allocation5] ss:$12 sps:$4 sm:$0xff]   ;;  %s358_s22 = scalar_lea.vmem [#allocation10], %s6709_s19 }
  0x8a   : > { %s6711_s20 = sshll.u32 %s12420_s17, 3  ;;  %7366 = vmatprep.subr.bf16.mxu0 %v7765_v8  ;;  %v7776_v27 = vld [vmem:[#allocation5 + $0x1c] ss:$12 sps:$4 sm:$0xff]   ;;  %869 = vmatprep.subr.bf16.mxu1 %v7772_v25  ;;  %v7778_v29 = vld [vmem:[#allocation5 + $0x18] ss:$12 sps:$4 sm:$0xff]   ;;  %12095 = vst [vmem:[#allocation18_spill] sm:$0xff] %v8967_v41 }
  0x8b   : > { %s8948_s24 = scalar_lea.vmem %s11916_s0, %s6711_s20  ;;  %v7775_v28 = vld [vmem:[#allocation5 + $0x8] ss:$12 sps:$4 sm:$0xff]   ;;  %870 = vmatpush1.bf16.msra.mxu1 %v7774_v26  ;;  %v7782_v31 = vld [vmem:[#allocation5 + $0x30] ss:$12 sps:$4 sm:$0xff]   ;;  %v7784_v32 = vld [vmem:[#allocation5 + $0x4c] ss:$12 sps:$4 sm:$0xff]  }
  0x8c   : > { %v369_v1 = vld [vmem:[%s8948_s24 + $0x10] sm:$0xff]  ;;  %v367_v2 = vld [vmem:[%s8948_s24] sm:$0xff]  ;;  %v370_v3 = vld [vmem:[%s8948_s24 + $0x18] sm:$0xff]  ;;  %871 = vmatprep.subr.bf16.mxu1 %v7776_v27  ;;  %s6594_s26 = sshll.u32 %s358_s22, 4  ;;  %s6953_s14 = sshll.u32 %s8796_s9, 9  ;;  %s11868_s26 = int_to_ptr.vmem [resolvable:$true] %s6594_s26 }
  0x8d   : > { %392 = vperm.xlu1 %7763, %v369_v1   ;;  %386 = vperm.xlu0 %7762, %v367_v2   ;;  %v368_v4 = vld [vmem:[%s8948_s24 + $0x8] sm:$0xff]  ;;  %v371_v6 = vld [vmem:[%s8948_s24 + $0x20] sm:$0xff]  ;;  %v374_v9 = vld [vmem:[%s8948_s24 + $0x38] sm:$0xff]  ;;  %s11873_s11 = scalar_lea.hbm %s11924_s8, %s6953_s14  ;;  %s11875_s9 = scalar_lea.sflag [#allocation4], %s356_s21 }
  0x8e   : > { %v372_v5 = vld [vmem:[%s8948_s24 + $0x28] sm:$0xff]  ;;  %v373_v10 = vld [vmem:[%s8948_s24 + $0x30] sm:$0xff]  ;;  %v375_v13 = vld [vmem:[%s8948_s24 + $0x40] sm:$0xff]  ;;  %7367 = vmatpush3.bf16.msra.mxu0 %v7765_v8  ;;  %s8639_s17 = scalar_lea.vmem %s11868_s26, 512  ;;  %p12411_p3 = scmp.ne.s32.totalorder %s12080_s15, 0 }
  0x8f   : > { %v376_v12 = vld [vmem:[%s8948_s24 + $0x48] sm:$0xff]  ;;  %7368 = vmatprep.subr.bf16.mxu0 %v7766_v11  ;;  %v378_v15 = vld [vmem:[%s8948_s24 + $0x58] sm:$0xff]  ;;  %v377_v16 = vld [vmem:[%s8948_s24 + $0x50] sm:$0xff]  ;;  %872 = vmatpush1.bf16.msra.mxu1 %v7778_v29  ;;  %p8640_p2 = scmp.ne.s32.totalorder %s11868_s26, %s8639_s17  ;;  %s8727_s20 = smov [#allocation10]  }
  0x90   : > { %v380_v18 = vld [vmem:[%s8948_s24 + $0x68] sm:$0xff]  ;;  %v379_v19 = vld [vmem:[%s8948_s24 + $0x60] sm:$0xff]  ;;  %v382_v21 = vld [vmem:[%s8948_s24 + $0x78] sm:$0xff]  ;;  %s8643_s12 = sshll.u32 %s8727_s20, 4  ;;  %s8644_s12 = int_to_ptr.vmem [resolvable:$false] %s8643_s12 }
  0x91   : > { %395 = vperm.xlu1 %7763, %v370_v3   ;;  %389 = vperm.xlu0 %7762, %v368_v4   ;;  %v381_v22 = vld [vmem:[%s8948_s24 + $0x70] sm:$0xff]  ;;  %v7780_v30 = vld [vmem:[#allocation5 + $0x34] ss:$12 sps:$4 sm:$0xff]   ;;  %v7788_v34 = vld [vmem:[#allocation5 + $0x64] ss:$12 sps:$4 sm:$0xff]   ;;  %p8641_p4 = pnand %p8640_p2, %p12411_p3  ;;  %s8645_s3 = scalar_lea.vmem %s8644_s12, 1024 }
  0x92   : > { %7369 = vmatpush3.bf16.msra.mxu0 %v7766_v11  ;;  %873 = vmatprep.subr.bf16.mxu1 %v7780_v30  ;;  %v7786_v33 = vld [vmem:[#allocation5 + $0x48] ss:$12 sps:$4 sm:$0xff]   ;;  %v7790_v35 = vld [vmem:[#allocation5 + $0x60] ss:$12 sps:$4 sm:$0xff]   ;;  %v7794_v37 = vld [vmem:[#allocation5 + $0x78] ss:$12 sps:$4 sm:$0xff]   ;;  %p8646_p8 = scmp.lt.s32.totalorder %s11868_s26, %s8644_s12  ;;  %p8647_p11 = scmp.lt.s32.totalorder %s8645_s3, %s8639_s17 }
  0x93   : > { %7370 = vmatprep.subr.bf16.mxu0 %v7767_v14  ;;  %874 = vmatpush1.bf16.msra.mxu1 %v7782_v31  ;;  %v7792_v36 = vld [vmem:[#allocation5 + $0x7c] ss:$12 sps:$4 sm:$0xff]   ;;  %v7779_v44 = vld [vmem:[#allocation5 + $0x20] ss:$12 sps:$4 sm:$0xff]   ;;  %v7783_v48 = vld [vmem:[#allocation5 + $0x38] ss:$12 sps:$4 sm:$0xff]   ;;  %p8642_p7 = pneg %p8641_p4 }
  0x94   : > { %875 = vmatprep.subr.bf16.mxu1 %v7784_v32  ;;  %v7787_v51 = vld [vmem:[#allocation5 + $0x50] ss:$12 sps:$4 sm:$0xff]   ;;  %v7791_v54 = vld [vmem:[#allocation5 + $0x68] ss:$12 sps:$4 sm:$0xff]   ;;  %v7795_v57 = vld [vmem:[#allocation5 + $0x80] ss:$12 sps:$4 sm:$0xff]   ;;  %p8648_p13 = por %p8647_p11, %p8646_p8 }
  0x95   : > { %401 = vperm.xlu1 %7763, %v372_v5   ;;  %398 = vperm.xlu0 %7762, %v371_v6   ;;  %v7796_v62 = vld [vmem:[#allocation5 + $0x94] ss:$12 sps:$4 sm:$0xff]   ;;  %v7798_v63 = vld [vmem:[#allocation5 + $0x90] ss:$12 sps:$4 sm:$0xff]   ;;  %v7799_v1 = vld [vmem:[#allocation5 + $0x98] ss:$12 sps:$4 sm:$0xff]  }
  0x96   : > { %7371 = vmatpush3.bf16.msra.mxu0 %v7767_v14  ;;  %v7800_v2 = vld [vmem:[#allocation5 + $0xac] ss:$12 sps:$4 sm:$0xff]   ;;  %v7802_v3 = vld [vmem:[#allocation5 + $0xa8] ss:$12 sps:$4 sm:$0xff]   ;;  %v7803_v4 = vld [vmem:[#allocation5 + $0xb0] ss:$12 sps:$4 sm:$0xff]   ;;  %p8649_p0 = pnand %p8648_p13, %p8642_p7 }
  0x97   : > { %7372 = vmatprep.subr.bf16.mxu0 %v7768_v17  ;;  %876 = vmatpush1.bf16.msra.mxu1 %v7786_v33  ;;  %v492_v6 = vld [vmem:[%s11918_s2 + $0x18] sm:$0xff]  ;;  %v489_v8 = vld [vmem:[%s11918_s2] sm:$0xff] }
  0x98   : > { %877 = vmatprep.subr.bf16.mxu1 %v7788_v34  ;;  %v500_v34 = vld [vmem:[%s11918_s2 + $0x58] sm:$0xff] }
  0x99   : > { %407 = vperm.xlu1 %7763, %v374_v9   ;;  %404 = vperm.xlu0 %7762, %v373_v10   ;;  %v490_v9 = vld [vmem:[%s11918_s2 + $0x8] sm:$0xff]  ;;  %v491_v10 = vld [vmem:[%s11918_s2 + $0x10] sm:$0xff] }
  0x9a   : > { %7373 = vmatpush3.bf16.msra.mxu0 %v7768_v17 }
  0x9b   : > { %7374 = vmatprep.subr.bf16.mxu0 %v7769_v20  ;;  %878 = vmatpush1.bf16.msra.mxu1 %v7790_v35 }
  0x9c   : > { %879 = vmatprep.subr.bf16.mxu1 %v7792_v36  ;;  %v497_v36 = vld [vmem:[%s11918_s2 + $0x40] sm:$0xff] }
  0x9d   : > { %413 = vperm.xlu1 %7763, %v376_v12   ;;  %410 = vperm.xlu0 %7762, %v375_v13  }
  0x9e   : > { %7375 = vmatpush3.bf16.msra.mxu0 %v7769_v20  ;;  %v496_v20 = vld [vmem:[%s11918_s2 + $0x38] sm:$0xff] }
  0x9f   : > { %7376 = vmatprep.subr.bf16.mxu0 %v7770_v23  ;;  %880 = vmatpush1.bf16.msra.mxu1 %v7794_v37  ;;  %v498_v37 = vld [vmem:[%s11918_s2 + $0x48] sm:$0xff] }
  0xa0   : > { %881 = vmatprep.subr.bf16.mxu1 %v7796_v62 }
  0xa1   : > { %419 = vperm.xlu1 %7763, %v378_v15   ;;  %416 = vperm.xlu0 %7762, %v377_v16  }
  0xa2   : > { %7377 = vmatpush3.bf16.msra.mxu0 %v7770_v23  ;;  %v494_v23 = vld [vmem:[%s11918_s2 + $0x28] sm:$0xff] }
  0xa3   : > { %7378 = vmatprep.subr.bf16.mxu0 %v7771_v24  ;;  %882 = vmatpush1.bf16.msra.mxu1 %v7798_v63 }
  0xa4   : > { %883 = vmatprep.subr.bf16.mxu1 %v7800_v2 }
  0xa5   : > { %425 = vperm.xlu1 %7763, %v380_v18   ;;  %422 = vperm.xlu0 %7762, %v379_v19  }
  0xa6   : > { %7379 = vmatpush3.bf16.msra.mxu0 %v7771_v24  ;;  %v495_v24 = vld [vmem:[%s11918_s2 + $0x30] sm:$0xff] }
  0xa7   : > { %7396 = vmatprep.subr.bf16.mxu0 %v7775_v28  ;;  %884 = vmatpush1.bf16.msra.mxu1 %v7802_v3 }
  0xa9   : > { %431 = vperm.xlu1 %7763, %v382_v21   ;;  %428 = vperm.xlu0 %7762, %v381_v22   ;;  %v493_v22 = vld [vmem:[%s11918_s2 + $0x20] sm:$0xff] }
 0x10c   : > { %v393_v39 = vpop.permute.xlu1 %392  ;;  %v387_v40 = vpop.permute.xlu0 %386 }
 0x10d   : > { %vm435_vm0 = vcmp.eq.s32.totalorder %v8967_v41, %v393_v39  ;;  %vm433_vm4 = vcmp.eq.s32.totalorder %v8967_v41, %v387_v40  ;;  %v499_v39 = vld [vmem:[%s11918_s2 + $0x50] sm:$0xff] }
 0x110   : > { %v396_v42 = vpop.permute.xlu1 %395  ;;  %v390_v43 = vpop.permute.xlu0 %389 }
 0x111   : > { %vm436_vm1 = vcmp.eq.s32.totalorder %v8967_v41, %v396_v42  ;;  %vm434_vm2 = vcmp.eq.s32.totalorder %v8967_v41, %v390_v43 }
 0x112   : > { %vm6722_vm3 = vmpackc.low %vm436_vm1, %vm435_vm0 }
 0x113   : > { %vm6720_vm5 = vmpackc.low %vm434_vm2, %vm433_vm4 }
 0x114   : > { %7380 = vmatprep.mubr.msk.bf16.mxu0 %vm6720_vm5, %v11933_v45  ;;  %v402_v46 = vpop.permute.xlu1 %401  ;;  %v399_v47 = vpop.permute.xlu0 %398 }
 0x115   : > { %vm438_vm6 = vcmp.eq.s32.totalorder %v8967_v41, %v402_v46  ;;  %7381 = vmatmul.mubr.msk.bf16.vlgmr.msra.gmra.mrb[0].mxu0 %vm6722_vm3, %v11933_v45  ;;  %vm437_vm7 = vcmp.eq.s32.totalorder %v8967_v41, %v399_v47 }
 0x116   : > { %vm6724_vm8 = vmpackc.low %vm438_vm6, %vm437_vm7  ;;  %7397 = vmatpush3.bf16.msra.mxu0 %v7775_v28 }
 0x117   : > { %7384 = vmatprep.mubr.msk.bf16.mxu0 %vm6724_vm8, %v11933_v45  ;;  %7398 = vmatprep.subr.bf16.mxu0 %v7779_v44 }
 0x118   : > { %v408_v49 = vpop.permute.xlu1 %407  ;;  %v405_v50 = vpop.permute.xlu0 %404 }
 0x119   : > { %vm440_vm9 = vcmp.eq.s32.totalorder %v8967_v41, %v408_v49  ;;  %vm439_vm10 = vcmp.eq.s32.totalorder %v8967_v41, %v405_v50 }
 0x11a   : > { %vm6726_vm11 = vmpackc.low %vm440_vm9, %vm439_vm10  ;;  %7399 = vmatpush3.bf16.msra.mxu0 %v7779_v44 }
 0x11b   : > { %7400 = vmatprep.subr.bf16.mxu0 %v7783_v48 }
 0x11c   : > { %v414_v52 = vpop.permute.xlu1 %413  ;;  %v411_v53 = vpop.permute.xlu0 %410 }
 0x11d   : > { %vm442_vm12 = vcmp.eq.s32.totalorder %v8967_v41, %v414_v52  ;;  %7385 = vmatmul.mubr.msk.bf16.gmra.mrb[4].mxu0 %vm6726_vm11, %v11933_v45  ;;  %vm441_vm13 = vcmp.eq.s32.totalorder %v8967_v41, %v411_v53  ;;  %v501_v53 = vld [vmem:[%s11918_s2 + $0x60] sm:$0xff] }
 0x11e   : > { %vm6728_vm14 = vmpackc.low %vm442_vm12, %vm441_vm13  ;;  %7401 = vmatpush3.bf16.msra.mxu0 %v7783_v48 }
 0x11f   : > { %7388 = vmatprep.mubr.msk.bf16.mxu0 %vm6728_vm14, %v11933_v45  ;;  %7402 = vmatprep.subr.bf16.mxu0 %v7787_v51 }
 0x120   : > { %v420_v55 = vpop.permute.xlu1 %419  ;;  %v417_v56 = vpop.permute.xlu0 %416 }
 0x121   : > { %vm444_vm15 = vcmp.eq.s32.totalorder %v8967_v41, %v420_v55  ;;  %vm443_vm0 = vcmp.eq.s32.totalorder %v8967_v41, %v417_v56  ;;  %v503_v55 = vld [vmem:[%s11918_s2 + $0x70] sm:$0xff] }
 0x122   : > { %vm6730_vm1 = vmpackc.low %vm444_vm15, %vm443_vm0  ;;  %7403 = vmatpush3.bf16.msra.mxu0 %v7787_v51  ;;  %v504_v51 = vld [vmem:[%s11918_s2 + $0x78] sm:$0xff] }
 0x123   : > { %7404 = vmatprep.subr.bf16.mxu0 %v7791_v54 }
 0x124   : > { %v426_v58 = vpop.permute.xlu1 %425  ;;  %v423_v59 = vpop.permute.xlu0 %422 }
 0x125   : > { %vm446_vm2 = vcmp.eq.s32.totalorder %v8967_v41, %v426_v58  ;;  %7389 = vmatmul.mubr.msk.bf16.gmra.mrb[8].mxu0 %vm6730_vm1, %v11933_v45  ;;  %vm445_vm3 = vcmp.eq.s32.totalorder %v8967_v41, %v423_v59 }
 0x126   : > { %vm6732_vm4 = vmpackc.low %vm446_vm2, %vm445_vm3  ;;  %7405 = vmatpush3.bf16.msra.mxu0 %v7791_v54  ;;  %v502_v54 = vld [vmem:[%s11918_s2 + $0x68] sm:$0xff] }
 0x127   : > { %7392 = vmatprep.mubr.msk.bf16.mxu0 %vm6732_vm4, %v11933_v45  ;;  %7406 = vmatprep.subr.bf16.mxu0 %v7795_v57 }
 0x128   : > { %v432_v60 = vpop.permute.xlu1 %431  ;;  %v429_v61 = vpop.permute.xlu0 %428 }
 0x129   : > { %vm448_vm5 = vcmp.eq.s32.totalorder %v8967_v41, %v432_v60  ;;  %vm447_vm6 = vcmp.eq.s32.totalorder %v8967_v41, %v429_v61 }
 0x12a   : > { %vm6734_vm7 = vmpackc.low %vm448_vm5, %vm447_vm6  ;;  %7407 = vmatpush3.bf16.msra.mxu0 %v7795_v57 }
 0x12b   : > { %7408 = vmatprep.subr.bf16.mxu0 %v7799_v1 }
 0x12d   : > { %7393 = vmatmul.mubr.msk.bf16.gmra.mrb[12].mxu0 %vm6734_vm7, %v11933_v45 }
 0x12e   : > { %7409 = vmatpush3.bf16.msra.mxu0 %v7799_v1 }
 0x12f   : > { %7410 = vmatprep.subr.bf16.mxu0 %v7803_v4 }
 0x132   : > { %7411 = vmatpush3.bf16.msra.mxu0 %v7803_v4 }
 0x1e8   : > { %v7382_v5 = vpop.f32.mrb[0].mxu0 }
 0x1e9   : > { %v587_v7 = vpop.f32.mrb[1].mxu0  ;;  %v9011_v16 = vadd.f32 %v7382_v5, %v491_v10 }
 0x1ea   : > { %v7383_v11 = vpop.f32.mrb[2].mxu0  ;;  %v9007_v14 = vadd.f32 %v587_v7, %v489_v8 }
 0x1eb   : > { %v9005_v12 = vadd.f32 %v7383_v11, %v492_v6  ;;  %v590_v13 = vpop.f32.mrb[3].mxu0 }
 0x1ec   : > { %v9009_v15 = vadd.f32 %v590_v13, %v490_v9 }
 0x1ed   : > { %v702_v18 = vpack.c.bf16 %v9005_v12, %v9011_v16 }
 0x1ee   : > { %v701_v17 = vpack.c.bf16 %v9009_v15, %v9007_v14 }
 0x1f0   : > { %v7386_v19 = vpop.f32.mrb[4].mxu0  ;;  %902 = vmatmul.mubr.bf16.vlgmr.msra.gmra.mrb[0].mxu1 %v701_v17  ;;  %7412 = vmatprep.mubr.bf16.mxu0 %v701_v17 }
 0x1f1   : > { %v603_v21 = vpop.f32.mrb[5].mxu0  ;;  %7413 = vmatmul.mubr.bf16.vlgmr.msra.gmra.mrb[16].mxu0 %v702_v18  ;;  %911 = vmatprep.mubr.bf16.mxu1 %v11935_v0  ;;  %v9036_v30 = vadd.f32 %v7386_v19, %v495_v24 }
 0x1f2   : > { %v7387_v25 = vpop.f32.mrb[6].mxu0  ;;  %v9032_v28 = vadd.f32 %v603_v21, %v493_v22 }
 0x1f3   : > { %v9030_v26 = vadd.f32 %v7387_v25, %v496_v20  ;;  %v606_v27 = vpop.f32.mrb[7].mxu0 }
 0x1f4   : > { %v9034_v29 = vadd.f32 %v606_v27, %v494_v23 }
 0x1f5   : > { %v704_v32 = vpack.c.bf16 %v9030_v26, %v9036_v30 }
 0x1f6   : > { %v703_v31 = vpack.c.bf16 %v9034_v29, %v9032_v28 }
 0x1f8   : > { %v7390_v33 = vpop.f32.mrb[8].mxu0  ;;  %912 = vmatmul.mubr.bf16.gmra.mrb[4].mxu1 %v702_v18  ;;  %7416 = vmatprep.mubr.bf16.mxu0 %v703_v31 }
 0x1f9   : > { %v619_v35 = vpop.f32.mrb[9].mxu0  ;;  %7417 = vmatmul.mubr.bf16.gmra.mrb[20].mxu0 %v704_v32  ;;  %921 = vmatprep.mubr.bf16.mxu1 %v11935_v0  ;;  %v9061_v47 = vadd.f32 %v7390_v33, %v499_v39 }
 0x1fa   : > { %v7391_v40 = vpop.f32.mrb[10].mxu0  ;;  %v9057_v44 = vadd.f32 %v619_v35, %v497_v36 }
 0x1fb   : > { %v9055_v42 = vadd.f32 %v7391_v40, %v500_v34  ;;  %v622_v43 = vpop.f32.mrb[11].mxu0 }
 0x1fc   : > { %v9059_v46 = vadd.f32 %v622_v43, %v498_v37 }
 0x1fd   : > { %v706_v49 = vpack.c.bf16 %v9055_v42, %v9061_v47 }
 0x1fe   : > { %v705_v48 = vpack.c.bf16 %v9059_v46, %v9057_v44 }
 0x200   : > { %v7394_v50 = vpop.f32.mrb[12].mxu0  ;;  %922 = vmatmul.mubr.bf16.gmra.mrb[8].mxu1 %v703_v31  ;;  %7420 = vmatprep.mubr.bf16.mxu0 %v705_v48 }
 0x201   : > { %v635_v52 = vpop.f32.mrb[13].mxu0  ;;  %7421 = vmatmul.mubr.bf16.gmra.mrb[24].mxu0 %v706_v49  ;;  %931 = vmatprep.mubr.bf16.mxu1 %v11935_v0  ;;  %v9086_v61 = vadd.f32 %v7394_v50, %v503_v55 }
 0x202   : > { %v7395_v56 = vpop.f32.mrb[14].mxu0  ;;  %v9082_v59 = vadd.f32 %v635_v52, %v501_v53 }
 0x203   : > { %v9080_v57 = vadd.f32 %v7395_v56, %v504_v51  ;;  %v638_v58 = vpop.f32.mrb[15].mxu0 }
 0x204   : > { %v9084_v60 = vadd.f32 %v638_v58, %v502_v54 }
 0x205   : > { %v708_v63 = vpack.c.bf16 %v9080_v57, %v9086_v61 }
 0x206   : > { %v707_v62 = vpack.c.bf16 %v9084_v60, %v9082_v59 }
 0x208   : > { %932 = vmatmul.mubr.bf16.gmra.mrb[12].mxu1 %v704_v32  ;;  %7424 = vmatprep.mubr.bf16.mxu0 %v707_v62 }
 0x209   : > { %7425 = vmatmul.mubr.bf16.gmra.mrb[28].mxu0 %v708_v63  ;;  %941 = vmatprep.mubr.bf16.mxu1 %v11935_v0 }
 0x210   : > { %942 = vmatmul.mubr.bf16.gmra.mrb[16].mxu1 %v705_v48 }
 0x211   : > { %951 = vmatprep.mubr.bf16.mxu1 %v11935_v0 }
 0x218   : > { %952 = vmatmul.mubr.bf16.gmra.mrb[20].mxu1 %v706_v49 }
 0x219   : > { %961 = vmatprep.mubr.bf16.mxu1 %v11935_v0 }
 0x220   : > { %962 = vmatmul.mubr.bf16.gmra.mrb[24].mxu1 %v707_v62 }
 0x221   : > { %971 = vmatprep.mubr.bf16.mxu1 %v11935_v0 }
 0x228   : > { %972 = vmatmul.mubr.bf16.gmra.mrb[28].mxu1 %v708_v63 }
 0x2c3   : > { %v903_v1 = vpop.f32.mrb[0].mxu1 }
 0x2c4   : > { %v905_v2 = vpop.f32.mrb[1].mxu1  ;;  %v7414_v3 = vpop.f32.mrb[16].mxu0 }
 0x2c5   : > { %v907_v4 = vpop.f32.mrb[2].mxu1  ;;  %v1016_v5 = vpop.f32.mrb[17].mxu0 }
 0x2c6   : > { %v1079_v6 = vpack.c.bf16 %v907_v4, %v903_v1  ;;  %v909_v7 = vpop.f32.mrb[3].mxu1  ;;  %v7415_v8 = vpop.f32.mrb[18].mxu0 }
 0x2c7   : > { %v1087_v9 = vpack.c.bf16 %v909_v7, %v905_v2  ;;  %v1361_v10 = vpack.c.bf16 %v7415_v8, %v7414_v3  ;;  %v1019_v11 = vpop.f32.mrb[19].mxu0 }
 0x2c8   : > { %v1360_v13 = vpack.c.bf16 %v1019_v11, %v1016_v5  ;;  %7444 = vmatprep.mubr.bf16.mxu1 %v1079_v6 }
 0x2c9   : > { %7428 = vmatprep.subr.bf16.mxu1 %v1087_v9 }
 0x2ca   : > { %7429 = vmatpush3.bf16.xpose.msra.mxu1 %v1087_v9  ;;  %7460 = vmatprep.subr.bf16.mxu0 %v1360_v13 }
 0x2cb   : > { %v9096_v17 = vpop.f32.mrb[4].mxu1  ;;  %7461 = vmatpush3.bf16.msra.mxu0 %v1360_v13 }
 0x2cc   : > { %v915_v18 = vpop.f32.mrb[5].mxu1  ;;  %v7418_v19 = vpop.f32.mrb[20].mxu0  ;;  %7462 = vmatprep.subr.bf16.mxu0 %v1361_v10 }
 0x2cd   : > { %v9098_v20 = vpop.f32.mrb[6].mxu1  ;;  %v1032_v21 = vpop.f32.mrb[21].mxu0 }
 0x2ce   : > { %v1080_v22 = vpack.c.bf16 %v9098_v20, %v9096_v17  ;;  %v919_v23 = vpop.f32.mrb[7].mxu1  ;;  %v7419_v24 = vpop.f32.mrb[22].mxu0  ;;  %v9123_v20 = vshra.s32 %v8967_v41, 5 }
 0x2cf   : > { %v1088_v25 = vpack.c.bf16 %v919_v23, %v915_v18  ;;  %v1363_v27 = vpack.c.bf16 %v7419_v24, %v7418_v19  ;;  %v1035_v31 = vpop.f32.mrb[23].mxu0  ;;  %7463 = vmatpush3.bf16.msra.mxu0 %v1361_v10 }
 0x2d0   : > { %v1362_v32 = vpack.c.bf16 %v1035_v31, %v1032_v21  ;;  %12098 = vst [vmem:[#allocation21_spill] sm:$0xff] %v9123_v20 }
 0x2d1   : > { %7430 = vmatprep.subr.bf16.mxu1 %v1088_v25 }
 0x2d2   : > { %7431 = vmatpush3.bf16.xpose.msra.mxu1 %v1088_v25  ;;  %7464 = vmatprep.subr.bf16.mxu0 %v1362_v32 }
 0x2d3   : > { %v9102_v33 = vpop.f32.mrb[8].mxu1  ;;  %7465 = vmatpush3.bf16.msra.mxu0 %v1362_v32 }
 0x2d4   : > { %v925_v34 = vpop.f32.mrb[9].mxu1  ;;  %v7422_v35 = vpop.f32.mrb[24].mxu0  ;;  %7466 = vmatprep.subr.bf16.mxu0 %v1363_v27 }
 0x2d5   : > { %v9104_v36 = vpop.f32.mrb[10].mxu1  ;;  %v1048_v37 = vpop.f32.mrb[25].mxu0 }
 0x2d6   : > { %v1081_v39 = vpack.c.bf16 %v9104_v36, %v9102_v33  ;;  %v929_v40 = vpop.f32.mrb[11].mxu1  ;;  %v7423_v43 = vpop.f32.mrb[26].mxu0 }
 0x2d7   : > { %v1089_v48 = vpack.c.bf16 %v929_v40, %v925_v34  ;;  %v1365_v49 = vpack.c.bf16 %v7423_v43, %v7422_v35  ;;  %v1051_v50 = vpop.f32.mrb[27].mxu0  ;;  %7467 = vmatpush3.bf16.msra.mxu0 %v1363_v27 }
 0x2d8   : > { %v1364_v51 = vpack.c.bf16 %v1051_v50, %v1048_v37  ;;  %v9116_v50 = vshrl.u32 %v383_v38, 7  ;;  %v12101_v38 = vmov 0 }
 0x2d9   : > { %7432 = vmatprep.subr.bf16.mxu1 %v1089_v48 }
 0x2da   : > { %7433 = vmatpush3.bf16.xpose.msra.mxu1 %v1089_v48  ;;  %7468 = vmatprep.subr.bf16.mxu0 %v1364_v51  ;;  %12096 = vst [vmem:[#allocation19_spill] sm:$0xff] %v9116_v50  ;;  %v667_v17 = vshra.s32 %v9116_v50, 5  ;;  %v9130_v36 = vadd.s32 24, %v9116_v50 }
 0x2db   : > { %v933_v52 = vpop.f32.mrb[12].mxu1  ;;  %7469 = vmatpush3.bf16.msra.mxu0 %v1364_v51  ;;  %v9119_v51 = vadd.s32 8, %v9116_v50 }
 0x2dc   : > { %v935_v53 = vpop.f32.mrb[13].mxu1  ;;  %v7426_v54 = vpop.f32.mrb[28].mxu0  ;;  %7470 = vmatprep.subr.bf16.mxu0 %v1365_v49  ;;  %12100 = vst [vmem:[#allocation23_spill] sm:$0xff] %v9130_v36  ;;  %vm9133_vm8 = vcmp.eq.s32.totalorder %v667_v17, %v9123_v20  ;;  %v12122_v17 = vmov 0 }
 0x2dd   : > { %v937_v55 = vpop.f32.mrb[14].mxu1  ;;  %v1064_v56 = vpop.f32.mrb[29].mxu0  ;;  %12097 = vst [vmem:[#allocation20_spill] sm:$0xff] %v9119_v51  ;;  %v668_v33 = vshra.s32 %v9119_v51, 5  ;;  %v12102_v38 = vsel %vm9133_vm8, 4294967295, %v12101_v38 }
 0x2de   : > { %v1082_v58 = vpack.c.bf16 %v937_v55, %v933_v52  ;;  %v939_v62 = vpop.f32.mrb[15].mxu1  ;;  %v7427_v63 = vpop.f32.mrb[30].mxu0  ;;  %12103 = vst [vmem:[#allocation24_spill] sm:$0xff] %v12102_v38  ;;  %v655_v52 = vadd.s32 32, %v9116_v50  ;;  %v12104_v55 = vmov 0 }
 0x2df   : > { %v1090_v1 = vpack.c.bf16 %v939_v62, %v935_v53  ;;  %v1367_v2 = vpack.c.bf16 %v7427_v63, %v7426_v54  ;;  %v1067_v3 = vpop.f32.mrb[31].mxu0  ;;  %7471 = vmatpush3.bf16.msra.mxu0 %v1365_v49  ;;  %vm9140_vm9 = vcmp.eq.s32.totalorder %v668_v33, %v9123_v20  ;;  %v670_v62 = vshra.s32 %v9130_v36, 5 }
 0x2e0   : > { %v1366_v4 = vpack.c.bf16 %v1067_v3, %v1064_v56  ;;  %v12105_v55 = vsel %vm9140_vm9, 4294967295, %v12104_v55  ;;  %v657_v63 = vadd.s32 48, %v9116_v50  ;;  %v671_v3 = vshra.s32 %v655_v52, 5 }
 0x2e1   : > { %7434 = vmatprep.subr.bf16.mxu1 %v1090_v1  ;;  %12106 = vst [vmem:[#allocation25_spill] sm:$0xff] %v12105_v55  ;;  %vm9167_vm11 = vcmp.eq.s32.totalorder %v670_v62, %v9123_v20  ;;  %v12125_v33 = vmov 0  ;;  %v663_v52 = vadd.s32 96, %v9116_v50 }
 0x2e2   : > { %7435 = vmatpush3.bf16.xpose.msra.mxu1 %v1090_v1  ;;  %7472 = vmatprep.subr.bf16.mxu0 %v1366_v4  ;;  %vm9173_vm12 = vcmp.eq.s32.totalorder %v671_v3, %v9123_v20 }
 0x2e3   : > { %v943_v5 = vpop.f32.mrb[16].mxu1  ;;  %7473 = vmatpush3.bf16.msra.mxu0 %v1366_v4  ;;  %v656_v4 = vadd.s32 40, %v9116_v50 }
 0x2e4   : > { %v945_v6 = vpop.f32.mrb[17].mxu1  ;;  %7474 = vmatprep.subr.bf16.mxu0 %v1367_v2 }
 0x2e5   : > { %v947_v7 = vpop.f32.mrb[18].mxu1 }
 0x2e6   : > { %v1083_v8 = vpack.c.bf16 %v947_v7, %v943_v5  ;;  %v949_v9 = vpop.f32.mrb[19].mxu1  ;;  %v12110_v7 = vmov 0 }
 0x2e7   : > { %v1091_v10 = vpack.c.bf16 %v949_v9, %v945_v6  ;;  %7475 = vmatpush3.bf16.msra.mxu0 %v1367_v2  ;;  %v12107_v2 = vmov 0  ;;  %v12111_v7 = vsel %vm9167_vm11, 4294967295, %v12110_v7  ;;  %v12113_v9 = vmov 0 }
 0x2e8   : > { %12112 = vst [vmem:[#allocation27_spill] sm:$0xff] %v12111_v7  ;;  %v12114_v9 = vsel %vm9173_vm12, 4294967295, %v12113_v9 }
 0x2e9   : > { %7436 = vmatprep.subr.bf16.mxu1 %v1091_v10  ;;  %12115 = vst [vmem:[#allocation28_spill] sm:$0xff] %v12114_v9 }
 0x2ea   : > { %7437 = vmatpush3.bf16.xpose.msra.mxu1 %v1091_v10  ;;  %v672_v10 = vshra.s32 %v656_v4, 5 }
 0x2eb   : > { %v953_v11 = vpop.f32.mrb[20].mxu1 }
 0x2ec   : > { %v955_v13 = vpop.f32.mrb[21].mxu1  ;;  %vm9196_vm14 = vcmp.eq.s32.totalorder %v672_v10, %v9123_v20  ;;  %v679_v10 = vshra.s32 %v663_v52, 5 }
 0x2ed   : > { %v957_v18 = vpop.f32.mrb[22].mxu1 }
 0x2ee   : > { %v1084_v19 = vpack.c.bf16 %v957_v18, %v953_v11  ;;  %v959_v21 = vpop.f32.mrb[23].mxu1  ;;  %v658_v11 = vadd.s32 56, %v9116_v50  ;;  %vm9261_vm4 = vcmp.eq.s32.totalorder %v679_v10, %v9123_v20 }
 0x2ef   : > { %v1092_v23 = vpack.c.bf16 %v959_v21, %v955_v13  ;;  %v659_v13 = vadd.s32 64, %v9116_v50 }
 0x2f1   : > { %7438 = vmatprep.subr.bf16.mxu1 %v1092_v23 }
 0x2f2   : > { %7439 = vmatpush3.bf16.xpose.msra.mxu1 %v1092_v23 }
 0x2f3   : > { %v963_v24 = vpop.f32.mrb[24].mxu1 }
 0x2f4   : > { %v965_v25 = vpop.f32.mrb[25].mxu1 }
 0x2f5   : > { %v967_v27 = vpop.f32.mrb[26].mxu1 }
 0x2f6   : > { %v1085_v31 = vpack.c.bf16 %v967_v27, %v963_v24  ;;  %v969_v32 = vpop.f32.mrb[27].mxu1  ;;  %v661_v27 = vadd.s32 80, %v9116_v50 }
 0x2f7   : > { %v1093_v34 = vpack.c.bf16 %v969_v32, %v965_v25  ;;  %v12116_v25 = vmov 0  ;;  %v12119_v32 = vmov 0 }
 0x2f8   : > { %v12120_v32 = vsel %vm9196_vm14, 4294967295, %v12119_v32 }
 0x2f9   : > { %7440 = vmatprep.subr.bf16.mxu1 %v1093_v34  ;;  %12121 = vst [vmem:[#allocation30_spill] sm:$0xff] %v12120_v32 }
 0x2fa   : > { %7441 = vmatpush3.bf16.xpose.msra.mxu1 %v1093_v34  ;;  %v674_v34 = vshra.s32 %v658_v11, 5  ;;  %v665_v11 = vadd.s32 112, %v9116_v50 }
 0x2fb   : > { %v973_v35 = vpop.f32.mrb[28].mxu1 }
 0x2fc   : > { %v975_v37 = vpop.f32.mrb[29].mxu1  ;;  %vm9213_vm15 = vcmp.eq.s32.totalorder %v674_v34, %v9123_v20 }
 0x2fd   : > { %v977_v40 = vpop.f32.mrb[30].mxu1  ;;  %v12123_v17 = vsel %vm9213_vm15, 4294967295, %v12122_v17 }
 0x2fe   : > { %v1086_v43 = vpack.c.bf16 %v977_v40, %v973_v35  ;;  %v979_v48 = vpop.f32.mrb[31].mxu1  ;;  %v675_v35 = vshra.s32 %v659_v13, 5  ;;  %12124 = vst [vmem:[#allocation31_spill] sm:$0xff] %v12123_v17  ;;  %v664_v13 = vadd.s32 104, %v9116_v50 }
 0x2ff   : > { %v1094_v49 = vpack.c.bf16 %v979_v48, %v975_v37  ;;  %v660_v37 = vadd.s32 72, %v9116_v50  ;;  %v677_v48 = vshra.s32 %v661_v27, 5  ;;  %v12137_v27 = vmov 0 }
 0x300   : > { %vm9218_vm0 = vcmp.eq.s32.totalorder %v675_v35, %v9123_v20  ;;  %v12138_v27 = vsel %vm9261_vm4, 4294967295, %v12137_v27  ;;  %v680_v34 = vshra.s32 %v664_v13, 5  ;;  %v666_v35 = vadd.s32 120, %v9116_v50 }
 0x301   : > { %7442 = vmatprep.subr.bf16.mxu1 %v1094_v49  ;;  %v12126_v33 = vsel %vm9218_vm0, 4294967295, %v12125_v33  ;;  %vm9232_vm1 = vcmp.eq.s32.totalorder %v677_v48, %v9123_v20  ;;  %12139 = vst [vmem:[#allocation36_spill] sm:$0xff] %v12138_v27 }
 0x302   : > { %7443 = vmatpush3.bf16.xpose.msra.mxu1 %v1094_v49  ;;  %v662_v49 = vadd.s32 88, %v9116_v50  ;;  %12127 = vst [vmem:[#allocation32_spill] sm:$0xff] %v12126_v33  ;;  %vm9282_vm6 = vcmp.eq.s32.totalorder %v680_v34, %v9123_v20 }
 0x304   : > { %v678_v3 = vshra.s32 %v662_v49, 5 }
 0x306   : > { %vm9254_vm3 = vcmp.eq.s32.totalorder %v678_v3, %v9123_v20  ;;  %v12143_v3 = vmov 0 }
 0x307   : > { %v12144_v3 = vsel %vm9282_vm6, 4294967295, %v12143_v3 }
 0x308   : > { %12145 = vst [vmem:[#allocation38_spill] sm:$0xff] %v12144_v3 }
 0x309   : > { %7445 = vmatmul.mubr.bf16.vlgmr.msra.gmra.mrb[32].mxu1 %v1080_v22  ;;  %v9126_v22 = vadd.s32 16, %v9116_v50 }
 0x30a   : > { %7448 = vmatprep.mubr.bf16.mxu1 %v1081_v39 }
 0x30b   : > { %12099 = vst [vmem:[#allocation22_spill] sm:$0xff] %v9126_v22  ;;  %v669_v39 = vshra.s32 %v9126_v22, 5 }
 0x30d   : > { %vm9152_vm10 = vcmp.eq.s32.totalorder %v669_v39, %v9123_v20  ;;  %v676_v39 = vshra.s32 %v660_v37, 5 }
 0x30e   : > { %v12108_v2 = vsel %vm9152_vm10, 4294967295, %v12107_v2 }
 0x30f   : > { %12109 = vst [vmem:[#allocation26_spill] sm:$0xff] %v12108_v2  ;;  %vm9239_vm2 = vcmp.eq.s32.totalorder %v676_v39, %v9123_v20 }
 0x311   : > { %7449 = vmatmul.mubr.bf16.gmra.mrb[36].mxu1 %v1082_v58 }
 0x312   : > { %7452 = vmatprep.mubr.bf16.mxu1 %v1083_v8  ;;  %v673_v8 = vshra.s32 %v657_v63, 5 }
 0x314   : > { %vm9188_vm13 = vcmp.eq.s32.totalorder %v673_v8, %v9123_v20  ;;  %v12131_v8 = vmov 0 }
 0x315   : > { %v12117_v25 = vsel %vm9188_vm13, 4294967295, %v12116_v25  ;;  %v12132_v8 = vsel %vm9239_vm2, 4294967295, %v12131_v8 }
 0x316   : > { %12118 = vst [vmem:[#allocation29_spill] sm:$0xff] %v12117_v25  ;;  %12133 = vst [vmem:[#allocation34_spill] sm:$0xff] %v12132_v8 }
 0x319   : > { %7453 = vmatmul.mubr.bf16.gmra.mrb[40].mxu1 %v1084_v19 }
 0x31a   : > { %7456 = vmatprep.mubr.bf16.mxu1 %v1085_v31 }
 0x321   : > { %7457 = vmatmul.mubr.bf16.gmra.mrb[44].mxu1 %v1086_v43 }
 0x322   : > { %2099 = vmatprep.mubr.bf16.mxu1 %v11935_v0 }
 0x3dc   : > { %v7446_v53 = vpop.f32.mrb[32].mxu1 }
 0x3dd   : > { %v1129_v54 = vpop.f32.mrb[33].mxu1  ;;  %v9164_v6 = vsel %vm9152_vm10, %v7446_v53, -1e+30 }
 0x3de   : > { %v7447_v56 = vpop.f32.mrb[34].mxu1  ;;  %v9146_v58 = vsel %vm9133_vm8, %v1129_v54, -1e+30 }
 0x3df   : > { %1208 = vmax.xlane.f32.xlu0 %v9146_v58  ;;  %v1132_v1 = vpop.f32.mrb[35].mxu1  ;;  %v9181_v23 = vsel %vm9167_vm11, %v7447_v56, -1e+30 }
 0x3e0   : > { %v9159_v5 = vsel %vm9140_vm9, %v1132_v1, -1e+30  ;;  %v12128_v1 = vmov 0 }
 0x3e1   : > { %1210 = vmax.xlane.f32.xlu1 %v9159_v5  ;;  %v12129_v1 = vsel %vm9232_vm1, 4294967295, %v12128_v1 }
 0x3e2   : > { %12130 = vst [vmem:[#allocation33_spill] sm:$0xff] %v12129_v1 }
 0x3e3   : > { %1212 = vmax.xlane.f32.xlu0 %v9164_v6 }
 0x3e4   : > { %v7450_v18 = vpop.f32.mrb[36].mxu1 }
 0x3e5   : > { %v1145_v19 = vpop.f32.mrb[37].mxu1  ;;  %v9203_v40 = vsel %vm9188_vm13, %v7450_v18, -1e+30 }
 0x3e6   : > { %v7451_v21 = vpop.f32.mrb[38].mxu1  ;;  %v9185_v24 = vsel %vm9173_vm12, %v1145_v19, -1e+30 }
 0x3e7   : > { %1214 = vmax.xlane.f32.xlu0 %v9181_v23  ;;  %1216 = vmax.xlane.f32.xlu1 %v9185_v24  ;;  %v1148_v31 = vpop.f32.mrb[39].mxu1  ;;  %v9225_v62 = vsel %vm9213_vm15, %v7451_v21, -1e+30  ;;  %v12134_v21 = vmov 0 }
 0x3e8   : > { %v9207_v43 = vsel %vm9196_vm14, %v1148_v31, -1e+30  ;;  %v12135_v21 = vsel %vm9254_vm3, 4294967295, %v12134_v21  ;;  %v681_v31 = vshra.s32 %v665_v11, 5  ;;  %v12146_v11 = vmov 0 }
 0x3e9   : > { %12136 = vst [vmem:[#allocation35_spill] sm:$0xff] %v12135_v21 }
 0x3ea   : > { %vm9277_vm5 = vcmp.eq.s32.totalorder %v681_v31, %v9123_v20 }
 0x3eb   : > { %1220 = vmax.xlane.f32.xlu1 %v9203_v40  ;;  %1218 = vmax.xlane.f32.xlu0 %v9207_v43 }
 0x3ec   : > { %v7454_v53 = vpop.f32.mrb[40].mxu1 }
 0x3ed   : > { %v1161_v54 = vpop.f32.mrb[41].mxu1  ;;  %v9247_v18 = vsel %vm9232_vm1, %v7454_v53, -1e+30 }
 0x3ee   : > { %v7455_v56 = vpop.f32.mrb[42].mxu1  ;;  %v9229_v63 = vsel %vm9218_vm0, %v1161_v54, -1e+30  ;;  %v12140_v54 = vmov 0 }
 0x3ef   : > { %1222 = vmax.xlane.f32.xlu0 %v9225_v62  ;;  %1224 = vmax.xlane.f32.xlu1 %v9229_v63  ;;  %v1164_v4 = vpop.f32.mrb[43].mxu1  ;;  %v9268_v39 = vsel %vm9254_vm3, %v7455_v56, -1e+30  ;;  %v12141_v54 = vsel %vm9277_vm5, 4294967295, %v12140_v54  ;;  %v682_v56 = vshra.s32 %v666_v35, 5 }
 0x3f0   : > { %v9251_v19 = vsel %vm9239_vm2, %v1164_v4, -1e+30  ;;  %12142 = vst [vmem:[#allocation37_spill] sm:$0xff] %v12141_v54 }
 0x3f1   : > { %vm9297_vm7 = vcmp.eq.s32.totalorder %v682_v56, %v9123_v20 }
 0x3f2   : > { %v12147_v11 = vsel %vm9297_vm7, 4294967295, %v12146_v11 }
 0x3f3   : > { %1228 = vmax.xlane.f32.xlu1 %v9247_v18  ;;  %1226 = vmax.xlane.f32.xlu0 %v9251_v19  ;;  %12148 = vst [vmem:[#allocation39_spill] sm:$0xff] %v12147_v11 }
 0x3f4   : > { %v7458_v37 = vpop.f32.mrb[44].mxu1 }
 0x3f5   : > { %v1177_v48 = vpop.f32.mrb[45].mxu1  ;;  %v9288_v4 = vsel %vm9277_vm5, %v7458_v37, -1e+30 }
 0x3f6   : > { %v7459_v49 = vpop.f32.mrb[46].mxu1  ;;  %v9272_v52 = vsel %vm9261_vm4, %v1177_v48, -1e+30 }
 0x3f7   : > { %1230 = vmax.xlane.f32.xlu0 %v9268_v39  ;;  %1232 = vmax.xlane.f32.xlu1 %v9272_v52  ;;  %v1180_v53 = vpop.f32.mrb[47].mxu1  ;;  %v9303_v13 = vsel %vm9297_vm7, %v7459_v49, -1e+30 }
 0x3f8   : > { %v9292_v10 = vsel %vm9282_vm6, %v1180_v53, -1e+30 }
 0x3fb   : > { %1236 = vmax.xlane.f32.xlu1 %v9288_v4  ;;  %1234 = vmax.xlane.f32.xlu0 %v9292_v10 }
 0x3ff   : > { %1238 = vmax.xlane.f32.xlu0 %v9303_v13 }
 0x46c   : > { %v1209_v31 = vpop.xlane.xlu0 %1208 }
 0x46d   : > { %v1240_v34 = vsub.f32 %v9146_v58, %v1209_v31 }
 0x46e   : > { %v1211_v35 = vpop.xlane.xlu1 %1210 }
 0x46f   : > { %v1256_v37 = vmul.f32 1.442695, %v1240_v34  ;;  %v1241_v48 = vsub.f32 %v9159_v5, %v1211_v35 }
 0x470   : > { %v1213_v53 = vpop.xlane.xlu0 %1212 }
 0x471   : > { %8012 = vpow2.f32 %v1256_v37  ;;  %v1258_v45 = vmul.f32 1.442695, %v1241_v48  ;;  %v1242_v56 = vsub.f32 %v9164_v6, %v1213_v53 }
 0x473   : > { %8014 = vpow2.f32 %v1258_v45  ;;  %v1260_v0 = vmul.f32 1.442695, %v1242_v56 }
 0x474   : > { %v1215_v20 = vpop.xlane.xlu0 %1214  ;;  %v1217_v41 = vpop.xlane.xlu1 %1216 }
 0x475   : > { %8016 = vpow2.f32 %v1260_v0  ;;  %v1243_v49 = vsub.f32 %v9181_v23, %v1215_v20  ;;  %v1244_v51 = vsub.f32 %v9185_v24, %v1217_v41 }
 0x477   : > { %v1262_v36 = vmul.f32 1.442695, %v1243_v49  ;;  %v1264_v58 = vmul.f32 1.442695, %v1244_v51 }
 0x478   : > { %v1221_v31 = vpop.xlane.xlu1 %1220  ;;  %v1219_v34 = vpop.xlane.xlu0 %1218 }
 0x479   : > { %8018 = vpow2.f32 %v1262_v36  ;;  %v1246_v5 = vsub.f32 %v9203_v40, %v1221_v31  ;;  %v1245_v35 = vsub.f32 %v9207_v43, %v1219_v34 }
 0x47a   : > { %8020 = vpow2.f32 %v1264_v58 }
 0x47b   : > { %v9313_v6 = vpop.eup %8012  ;;  %v1268_v45 = vmul.f32 1.442695, %v1246_v5  ;;  %v1266_v37 = vmul.f32 1.442695, %v1245_v35 }
 0x47c   : > { %v1223_v48 = vpop.xlane.xlu0 %1222  ;;  %v1225_v0 = vpop.xlane.xlu1 %1224  ;;  %1288 = vadd.xlane.f32.xlu1 %v9313_v6 }
 0x47d   : > { %v9316_v20 = vpop.eup %8014  ;;  %8022 = vpow2.f32 %v1268_v45  ;;  %v1247_v41 = vsub.f32 %v9225_v62, %v1223_v48  ;;  %v1248_v51 = vsub.f32 %v9229_v63, %v1225_v0 }
 0x47e   : > { %8024 = vpow2.f32 %v1266_v37  ;;  %1290 = vadd.xlane.f32.xlu0 %v9316_v20 }
 0x47f   : > { %v9321_v36 = vpop.eup %8016  ;;  %v1270_v23 = vmul.f32 1.442695, %v1247_v41  ;;  %v1272_v24 = vmul.f32 1.442695, %v1248_v51 }
 0x480   : > { %v1229_v40 = vpop.xlane.xlu1 %1228  ;;  %v1227_v43 = vpop.xlane.xlu0 %1226  ;;  %1292 = vadd.xlane.f32.xlu1 %v9321_v36 }
 0x481   : > { %8026 = vpow2.f32 %v1270_v23  ;;  %v1250_v53 = vsub.f32 %v9247_v18, %v1229_v40  ;;  %v1249_v56 = vsub.f32 %v9251_v19, %v1227_v43 }
 0x482   : > { %8028 = vpow2.f32 %v1272_v24 }
 0x483   : > { %v9326_v62 = vpop.eup %8018  ;;  %v1276_v63 = vmul.f32 1.442695, %v1250_v53  ;;  %v1274_v49 = vmul.f32 1.442695, %v1249_v56 }
 0x484   : > { %v9328_v58 = vpop.eup %8020  ;;  %v1231_v31 = vpop.xlane.xlu0 %1230  ;;  %1294 = vadd.xlane.f32.xlu0 %v9326_v62 }
 0x485   : > { %v1233_v34 = vpop.xlane.xlu1 %1232  ;;  %8030 = vpow2.f32 %v1276_v63  ;;  %v1251_v5 = vsub.f32 %v9268_v39, %v1231_v31  ;;  %1296 = vadd.xlane.f32.xlu1 %v9328_v58 }
 0x486   : > { %v1252_v18 = vsub.f32 %v9272_v52, %v1233_v34  ;;  %8032 = vpow2.f32 %v1274_v49  ;;  %v7804_v34 = vld [vmem:[%s11920_s4] sm:$0xff]  }
 0x487   : > { %v9334_v19 = vpop.eup %8022  ;;  %v1278_v35 = vmul.f32 1.442695, %v1251_v5  ;;  %7492 = vmatprep.subr.bf16.mxu0 %v7804_v34 }
 0x488   : > { %v1280_v45 = vmul.f32 1.442695, %v1252_v18  ;;  %v9336_v37 = vpop.eup %8024  ;;  %v1235_v0 = vpop.xlane.xlu0 %1234 }
 0x489   : > { %v1237_v48 = vpop.xlane.xlu1 %1236  ;;  %8034 = vpow2.f32 %v1278_v35  ;;  %1300 = vadd.xlane.f32.xlu1 %v9334_v19  ;;  %1298 = vadd.xlane.f32.xlu0 %v9336_v37  ;;  %v1253_v39 = vsub.f32 %v9292_v10, %v1235_v0 }
 0x48a   : > { %v1254_v41 = vsub.f32 %v9288_v4, %v1237_v48  ;;  %8036 = vpow2.f32 %v1280_v45 }
 0x48b   : > { %v9342_v52 = vpop.eup %8026  ;;  %v1282_v23 = vmul.f32 1.442695, %v1253_v39 }
 0x48c   : > { %v1284_v51 = vmul.f32 1.442695, %v1254_v41  ;;  %v9344_v24 = vpop.eup %8028  ;;  %v1239_v40 = vpop.xlane.xlu0 %1238 }
 0x48d   : > { %1304 = vadd.xlane.f32.xlu1 %v9344_v24  ;;  %1302 = vadd.xlane.f32.xlu0 %v9342_v52  ;;  %v1255_v43 = vsub.f32 %v9303_v13, %v1239_v40 }
 0x48e   : > { %8038 = vpow2.f32 %v1284_v51 }
 0x48f   : > { %8040 = vpow2.f32 %v1282_v23  ;;  %v9349_v4 = vpop.eup %8030  ;;  %v1286_v53 = vmul.f32 1.442695, %v1255_v43 }
 0x490   : > { %v9351_v10 = vpop.eup %8032 }
 0x491   : > { %8042 = vpow2.f32 %v1286_v53  ;;  %1308 = vadd.xlane.f32.xlu1 %v9349_v4  ;;  %1306 = vadd.xlane.f32.xlu0 %v9351_v10 }
 0x493   : > { %v9355_v56 = vpop.eup %8034 }
 0x494   : > { %v9357_v63 = vpop.eup %8036 }
 0x495   : > { %1312 = vadd.xlane.f32.xlu1 %v9357_v63  ;;  %1310 = vadd.xlane.f32.xlu0 %v9355_v56 }
 0x498   : > { %v9361_v13 = vpop.eup %8038 }
 0x499   : > { %v9363_v49 = vpop.eup %8040  ;;  %1316 = vadd.xlane.f32.xlu1 %v9361_v13 }
 0x49a   : > { %1314 = vadd.xlane.f32.xlu0 %v9363_v49 }
 0x49b   : > { %v9367_v31 = vpop.eup %8042 }
 0x49e   : > { %1318 = vadd.xlane.f32.xlu0 %v9367_v31 }
 0x509   : > { %v1289_v5 = vpop.xlane.xlu1 %1288 }
 0x50a   : > { %8044 = vrcp.f32 %v1289_v5 }
 0x50b   : > { %v1291_v18 = vpop.xlane.xlu0 %1290 }
 0x50c   : > { %8046 = vrcp.f32 %v1291_v18 }
 0x50d   : > { %v1293_v35 = vpop.xlane.xlu1 %1292 }
 0x50e   : > { %8048 = vrcp.f32 %v1293_v35 }
 0x511   : > { %v1295_v45 = vpop.xlane.xlu0 %1294 }
 0x512   : > { %v1297_v48 = vpop.xlane.xlu1 %1296  ;;  %8050 = vrcp.f32 %v1295_v45 }
 0x513   : > { %8052 = vrcp.f32 %v1297_v48 }
 0x514   : > { %v8045_v0 = vpop.eup %8044 }
 0x515   : > { %v1336_v23 = vmul.f32 %v8045_v0, %v9313_v6  ;;  %v7805_v6 = vld [vmem:[%s11920_s4 + $0x8] sm:$0xff]  }
 0x516   : > { %v8047_v41 = vpop.eup %8046  ;;  %v1301_v39 = vpop.xlane.xlu1 %1300 }
 0x517   : > { %v1299_v51 = vpop.xlane.xlu0 %1298  ;;  %v1337_v40 = vmul.f32 %v8047_v41, %v9316_v20 }
 0x518   : > { %8054 = vrcp.f32 %v1299_v51  ;;  %v8049_v53 = vpop.eup %8048 }
 0x519   : > { %v1352_v43 = vpack.c.bf16 %v1337_v40, %v1336_v23  ;;  %8056 = vrcp.f32 %v1301_v39  ;;  %v1338_v45 = vmul.f32 %v8049_v53, %v9321_v36 }
 0x51a   : > { %v1305_v5 = vpop.xlane.xlu1 %1304 }
 0x51b   : > { %v1303_v18 = vpop.xlane.xlu0 %1302  ;;  %7476 = vmatprep.mubr.bf16.mxu0 %v1352_v43 }
 0x51c   : > { %v8051_v35 = vpop.eup %8050  ;;  %8058 = vrcp.f32 %v1303_v18 }
 0x51d   : > { %v1339_v22 = vmul.f32 %v8051_v35, %v9326_v62  ;;  %8060 = vrcp.f32 %v1305_v5  ;;  %v8053_v20 = vpop.eup %8052 }
 0x51e   : > { %v1309_v48 = vpop.xlane.xlu1 %1308  ;;  %v1340_v36 = vmul.f32 %v8053_v20, %v9328_v58 }
 0x51f   : > { %v1307_v11 = vpop.xlane.xlu0 %1306  ;;  %v1353_v54 = vpack.c.bf16 %v1339_v22, %v1338_v45  ;;  %v7806_v22 = vld [vmem:[%s11920_s4 + $0x10] sm:$0xff]  }
 0x520   : > { %8062 = vrcp.f32 %v1307_v11 }
 0x521   : > { %7477 = vmatmul.mubr.bf16.vlgmr.msra.gmra.mrb[32].mxu0 %v1353_v54  ;;  %8064 = vrcp.f32 %v1309_v48 }
 0x522   : > { %v8055_v0 = vpop.eup %8054  ;;  %v1313_v41 = vpop.xlane.xlu1 %1312  ;;  %7493 = vmatpush3.bf16.msra.mxu0 %v7804_v34 }
 0x523   : > { %v1311_v39 = vpop.xlane.xlu0 %1310  ;;  %v1341_v62 = vmul.f32 %v8055_v0, %v9336_v37  ;;  %7494 = vmatprep.subr.bf16.mxu0 %v7805_v6  ;;  %v8057_v51 = vpop.eup %8056  ;;  %v7807_v37 = vld [vmem:[%s11920_s4 + $0x18] sm:$0xff]  }
 0x524   : > { %8066 = vrcp.f32 %v1311_v39  ;;  %v1342_v34 = vmul.f32 %v8057_v51, %v9334_v19 }
 0x525   : > { %v1354_v23 = vpack.c.bf16 %v1341_v62, %v1340_v36  ;;  %8068 = vrcp.f32 %v1313_v41 }
 0x526   : > { %v8059_v40 = vpop.eup %8058  ;;  %v1317_v54 = vpop.xlane.xlu1 %1316  ;;  %7495 = vmatpush3.bf16.msra.mxu0 %v7805_v6 }
 0x527   : > { %v1315_v11 = vpop.xlane.xlu0 %1314  ;;  %7480 = vmatprep.mubr.bf16.mxu0 %v1354_v23  ;;  %v1343_v58 = vmul.f32 %v8059_v40, %v9342_v52  ;;  %7496 = vmatprep.subr.bf16.mxu0 %v7806_v22  ;;  %v8061_v43 = vpop.eup %8060  ;;  %v7808_v52 = vld [vmem:[%s11920_s4 + $0x20] sm:$0xff]  }
 0x528   : > { %8070 = vrcp.f32 %v1315_v11  ;;  %v1344_v35 = vmul.f32 %v8061_v43, %v9344_v24  ;;  %v7809_v24 = vld [vmem:[%s11920_s4 + $0x28] sm:$0xff]  }
 0x529   : > { %8072 = vrcp.f32 %v1317_v54  ;;  %v1355_v53 = vpack.c.bf16 %v1343_v58, %v1342_v34 }
 0x52a   : > { %v8063_v5 = vpop.eup %8062  ;;  %7497 = vmatpush3.bf16.msra.mxu0 %v7806_v22 }
 0x52b   : > { %v1319_v18 = vpop.xlane.xlu0 %1318  ;;  %7481 = vmatmul.mubr.bf16.gmra.mrb[36].mxu0 %v1355_v53  ;;  %v1345_v19 = vmul.f32 %v8063_v5, %v9351_v10  ;;  %7498 = vmatprep.subr.bf16.mxu0 %v7807_v37  ;;  %v8065_v45 = vpop.eup %8064 }
 0x52c   : > { %8074 = vrcp.f32 %v1319_v18  ;;  %v1346_v20 = vmul.f32 %v8065_v45, %v9349_v4  ;;  %v7810_v4 = vld [vmem:[%s11920_s4 + $0x30] sm:$0xff]  }
 0x52d   : > { %v1356_v48 = vpack.c.bf16 %v1345_v19, %v1344_v35 }
 0x52e   : > { %v8067_v6 = vpop.eup %8066  ;;  %7499 = vmatpush3.bf16.msra.mxu0 %v7807_v37 }
 0x52f   : > { %7484 = vmatprep.mubr.bf16.mxu0 %v1356_v48  ;;  %v1347_v0 = vmul.f32 %v8067_v6, %v9355_v56  ;;  %7500 = vmatprep.subr.bf16.mxu0 %v7808_v52  ;;  %v8069_v10 = vpop.eup %8068 }
 0x530   : > { %v1348_v62 = vmul.f32 %v8069_v10, %v9357_v63  ;;  %v7811_v63 = vld [vmem:[%s11920_s4 + $0x38] sm:$0xff]  }
 0x531   : > { %v1357_v41 = vpack.c.bf16 %v1347_v0, %v1346_v20 }
 0x532   : > { %v8071_v39 = vpop.eup %8070  ;;  %7501 = vmatpush3.bf16.msra.mxu0 %v7808_v52 }
 0x533   : > { %v8073_v36 = vpop.eup %8072  ;;  %7485 = vmatmul.mubr.bf16.gmra.mrb[40].mxu0 %v1357_v41  ;;  %v1349_v22 = vmul.f32 %v8071_v39, %v9363_v49  ;;  %7502 = vmatprep.subr.bf16.mxu0 %v7809_v24 }
 0x534   : > { %v1350_v23 = vmul.f32 %v8073_v36, %v9361_v13 }
 0x535   : > { %v1358_v51 = vpack.c.bf16 %v1349_v22, %v1348_v62  ;;  %v12149_v62 = vmov 0  }
 0x536   : > { %v8075_v56 = vpop.eup %8074  ;;  %7503 = vmatpush3.bf16.msra.mxu0 %v7809_v24 }
 0x537   : > { %v1351_v40 = vmul.f32 %v8075_v56, %v9367_v31  ;;  %7488 = vmatprep.mubr.bf16.mxu0 %v1358_v51  ;;  %7504 = vmatprep.subr.bf16.mxu0 %v7810_v4 }
 0x539   : > { %v1359_v54 = vpack.c.bf16 %v1351_v40, %v1350_v23 }
 0x53a   : > { %7505 = vmatpush3.bf16.msra.mxu0 %v7810_v4 }
 0x53b   : > { %7489 = vmatmul.mubr.bf16.gmra.mrb[44].mxu0 %v1359_v54  ;;  %7506 = vmatprep.subr.bf16.mxu0 %v7811_v63 }
 0x53e   : > { %7507 = vmatpush3.bf16.msra.mxu0 %v7811_v63 }
 0x5f4   : > { %v7478_v49 = vpop.f32.mrb[32].mxu0 }
 0x5f5   : > { %v1402_v11 = vpop.f32.mrb[33].mxu0 }
 0x5f6   : > { %v7479_v34 = vpop.f32.mrb[34].mxu0 }
 0x5f7   : > { %v1466_v58 = vpack.c.bf16 %v7479_v34, %v7478_v49  ;;  %v1405_v37 = vpop.f32.mrb[35].mxu0 }
 0x5f8   : > { %v1465_v13 = vpack.c.bf16 %v1405_v37, %v1402_v11 }
 0x5fa   : > { %7508 = vmatprep.mubr.bf16.mxu0 %v1465_v13 }
 0x5fb   : > { %7509 = vmatmul.mubr.bf16.vlgmr.msra.gmra.mrb[48].mxu0 %v1466_v58 }
 0x5fe   : > { %v7482_v31 = vpop.f32.mrb[36].mxu0 }
 0x5ff   : > { %v1418_v43 = vpop.f32.mrb[37].mxu0 }
 0x600   : > { %v7483_v53 = vpop.f32.mrb[38].mxu0 }
 0x601   : > { %v1468_v5 = vpack.c.bf16 %v7483_v53, %v7482_v31  ;;  %v1421_v18 = vpop.f32.mrb[39].mxu0 }
 0x602   : > { %v1467_v35 = vpack.c.bf16 %v1421_v18, %v1418_v43 }
 0x604   : > { %7512 = vmatprep.mubr.bf16.mxu0 %v1467_v35 }
 0x605   : > { %7513 = vmatmul.mubr.bf16.gmra.mrb[52].mxu0 %v1468_v5 }
 0x606   : > { %v7486_v19 = vpop.f32.mrb[40].mxu0 }
 0x607   : > { %v1434_v52 = vpop.f32.mrb[41].mxu0 }
 0x608   : > { %v7487_v45 = vpop.f32.mrb[42].mxu0 }
 0x609   : > { %v1470_v48 = vpack.c.bf16 %v7487_v45, %v7486_v19  ;;  %v1437_v6 = vpop.f32.mrb[43].mxu0  ;;  %v7814_v19 = vld [vmem:[#allocation7 + $0x4] ss:$16 sps:$4 sm:$0xff]   ;;  %v7817_v45 = vld [vmem:[#allocation7 + $0xc] ss:$16 sps:$4 sm:$0xff]  }
 0x60a   : > { %v1469_v20 = vpack.c.bf16 %v1437_v6, %v1434_v52  ;;  %v7815_v52 = vld [vmem:[#allocation7 + $0x8] ss:$16 sps:$4 sm:$0xff]   ;;  %2067 = vmatprep.subr.bf16.mxu1 %v7814_v19  ;;  %2180 = vmatprep.subr.bf16.mxu0 %v7817_v45 }
 0x60b   : > { %2181 = vmatpush1.bf16.msra.mxu0 %v7815_v52  ;;  %v7821_v6 = vld [vmem:[#allocation7 + $0x28] ss:$16 sps:$4 sm:$0xff]  }
 0x60c   : > { %7516 = vmatprep.mubr.bf16.mxu0 %v1469_v20 }
 0x60d   : > { %7517 = vmatmul.mubr.bf16.gmra.mrb[56].mxu0 %v1470_v48  ;;  %v7823_v48 = vld [vmem:[#allocation7 + $0x2c] ss:$16 sps:$4 sm:$0xff]  }
 0x60e   : > { %v7490_v0 = vpop.f32.mrb[44].mxu0  ;;  %2182 = vmatprep.subr.bf16.mxu0 %v7823_v48 }
 0x60f   : > { %v1450_v24 = vpop.f32.mrb[45].mxu0  ;;  %2183 = vmatpush1.bf16.msra.mxu0 %v7821_v6  ;;  %v7826_v6 = vld [vmem:[#allocation7 + $0x44] ss:$16 sps:$4 sm:$0xff]  }
 0x610   : > { %v7491_v10 = vpop.f32.mrb[46].mxu0 }
 0x611   : > { %v1472_v41 = vpack.c.bf16 %v7491_v10, %v7490_v0  ;;  %v1453_v39 = vpop.f32.mrb[47].mxu0 }
 0x612   : > { %v1471_v36 = vpack.c.bf16 %v1453_v39, %v1450_v24 }
 0x614   : > { %7520 = vmatprep.mubr.bf16.mxu0 %v1471_v36 }
 0x615   : > { %7521 = vmatmul.mubr.bf16.gmra.mrb[60].mxu0 %v1472_v41 }
 0x616   : > { %2212 = vmatprep.mubr.bf16.mxu0 %v12149_v62 }
 0x6ce   : > { %v7510_v22 = vpop.f32.mrb[48].mxu0 }
 0x6cf   : > { %v1571_v4 = vpop.f32.mrb[49].mxu0  ;;  %v9419_v54 = vadd.f32 %v7510_v22, %v9011_v16 }
 0x6d0   : > { %v9412_v56 = vadd.f32 %v1571_v4, %v9007_v14  ;;  %v7511_v51 = vpop.f32.mrb[50].mxu0 }
 0x6d1   : > { %v1574_v23 = vpop.f32.mrb[51].mxu0  ;;  %v9423_v63 = vadd.f32 %v7511_v51, %v9005_v12 }
 0x6d2   : > { %v9415_v40 = vadd.f32 %v1574_v23, %v9009_v15  ;;  %1650 = vadd.xlane.f32.xlu1 %v9412_v56 }
 0x6d4   : > { %1652 = vadd.xlane.f32.xlu0 %v9415_v40 }
 0x6d6   : > { %1654 = vadd.xlane.f32.xlu1 %v9419_v54 }
 0x6d8   : > { %v7514_v49 = vpop.f32.mrb[52].mxu0  ;;  %1656 = vadd.xlane.f32.xlu0 %v9423_v63 }
 0x6d9   : > { %v1587_v14 = vpop.f32.mrb[53].mxu0  ;;  %v9435_v16 = vadd.f32 %v7514_v49, %v9036_v30 }
 0x6da   : > { %v9428_v11 = vadd.f32 %v1587_v14, %v9032_v28  ;;  %v7515_v15 = vpop.f32.mrb[54].mxu0 }
 0x6db   : > { %v1590_v34 = vpop.f32.mrb[55].mxu0  ;;  %v9439_v12 = vadd.f32 %v7515_v15, %v9030_v26 }
 0x6dc   : > { %v9431_v58 = vadd.f32 %v1590_v34, %v9034_v29  ;;  %1658 = vadd.xlane.f32.xlu1 %v9428_v11 }
 0x6de   : > { %1660 = vadd.xlane.f32.xlu0 %v9431_v58 }
 0x6e0   : > { %1662 = vadd.xlane.f32.xlu1 %v9435_v16  ;;  %v7518_v37 = vpop.f32.mrb[56].mxu0 }
 0x6e1   : > { %v1603_v28 = vpop.f32.mrb[57].mxu0  ;;  %v9451_v30 = vadd.f32 %v7518_v37, %v9061_v47 }
 0x6e2   : > { %v9443_v13 = vadd.f32 %v1603_v28, %v9057_v44  ;;  %1664 = vadd.xlane.f32.xlu0 %v9439_v12  ;;  %v7519_v29 = vpop.f32.mrb[58].mxu0 }
 0x6e3   : > { %v1606_v31 = vpop.f32.mrb[59].mxu0  ;;  %v9455_v26 = vadd.f32 %v7519_v29, %v9055_v42 }
 0x6e4   : > { %v9447_v43 = vadd.f32 %v1606_v31, %v9059_v46  ;;  %1666 = vadd.xlane.f32.xlu1 %v9443_v13 }
 0x6e6   : > { %1668 = vadd.xlane.f32.xlu0 %v9447_v43 }
 0x6e8   : > { %1670 = vadd.xlane.f32.xlu1 %v9451_v30  ;;  %v7522_v44 = vpop.f32.mrb[60].mxu0 }
 0x6e9   : > { %v1619_v53 = vpop.f32.mrb[61].mxu0  ;;  %v9467_v47 = vadd.f32 %v7522_v44, %v9086_v61  ;;  %v7818_v61 = vld [vmem:[#allocation7 + $0x20] ss:$16 sps:$4 sm:$0xff]  }
 0x6ea   : > { %v9459_v5 = vadd.f32 %v1619_v53, %v9082_v59  ;;  %1672 = vadd.xlane.f32.xlu0 %v9455_v26  ;;  %v7523_v46 = vpop.f32.mrb[62].mxu0  ;;  %v7812_v59 = vld [vmem:[#allocation7] ss:$16 sps:$4 sm:$0xff]  }
 0x6eb   : > { %v1622_v18 = vpop.f32.mrb[63].mxu0  ;;  %v9471_v42 = vadd.f32 %v7523_v46, %v9080_v57  ;;  %2068 = vmatpush1.bf16.msra.mxu1 %v7812_v59 }
 0x6ec   : > { %v9463_v35 = vadd.f32 %v1622_v18, %v9084_v60  ;;  %1674 = vadd.xlane.f32.xlu1 %v9459_v5  ;;  %v7820_v60 = vld [vmem:[#allocation7 + $0x24] ss:$16 sps:$4 sm:$0xff]  }
 0x6ed   : > { %2069 = vmatprep.subr.bf16.mxu1 %v7820_v60 }
 0x6ee   : > { %1676 = vadd.xlane.f32.xlu0 %v9463_v35 }
 0x6ef   : > { %2070 = vmatpush1.bf16.msra.mxu1 %v7818_v61 }
 0x6f0   : > { %1678 = vadd.xlane.f32.xlu1 %v9467_v47  ;;  %2071 = vmatprep.subr.bf16.mxu1 %v7826_v6  ;;  %v7847_v6 = vld [vmem:[#allocation7 + $0xac] ss:$16 sps:$4 sm:$0xff]  }
 0x6f2   : > { %1680 = vadd.xlane.f32.xlu0 %v9471_v42 }
 0x75f   : > { %v1651_v57 = vpop.xlane.xlu1 %1650 }
 0x760   : > { %v1683_v20 = vmul.f32 0.0078125, %v1651_v57  ;;  %v7829_v57 = vld [vmem:[#allocation7 + $0x4c] ss:$16 sps:$4 sm:$0xff]  }
 0x761   : > { %v1653_v0 = vpop.xlane.xlu0 %1652  ;;  %2184 = vmatprep.subr.bf16.mxu0 %v7829_v57 }
 0x762   : > { %v1684_v24 = vmul.f32 0.0078125, %v1653_v0  ;;  %v9476_v10 = vsub.f32 %v9412_v56, %v1683_v20 }
 0x763   : > { %v1655_v41 = vpop.xlane.xlu1 %1654 }
 0x764   : > { %v1685_v39 = vmul.f32 0.0078125, %v1655_v41  ;;  %v1715_v36 = vmul.f32 %v9476_v10, %v9476_v10  ;;  %v9481_v22 = vsub.f32 %v9415_v40, %v1684_v24  ;;  %v7824_v24 = vld [vmem:[#allocation7 + $0x40] ss:$16 sps:$4 sm:$0xff]   ;;  %v7827_v41 = vld [vmem:[#allocation7 + $0x48] ss:$16 sps:$4 sm:$0xff]  }
 0x765   : > { %v1657_v4 = vpop.xlane.xlu0 %1656  ;;  %2072 = vmatpush1.bf16.msra.mxu1 %v7824_v24  ;;  %2185 = vmatpush1.bf16.msra.mxu0 %v7827_v41  ;;  %v7850_v24 = vld [vmem:[#allocation7 + $0xc4] ss:$16 sps:$4 sm:$0xff]   ;;  %v7853_v41 = vld [vmem:[#allocation7 + $0xcc] ss:$16 sps:$4 sm:$0xff]  }
 0x766   : > { %v1686_v51 = vmul.f32 0.0078125, %v1657_v4  ;;  %1731 = vadd.xlane.f32.xlu1 %v1715_v36  ;;  %v1716_v23 = vmul.f32 %v9481_v22, %v9481_v22  ;;  %v9486_v49 = vsub.f32 %v9419_v54, %v1685_v39 }
 0x768   : > { %1733 = vadd.xlane.f32.xlu0 %v1716_v23  ;;  %v1717_v56 = vmul.f32 %v9486_v49, %v9486_v49  ;;  %v9491_v14 = vsub.f32 %v9423_v63, %v1686_v51  ;;  %v7832_v23 = vld [vmem:[#allocation7 + $0x64] ss:$16 sps:$4 sm:$0xff]  }
 0x769   : > { %v1659_v15 = vpop.xlane.xlu1 %1658  ;;  %2073 = vmatprep.subr.bf16.mxu1 %v7832_v23  ;;  %v7857_v23 = vld [vmem:[#allocation7 + $0xe8] ss:$16 sps:$4 sm:$0xff]  }
 0x76a   : > { %v1687_v34 = vmul.f32 0.0078125, %v1659_v15  ;;  %1735 = vadd.xlane.f32.xlu1 %v1717_v56  ;;  %v1718_v40 = vmul.f32 %v9491_v14, %v9491_v14  ;;  %v7835_v56 = vld [vmem:[#allocation7 + $0x6c] ss:$16 sps:$4 sm:$0xff]  }
 0x76b   : > { %v1661_v37 = vpop.xlane.xlu0 %1660  ;;  %2186 = vmatprep.subr.bf16.mxu0 %v7835_v56  ;;  %v7860_v56 = vld [vmem:[#allocation8 + $0x40] sm:$0xff]  }
 0x76c   : > { %v1688_v28 = vmul.f32 0.0078125, %v1661_v37  ;;  %1737 = vadd.xlane.f32.xlu0 %v1718_v40  ;;  %v9496_v29 = vsub.f32 %v9428_v11, %v1687_v34  ;;  %v7830_v40 = vld [vmem:[#allocation7 + $0x60] ss:$16 sps:$4 sm:$0xff]   ;;  %v7833_v37 = vld [vmem:[#allocation7 + $0x68] ss:$16 sps:$4 sm:$0xff]  }
 0x76d   : > { %v1663_v54 = vpop.xlane.xlu1 %1662  ;;  %2074 = vmatpush1.bf16.msra.mxu1 %v7830_v40  ;;  %2187 = vmatpush1.bf16.msra.mxu0 %v7833_v37 }
 0x76e   : > { %v1689_v31 = vmul.f32 0.0078125, %v1663_v54  ;;  %v1719_v44 = vmul.f32 %v9496_v29, %v9496_v29  ;;  %v9501_v63 = vsub.f32 %v9431_v58, %v1688_v28 }
 0x76f   : > { %v1665_v53 = vpop.xlane.xlu0 %1664 }
 0x770   : > { %v1690_v46 = vmul.f32 0.0078125, %v1665_v53  ;;  %1739 = vadd.xlane.f32.xlu1 %v1719_v44  ;;  %v1720_v18 = vmul.f32 %v9501_v63, %v9501_v63  ;;  %v9506_v59 = vsub.f32 %v9435_v16, %v1689_v31  ;;  %v7838_v53 = vld [vmem:[#allocation7 + $0x84] ss:$16 sps:$4 sm:$0xff]  }
 0x771   : > { %v1667_v19 = vpop.xlane.xlu1 %1666  ;;  %2075 = vmatprep.subr.bf16.mxu1 %v7838_v53 }
 0x772   : > { %v1691_v11 = vmul.f32 0.0078125, %v1667_v19  ;;  %1741 = vadd.xlane.f32.xlu0 %v1720_v18  ;;  %v1721_v52 = vmul.f32 %v9506_v59, %v9506_v59  ;;  %v9511_v45 = vsub.f32 %v9439_v12, %v1690_v46  ;;  %v7841_v46 = vld [vmem:[#allocation7 + $0x8c] ss:$16 sps:$4 sm:$0xff]  }
 0x773   : > { %v1669_v58 = vpop.xlane.xlu0 %1668  ;;  %2188 = vmatprep.subr.bf16.mxu0 %v7841_v46 }
 0x774   : > { %v1692_v60 = vmul.f32 0.0078125, %v1669_v58  ;;  %1743 = vadd.xlane.f32.xlu1 %v1721_v52  ;;  %v1722_v48 = vmul.f32 %v9511_v45, %v9511_v45  ;;  %v9516_v61 = vsub.f32 %v9443_v13, %v1691_v11  ;;  %v7836_v11 = vld [vmem:[#allocation7 + $0x80] ss:$16 sps:$4 sm:$0xff]   ;;  %v7839_v52 = vld [vmem:[#allocation7 + $0x88] ss:$16 sps:$4 sm:$0xff]  }
 0x775   : > { %v1671_v16 = vpop.xlane.xlu1 %1670  ;;  %2076 = vmatpush1.bf16.msra.mxu1 %v7836_v11  ;;  %2189 = vmatpush1.bf16.msra.mxu0 %v7839_v52  ;;  %v1829_v52 = vsub.s32 0, %v9116_v50 }
 0x776   : > { %v1693_v20 = vmul.f32 0.0078125, %v1671_v16  ;;  %1745 = vadd.xlane.f32.xlu0 %v1722_v48  ;;  %v1723_v0 = vmul.f32 %v9516_v61, %v9516_v61  ;;  %v9521_v12 = vsub.f32 %v9447_v43, %v1692_v60  ;;  %v7844_v16 = vld [vmem:[#allocation7 + $0xa4] ss:$16 sps:$4 sm:$0xff]   ;;  %2190 = vmatprep.subr.bf16.mxu0 %v7847_v6 }
 0x777   : > { %v1673_v39 = vpop.xlane.xlu0 %1672  ;;  %2077 = vmatprep.subr.bf16.mxu1 %v7844_v16 }
 0x778   : > { %v1694_v36 = vmul.f32 0.0078125, %v1673_v39  ;;  %1747 = vadd.xlane.f32.xlu1 %v1723_v0  ;;  %v1724_v13 = vmul.f32 %v9521_v12, %v9521_v12  ;;  %v9526_v4 = vsub.f32 %v9451_v30, %v1693_v20  ;;  %v7842_v20 = vld [vmem:[#allocation7 + $0xa0] ss:$16 sps:$4 sm:$0xff]   ;;  %v7845_v0 = vld [vmem:[#allocation7 + $0xa8] ss:$16 sps:$4 sm:$0xff]  }
 0x779   : > { %v1675_v51 = vpop.xlane.xlu1 %1674  ;;  %2078 = vmatpush1.bf16.msra.mxu1 %v7842_v20  ;;  %2191 = vmatpush1.bf16.msra.mxu0 %v7845_v0  ;;  %v7848_v39 = vld [vmem:[#allocation7 + $0xc0] ss:$16 sps:$4 sm:$0xff]  }
 0x77a   : > { %v1695_v43 = vmul.f32 0.0078125, %v1675_v51  ;;  %1749 = vadd.xlane.f32.xlu0 %v1724_v13  ;;  %v1725_v15 = vmul.f32 %v9526_v4, %v9526_v4  ;;  %v9531_v34 = vsub.f32 %v9455_v26, %v1694_v36  ;;  %v7851_v36 = vld [vmem:[#allocation7 + $0xc8] ss:$16 sps:$4 sm:$0xff]   ;;  %2079 = vmatprep.subr.bf16.mxu1 %v7850_v24  ;;  %v7859_v13 = vld [vmem:[#allocation7 + $0xec] ss:$16 sps:$4 sm:$0xff]  }
 0x77b   : > { %v1677_v28 = vpop.xlane.xlu0 %1676  ;;  %2192 = vmatprep.subr.bf16.mxu0 %v7853_v41  ;;  %v7854_v51 = vld [vmem:[#allocation7 + $0xe0] ss:$16 sps:$4 sm:$0xff]  }
 0x77c   : > { %v1696_v30 = vmul.f32 0.0078125, %v1677_v28  ;;  %1751 = vadd.xlane.f32.xlu1 %v1725_v15  ;;  %v1726_v54 = vmul.f32 %v9531_v34, %v9531_v34  ;;  %v9536_v31 = vsub.f32 %v9459_v5, %v1695_v43  ;;  %v7861_v43 = vld [vmem:[#allocation8 + $0xc0] sm:$0xff]  }
 0x77d   : > { %v1679_v44 = vpop.xlane.xlu1 %1678  ;;  %2080 = vmatpush1.bf16.msra.mxu1 %v7848_v39  ;;  %2193 = vmatpush1.bf16.msra.mxu0 %v7851_v36 }
 0x77e   : > { %v1697_v26 = vmul.f32 0.0078125, %v1679_v44  ;;  %1753 = vadd.xlane.f32.xlu0 %v1726_v54  ;;  %v1727_v18 = vmul.f32 %v9536_v31, %v9536_v31  ;;  %v9541_v19 = vsub.f32 %v9463_v35, %v1696_v30  ;;  %2194 = vmatprep.subr.bf16.mxu0 %v7859_v13 }
 0x77f   : > { %v1681_v58 = vpop.xlane.xlu0 %1680 }
 0x780   : > { %v1698_v5 = vmul.f32 0.0078125, %v1681_v58  ;;  %1755 = vadd.xlane.f32.xlu1 %v1727_v18  ;;  %v1728_v60 = vmul.f32 %v9541_v19, %v9541_v19  ;;  %v9546_v48 = vsub.f32 %v9467_v47, %v1697_v26 }
 0x781   : > { %2195 = vmatpush1.bf16.msra.mxu0 %v7857_v23 }
 0x782   : > { %1757 = vadd.xlane.f32.xlu0 %v1728_v60  ;;  %v1729_v35 = vmul.f32 %v9546_v48, %v9546_v48  ;;  %v9551_v57 = vsub.f32 %v9471_v42, %v1698_v5  ;;  %v7856_v42 = vld [vmem:[#allocation7 + $0xe4] ss:$16 sps:$4 sm:$0xff]   ;;  %7098 = vmatprep.subr.bf16.mxu0 %v7861_v43  ;;  %v700_v5 = vld [vmem:[%s11923_s7] sm:$0xff] }
 0x783   : > { %2081 = vmatprep.subr.bf16.mxu1 %v7856_v42  ;;  %v9559_v20 = vrot.slane %v700_v5, %v1829_v52  ;;  %v7862_v52 = vld [vmem:[#allocation8] sm:$0xff]  }
 0x784   : > { %1759 = vadd.xlane.f32.xlu1 %v1729_v35  ;;  %v1730_v47 = vmul.f32 %v9551_v57, %v9551_v57  ;;  %2082 = vmatpush1.bf16.msra.mxu1 %v7854_v51 }
 0x785   : > { %7034 = vmatprep.subr.bf16.mxu1 %v7860_v56 }
 0x786   : > { %1761 = vadd.xlane.f32.xlu0 %v1730_v47  ;;  %v1849_v47 = vsub.s32 1, %v9116_v50 }
 0x788   : > { %v9565_v43 = vrot.slane %v700_v5, %v1849_v47 }
 0x7f3   : > { %v1732_v15 = vpop.xlane.xlu1 %1731 }
 0x7f4   : > { %v1763_v40 = vmul.f32 0.0078125, %v1732_v15 }
 0x7f5   : > { %v1734_v37 = vpop.xlane.xlu0 %1733 }
 0x7f6   : > { %v1779_v28 = vadd.f32 1e-12, %v1763_v40  ;;  %v1764_v30 = vmul.f32 0.0078125, %v1734_v37 }
 0x7f7   : > { %v1736_v54 = vpop.xlane.xlu1 %1735 }
 0x7f8   : > { %8076 = vrsqrt.f32 %v1779_v28  ;;  %v1780_v44 = vadd.f32 1e-12, %v1764_v30  ;;  %v1765_v53 = vmul.f32 0.0078125, %v1736_v54 }
 0x7f9   : > { %v1738_v46 = vpop.xlane.xlu0 %1737 }
 0x7fa   : > { %8078 = vrsqrt.f32 %v1780_v44  ;;  %v1781_v26 = vadd.f32 1e-12, %v1765_v53  ;;  %v1766_v18 = vmul.f32 0.0078125, %v1738_v46 }
 0x7fc   : > { %8080 = vrsqrt.f32 %v1781_v26  ;;  %v1782_v11 = vadd.f32 1e-12, %v1766_v18 }
 0x7fd   : > { %v1740_v58 = vpop.xlane.xlu1 %1739 }
 0x7fe   : > { %8082 = vrsqrt.f32 %v1782_v11  ;;  %v1767_v60 = vmul.f32 0.0078125, %v1740_v58  ;;  %v7863_v58 = vld [vmem:[#allocation8 + $0x80] sm:$0xff]  }
 0x7ff   : > { %v1742_v16 = vpop.xlane.xlu0 %1741 }
 0x800   : > { %v1783_v6 = vadd.f32 1e-12, %v1767_v60  ;;  %v1768_v35 = vmul.f32 0.0078125, %v1742_v16  ;;  %v7864_v60 = vld [vmem:[#allocation8 + $0x48] sm:$0xff]  }
 0x801   : > { %v1744_v0 = vpop.xlane.xlu1 %1743  ;;  %v7865_v16 = vld [vmem:[#allocation8 + $0xc8] sm:$0xff]  }
 0x802   : > { %v8077_v24 = vpop.eup %8076  ;;  %v1784_v41 = vadd.f32 1e-12, %v1768_v35  ;;  %8084 = vrsqrt.f32 %v1783_v6  ;;  %v1769_v13 = vmul.f32 0.0078125, %v1744_v0 }
 0x803   : > { %v1811_v39 = vmul.f32 %v8077_v24, %v9476_v10  ;;  %v1746_v36 = vpop.xlane.xlu0 %1745 }
 0x804   : > { %v8079_v42 = vpop.eup %8078  ;;  %8086 = vrsqrt.f32 %v1784_v41  ;;  %v1770_v51 = vmul.f32 0.0078125, %v1746_v36  ;;  %v1785_v54 = vadd.f32 1e-12, %v1769_v13  ;;  %v7866_v41 = vld [vmem:[#allocation8 + $0x8] sm:$0xff]   ;;  %v7869_v13 = vld [vmem:[#allocation8 + $0xd0] sm:$0xff]  }
 0x805   : > { %v1831_v23 = vmul.f32 %v9559_v20, %v1811_v39  ;;  %v1812_v56 = vmul.f32 %v8079_v42, %v9481_v22  ;;  %v1748_v10 = vpop.xlane.xlu1 %1747  ;;  %v7867_v39 = vld [vmem:[#allocation8 + $0x88] sm:$0xff]   ;;  %v7868_v42 = vld [vmem:[#allocation8 + $0x50] sm:$0xff]  }
 0x806   : > { %v8081_v15 = vpop.eup %8080  ;;  %v1786_v40 = vadd.f32 1e-12, %v1770_v51  ;;  %v1771_v5 = vmul.f32 0.0078125, %v1748_v10  ;;  %v7872_v10 = vld [vmem:[#allocation8 + $0x58] sm:$0xff]  }
 0x807   : > { %v1832_v37 = vmul.f32 %v9559_v20, %v1812_v56  ;;  %v1750_v28 = vpop.xlane.xlu0 %1749  ;;  %v9569_v44 = vadd.f32 %v9565_v43, %v1831_v23  ;;  %v1813_v46 = vmul.f32 %v8081_v15, %v9486_v49 }
 0x808   : > { %v8083_v30 = vpop.eup %8082  ;;  %8088 = vrsqrt.f32 %v1786_v40  ;;  %v1772_v26 = vmul.f32 0.0078125, %v1750_v28  ;;  %v1787_v36 = vadd.f32 1e-12, %v1771_v5  ;;  %v7871_v28 = vld [vmem:[#allocation8 + $0x90] sm:$0xff]   ;;  %v7875_v5 = vld [vmem:[#allocation8 + $0x98] sm:$0xff]  }
 0x809   : > { %12150 = vst [vmem:[#allocation40_spill] sm:$0xff] %v9569_v44  ;;  %v9572_v53 = vadd.f32 %v9565_v43, %v1832_v37  ;;  %v1814_v22 = vmul.f32 %v8083_v30, %v9491_v14  ;;  %8090 = vrsqrt.f32 %v1785_v54  ;;  %v1833_v49 = vmul.f32 %v9559_v20, %v1813_v46  ;;  %v1752_v51 = vpop.xlane.xlu1 %1751  ;;  %v7870_v37 = vld [vmem:[#allocation8 + $0x10] sm:$0xff]   ;;  %v7873_v46 = vld [vmem:[#allocation8 + $0xd8] sm:$0xff]  }
 0x80a   : > { %v1788_v14 = vadd.f32 1e-12, %v1772_v26  ;;  %v1773_v54 = vmul.f32 0.0078125, %v1752_v51 }
 0x80b   : > { %12151 = vst [vmem:[#allocation41_spill] sm:$0xff] %v9572_v53  ;;  %v1867_v18 = vpack.c.bf16 %v9572_v53, %v9569_v44  ;;  %v1834_v11 = vmul.f32 %v9559_v20, %v1814_v22  ;;  %v1754_v0 = vpop.xlane.xlu0 %1753  ;;  %v9587_v23 = vadd.f32 %v9565_v43, %v1833_v49 }
 0x80c   : > { %v8085_v6 = vpop.eup %8084  ;;  %8092 = vrsqrt.f32 %v1788_v14  ;;  %v1774_v15 = vmul.f32 0.0078125, %v1754_v0 }
 0x80d   : > { %2100 = vmatmul.mubr.bf16.vlgmr.msra.gmra.mrb[48].mxu1 %v1867_v18  ;;  %2213 = vmatmul.mubr.bf16.vlgmr.msra.gmra.mrb[64].mxu0 %v1867_v18  ;;  %v9583_v47 = vadd.f32 %v9565_v43, %v1834_v11  ;;  %12153 = vst [vmem:[#allocation43_spill] sm:$0xff] %v9587_v23  ;;  %v1815_v56 = vmul.f32 %v8085_v6, %v9496_v29  ;;  %8094 = vrsqrt.f32 %v1787_v36 }
 0x80e   : > { %v8087_v35 = vpop.eup %8086  ;;  %2109 = vmatprep.mubr.bf16.mxu1 %v12149_v62  ;;  %2222 = vmatprep.mubr.bf16.mxu0 %v12149_v62  ;;  %v1790_v26 = vadd.f32 1e-12, %v1774_v15 }
 0x80f   : > { %12152 = vst [vmem:[#allocation42_spill] sm:$0xff] %v9583_v47  ;;  %v1816_v24 = vmul.f32 %v8087_v35, %v9501_v63  ;;  %7035 = vmatpush3.bf16.msra.mxu1 %v7862_v52  ;;  %7099 = vmatpush3.bf16.msra.mxu0 %v7863_v58  ;;  %v1868_v63 = vpack.c.bf16 %v9583_v47, %v9587_v23  ;;  %v1758_v18 = vpop.xlane.xlu0 %1757  ;;  %v7874_v58 = vld [vmem:[#allocation8 + $0x18] sm:$0xff]  }
 0x810   : > { %7036 = vmatprep.subr.bf16.mxu1 %v7864_v60  ;;  %7100 = vmatprep.subr.bf16.mxu0 %v7865_v16  ;;  %v1835_v29 = vmul.f32 %v9559_v20, %v1815_v56  ;;  %v1789_v60 = vadd.f32 1e-12, %v1773_v54  ;;  %v1756_v16 = vpop.xlane.xlu1 %1755  ;;  %8096 = vrsqrt.f32 %v1790_v26  ;;  %v1776_v35 = vmul.f32 0.0078125, %v1758_v18 }
 0x811   : > { %v1836_v40 = vmul.f32 %v9559_v20, %v1816_v24  ;;  %v1775_v24 = vmul.f32 0.0078125, %v1756_v16 }
 0x812   : > { %v8089_v30 = vpop.eup %8088  ;;  %v9601_v6 = vadd.f32 %v9565_v43, %v1835_v29  ;;  %8098 = vrsqrt.f32 %v1789_v60  ;;  %v1792_v36 = vadd.f32 1e-12, %v1776_v35 }
 0x813   : > { %7037 = vmatpush3.bf16.msra.mxu1 %v7866_v41  ;;  %7101 = vmatpush3.bf16.msra.mxu0 %v7867_v39  ;;  %v8091_v22 = vpop.eup %8090  ;;  %v9597_v11 = vadd.f32 %v9565_v43, %v1836_v40  ;;  %v1818_v52 = vmul.f32 %v8089_v30, %v9511_v45  ;;  %v1791_v51 = vadd.f32 1e-12, %v1775_v24 }
 0x814   : > { %7038 = vmatprep.subr.bf16.mxu1 %v7868_v42  ;;  %7102 = vmatprep.subr.bf16.mxu0 %v7869_v13  ;;  %12155 = vst [vmem:[#allocation45_spill] sm:$0xff] %v9601_v6  ;;  %v1817_v49 = vmul.f32 %v8091_v22, %v9506_v59  ;;  %v1762_v59 = vpop.xlane.xlu0 %1761  ;;  %v1760_v56 = vpop.xlane.xlu1 %1759  ;;  %8100 = vrsqrt.f32 %v1792_v36 }
 0x815   : > { %2110 = vmatmul.mubr.bf16.gmra.mrb[52].mxu1 %v1868_v63  ;;  %2223 = vmatmul.mubr.bf16.gmra.mrb[68].mxu0 %v1868_v63  ;;  %12154 = vst [vmem:[#allocation44_spill] sm:$0xff] %v9597_v11  ;;  %v1869_v14 = vpack.c.bf16 %v9597_v11, %v9601_v6  ;;  %v1838_v45 = vmul.f32 %v9559_v20, %v1818_v52  ;;  %v1778_v40 = vmul.f32 0.0078125, %v1762_v59  ;;  %8102 = vrsqrt.f32 %v1791_v51 }
 0x816   : > { %2119 = vmatprep.mubr.bf16.mxu1 %v12149_v62  ;;  %2232 = vmatprep.mubr.bf16.mxu0 %v12149_v62  ;;  %v8093_v0 = vpop.eup %8092  ;;  %v1837_v41 = vmul.f32 %v9559_v20, %v1817_v49  ;;  %v1777_v54 = vmul.f32 0.0078125, %v1760_v56 }
 0x817   : > { %7039 = vmatpush3.bf16.msra.mxu1 %v7870_v37  ;;  %7103 = vmatpush3.bf16.msra.mxu0 %v7871_v28  ;;  %v8095_v39 = vpop.eup %8094  ;;  %v9611_v42 = vadd.f32 %v9565_v43, %v1838_v45  ;;  %v1820_v13 = vmul.f32 %v8093_v0, %v9521_v12 }
 0x818   : > { %7040 = vmatprep.subr.bf16.mxu1 %v7872_v10  ;;  %7104 = vmatprep.subr.bf16.mxu0 %v7873_v46  ;;  %v9615_v15 = vadd.f32 %v9565_v43, %v1837_v41  ;;  %v1819_v63 = vmul.f32 %v8095_v39, %v9516_v61  ;;  %v1794_v46 = vadd.f32 1e-12, %v1778_v40  ;;  %v1793_v22 = vadd.f32 1e-12, %v1777_v54  ;;  %v7877_v40 = vld [vmem:[#allocation8 + $0xe0] sm:$0xff]   ;;  %v7882_v54 = vld [vmem:[#allocation8 + $0x28] sm:$0xff]  }
 0x819   : > { %12156 = vst [vmem:[#allocation46_spill] sm:$0xff] %v9611_v42  ;;  %v1840_v28 = vmul.f32 %v9559_v20, %v1820_v13 }
 0x81a   : > { %12157 = vst [vmem:[#allocation47_spill] sm:$0xff] %v9615_v15  ;;  %v1870_v37 = vpack.c.bf16 %v9611_v42, %v9615_v15  ;;  %v8097_v30 = vpop.eup %8096  ;;  %v1839_v12 = vmul.f32 %v9559_v20, %v1819_v63  ;;  %8104 = vrsqrt.f32 %v1794_v46  ;;  %v7876_v63 = vld [vmem:[#allocation8 + $0x60] sm:$0xff]   ;;  %v7886_v46 = vld [vmem:[#allocation8 + $0x30] sm:$0xff]  }
 0x81b   : > { %7041 = vmatpush3.bf16.msra.mxu1 %v7874_v58  ;;  %7105 = vmatpush3.bf16.msra.mxu0 %v7875_v5  ;;  %v9625_v61 = vadd.f32 %v9565_v43, %v1840_v28  ;;  %v1822_v29 = vmul.f32 %v8097_v30, %v9531_v34  ;;  %8106 = vrsqrt.f32 %v1793_v22  ;;  %v7879_v28 = vld [vmem:[#allocation8 + $0xa0] sm:$0xff]   ;;  %v7881_v30 = vld [vmem:[#allocation8 + $0xe8] sm:$0xff]   ;;  %v7888_v22 = vld [vmem:[#allocation8 + $0x78] sm:$0xff]  }
 0x81c   : > { %v8099_v10 = vpop.eup %8098  ;;  %v9629_v26 = vadd.f32 %v9565_v43, %v1839_v12  ;;  %7042 = vmatprep.subr.bf16.mxu1 %v7876_v63  ;;  %7106 = vmatprep.subr.bf16.mxu0 %v7877_v40  ;;  %v7883_v12 = vld [vmem:[#allocation8 + $0xa8] sm:$0xff]  }
 0x81d   : > { %2120 = vmatmul.mubr.bf16.gmra.mrb[56].mxu1 %v1869_v14  ;;  %2233 = vmatmul.mubr.bf16.gmra.mrb[72].mxu0 %v1869_v14  ;;  %12158 = vst [vmem:[#allocation48_spill] sm:$0xff] %v9625_v61  ;;  %v1821_v18 = vmul.f32 %v8099_v10, %v9526_v4  ;;  %v1842_v58 = vmul.f32 %v9559_v20, %v1822_v29  ;;  %v7885_v10 = vld [vmem:[#allocation8 + $0xf0] sm:$0xff]  }
 0x81e   : > { %2129 = vmatprep.mubr.bf16.mxu1 %v12149_v62  ;;  %2242 = vmatprep.mubr.bf16.mxu0 %v12149_v62  ;;  %12159 = vst [vmem:[#allocation49_spill] sm:$0xff] %v9629_v26  ;;  %v1871_v52 = vpack.c.bf16 %v9625_v61, %v9629_v26  ;;  %v8101_v5 = vpop.eup %8100  ;;  %v7887_v29 = vld [vmem:[#allocation8 + $0xb0] sm:$0xff]  }
 0x81f   : > { %v1841_v60 = vmul.f32 %v9559_v20, %v1821_v18  ;;  %v8103_v16 = vpop.eup %8102  ;;  %v9639_v34 = vadd.f32 %v9565_v43, %v1842_v58  ;;  %v1824_v4 = vmul.f32 %v8101_v5, %v9541_v19  ;;  %7107 = vmatpush3.bf16.msra.mxu0 %v7879_v28  ;;  %v7889_v18 = vld [vmem:[#allocation8 + $0xf8] sm:$0xff]  }
 0x820   : > { %v1823_v35 = vmul.f32 %v8103_v16, %v9536_v31  ;;  %7108 = vmatprep.subr.bf16.mxu0 %v7881_v30  ;;  %v7891_v58 = vld [vmem:[#allocation8 + $0xb8] sm:$0xff]  }
 0x821   : > { %12160 = vst [vmem:[#allocation50_spill] sm:$0xff] %v9639_v34  ;;  %v9643_v49 = vadd.f32 %v9565_v43, %v1841_v60  ;;  %v1844_v45 = vmul.f32 %v9559_v20, %v1824_v4 }
 0x822   : > { %v1843_v24 = vmul.f32 %v9559_v20, %v1823_v35 }
 0x823   : > { %12161 = vst [vmem:[#allocation51_spill] sm:$0xff] %v9643_v49  ;;  %v1872_v14 = vpack.c.bf16 %v9639_v34, %v9643_v49  ;;  %v9653_v19 = vadd.f32 %v9565_v43, %v1844_v45  ;;  %7109 = vmatpush3.bf16.msra.mxu0 %v7883_v12 }
 0x824   : > { %v8105_v0 = vpop.eup %8104  ;;  %v9657_v39 = vadd.f32 %v9565_v43, %v1843_v24  ;;  %7110 = vmatprep.subr.bf16.mxu0 %v7885_v10 }
 0x825   : > { %2130 = vmatmul.mubr.bf16.gmra.mrb[60].mxu1 %v1870_v37  ;;  %2243 = vmatmul.mubr.bf16.gmra.mrb[76].mxu0 %v1870_v37  ;;  %v8107_v41 = vpop.eup %8106  ;;  %12162 = vst [vmem:[#allocation52_spill] sm:$0xff] %v9653_v19  ;;  %v1826_v31 = vmul.f32 %v8105_v0, %v9551_v57  ;;  %v7878_v37 = vld [vmem:[#allocation8 + $0x20] sm:$0xff]  }
 0x826   : > { %2139 = vmatprep.mubr.bf16.mxu1 %v12149_v62  ;;  %2252 = vmatprep.mubr.bf16.mxu0 %v12149_v62  ;;  %12163 = vst [vmem:[#allocation53_spill] sm:$0xff] %v9657_v39  ;;  %v1825_v36 = vmul.f32 %v8107_v41, %v9546_v48  ;;  %v1873_v59 = vpack.c.bf16 %v9653_v19, %v9657_v39 }
 0x827   : > { %v1846_v13 = vmul.f32 %v9559_v20, %v1826_v31  ;;  %7043 = vmatpush3.bf16.msra.mxu1 %v7878_v37  ;;  %7111 = vmatpush3.bf16.msra.mxu0 %v7887_v29 }
 0x828   : > { %v1845_v51 = vmul.f32 %v9559_v20, %v1825_v36  ;;  %v7880_v20 = vld [vmem:[#allocation8 + $0x68] sm:$0xff]   ;;  %7112 = vmatprep.subr.bf16.mxu0 %v7889_v18 }
 0x829   : > { %v9667_v57 = vadd.f32 %v9565_v43, %v1846_v13  ;;  %7044 = vmatprep.subr.bf16.mxu1 %v7880_v20 }
 0x82a   : > { %v9670_v56 = vadd.f32 %v9565_v43, %v1845_v51  ;;  %v7884_v43 = vld [vmem:[#allocation8 + $0x70] sm:$0xff]  }
 0x82b   : > { %12164 = vst [vmem:[#allocation54_spill] sm:$0xff] %v9667_v57  ;;  %7045 = vmatpush3.bf16.msra.mxu1 %v7882_v54  ;;  %7113 = vmatpush3.bf16.msra.mxu0 %v7891_v58 }
 0x82c   : > { %12165 = vst [vmem:[#allocation55_spill] sm:$0xff] %v9670_v56  ;;  %v1874_v48 = vpack.c.bf16 %v9667_v57, %v9670_v56  ;;  %7046 = vmatprep.subr.bf16.mxu1 %v7884_v43 }
 0x82d   : > { %2140 = vmatmul.mubr.bf16.gmra.mrb[64].mxu1 %v1871_v52  ;;  %2253 = vmatmul.mubr.bf16.gmra.mrb[80].mxu0 %v1871_v52  ;;  %v7890_v52 = vld [vmem:[#allocation8 + $0x38] sm:$0xff]  }
 0x82e   : > { %2149 = vmatprep.mubr.bf16.mxu1 %v12149_v62  ;;  %2262 = vmatprep.mubr.bf16.mxu0 %v12149_v62 }
 0x82f   : > { %7047 = vmatpush3.bf16.msra.mxu1 %v7886_v46 }
 0x830   : > { %7048 = vmatprep.subr.bf16.mxu1 %v7888_v22 }
 0x833   : > { %7049 = vmatpush3.bf16.msra.mxu1 %v7890_v52 }
 0x835   : > { %2150 = vmatmul.mubr.bf16.gmra.mrb[68].mxu1 %v1872_v14  ;;  %2263 = vmatmul.mubr.bf16.gmra.mrb[84].mxu0 %v1872_v14 }
 0x836   : > { %2159 = vmatprep.mubr.bf16.mxu1 %v12149_v62  ;;  %2272 = vmatprep.mubr.bf16.mxu0 %v12149_v62 }
 0x83d   : > { %2160 = vmatmul.mubr.bf16.gmra.mrb[72].mxu1 %v1873_v59  ;;  %2273 = vmatmul.mubr.bf16.gmra.mrb[88].mxu0 %v1873_v59 }
 0x83e   : > { %2169 = vmatprep.mubr.bf16.mxu1 %v12149_v62  ;;  %2282 = vmatprep.mubr.bf16.mxu0 %v12149_v62 }
 0x845   : > { %2170 = vmatmul.mubr.bf16.gmra.mrb[76].mxu1 %v1874_v48  ;;  %2283 = vmatmul.mubr.bf16.gmra.mrb[92].mxu0 %v1874_v48 }
 0x8e0   : > { %v2101_v5 = vpop.f32.mrb[48].mxu1  ;;  %v2214_v60 = vpop.f32.mrb[64].mxu0 }
 0x8e1   : > { %v2357_v16 = vmul.f32 0.044715, %v2101_v5  ;;  %v2359_v4 = vmul.f32 0.044715, %v2214_v60  ;;  %v9674_v35 = vmul.f32 0.5, %v2101_v5  ;;  %v9676_v14 = vpop.f32.mrb[49].mxu1 }
 0x8e2   : > { %v9678_v45 = vpop.f32.mrb[65].mxu0  ;;  %v2358_v41 = vmul.f32 0.044715, %v9676_v14  ;;  %v2105_v36 = vpop.f32.mrb[50].mxu1  ;;  %v9684_v13 = vmul.f32 0.5, %v2214_v60 }
 0x8e3   : > { %v2421_v0 = vmul.f32 %v2357_v16, %v2101_v5  ;;  %v2423_v24 = vmul.f32 %v2359_v4, %v2214_v60  ;;  %v2360_v31 = vmul.f32 0.044715, %v9678_v45  ;;  %v9682_v59 = vpop.f32.mrb[66].mxu0  ;;  %v9686_v51 = vmul.f32 0.5, %v2105_v36  ;;  %v9691_v30 = vpop.f32.mrb[51].mxu1 }
 0x8e4   : > { %v2361_v48 = vmul.f32 0.044715, %v2105_v36  ;;  %v2363_v63 = vmul.f32 0.044715, %v9682_v59  ;;  %v2422_v28 = vmul.f32 %v2358_v41, %v9676_v14  ;;  %v9693_v54 = vpop.f32.mrb[67].mxu0 }
 0x8e5   : > { %v2485_v40 = vmul.f32 %v2421_v0, %v2101_v5  ;;  %v2487_v37 = vmul.f32 %v2423_v24, %v2214_v60  ;;  %v2424_v20 = vmul.f32 %v2360_v31, %v9678_v45  ;;  %v2362_v10 = vmul.f32 0.044715, %v9691_v30 }
 0x8e6   : > { %v2425_v12 = vmul.f32 %v2361_v48, %v2105_v36  ;;  %v2427_v43 = vmul.f32 %v2363_v63, %v9682_v59  ;;  %v2364_v46 = vmul.f32 0.044715, %v9693_v54  ;;  %v2486_v18 = vmul.f32 %v2422_v28, %v9676_v14 }
 0x8e7   : > { %v2549_v29 = vadd.f32 %v2485_v40, %v2101_v5  ;;  %v2551_v22 = vadd.f32 %v2487_v37, %v2214_v60  ;;  %v2488_v52 = vmul.f32 %v2424_v20, %v9678_v45  ;;  %v2426_v4 = vmul.f32 %v2362_v10, %v9691_v30 }
 0x8e8   : > { %v2489_v58 = vmul.f32 %v2425_v12, %v2105_v36  ;;  %v2491_v16 = vmul.f32 %v2427_v43, %v9682_v59  ;;  %v2428_v0 = vmul.f32 %v2364_v46, %v9693_v54  ;;  %v9703_v24 = vpop.f32.mrb[52].mxu1  ;;  %v9705_v41 = vpop.f32.mrb[68].mxu0  ;;  %v2550_v5 = vadd.f32 %v2486_v18, %v9676_v14 }
 0x8e9   : > { %v2613_v31 = vmul.f32 0.7978846, %v2549_v29  ;;  %v2615_v48 = vmul.f32 0.7978846, %v2551_v22  ;;  %v2552_v60 = vadd.f32 %v2488_v52, %v9678_v45  ;;  %v9709_v63 = vpop.f32.mrb[53].mxu1  ;;  %v9711_v40 = vpop.f32.mrb[69].mxu0  ;;  %v2490_v20 = vmul.f32 %v2426_v4, %v9691_v30 }
 0x8ea   : > { %v2553_v37 = vadd.f32 %v2489_v58, %v2105_v36  ;;  %v2555_v28 = vadd.f32 %v2491_v16, %v9682_v59  ;;  %v2492_v12 = vmul.f32 %v2428_v0, %v9693_v54  ;;  %v9716_v43 = vpop.f32.mrb[54].mxu1  ;;  %v9718_v10 = vpop.f32.mrb[70].mxu0  ;;  %v2614_v46 = vmul.f32 0.7978846, %v2550_v5 }
 0x8eb   : > { %8108 = vtanh.f32 %v2613_v31  ;;  %v2616_v29 = vmul.f32 0.7978846, %v2552_v60  ;;  %v2365_v22 = vmul.f32 0.044715, %v9703_v24  ;;  %v2554_v36 = vadd.f32 %v2490_v20, %v9691_v30  ;;  %v9722_v58 = vpop.f32.mrb[55].mxu1  ;;  %v9724_v16 = vpop.f32.mrb[71].mxu0 }
 0x8ec   : > { %8110 = vtanh.f32 %v2615_v48  ;;  %v2617_v18 = vmul.f32 0.7978846, %v2553_v37  ;;  %v2619_v52 = vmul.f32 0.7978846, %v2555_v28  ;;  %v2556_v4 = vadd.f32 %v2492_v12, %v9693_v54 }
 0x8ed   : > { %8112 = vtanh.f32 %v2614_v46  ;;  %v2429_v0 = vmul.f32 %v2365_v22, %v9703_v24  ;;  %v2367_v31 = vmul.f32 0.044715, %v9705_v41  ;;  %v2618_v5 = vmul.f32 0.7978846, %v2554_v36 }
 0x8ee   : > { %8114 = vtanh.f32 %v2616_v29  ;;  %v2366_v60 = vmul.f32 0.044715, %v9709_v63  ;;  %v2368_v48 = vmul.f32 0.044715, %v9711_v40  ;;  %v2620_v37 = vmul.f32 0.7978846, %v2556_v4 }
 0x8ef   : > { %8116 = vtanh.f32 %v2617_v18  ;;  %v2493_v28 = vmul.f32 %v2429_v0, %v9703_v24  ;;  %v2431_v20 = vmul.f32 %v2367_v31, %v9705_v41  ;;  %v2369_v22 = vmul.f32 0.044715, %v9716_v43 }
 0x8f0   : > { %8118 = vtanh.f32 %v2619_v52  ;;  %v2430_v46 = vmul.f32 %v2366_v60, %v9709_v63  ;;  %v2432_v12 = vmul.f32 %v2368_v48, %v9711_v40  ;;  %v9736_v3 = vpop.f32.mrb[56].mxu1  ;;  %v9738_v29 = vpop.f32.mrb[72].mxu0  ;;  %v2371_v4 = vmul.f32 0.044715, %v9718_v10 }
 0x8f1   : > { %12166 = vst [vmem:[#allocation56_spill] sm:$0xff] %v9736_v3  ;;  %12167 = vst [vmem:[#allocation57_spill] sm:$0xff] %v9738_v29  ;;  %8120 = vtanh.f32 %v2618_v5  ;;  %v2557_v36 = vadd.f32 %v2493_v28, %v9703_v24  ;;  %v2495_v18 = vmul.f32 %v2431_v20, %v9705_v41  ;;  %v9743_v0 = vpop.f32.mrb[57].mxu1  ;;  %v9745_v52 = vpop.f32.mrb[73].mxu0  ;;  %v2433_v48 = vmul.f32 %v2369_v22, %v9716_v43 }
 0x8f2   : > { %12168 = vst [vmem:[#allocation58_spill] sm:$0xff] %v9743_v0  ;;  %12169 = vst [vmem:[#allocation59_spill] sm:$0xff] %v9745_v52  ;;  %8122 = vtanh.f32 %v2620_v37  ;;  %v2494_v31 = vmul.f32 %v2430_v46, %v9709_v63  ;;  %v2496_v60 = vmul.f32 %v2432_v12, %v9711_v40  ;;  %v9750_v27 = vpop.f32.mrb[58].mxu1  ;;  %v9752_v5 = vpop.f32.mrb[74].mxu0  ;;  %v2435_v21 = vmul.f32 %v2371_v4, %v9718_v10 }
 0x8f3   : > { %12170 = vst [vmem:[#allocation60_spill] sm:$0xff] %v9750_v27  ;;  %12171 = vst [vmem:[#allocation61_spill] sm:$0xff] %v9752_v5  ;;  %v2621_v28 = vmul.f32 0.7978846, %v2557_v36  ;;  %v2559_v20 = vadd.f32 %v2495_v18, %v9705_v41  ;;  %v2370_v1 = vmul.f32 0.044715, %v9722_v58  ;;  %v2497_v22 = vmul.f32 %v2433_v48, %v9716_v43 }
 0x8f4   : > { %v9757_v8 = vpop.f32.mrb[59].mxu1  ;;  %v9759_v37 = vpop.f32.mrb[75].mxu0  ;;  %v2558_v46 = vadd.f32 %v2494_v31, %v9709_v63  ;;  %v2560_v12 = vadd.f32 %v2496_v60, %v9711_v40  ;;  %v2372_v33 = vmul.f32 0.044715, %v9724_v16  ;;  %v2499_v18 = vmul.f32 %v2435_v21, %v9718_v10 }
 0x8f5   : > { %12172 = vst [vmem:[#allocation62_spill] sm:$0xff] %v9757_v8  ;;  %12173 = vst [vmem:[#allocation63_spill] sm:$0xff] %v9759_v37  ;;  %v8109_v17 = vpop.eup %8108  ;;  %8124 = vtanh.f32 %v2621_v28  ;;  %v2623_v36 = vmul.f32 0.7978846, %v2559_v20  ;;  %v2434_v4 = vmul.f32 %v2370_v1, %v9722_v58  ;;  %v2561_v2 = vadd.f32 %v2497_v22, %v9716_v43 }
 0x8f6   : > { %v8111_v25 = vpop.eup %8110  ;;  %v2741_v32 = vadd.f32 1.0, %v8109_v17  ;;  %v2622_v9 = vmul.f32 0.7978846, %v2558_v46  ;;  %v2624_v7 = vmul.f32 0.7978846, %v2560_v12  ;;  %v2299_v60 = vmul.f32 0.5, %v9682_v59 }
 0x8f7   : > { %v9768_v31 = vpop.eup %8112  ;;  %8126 = vtanh.f32 %v2623_v36  ;;  %v2563_v48 = vadd.f32 %v2499_v18, %v9718_v10  ;;  %v2498_v28 = vmul.f32 %v2434_v4, %v9722_v58  ;;  %v9775_v21 = vadd.f32 1.0, %v8111_v25 }
 0x8f8   : > { %v9773_v20 = vpop.eup %8114  ;;  %8128 = vtanh.f32 %v2622_v9  ;;  %v2625_v1 = vmul.f32 0.7978846, %v2561_v2  ;;  %v2436_v17 = vmul.f32 %v2372_v33, %v9724_v16  ;;  %v9778_v46 = vpop.f32.mrb[60].mxu1  ;;  %v9783_v59 = vmul.f32 %v2741_v32, %v9674_v35 }
 0x8f9   : > { %12174 = vst [vmem:[#allocation64_spill] sm:$0xff] %v9778_v46  ;;  %v9780_v12 = vpop.f32.mrb[76].mxu0  ;;  %v8117_v22 = vpop.eup %8116  ;;  %8130 = vtanh.f32 %v2624_v7  ;;  %v2627_v36 = vmul.f32 0.7978846, %v2563_v48  ;;  %v2562_v18 = vadd.f32 %v2498_v28, %v9722_v58  ;;  %v2373_v55 = vmul.f32 0.044715, %v9736_v3 }
 0x8fa   : > { %12175 = vst [vmem:[#allocation65_spill] sm:$0xff] %v9780_v12  ;;  %v9786_v4 = vpop.f32.mrb[61].mxu1  ;;  %v9788_v25 = vpop.f32.mrb[77].mxu0  ;;  %v2745_v2 = vadd.f32 1.0, %v8117_v22  ;;  %8132 = vtanh.f32 %v2625_v1  ;;  %v2500_v33 = vmul.f32 %v2436_v17, %v9724_v16  ;;  %v2375_v48 = vmul.f32 0.044715, %v9738_v29 }
 0x8fb   : > { %12176 = vst [vmem:[#allocation66_spill] sm:$0xff] %v9786_v4  ;;  %12177 = vst [vmem:[#allocation67_spill] sm:$0xff] %v9788_v25  ;;  %v8119_v9 = vpop.eup %8118  ;;  %v9792_v38 = vpop.f32.mrb[62].mxu1  ;;  %8134 = vtanh.f32 %v2627_v36  ;;  %v2626_v35 = vmul.f32 0.7978846, %v2562_v18  ;;  %v2437_v22 = vmul.f32 %v2373_v55, %v9736_v3 }
 0x8fc   : > { %12178 = vst [vmem:[#allocation68_spill] sm:$0xff] %v9792_v38  ;;  %v9794_v50 = vpop.f32.mrb[78].mxu0  ;;  %v9796_v32 = vpop.eup %8120  ;;  %v2747_v7 = vadd.f32 1.0, %v8119_v9  ;;  %v9804_v1 = vmul.f32 %v2745_v2, %v9686_v51  ;;  %v2564_v17 = vadd.f32 %v2500_v33, %v9724_v16  ;;  %v2374_v56 = vmul.f32 0.044715, %v9743_v0 }
 0x8fd   : > { %12179 = vst [vmem:[#allocation69_spill] sm:$0xff] %v9794_v50  ;;  %v9799_v28 = vpop.f32.mrb[63].mxu1  ;;  %v9801_v57 = vpop.eup %8122  ;;  %8136 = vtanh.f32 %v2626_v35  ;;  %v2439_v36 = vmul.f32 %v2375_v48, %v9738_v29  ;;  %v2376_v18 = vmul.f32 0.044715, %v9745_v52  ;;  %v2501_v34 = vmul.f32 %v2437_v22, %v9736_v3 }
 0x8fe   : > { %12180 = vst [vmem:[#allocation70_spill] sm:$0xff] %v9799_v28  ;;  %v9809_v19 = vpop.f32.mrb[79].mxu0  ;;  %v9811_v9 = vmul.f32 %v2747_v7, %v2299_v60  ;;  %v2628_v39 = vmul.f32 0.7978846, %v2564_v17  ;;  %v2438_v51 = vmul.f32 %v2374_v56, %v9743_v0  ;;  %v2377_v2 = vmul.f32 0.044715, %v9750_v27 }
 0x8ff   : > { %v9818_v33 = vpop.eup %8124  ;;  %v2503_v55 = vmul.f32 %v2439_v36, %v9738_v29  ;;  %v2440_v49 = vmul.f32 %v2376_v18, %v9745_v52  ;;  %v2379_v60 = vmul.f32 0.044715, %v9752_v5  ;;  %v2378_v7 = vmul.f32 0.044715, %v9757_v8 }
 0x900   : > { %8138 = vtanh.f32 %v2628_v39  ;;  %v2565_v35 = vadd.f32 %v2501_v34, %v9736_v3  ;;  %v2502_v48 = vmul.f32 %v2438_v51, %v9743_v0  ;;  %v2441_v17 = vmul.f32 %v2377_v2, %v9750_v27  ;;  %v9827_v56 = vpop.f32.mrb[64].mxu1  ;;  %v9829_v22 = vpop.f32.mrb[80].mxu0 }
 0x901   : > { %12181 = vst [vmem:[#allocation71_spill] sm:$0xff] %v9827_v56  ;;  %12182 = vst [vmem:[#allocation72_spill] sm:$0xff] %v9829_v22  ;;  %v9831_v61 = vpop.eup %8126  ;;  %v2567_v36 = vadd.f32 %v2503_v55, %v9738_v29  ;;  %v2504_v18 = vmul.f32 %v2440_v49, %v9745_v52  ;;  %v2443_v26 = vmul.f32 %v2379_v60, %v9752_v5  ;;  %v9837_v42 = vpop.f32.mrb[65].mxu1  ;;  %v2380_v6 = vmul.f32 0.044715, %v9759_v37 }
 0x902   : > { %v2442_v39 = vmul.f32 %v2378_v7, %v9757_v8  ;;  %v9839_v34 = vpop.f32.mrb[81].mxu0  ;;  %v9841_v51 = vpop.eup %8128  ;;  %v2629_v2 = vmul.f32 0.7978846, %v2565_v35  ;;  %v2566_v15 = vadd.f32 %v2502_v48, %v9743_v0  ;;  %v2505_v11 = vmul.f32 %v2441_v17, %v9750_v27 }
 0x903   : > { %v9846_v55 = vpop.f32.mrb[66].mxu1  ;;  %v9848_v49 = vpop.f32.mrb[82].mxu0  ;;  %v2631_v7 = vmul.f32 0.7978846, %v2567_v36  ;;  %v2568_v47 = vadd.f32 %v2504_v18, %v9745_v52  ;;  %v2507_v23 = vmul.f32 %v2443_v26, %v9752_v5  ;;  %v2444_v29 = vmul.f32 %v2380_v6, %v9759_v37 }
 0x904   : > { %v9850_v60 = vpop.eup %8130  ;;  %v2506_v53 = vmul.f32 %v2442_v39, %v9757_v8  ;;  %v9855_v35 = vpop.f32.mrb[67].mxu1  ;;  %8140 = vtanh.f32 %v2629_v2  ;;  %v2630_v44 = vmul.f32 0.7978846, %v2566_v15  ;;  %v2569_v62 = vadd.f32 %v2505_v11, %v9750_v27 }
 0x905   : > { %v9857_v48 = vpop.f32.mrb[83].mxu0  ;;  %v9859_v17 = vpop.eup %8132  ;;  %8142 = vtanh.f32 %v2631_v7  ;;  %v2632_v36 = vmul.f32 0.7978846, %v2568_v47  ;;  %v2571_v26 = vadd.f32 %v2507_v23, %v9752_v5  ;;  %v2508_v52 = vmul.f32 %v2444_v29, %v9759_v37 }
 0x906   : > { %v9863_v3 = vpop.eup %8134  ;;  %v2570_v18 = vadd.f32 %v2506_v53, %v9757_v8  ;;  %8144 = vtanh.f32 %v2630_v44  ;;  %v2633_v39 = vmul.f32 0.7978846, %v2569_v62  ;;  %v2381_v0 = vmul.f32 0.044715, %v9778_v46 }
 0x907   : > { %v9869_v2 = vpop.eup %8136  ;;  %8146 = vtanh.f32 %v2632_v36  ;;  %v2635_v11 = vmul.f32 0.7978846, %v2571_v26  ;;  %v2383_v6 = vmul.f32 0.044715, %v9780_v12  ;;  %v2572_v47 = vadd.f32 %v2508_v52, %v9759_v37 }
 0x908   : > { %v2634_v15 = vmul.f32 0.7978846, %v2570_v18  ;;  %8148 = vtanh.f32 %v2633_v39  ;;  %v2445_v23 = vmul.f32 %v2381_v0, %v9778_v46  ;;  %v2382_v53 = vmul.f32 0.044715, %v9786_v4  ;;  %v9875_v44 = vpop.f32.mrb[68].mxu1  ;;  %v9877_v62 = vpop.f32.mrb[84].mxu0 }
 0x909   : > { %12183 = vst [vmem:[#allocation73_spill] sm:$0xff] %v9877_v62  ;;  %8150 = vtanh.f32 %v2635_v11  ;;  %v2447_v29 = vmul.f32 %v2383_v6, %v9780_v12  ;;  %v2384_v7 = vmul.f32 0.044715, %v9788_v25  ;;  %v2385_v36 = vmul.f32 0.044715, %v9792_v38  ;;  %v9882_v26 = vpop.f32.mrb[69].mxu1 }
 0x90a   : > { %12184 = vst [vmem:[#allocation74_spill] sm:$0xff] %v9882_v26  ;;  %v9884_v18 = vpop.f32.mrb[85].mxu0  ;;  %v9886_v52 = vpop.eup %8138  ;;  %8152 = vtanh.f32 %v2634_v15  ;;  %v2636_v0 = vmul.f32 0.7978846, %v2572_v47  ;;  %v2509_v39 = vmul.f32 %v2445_v23, %v9778_v46  ;;  %v2446_v5 = vmul.f32 %v2382_v53, %v9786_v4 }
 0x90b   : > { %12185 = vst [vmem:[#allocation75_spill] sm:$0xff] %v9884_v18  ;;  %v9890_v27 = vpop.f32.mrb[70].mxu1  ;;  %v9892_v11 = vpop.f32.mrb[86].mxu0  ;;  %v2511_v6 = vmul.f32 %v2447_v29, %v9780_v12  ;;  %v2448_v37 = vmul.f32 %v2384_v7, %v9788_v25  ;;  %v2449_v8 = vmul.f32 %v2385_v36, %v9792_v38  ;;  %v2387_v18 = vmul.f32 0.044715, %v9794_v50 }
 0x90c   : > { %12186 = vst [vmem:[#allocation76_spill] sm:$0xff] %v9890_v27  ;;  %12187 = vst [vmem:[#allocation77_spill] sm:$0xff] %v9892_v11  ;;  %v9898_v26 = vpop.f32.mrb[71].mxu1  ;;  %v9900_v15 = vpop.f32.mrb[87].mxu0  ;;  %8154 = vtanh.f32 %v2636_v0  ;;  %v2573_v47 = vadd.f32 %v2509_v39, %v9778_v46  ;;  %v2510_v23 = vmul.f32 %v2446_v5, %v9786_v4  ;;  %v2386_v53 = vmul.f32 0.044715, %v9799_v28 }
 0x90d   : > { %12188 = vst [vmem:[#allocation78_spill] sm:$0xff] %v9898_v26  ;;  %12189 = vst [vmem:[#allocation79_spill] sm:$0xff] %v9900_v15  ;;  %v2575_v11 = vadd.f32 %v2511_v6, %v9780_v12  ;;  %v2512_v29 = vmul.f32 %v2448_v37, %v9788_v25  ;;  %v2513_v7 = vmul.f32 %v2449_v8, %v9792_v38  ;;  %v2388_v39 = vmul.f32 0.044715, %v9809_v19 }
 0x90e   : > { %v2451_v36 = vmul.f32 %v2387_v18, %v9794_v50  ;;  %v9909_v27 = vpop.eup %8140  ;;  %v2637_v26 = vmul.f32 0.7978846, %v2573_v47  ;;  %v2574_v15 = vadd.f32 %v2510_v23, %v9786_v4  ;;  %v2450_v0 = vmul.f32 %v2386_v53, %v9799_v28 }
 0x90f   : > { %v9914_v5 = vpop.eup %8142  ;;  %v2639_v46 = vmul.f32 0.7978846, %v2575_v11  ;;  %v2576_v6 = vadd.f32 %v2512_v29, %v9788_v25  ;;  %v2577_v37 = vadd.f32 %v2513_v7, %v9792_v38  ;;  %v2452_v23 = vmul.f32 %v2388_v39, %v9809_v19 }
 0x910   : > { %12190 = vst [vmem:[#allocation80_spill] sm:$0xff] %v9914_v5  ;;  %v2515_v8 = vmul.f32 %v2451_v36, %v9794_v50  ;;  %v9919_v12 = vpop.eup %8144  ;;  %8156 = vtanh.f32 %v2637_v26  ;;  %v2638_v18 = vmul.f32 0.7978846, %v2574_v15  ;;  %v2514_v47 = vmul.f32 %v2450_v0, %v9799_v28  ;;  %v9923_v53 = vpop.f32.mrb[72].mxu1 }
 0x911   : > { %12191 = vst [vmem:[#allocation81_spill] sm:$0xff] %v9923_v53  ;;  %v9925_v4 = vpop.f32.mrb[88].mxu0  ;;  %v9927_v5 = vpop.eup %8146  ;;  %8158 = vtanh.f32 %v2639_v46  ;;  %v2640_v11 = vmul.f32 0.7978846, %v2576_v6  ;;  %v2641_v29 = vmul.f32 0.7978846, %v2577_v37  ;;  %v2516_v0 = vmul.f32 %v2452_v23, %v9809_v19 }
 0x912   : > { %12192 = vst [vmem:[#allocation82_spill] sm:$0xff] %v9925_v4  ;;  %v2579_v7 = vadd.f32 %v2515_v8, %v9794_v50  ;;  %v9930_v36 = vpop.f32.mrb[73].mxu1  ;;  %v9932_v38 = vpop.f32.mrb[89].mxu0  ;;  %8160 = vtanh.f32 %v2638_v18  ;;  %v2578_v15 = vadd.f32 %v2514_v47, %v9799_v28  ;;  %v2294_v39 = vmul.f32 0.5, %v9676_v14 }
 0x913   : > { %12193 = vst [vmem:[#allocation83_spill] sm:$0xff] %v9930_v36  ;;  %12194 = vst [vmem:[#allocation84_spill] sm:$0xff] %v9932_v38  ;;  %v9934_v26 = vpop.eup %8148  ;;  %v9939_v25 = vpop.f32.mrb[74].mxu1  ;;  %8162 = vtanh.f32 %v2640_v11  ;;  %v2298_v8 = vmul.f32 0.5, %v9691_v30  ;;  %v2742_v50 = vadd.f32 1.0, %v9768_v31  ;;  %v2580_v23 = vadd.f32 %v2516_v0, %v9809_v19 }
 0x914   : > { %v9941_v46 = vpop.f32.mrb[90].mxu0  ;;  %v9943_v6 = vpop.eup %8150  ;;  %v2643_v37 = vmul.f32 0.7978846, %v2579_v7  ;;  %8164 = vtanh.f32 %v2641_v29  ;;  %v2642_v14 = vmul.f32 0.7978846, %v2578_v15  ;;  %v2746_v28 = vadd.f32 1.0, %v9796_v32 }
 0x915   : > { %12195 = vst [vmem:[#allocation85_spill] sm:$0xff] %v9941_v46  ;;  %v9947_v38 = vpop.f32.mrb[75].mxu1  ;;  %v9949_v18 = vpop.f32.mrb[91].mxu0  ;;  %v2807_v11 = vmul.f32 %v9775_v21, %v9684_v13  ;;  %v2806_v7 = vmul.f32 %v2742_v50, %v2294_v39  ;;  %v2296_v30 = vmul.f32 0.5, %v9678_v45  ;;  %v2744_v29 = vadd.f32 1.0, %v9773_v20 }
 0x916   : > { %12196 = vst [vmem:[#allocation86_spill] sm:$0xff] %v9947_v38  ;;  %12197 = vst [vmem:[#allocation87_spill] sm:$0xff] %v9949_v18  ;;  %v9951_v47 = vpop.eup %8152  ;;  %8166 = vtanh.f32 %v2643_v37  ;;  %v2644_v38 = vmul.f32 0.7978846, %v2580_v23  ;;  %v2810_v46 = vmul.f32 %v2746_v28, %v2298_v8  ;;  %v2300_v18 = vmul.f32 0.5, %v9693_v54 }
 0x917   : > { %v9958_v31 = vpop.eup %8154  ;;  %v2748_v15 = vadd.f32 1.0, %v9801_v57  ;;  %v2389_v0 = vmul.f32 0.044715, %v9827_v56  ;;  %v2391_v32 = vmul.f32 0.044715, %v9829_v22  ;;  %v2869_v13 = vpack.c.bf16 %v9804_v1, %v9783_v59 }
 0x918   : > { %8168 = vtanh.f32 %v2642_v14  ;;  %v2870_v50 = vpack.c.bf16 %v2810_v46, %v2806_v7  ;;  %v2808_v45 = vmul.f32 %v2744_v29, %v2296_v30  ;;  %v2871_v21 = vpack.c.bf16 %v9811_v9, %v2807_v11  ;;  %v9968_v39 = vpop.f32.mrb[76].mxu1  ;;  %v9970_v28 = vpop.f32.mrb[92].mxu0 }
 0x919   : > { %12198 = vst [vmem:[#allocation88_spill] sm:$0xff] %v9968_v39  ;;  %12199 = vst [vmem:[#allocation89_spill] sm:$0xff] %v9970_v28  ;;  %v2812_v54 = vmul.f32 %v2748_v15, %v2300_v18  ;;  %v2453_v20 = vmul.f32 %v2389_v0, %v9827_v56  ;;  %v2455_v57 = vmul.f32 %v2391_v32, %v9829_v22  ;;  %v2390_v37 = vmul.f32 0.044715, %v9837_v42  ;;  %v9975_v8 = vpop.f32.mrb[77].mxu1  ;;  %v9977_v23 = vpop.f32.mrb[93].mxu0 }
 0x91a   : > { %12200 = vst [vmem:[#allocation90_spill] sm:$0xff] %v9977_v23  ;;  %v9979_v59 = vpop.eup %8156  ;;  %8170 = vtanh.f32 %v2644_v38  ;;  %3189 = vmatprep.mubr.bf16.mxu1 %v2870_v50  ;;  %v2392_v1 = vmul.f32 0.044715, %v9839_v34  ;;  %v2393_v9 = vmul.f32 0.044715, %v9846_v55  ;;  %v9989_v29 = vpop.f32.mrb[78].mxu1 }
 0x91b   : > { %v2395_v46 = vmul.f32 0.044715, %v9848_v49  ;;  %v9984_v18 = vpop.eup %8158  ;;  %v2872_v14 = vpack.c.bf16 %v2812_v54, %v2808_v45  ;;  %v2517_v11 = vmul.f32 %v2453_v20, %v9827_v56  ;;  %v2519_v7 = vmul.f32 %v2455_v57, %v9829_v22  ;;  %3190 = vmatmul.mubr.bf16.vlgmr.msra.gmra.mrb[80].mxu1 %v2869_v13  ;;  %12201 = vst [vmem:[#allocation91_spill] sm:$0xff] %v9989_v29  ;;  %v9991_v38 = vpop.f32.mrb[94].mxu0 }
 0x91c   : > { %v2454_v30 = vmul.f32 %v2390_v37, %v9837_v42  ;;  %12202 = vst [vmem:[#allocation92_spill] sm:$0xff] %v9991_v38  ;;  %v9993_v15 = vpop.eup %8160  ;;  %v2456_v0 = vmul.f32 %v2392_v1, %v9839_v34  ;;  %v2457_v32 = vmul.f32 %v2393_v9, %v9846_v55  ;;  %v2394_v45 = vmul.f32 0.044715, %v9855_v35  ;;  %v9999_v54 = vpop.f32.mrb[79].mxu1 }
 0x91d   : > { %v2459_v50 = vmul.f32 %v2395_v46, %v9848_v49  ;;  %12203 = vst [vmem:[#allocation93_spill] sm:$0xff] %v9999_v54  ;;  %v10001_v20 = vpop.f32.mrb[95].mxu0  ;;  %v10003_v13 = vpop.eup %8162  ;;  %3286 = vmatprep.mubr.bf16.mxu0 %v2872_v14  ;;  %v2581_v57 = vadd.f32 %v2517_v11, %v9827_v56  ;;  %v2583_v37 = vadd.f32 %v2519_v7, %v9829_v22  ;;  %v2396_v1 = vmul.f32 0.044715, %v9857_v48 }
 0x91e   : > { %12204 = vst [vmem:[#allocation94_spill] sm:$0xff] %v10001_v20  ;;  %v2518_v38 = vmul.f32 %v2454_v30, %v9837_v42  ;;  %v10009_v9 = vpop.eup %8164  ;;  %3287 = vmatmul.mubr.bf16.vlgmr.msra.gmra.mrb[96].mxu0 %v2871_v21  ;;  %v2520_v46 = vmul.f32 %v2456_v0, %v9839_v34  ;;  %v2521_v54 = vmul.f32 %v2457_v32, %v9846_v55  ;;  %v2302_v23 = vmul.f32 0.5, %v9709_v63 }
 0x91f   : > { %v2523_v20 = vmul.f32 %v2459_v50, %v9848_v49  ;;  %v2458_v29 = vmul.f32 %v2394_v45, %v9855_v35  ;;  %v2645_v11 = vmul.f32 0.7978846, %v2581_v57  ;;  %v2647_v56 = vmul.f32 0.7978846, %v2583_v37 }
 0x920   : > { %v10015_v14 = vpop.eup %8166  ;;  %v2582_v7 = vadd.f32 %v2518_v38, %v9837_v42  ;;  %v2460_v30 = vmul.f32 %v2396_v1, %v9857_v48  ;;  %v2584_v22 = vadd.f32 %v2520_v46, %v9839_v34  ;;  %v2585_v21 = vadd.f32 %v2521_v54, %v9846_v55 }
 0x921   : > { %v2587_v0 = vadd.f32 %v2523_v20, %v9848_v49  ;;  %v2522_v32 = vmul.f32 %v2458_v29, %v9855_v35  ;;  %8172 = vtanh.f32 %v2645_v11  ;;  %v2306_v20 = vmul.f32 0.5, %v9722_v58 }
 0x922   : > { %v2646_v50 = vmul.f32 0.7978846, %v2582_v7  ;;  %v2524_v45 = vmul.f32 %v2460_v30, %v9857_v48  ;;  %v10025_v57 = vpop.eup %8168  ;;  %8174 = vtanh.f32 %v2647_v56  ;;  %v2648_v38 = vmul.f32 0.7978846, %v2584_v22 }
 0x923   : > { %v2649_v37 = vmul.f32 0.7978846, %v2585_v21  ;;  %v2651_v1 = vmul.f32 0.7978846, %v2587_v0  ;;  %v2586_v46 = vadd.f32 %v2522_v32, %v9855_v35  ;;  %v2750_v11 = vadd.f32 1.0, %v9841_v51 }
 0x924   : > { %8176 = vtanh.f32 %v2646_v50  ;;  %v2588_v54 = vadd.f32 %v2524_v45, %v9857_v48  ;;  %v10030_v29 = vpop.eup %8170  ;;  %v2754_v63 = vadd.f32 1.0, %v9869_v2  ;;  %v2304_v7 = vmul.f32 0.5, %v9711_v40 }
 0x925   : > { %8178 = vtanh.f32 %v2648_v38  ;;  %v2650_v56 = vmul.f32 0.7978846, %v2586_v46  ;;  %v2308_v30 = vmul.f32 0.5, %v9724_v16  ;;  %v2814_v21 = vmul.f32 %v2750_v11, %v2302_v23 }
 0x926   : > { %8180 = vtanh.f32 %v2649_v37  ;;  %v2652_v22 = vmul.f32 0.7978846, %v2588_v54  ;;  %v2818_v0 = vmul.f32 %v2754_v63, %v2306_v20  ;;  %v2752_v32 = vadd.f32 1.0, %v9850_v60 }
 0x927   : > { %8182 = vtanh.f32 %v2651_v1  ;;  %v2756_v58 = vadd.f32 1.0, %v9886_v52  ;;  %v2397_v50 = vmul.f32 0.044715, %v9875_v44  ;;  %v2399_v51 = vmul.f32 0.044715, %v9877_v62 }
 0x928   : > { %8184 = vtanh.f32 %v2650_v56  ;;  %v2874_v2 = vpack.c.bf16 %v2818_v0, %v2814_v21  ;;  %v2816_v40 = vmul.f32 %v2752_v32, %v2304_v7  ;;  %v2301_v45 = vmul.f32 0.5, %v9703_v24  ;;  %v12206_v0 = vld [vmem:[#allocation75_spill] sm:$0xff] }
 0x929   : > { %8186 = vtanh.f32 %v2652_v22  ;;  %v2820_v38 = vmul.f32 %v2756_v58, %v2308_v30  ;;  %v2461_v16 = vmul.f32 %v2397_v50, %v9875_v44  ;;  %v2463_v23 = vmul.f32 %v2399_v51, %v9877_v62 }
 0x92a   : > { %v2305_v37 = vmul.f32 0.5, %v9716_v43  ;;  %3197 = vmatprep.mubr.bf16.mxu1 %v2874_v2  ;;  %v2749_v60 = vadd.f32 1.0, %v9818_v33  ;;  %v2753_v52 = vadd.f32 1.0, %v9859_v17  ;;  %v2303_v1 = vmul.f32 0.5, %v9705_v41  ;;  %v12205_v17 = vld [vmem:[#allocation74_spill] sm:$0xff]  ;;  %v12207_v2 = vld [vmem:[#allocation76_spill] sm:$0xff] }
 0x92b   : > { %v2307_v46 = vmul.f32 0.5, %v9718_v10  ;;  %v10048_v54 = vpop.eup %8172  ;;  %v2876_v20 = vpack.c.bf16 %v2820_v38, %v2816_v40  ;;  %v2525_v24 = vmul.f32 %v2461_v16, %v9875_v44  ;;  %v2527_v11 = vmul.f32 %v2463_v23, %v9877_v62  ;;  %v12208_v23 = vld [vmem:[#allocation77_spill] sm:$0xff] }
 0x92c   : > { %v2751_v63 = vadd.f32 1.0, %v9831_v61  ;;  %v10053_v7 = vpop.eup %8174  ;;  %v2813_v43 = vmul.f32 %v2749_v60, %v2301_v45  ;;  %v2817_v56 = vmul.f32 %v2753_v52, %v2305_v37  ;;  %v2755_v33 = vadd.f32 1.0, %v9863_v3 }
 0x92d   : > { %v2398_v22 = vmul.f32 0.044715, %v12205_v17  ;;  %3294 = vmatprep.mubr.bf16.mxu0 %v2876_v20  ;;  %v2589_v10 = vadd.f32 %v2525_v24, %v9875_v44  ;;  %v2591_v30 = vadd.f32 %v2527_v11, %v9877_v62  ;;  %v2400_v32 = vmul.f32 0.044715, %v12206_v0  ;;  %v12209_v20 = vld [vmem:[#allocation78_spill] sm:$0xff]  ;;  %v12213_v62 = vld [vmem:[#allocation59_spill] sm:$0xff] }
 0x92e   : > { %v10057_v41 = vpop.eup %8176  ;;  %v2815_v21 = vmul.f32 %v2751_v63, %v2303_v1  ;;  %v2873_v61 = vpack.c.bf16 %v2817_v56, %v2813_v43  ;;  %v2819_v50 = vmul.f32 %v2755_v33, %v2307_v46  ;;  %v2401_v3 = vmul.f32 0.044715, %v12207_v2  ;;  %v12210_v56 = vld [vmem:[#allocation79_spill] sm:$0xff] }
 0x92f   : > { %v10062_v58 = vpop.eup %8178  ;;  %v2462_v51 = vmul.f32 %v2398_v22, %v12205_v17  ;;  %v2653_v45 = vmul.f32 0.7978846, %v2589_v10  ;;  %v2655_v38 = vmul.f32 0.7978846, %v2591_v30  ;;  %v2464_v16 = vmul.f32 %v2400_v32, %v12206_v0 }
 0x930   : > { %v10066_v40 = vpop.eup %8180  ;;  %v2403_v37 = vmul.f32 0.044715, %v12208_v23  ;;  %3198 = vmatmul.mubr.bf16.gmra.mrb[84].mxu1 %v2873_v61  ;;  %v2875_v52 = vpack.c.bf16 %v2819_v50, %v2815_v21  ;;  %v2465_v46 = vmul.f32 %v2401_v3, %v12207_v2  ;;  %v2402_v24 = vmul.f32 0.044715, %v12209_v20 }
 0x931   : > { %v10070_v60 = vpop.eup %8182  ;;  %v2526_v1 = vmul.f32 %v2462_v51, %v12205_v17  ;;  %8188 = vtanh.f32 %v2653_v45  ;;  %v2528_v63 = vmul.f32 %v2464_v16, %v12206_v0  ;;  %v2404_v33 = vmul.f32 0.044715, %v12210_v56  ;;  %v12211_v51 = vld [vmem:[#allocation58_spill] sm:$0xff] }
 0x932   : > { %v10075_v11 = vpop.eup %8184  ;;  %v2467_v43 = vmul.f32 %v2403_v37, %v12208_v23  ;;  %8190 = vtanh.f32 %v2655_v38  ;;  %3295 = vmatmul.mubr.bf16.gmra.mrb[100].mxu0 %v2875_v52  ;;  %v2529_v30 = vmul.f32 %v2465_v46, %v12207_v2  ;;  %v2466_v21 = vmul.f32 %v2402_v24, %v12209_v20  ;;  %v12212_v37 = vld [vmem:[#allocation62_spill] sm:$0xff] }
 0x933   : > { %v10080_v22 = vpop.eup %8186  ;;  %v2590_v10 = vadd.f32 %v2526_v1, %v12205_v17  ;;  %v2592_v32 = vadd.f32 %v2528_v63, %v12206_v0  ;;  %v2468_v50 = vmul.f32 %v2404_v33, %v12210_v56  ;;  %v2310_v3 = vmul.f32 0.5, %v12211_v51 }
 0x934   : > { %v2531_v61 = vmul.f32 %v2467_v43, %v12208_v23  ;;  %v2593_v16 = vadd.f32 %v2529_v30, %v12207_v2  ;;  %v2530_v38 = vmul.f32 %v2466_v21, %v12209_v20  ;;  %v2314_v52 = vmul.f32 0.5, %v12212_v37 }
 0x935   : > { %v2654_v45 = vmul.f32 0.7978846, %v2590_v10  ;;  %v2656_v1 = vmul.f32 0.7978846, %v2592_v32  ;;  %v2532_v24 = vmul.f32 %v2468_v50, %v12210_v56  ;;  %v2758_v63 = vadd.f32 1.0, %v9919_v12 }
 0x936   : > { %v2595_v46 = vadd.f32 %v2531_v61, %v12208_v23  ;;  %v2657_v43 = vmul.f32 0.7978846, %v2593_v16  ;;  %v2594_v33 = vadd.f32 %v2530_v38, %v12209_v20  ;;  %v2762_v51 = vadd.f32 1.0, %v9951_v47  ;;  %v12214_v23 = vld [vmem:[#allocation63_spill] sm:$0xff] }
 0x937   : > { %8192 = vtanh.f32 %v2654_v45  ;;  %v2596_v30 = vadd.f32 %v2532_v24, %v12210_v56  ;;  %v2822_v21 = vmul.f32 %v2758_v63, %v2310_v3  ;;  %v2312_v61 = vmul.f32 0.5, %v12213_v62  ;;  %v12216_v63 = vld [vmem:[#allocation60_spill] sm:$0xff] }
 0x938   : > { %8194 = vtanh.f32 %v2656_v1  ;;  %v2659_v10 = vmul.f32 0.7978846, %v2595_v46  ;;  %v2658_v37 = vmul.f32 0.7978846, %v2594_v33  ;;  %v2826_v32 = vmul.f32 %v2762_v51, %v2314_v52  ;;  %v12215_v46 = vld [vmem:[#allocation56_spill] sm:$0xff] }
 0x939   : > { %8196 = vtanh.f32 %v2657_v43  ;;  %v2660_v50 = vmul.f32 0.7978846, %v2596_v30  ;;  %v2316_v12 = vmul.f32 0.5, %v12214_v23  ;;  %v2760_v45 = vadd.f32 1.0, %v9927_v5 }
 0x93a   : > { %8198 = vtanh.f32 %v2659_v10  ;;  %v2878_v16 = vpack.c.bf16 %v2826_v32, %v2822_v21  ;;  %v2764_v47 = vadd.f32 1.0, %v9958_v31  ;;  %v2405_v38 = vmul.f32 0.044715, %v9923_v53  ;;  %v12217_v10 = vld [vmem:[#allocation57_spill] sm:$0xff] }
 0x93b   : > { %8200 = vtanh.f32 %v2658_v37  ;;  %v10103_v1 = vpop.eup %8188  ;;  %v2824_v3 = vmul.f32 %v2760_v45, %v2312_v61  ;;  %v2407_v52 = vmul.f32 0.044715, %v9925_v4  ;;  %v2309_v62 = vmul.f32 0.5, %v12215_v46  ;;  %v12218_v21 = vld [vmem:[#allocation61_spill] sm:$0xff]  ;;  %v12219_v45 = vld [vmem:[#allocation80_spill] sm:$0xff] }
 0x93c   : > { %8202 = vtanh.f32 %v2660_v50  ;;  %v10107_v24 = vpop.eup %8190  ;;  %3205 = vmatprep.mubr.bf16.mxu1 %v2878_v16  ;;  %v2828_v23 = vmul.f32 %v2764_v47, %v2316_v12  ;;  %v2469_v5 = vmul.f32 %v2405_v38, %v9923_v53  ;;  %v2313_v43 = vmul.f32 0.5, %v12216_v63  ;;  %v12220_v63 = vld [vmem:[#allocation84_spill] sm:$0xff] }
 0x93d   : > { %v2757_v31 = vadd.f32 1.0, %v9909_v27  ;;  %v2471_v33 = vmul.f32 %v2407_v52, %v9925_v4  ;;  %v2761_v51 = vadd.f32 1.0, %v9934_v26  ;;  %v2311_v30 = vmul.f32 0.5, %v12217_v10 }
 0x93e   : > { %v2315_v37 = vmul.f32 0.5, %v12218_v21  ;;  %v2880_v32 = vpack.c.bf16 %v2828_v23, %v2824_v3  ;;  %v2533_v61 = vmul.f32 %v2469_v5, %v9923_v53  ;;  %v2759_v12 = vadd.f32 1.0, %v12219_v45 }
 0x93f   : > { %v2821_v50 = vmul.f32 %v2757_v31, %v2309_v62  ;;  %v2535_v16 = vmul.f32 %v2471_v33, %v9925_v4  ;;  %v2825_v47 = vmul.f32 %v2761_v51, %v2313_v43  ;;  %v2763_v38 = vadd.f32 1.0, %v9943_v6 }
 0x940   : > { %v2406_v27 = vmul.f32 0.044715, %v9930_v36  ;;  %3302 = vmatprep.mubr.bf16.mxu0 %v2880_v32  ;;  %v2597_v26 = vadd.f32 %v2533_v61, %v9923_v53  ;;  %v2823_v46 = vmul.f32 %v2759_v12, %v2311_v30  ;;  %v2408_v3 = vmul.f32 0.044715, %v12220_v63  ;;  %v12221_v30 = vld [vmem:[#allocation85_spill] sm:$0xff] }
 0x941   : > { %v10121_v52 = vpop.eup %8192  ;;  %v2409_v23 = vmul.f32 0.044715, %v9939_v25  ;;  %v2599_v5 = vadd.f32 %v2535_v16, %v9925_v4  ;;  %v2877_v31 = vpack.c.bf16 %v2825_v47, %v2821_v50  ;;  %v2827_v43 = vmul.f32 %v2763_v38, %v2315_v37  ;;  %v12223_v50 = vld [vmem:[#allocation86_spill] sm:$0xff] }
 0x942   : > { %v10126_v62 = vpop.eup %8194  ;;  %v2470_v6 = vmul.f32 %v2406_v27, %v9930_v36  ;;  %v2661_v51 = vmul.f32 0.7978846, %v2597_v26  ;;  %v2472_v10 = vmul.f32 %v2408_v3, %v12220_v63  ;;  %v2411_v32 = vmul.f32 0.044715, %v12221_v30 }
 0x943   : > { %v10130_v33 = vpop.eup %8196  ;;  %v2473_v21 = vmul.f32 %v2409_v23, %v9939_v25  ;;  %v2663_v45 = vmul.f32 0.7978846, %v2599_v5  ;;  %3206 = vmatmul.mubr.bf16.gmra.mrb[88].mxu1 %v2877_v31  ;;  %v2879_v12 = vpack.c.bf16 %v2827_v43, %v2823_v46  ;;  %v2410_v37 = vmul.f32 0.044715, %v12223_v50  ;;  %v12224_v5 = vld [vmem:[#allocation87_spill] sm:$0xff] }
 0x944   : > { %v10135_v61 = vpop.eup %8198  ;;  %v2534_v16 = vmul.f32 %v2470_v6, %v9930_v36  ;;  %8204 = vtanh.f32 %v2661_v51  ;;  %v2536_v38 = vmul.f32 %v2472_v10, %v12220_v63  ;;  %v2475_v26 = vmul.f32 %v2411_v32, %v12221_v30  ;;  %v12225_v10 = vld [vmem:[#allocation66_spill] sm:$0xff] }
 0x945   : > { %12222 = vst [vmem:[#allocation74_spill] sm:$0xff] %v10135_v61  ;;  %v10139_v47 = vpop.eup %8200  ;;  %v2537_v27 = vmul.f32 %v2473_v21, %v9939_v25  ;;  %8206 = vtanh.f32 %v2663_v45  ;;  %3303 = vmatmul.mubr.bf16.gmra.mrb[104].mxu0 %v2879_v12  ;;  %v2474_v46 = vmul.f32 %v2410_v37, %v12223_v50  ;;  %v2412_v31 = vmul.f32 0.044715, %v12224_v5  ;;  %v12226_v12 = vld [vmem:[#allocation70_spill] sm:$0xff] }
 0x946   : > { %v10144_v3 = vpop.eup %8202  ;;  %v2598_v23 = vadd.f32 %v2534_v16, %v9930_v36  ;;  %v2600_v43 = vadd.f32 %v2536_v38, %v12220_v63  ;;  %v2539_v51 = vmul.f32 %v2475_v26, %v12221_v30  ;;  %v2318_v21 = vmul.f32 0.5, %v12225_v10  ;;  %v12227_v10 = vld [vmem:[#allocation67_spill] sm:$0xff] }
 0x947   : > { %v2601_v6 = vadd.f32 %v2537_v27, %v9939_v25  ;;  %v2538_v32 = vmul.f32 %v2474_v46, %v12223_v50  ;;  %v2476_v45 = vmul.f32 %v2412_v31, %v12224_v5  ;;  %v2322_v53 = vmul.f32 0.5, %v12226_v12 }
 0x948   : > { %v2662_v4 = vmul.f32 0.7978846, %v2598_v23  ;;  %v2664_v16 = vmul.f32 0.7978846, %v2600_v43  ;;  %v2603_v37 = vadd.f32 %v2539_v51, %v12221_v30  ;;  %v2766_v61 = vadd.f32 1.0, %v9993_v15 }
 0x949   : > { %v2665_v36 = vmul.f32 0.7978846, %v2601_v6  ;;  %v2602_v38 = vadd.f32 %v2538_v32, %v12223_v50  ;;  %v2540_v27 = vmul.f32 %v2476_v45, %v12224_v5  ;;  %v2770_v26 = vadd.f32 1.0, %v10025_v57 }
 0x94a   : > { %8208 = vtanh.f32 %v2662_v4  ;;  %v2667_v23 = vmul.f32 0.7978846, %v2603_v37  ;;  %v2830_v46 = vmul.f32 %v2766_v61, %v2318_v21  ;;  %v2320_v31 = vmul.f32 0.5, %v12227_v10  ;;  %v12228_v37 = vld [vmem:[#allocation64_spill] sm:$0xff]  ;;  %v12230_v10 = vld [vmem:[#allocation65_spill] sm:$0xff] }
 0x94b   : > { %8210 = vtanh.f32 %v2664_v16  ;;  %v2666_v12 = vmul.f32 0.7978846, %v2602_v38  ;;  %v2604_v43 = vadd.f32 %v2540_v27, %v12224_v5  ;;  %v2834_v6 = vmul.f32 %v2770_v26, %v2322_v53 }
 0x94c   : > { %8212 = vtanh.f32 %v2665_v36  ;;  %v2324_v15 = vmul.f32 0.5, %v9809_v19  ;;  %v2768_v4 = vadd.f32 1.0, %v10003_v13  ;;  %v2772_v51 = vadd.f32 1.0, %v10030_v29  ;;  %v12229_v13 = vld [vmem:[#allocation68_spill] sm:$0xff] }
 0x94d   : > { %8214 = vtanh.f32 %v2667_v23  ;;  %v2668_v32 = vmul.f32 0.7978846, %v2604_v43  ;;  %v2882_v57 = vpack.c.bf16 %v2834_v6, %v2830_v46  ;;  %v2413_v45 = vmul.f32 0.044715, %v9968_v39  ;;  %v12231_v6 = vld [vmem:[#allocation69_spill] sm:$0xff] }
 0x94e   : > { %8216 = vtanh.f32 %v2666_v12  ;;  %v10167_v61 = vpop.eup %8204  ;;  %v2832_v21 = vmul.f32 %v2768_v4, %v2320_v31  ;;  %v2836_v36 = vmul.f32 %v2772_v51, %v2324_v15  ;;  %v2415_v16 = vmul.f32 0.044715, %v9970_v28 }
 0x94f   : > { %v2317_v53 = vmul.f32 0.5, %v12228_v37  ;;  %v10171_v38 = vpop.eup %8206  ;;  %8218 = vtanh.f32 %v2668_v32  ;;  %3213 = vmatprep.mubr.bf16.mxu1 %v2882_v57  ;;  %v2477_v19 = vmul.f32 %v2413_v45, %v9968_v39  ;;  %v2321_v29 = vmul.f32 0.5, %v12229_v13  ;;  %v12233_v37 = vld [vmem:[#allocation91_spill] sm:$0xff] }
 0x950   : > { %v2765_v27 = vadd.f32 1.0, %v9979_v59  ;;  %v2884_v26 = vpack.c.bf16 %v2836_v36, %v2832_v21  ;;  %v2479_v23 = vmul.f32 %v2415_v16, %v9970_v28  ;;  %v2769_v46 = vadd.f32 1.0, %v10009_v9  ;;  %v12232_v36 = vld [vmem:[#allocation90_spill] sm:$0xff] }
 0x951   : > { %v2319_v31 = vmul.f32 0.5, %v12230_v10  ;;  %v2541_v12 = vmul.f32 %v2477_v19, %v9968_v39  ;;  %v2323_v15 = vmul.f32 0.5, %v12231_v6  ;;  %v2767_v4 = vadd.f32 1.0, %v9984_v18  ;;  %v12234_v10 = vld [vmem:[#allocation92_spill] sm:$0xff] }
 0x952   : > { %v2829_v43 = vmul.f32 %v2765_v27, %v2317_v53  ;;  %3310 = vmatprep.mubr.bf16.mxu0 %v2884_v26  ;;  %v2543_v51 = vmul.f32 %v2479_v23, %v9970_v28  ;;  %v2833_v32 = vmul.f32 %v2769_v46, %v2321_v29  ;;  %v2771_v59 = vadd.f32 1.0, %v10015_v14 }
 0x953   : > { %v2414_v57 = vmul.f32 0.044715, %v9975_v8  ;;  %v2605_v9 = vadd.f32 %v2541_v12, %v9968_v39  ;;  %v2831_v21 = vmul.f32 %v2767_v4, %v2319_v31  ;;  %v2416_v16 = vmul.f32 0.044715, %v12232_v36 }
 0x954   : > { %v10185_v45 = vpop.eup %8208  ;;  %v2417_v53 = vmul.f32 0.044715, %v12233_v37  ;;  %v2607_v18 = vadd.f32 %v2543_v51, %v9970_v28  ;;  %v2881_v13 = vpack.c.bf16 %v2833_v32, %v2829_v43  ;;  %v2835_v27 = vmul.f32 %v2771_v59, %v2323_v15  ;;  %v12235_v43 = vld [vmem:[#allocation93_spill] sm:$0xff] }
 0x955   : > { %v10190_v19 = vpop.eup %8210  ;;  %v2478_v29 = vmul.f32 %v2414_v57, %v9975_v8  ;;  %v2669_v26 = vmul.f32 0.7978846, %v2605_v9  ;;  %v2480_v23 = vmul.f32 %v2416_v16, %v12232_v36  ;;  %v2419_v31 = vmul.f32 0.044715, %v12234_v10 }
 0x956   : > { %v10194_v14 = vpop.eup %8212  ;;  %v2481_v46 = vmul.f32 %v2417_v53, %v12233_v37  ;;  %v2671_v6 = vmul.f32 0.7978846, %v2607_v18  ;;  %3214 = vmatmul.mubr.bf16.gmra.mrb[92].mxu1 %v2881_v13  ;;  %v2883_v4 = vpack.c.bf16 %v2835_v27, %v2831_v21  ;;  %v2418_v15 = vmul.f32 0.044715, %v12235_v43  ;;  %v12236_v21 = vld [vmem:[#allocation94_spill] sm:$0xff] }
 0x957   : > { %v10199_v12 = vpop.eup %8214  ;;  %v2542_v51 = vmul.f32 %v2478_v29, %v9975_v8  ;;  %8220 = vtanh.f32 %v2669_v26  ;;  %v2544_v59 = vmul.f32 %v2480_v23, %v12232_v36  ;;  %v2483_v9 = vmul.f32 %v2419_v31, %v12234_v10 }
 0x958   : > { %v10203_v32 = vpop.eup %8216  ;;  %v2545_v57 = vmul.f32 %v2481_v46, %v12233_v37  ;;  %8222 = vtanh.f32 %v2671_v6  ;;  %3311 = vmatmul.mubr.bf16.gmra.mrb[108].mxu0 %v2883_v4  ;;  %v2482_v53 = vmul.f32 %v2418_v15, %v12235_v43  ;;  %v2420_v18 = vmul.f32 0.044715, %v12236_v21 }
 0x959   : > { %v2606_v16 = vadd.f32 %v2542_v51, %v9975_v8  ;;  %v10211_v13 = vpop.eup %8218  ;;  %v2608_v27 = vadd.f32 %v2544_v59, %v12232_v36  ;;  %v2547_v26 = vmul.f32 %v2483_v9, %v12234_v10  ;;  %v2326_v23 = vmul.f32 0.5, %v9837_v42 }
 0x95a   : > { %v2609_v29 = vadd.f32 %v2545_v57, %v12233_v37  ;;  %v2546_v31 = vmul.f32 %v2482_v53, %v12235_v43  ;;  %v2484_v6 = vmul.f32 %v2420_v18, %v12236_v21  ;;  %v2330_v4 = vmul.f32 0.5, %v9855_v35 }
 0x95b   : > { %v2670_v46 = vmul.f32 0.7978846, %v2606_v16  ;;  %v2672_v51 = vmul.f32 0.7978846, %v2608_v27  ;;  %v2611_v28 = vadd.f32 %v2547_v26, %v12234_v10  ;;  %v2774_v39 = vadd.f32 1.0, %v10057_v41 }
 0x95c   : > { %v2673_v15 = vmul.f32 0.7978846, %v2609_v29  ;;  %v2610_v59 = vadd.f32 %v2546_v31, %v12235_v43  ;;  %v2548_v57 = vmul.f32 %v2484_v6, %v12236_v21  ;;  %v2778_v42 = vadd.f32 1.0, %v10075_v11  ;;  %v12237_v31 = vld [vmem:[#allocation71_spill] sm:$0xff] }
 0x95d   : > { %8224 = vtanh.f32 %v2670_v46  ;;  %v2675_v9 = vmul.f32 0.7978846, %v2611_v28  ;;  %v2838_v16 = vmul.f32 %v2774_v39, %v2326_v23  ;;  %v2328_v53 = vmul.f32 0.5, %v9839_v34 }
 0x95e   : > { %8226 = vtanh.f32 %v2672_v51  ;;  %v2674_v35 = vmul.f32 0.7978846, %v2610_v59  ;;  %v2612_v18 = vadd.f32 %v2548_v57, %v12236_v21  ;;  %v2842_v27 = vmul.f32 %v2778_v42, %v2330_v4 }
 0x95f   : > { %8228 = vtanh.f32 %v2673_v15  ;;  %v2332_v41 = vmul.f32 0.5, %v9857_v48  ;;  %v2776_v29 = vadd.f32 1.0, %v10062_v58  ;;  %v2780_v26 = vadd.f32 1.0, %v10080_v22  ;;  %v12238_v58 = vld [vmem:[#allocation72_spill] sm:$0xff] }
 0x960   : > { %8230 = vtanh.f32 %v2675_v9  ;;  %v2676_v46 = vmul.f32 0.7978846, %v2612_v18  ;;  %v2886_v11 = vpack.c.bf16 %v2842_v27, %v2838_v16  ;;  %v2325_v28 = vmul.f32 0.5, %v12237_v31 }
 0x961   : > { %8232 = vtanh.f32 %v2674_v35  ;;  %v10231_v39 = vpop.eup %8220  ;;  %v2840_v34 = vmul.f32 %v2776_v29, %v2328_v53  ;;  %v2844_v23 = vmul.f32 %v2780_v26, %v2332_v41  ;;  %v2329_v6 = vmul.f32 0.5, %v9846_v55 }
 0x962   : > { %v2773_v4 = vadd.f32 1.0, %v10048_v54  ;;  %v10235_v51 = vpop.eup %8222  ;;  %8234 = vtanh.f32 %v2676_v46  ;;  %3221 = vmatprep.mubr.bf16.mxu1 %v2886_v11  ;;  %v2777_v48 = vadd.f32 1.0, %v10066_v40  ;;  %v2327_v22 = vmul.f32 0.5, %v12238_v58 }
 0x963   : > { %v2331_v15 = vmul.f32 0.5, %v9848_v49  ;;  %v2888_v59 = vpack.c.bf16 %v2844_v23, %v2840_v34  ;;  %v2775_v42 = vadd.f32 1.0, %v10053_v7  ;;  %v2779_v9 = vadd.f32 1.0, %v10070_v60  ;;  %v12239_v23 = vld [vmem:[#allocation73_spill] sm:$0xff] }
 0x964   : > { %v2837_v57 = vmul.f32 %v2773_v4, %v2325_v28  ;;  %v2841_v16 = vmul.f32 %v2777_v48, %v2329_v6  ;;  %v2334_v55 = vmul.f32 0.5, %v12205_v17  ;;  %v2338_v54 = vmul.f32 0.5, %v12209_v20 }
 0x965   : > { %v2782_v53 = vadd.f32 1.0, %v10121_v52  ;;  %3318 = vmatprep.mubr.bf16.mxu0 %v2888_v59  ;;  %v2839_v35 = vmul.f32 %v2775_v42, %v2327_v22  ;;  %v2843_v40 = vmul.f32 %v2779_v9, %v2331_v15  ;;  %v2786_v18 = vadd.f32 1.0, %v10139_v47  ;;  %v12241_v15 = vld [vmem:[#allocation74_spill] sm:$0xff]  ;;  %v12242_v59 = vld [vmem:[#allocation83_spill] sm:$0xff] }
 0x966   : > { %v2336_v49 = vmul.f32 0.5, %v12206_v0  ;;  %v2885_v41 = vpack.c.bf16 %v2841_v16, %v2837_v57  ;;  %v2340_v60 = vmul.f32 0.5, %v12210_v56  ;;  %v2784_v29 = vadd.f32 1.0, %v10126_v62 }
 0x967   : > { %v10247_v27 = vpop.eup %8224  ;;  %v2846_v7 = vmul.f32 %v2782_v53, %v2334_v55  ;;  %v2887_v20 = vpack.c.bf16 %v2843_v40, %v2839_v35  ;;  %v2850_v26 = vmul.f32 %v2786_v18, %v2338_v54  ;;  %v2788_v52 = vadd.f32 1.0, %v10144_v3  ;;  %v12240_v3 = vld [vmem:[#allocation77_spill] sm:$0xff] }
 0x968   : > { %v10251_v17 = vpop.eup %8226  ;;  %v2333_v46 = vmul.f32 0.5, %v9875_v44  ;;  %3222 = vmatmul.mubr.bf16.gmra.mrb[96].mxu1 %v2885_v41  ;;  %v2848_v0 = vmul.f32 %v2784_v29, %v2336_v49  ;;  %v2337_v47 = vmul.f32 0.5, %v12207_v2  ;;  %v2781_v31 = vadd.f32 1.0, %v10103_v1 }
 0x969   : > { %v10255_v11 = vpop.eup %8228  ;;  %v2785_v56 = vadd.f32 1.0, %v10130_v33  ;;  %3319 = vmatmul.mubr.bf16.gmra.mrb[112].mxu0 %v2887_v20  ;;  %v2890_v62 = vpack.c.bf16 %v2850_v26, %v2846_v7  ;;  %v2852_v34 = vmul.f32 %v2788_v52, %v2340_v60  ;;  %v2335_v6 = vmul.f32 0.5, %v12239_v23  ;;  %v12243_v7 = vld [vmem:[#allocation81_spill] sm:$0xff]  ;;  %v12244_v52 = vld [vmem:[#allocation82_spill] sm:$0xff] }
 0x96a   : > { %v10260_v28 = vpop.eup %8230  ;;  %v2339_v4 = vmul.f32 0.5, %v12240_v3  ;;  %v2845_v48 = vmul.f32 %v2781_v31, %v2333_v46  ;;  %v2783_v22 = vadd.f32 1.0, %v10107_v24  ;;  %v2787_v2 = vadd.f32 1.0, %v12241_v15 }
 0x96b   : > { %v8233_v44 = vpop.eup %8232  ;;  %v2849_v58 = vmul.f32 %v2785_v56, %v2337_v47  ;;  %3229 = vmatprep.mubr.bf16.mxu1 %v2890_v62  ;;  %v2892_v1 = vpack.c.bf16 %v2852_v34, %v2848_v0  ;;  %v2342_v33 = vmul.f32 0.5, %v12242_v59  ;;  %v2346_v57 = vmul.f32 0.5, %v12223_v50 }
 0x96c   : > { %v2790_v42 = vadd.f32 1.0, %v10185_v45  ;;  %v8235_v9 = vpop.eup %8234  ;;  %v2847_v55 = vmul.f32 %v2783_v22, %v2335_v6  ;;  %v2851_v54 = vmul.f32 %v2787_v2, %v2339_v4  ;;  %v2794_v53 = vadd.f32 1.0, %v10203_v32 }
 0x96d   : > { %v2889_v16 = vpack.c.bf16 %v2849_v58, %v2845_v48  ;;  %3326 = vmatprep.mubr.bf16.mxu0 %v2892_v1  ;;  %v2344_v24 = vmul.f32 0.5, %v12220_v63  ;;  %v2348_v40 = vmul.f32 0.5, %v12224_v5  ;;  %v2792_v18 = vadd.f32 1.0, %v10190_v19  ;;  %v12246_v1 = vld [vmem:[#allocation89_spill] sm:$0xff] }
 0x96e   : > { %v2854_v35 = vmul.f32 %v2790_v42, %v2342_v33  ;;  %v2891_v49 = vpack.c.bf16 %v2851_v54, %v2847_v55  ;;  %v2858_v41 = vmul.f32 %v2794_v53, %v2346_v57  ;;  %v2796_v50 = vadd.f32 1.0, %v10211_v13 }
 0x96f   : > { %v2341_v45 = vmul.f32 0.5, %v12243_v7  ;;  %v2856_v60 = vmul.f32 %v2792_v18, %v2344_v24  ;;  %v2345_v29 = vmul.f32 0.5, %v9939_v25  ;;  %v2789_v20 = vadd.f32 1.0, %v10167_v61 }
 0x970   : > { %v2793_v32 = vadd.f32 1.0, %v10194_v14  ;;  %3230 = vmatmul.mubr.bf16.gmra.mrb[100].mxu1 %v2889_v16  ;;  %v2894_v26 = vpack.c.bf16 %v2858_v41, %v2854_v35  ;;  %v2860_v63 = vmul.f32 %v2796_v50, %v2348_v40  ;;  %v2343_v5 = vmul.f32 0.5, %v12244_v52 }
 0x971   : > { %v2347_v19 = vmul.f32 0.5, %v12221_v30  ;;  %3327 = vmatmul.mubr.bf16.gmra.mrb[116].mxu0 %v2891_v49  ;;  %v2853_v46 = vmul.f32 %v2789_v20, %v2341_v45  ;;  %v2791_v13 = vadd.f32 1.0, %v10171_v38  ;;  %v2795_v47 = vadd.f32 1.0, %v10199_v12  ;;  %v12248_v45 = vld [vmem:[#allocation40_spill] sm:$0xff] }
 0x972   : > { %v2857_v0 = vmul.f32 %v2793_v32, %v2345_v29  ;;  %3237 = vmatprep.mubr.bf16.mxu1 %v2894_v26  ;;  %v2896_v25 = vpack.c.bf16 %v2860_v63, %v2856_v60  ;;  %v2350_v61 = vmul.f32 0.5, %v9975_v8  ;;  %v2354_v14 = vmul.f32 0.5, %v12235_v43  ;;  %v12245_v8 = vld [vmem:[#allocation88_spill] sm:$0xff]  ;;  %v12249_v29 = vld [vmem:[#allocation41_spill] sm:$0xff] }
 0x973   : > { %v2798_v31 = vadd.f32 1.0, %v10247_v27  ;;  %v2855_v62 = vmul.f32 %v2791_v13, %v2343_v5  ;;  %v2859_v34 = vmul.f32 %v2795_v47, %v2347_v19  ;;  %v2802_v23 = vadd.f32 1.0, %v8233_v44 }
 0x974   : > { %v2893_v56 = vpack.c.bf16 %v2857_v0, %v2853_v46  ;;  %3334 = vmatprep.mubr.bf16.mxu0 %v2896_v25  ;;  %v2352_v6 = vmul.f32 0.5, %v12232_v36  ;;  %v2356_v38 = vmul.f32 0.5, %v12236_v21  ;;  %v2800_v12 = vadd.f32 1.0, %v10251_v17 }
 0x975   : > { %v2862_v30 = vmul.f32 %v2798_v31, %v2350_v61  ;;  %v2895_v3 = vpack.c.bf16 %v2859_v34, %v2855_v62  ;;  %v2866_v4 = vmul.f32 %v2802_v23, %v2354_v14  ;;  %v2804_v48 = vadd.f32 1.0, %v8235_v9  ;;  %v12251_v34 = vld [vmem:[#allocation42_spill] sm:$0xff] }
 0x976   : > { %v2349_v58 = vmul.f32 0.5, %v12245_v8  ;;  %v2864_v43 = vmul.f32 %v2800_v12, %v2352_v6  ;;  %v2353_v27 = vmul.f32 0.5, %v12233_v37  ;;  %v2797_v22 = vadd.f32 1.0, %v10231_v39 }
 0x977   : > { %v2801_v44 = vadd.f32 1.0, %v10255_v11  ;;  %v2898_v15 = vpack.c.bf16 %v2866_v4, %v2862_v30  ;;  %v2868_v2 = vmul.f32 %v2804_v48, %v2356_v38  ;;  %v2351_v36 = vmul.f32 0.5, %v12246_v1 }
 0x978   : > { %v2355_v21 = vmul.f32 0.5, %v12234_v10  ;;  %3238 = vmatmul.mubr.bf16.gmra.mrb[104].mxu1 %v2893_v56  ;;  %v2861_v17 = vmul.f32 %v2797_v22, %v2349_v58  ;;  %v2799_v33 = vadd.f32 1.0, %v10235_v51  ;;  %v2803_v57 = vadd.f32 1.0, %v10260_v28  ;;  %v12250_v56 = vld [vmem:[#allocation43_spill] sm:$0xff] }
 0x979   : > { %v2865_v59 = vmul.f32 %v2801_v44, %v2353_v27  ;;  %3335 = vmatmul.mubr.bf16.gmra.mrb[120].mxu0 %v2895_v3  ;;  %3245 = vmatprep.mubr.bf16.mxu1 %v2898_v15  ;;  %v2900_v37 = vpack.c.bf16 %v2868_v2, %v2864_v43  ;;  %v12247_v16 = vmov 0   ;;  %v12252_v2 = vld [vmem:[#allocation45_spill] sm:$0xff] }
 0x97a   : > { %v2863_v39 = vmul.f32 %v2799_v33, %v2351_v36  ;;  %v2867_v9 = vmul.f32 %v2803_v57, %v2355_v21  ;;  %v12253_v36 = vld [vmem:[#allocation44_spill] sm:$0xff] }
 0x97b   : > { %v2897_v42 = vpack.c.bf16 %v2865_v59, %v2861_v17  ;;  %3342 = vmatprep.mubr.bf16.mxu0 %v2900_v37 }
 0x97c   : > { %v2899_v11 = vpack.c.bf16 %v2867_v9, %v2863_v39 }
 0x980   : > { %3246 = vmatmul.mubr.bf16.gmra.mrb[108].mxu1 %v2897_v42 }
 0x981   : > { %3343 = vmatmul.mubr.bf16.gmra.mrb[124].mxu0 %v2899_v11  ;;  %3784 = vmatprep.mubr.bf16.mxu1 %v12247_v16 }
 0x9ee   : > { %v7050_v10 = vpop.f32.mrb[80].mxu1 }
 0x9ef   : > { %v7051_v55 = vpop.f32.mrb[81].mxu1 }
 0x9f0   : > { %v7052_v54 = vadd.f32 %v7051_v55, %v7050_v10  ;;  %v7053_v53 = vpop.f32.mrb[82].mxu1 }
 0x9f1   : > { %v7114_v35 = vpop.f32.mrb[96].mxu0  ;;  %v7054_v51 = vpop.f32.mrb[83].mxu1 }
 0x9f2   : > { %v7115_v24 = vpop.f32.mrb[97].mxu0  ;;  %v7055_v28 = vadd.f32 %v7054_v51, %v7053_v53  ;;  %v12254_v51 = vld [vmem:[#allocation47_spill] sm:$0xff] }
 0x9f3   : > { %v7116_v40 = vadd.f32 %v7115_v24, %v7114_v35  ;;  %v7117_v18 = vpop.f32.mrb[98].mxu0 }
 0x9f4   : > { %v7118_v49 = vpop.f32.mrb[99].mxu0 }
 0x9f5   : > { %v3289_v41 = vadd.f32 %v7116_v40, %v7052_v54  ;;  %v7119_v50 = vadd.f32 %v7118_v49, %v7117_v18 }
 0x9f7   : > { %v3292_v7 = vadd.f32 %v7119_v50, %v7055_v28  ;;  %v10298_v60 = vadd.f32 %v3289_v41, %v12248_v45  ;;  %v12255_v28 = vld [vmem:[#allocation46_spill] sm:$0xff] }
 0x9f9   : > { %3367 = vadd.xlane.f32.xlu1 %v10298_v60  ;;  %v10302_v20 = vadd.f32 %v3292_v7, %v12249_v29 }
 0x9fb   : > { %3369 = vadd.xlane.f32.xlu0 %v10302_v20 }
 0xa03   : > { %v7056_v32 = vpop.f32.mrb[84].mxu1 }
 0xa04   : > { %v7057_v26 = vpop.f32.mrb[85].mxu1 }
 0xa05   : > { %v7120_v63 = vpop.f32.mrb[100].mxu0  ;;  %v7058_v52 = vadd.f32 %v7057_v26, %v7056_v32  ;;  %v7059_v5 = vpop.f32.mrb[86].mxu1 }
 0xa06   : > { %v7121_v19 = vpop.f32.mrb[101].mxu0  ;;  %v7060_v46 = vpop.f32.mrb[87].mxu1 }
 0xa07   : > { %v7122_v0 = vadd.f32 %v7121_v19, %v7120_v63  ;;  %v7123_v13 = vpop.f32.mrb[102].mxu0  ;;  %v7061_v47 = vadd.f32 %v7060_v46, %v7059_v5 }
 0xa08   : > { %v7124_v25 = vpop.f32.mrb[103].mxu0 }
 0xa09   : > { %v3297_v61 = vadd.f32 %v7122_v0, %v7058_v52  ;;  %v7125_v14 = vadd.f32 %v7124_v25, %v7123_v13  ;;  %v12256_v0 = vld [vmem:[#allocation49_spill] sm:$0xff] }
 0xa0b   : > { %v3300_v31 = vadd.f32 %v7125_v14, %v7061_v47  ;;  %v10306_v62 = vadd.f32 %v3297_v61, %v12250_v56  ;;  %v12257_v14 = vld [vmem:[#allocation48_spill] sm:$0xff] }
 0xa0d   : > { %3371 = vadd.xlane.f32.xlu1 %v10306_v62  ;;  %v10310_v23 = vadd.f32 %v3300_v31, %v12251_v34 }
 0xa0f   : > { %3373 = vadd.xlane.f32.xlu0 %v10310_v23 }
 0xa16   : > { %v7062_v30 = vpop.f32.mrb[88].mxu1 }
 0xa17   : > { %v7063_v6 = vpop.f32.mrb[89].mxu1 }
 0xa18   : > { %v7126_v38 = vpop.f32.mrb[104].mxu0  ;;  %v7064_v12 = vadd.f32 %v7063_v6, %v7062_v30  ;;  %v7065_v3 = vpop.f32.mrb[90].mxu1 }
 0xa19   : > { %v7127_v4 = vpop.f32.mrb[105].mxu0  ;;  %v7066_v48 = vpop.f32.mrb[91].mxu1 }
 0xa1a   : > { %v7128_v8 = vadd.f32 %v7127_v4, %v7126_v38  ;;  %v7129_v58 = vpop.f32.mrb[106].mxu0  ;;  %v7067_v43 = vadd.f32 %v7066_v48, %v7065_v3 }
 0xa1b   : > { %v7130_v27 = vpop.f32.mrb[107].mxu0 }
 0xa1c   : > { %v3305_v22 = vadd.f32 %v7128_v8, %v7064_v12  ;;  %v7131_v44 = vadd.f32 %v7130_v27, %v7129_v58 }
 0xa1e   : > { %v3308_v15 = vadd.f32 %v7131_v44, %v7067_v43  ;;  %v10314_v1 = vadd.f32 %v3305_v22, %v12252_v2  ;;  %v12258_v43 = vld [vmem:[#allocation51_spill] sm:$0xff]  ;;  %v12259_v2 = vld [vmem:[#allocation50_spill] sm:$0xff] }
 0xa20   : > { %3375 = vadd.xlane.f32.xlu1 %v10314_v1  ;;  %v10318_v21 = vadd.f32 %v3308_v15, %v12253_v36 }
 0xa22   : > { %3377 = vadd.xlane.f32.xlu0 %v10318_v21 }
 0xa29   : > { %v7068_v17 = vpop.f32.mrb[92].mxu1 }
 0xa2a   : > { %v7069_v59 = vpop.f32.mrb[93].mxu1 }
 0xa2b   : > { %v7132_v33 = vpop.f32.mrb[108].mxu0  ;;  %v7070_v57 = vadd.f32 %v7069_v59, %v7068_v17  ;;  %v7071_v37 = vpop.f32.mrb[94].mxu1 }
 0xa2c   : > { %v7133_v42 = vpop.f32.mrb[109].mxu0  ;;  %v7072_v39 = vpop.f32.mrb[95].mxu1 }
 0xa2d   : > { %v7134_v9 = vadd.f32 %v7133_v42, %v7132_v33  ;;  %v7135_v11 = vpop.f32.mrb[110].mxu0  ;;  %v7073_v10 = vadd.f32 %v7072_v39, %v7071_v37 }
 0xa2e   : > { %v7136_v55 = vpop.f32.mrb[111].mxu0 }
 0xa2f   : > { %v3313_v54 = vadd.f32 %v7134_v9, %v7070_v57  ;;  %v7137_v53 = vadd.f32 %v7136_v55, %v7135_v11 }
 0xa31   : > { %v3316_v35 = vadd.f32 %v7137_v53, %v7073_v10  ;;  %v10322_v24 = vadd.f32 %v3313_v54, %v12254_v51  ;;  %v12260_v54 = vld [vmem:[#allocation53_spill] sm:$0xff] }
 0xa33   : > { %3379 = vadd.xlane.f32.xlu1 %v10322_v24  ;;  %v10326_v40 = vadd.f32 %v3316_v35, %v12255_v28 }
 0xa35   : > { %3381 = vadd.xlane.f32.xlu0 %v10326_v40 }
 0xa3b   : > { %v7074_v18 = vpop.f32.mrb[96].mxu1 }
 0xa3c   : > { %v7138_v49 = vpop.f32.mrb[112].mxu0  ;;  %v7075_v41 = vpop.f32.mrb[97].mxu1 }
 0xa3d   : > { %v7076_v50 = vadd.f32 %v7075_v41, %v7074_v18  ;;  %v7139_v7 = vpop.f32.mrb[113].mxu0  ;;  %v7077_v45 = vpop.f32.mrb[98].mxu1  ;;  %v12261_v18 = vld [vmem:[#allocation52_spill] sm:$0xff] }
 0xa3e   : > { %v7140_v29 = vadd.f32 %v7139_v7, %v7138_v49  ;;  %v7141_v32 = vpop.f32.mrb[114].mxu0  ;;  %v7078_v26 = vpop.f32.mrb[99].mxu1 }
 0xa3f   : > { %v7079_v63 = vadd.f32 %v7078_v26, %v7077_v45  ;;  %v7142_v52 = vpop.f32.mrb[115].mxu0 }
 0xa40   : > { %v3321_v5 = vadd.f32 %v7140_v29, %v7076_v50  ;;  %v7143_v19 = vadd.f32 %v7142_v52, %v7141_v32 }
 0xa42   : > { %v3324_v46 = vadd.f32 %v7143_v19, %v7079_v63  ;;  %v10330_v13 = vadd.f32 %v3321_v5, %v12256_v0 }
 0xa43   : > { %v7080_v47 = vpop.f32.mrb[100].mxu1 }
 0xa44   : > { %v7144_v25 = vpop.f32.mrb[116].mxu0  ;;  %3383 = vadd.xlane.f32.xlu1 %v10330_v13  ;;  %v7081_v61 = vpop.f32.mrb[101].mxu1  ;;  %v10334_v31 = vadd.f32 %v3324_v46, %v12257_v14  ;;  %v12262_v46 = vld [vmem:[#allocation55_spill] sm:$0xff]  ;;  %v7894_v14 = vld [vmem:[#allocation5 + $0xc4] ss:$12 sps:$4 sm:$0xff]  }
 0xa45   : > { %v7082_v56 = vadd.f32 %v7081_v61, %v7080_v47  ;;  %v7145_v34 = vpop.f32.mrb[117].mxu0  ;;  %v7083_v30 = vpop.f32.mrb[102].mxu1  ;;  %v12263_v47 = vld [vmem:[#allocation54_spill] sm:$0xff]  ;;  %3752 = vmatprep.subr.bf16.mxu1 %v7894_v14 }
 0xa46   : > { %v7146_v6 = vadd.f32 %v7145_v34, %v7144_v25  ;;  %v7147_v38 = vpop.f32.mrb[118].mxu0  ;;  %3385 = vadd.xlane.f32.xlu0 %v10334_v31  ;;  %v7084_v12 = vpop.f32.mrb[103].mxu1  ;;  %v7892_v61 = vld [vmem:[#allocation5 + $0xc0] ss:$12 sps:$4 sm:$0xff]   ;;  %v7895_v34 = vld [vmem:[#allocation5 + $0xd8] ss:$12 sps:$4 sm:$0xff]  }
 0xa47   : > { %v7085_v3 = vadd.f32 %v7084_v12, %v7083_v30  ;;  %v7148_v4 = vpop.f32.mrb[119].mxu0  ;;  %3753 = vmatpush1.bf16.msra.mxu1 %v7892_v61  ;;  %v7900_v30 = vld [vmem:[#allocation5 + $0xf4] ss:$12 sps:$4 sm:$0xff]  }
 0xa48   : > { %v3329_v48 = vadd.f32 %v7146_v6, %v7082_v56  ;;  %v7149_v8 = vadd.f32 %v7148_v4, %v7147_v38  ;;  %v7897_v56 = vld [vmem:[#allocation5 + $0xdc] ss:$12 sps:$4 sm:$0xff]   ;;  %v7903_v38 = vld [vmem:[#allocation5 + $0x10c] ss:$12 sps:$4 sm:$0xff]  }
 0xa49   : > { %3754 = vmatprep.subr.bf16.mxu1 %v7897_v56  ;;  %v7898_v6 = vld [vmem:[#allocation5 + $0xf0] ss:$12 sps:$4 sm:$0xff]   ;;  %v7901_v12 = vld [vmem:[#allocation5 + $0x108] ss:$12 sps:$4 sm:$0xff]   ;;  %v7904_v4 = vld [vmem:[#allocation5 + $0x120] ss:$12 sps:$4 sm:$0xff]  }
 0xa4a   : > { %v3332_v58 = vadd.f32 %v7149_v8, %v7085_v3  ;;  %v10338_v27 = vadd.f32 %v3329_v48, %v12258_v43  ;;  %v7906_v3 = vld [vmem:[#allocation5 + $0x124] ss:$12 sps:$4 sm:$0xff]   ;;  %v7921_v61 = vld [vmem:[#allocation5 + $0x140] ss:$12 sps:$4 sm:$0xff]  }
 0xa4b   : > { %v7086_v22 = vpop.f32.mrb[104].mxu1  ;;  %3755 = vmatpush1.bf16.msra.mxu1 %v7895_v34 }
 0xa4c   : > { %v7150_v44 = vpop.f32.mrb[120].mxu0  ;;  %3387 = vadd.xlane.f32.xlu1 %v10338_v27  ;;  %v7087_v15 = vpop.f32.mrb[105].mxu1  ;;  %v10342_v36 = vadd.f32 %v3332_v58, %v12259_v2  ;;  %3756 = vmatprep.subr.bf16.mxu1 %v7900_v30 }
 0xa4d   : > { %v7088_v17 = vadd.f32 %v7087_v15, %v7086_v22  ;;  %v7151_v59 = vpop.f32.mrb[121].mxu0  ;;  %v7089_v33 = vpop.f32.mrb[106].mxu1 }
 0xa4e   : > { %v7152_v57 = vadd.f32 %v7151_v59, %v7150_v44  ;;  %v7153_v37 = vpop.f32.mrb[122].mxu0  ;;  %3389 = vadd.xlane.f32.xlu0 %v10342_v36  ;;  %v7090_v42 = vpop.f32.mrb[107].mxu1 }
 0xa4f   : > { %v7091_v39 = vadd.f32 %v7090_v42, %v7089_v33  ;;  %v7154_v9 = vpop.f32.mrb[123].mxu0  ;;  %3757 = vmatpush1.bf16.msra.mxu1 %v7898_v6 }
 0xa50   : > { %v3337_v11 = vadd.f32 %v7152_v57, %v7088_v17  ;;  %v7155_v10 = vadd.f32 %v7154_v9, %v7153_v37  ;;  %3758 = vmatprep.subr.bf16.mxu1 %v7903_v38 }
 0xa52   : > { %v3340_v55 = vadd.f32 %v7155_v10, %v7091_v39  ;;  %v10346_v53 = vadd.f32 %v3337_v11, %v12260_v54  ;;  %v7907_v39 = vld [vmem:[#allocation5 + $0xc8] ss:$12 sps:$4 sm:$0xff]   ;;  %v7908_v10 = vld [vmem:[#allocation5 + $0x138] ss:$12 sps:$4 sm:$0xff]  }
 0xa53   : > { %v7092_v35 = vpop.f32.mrb[108].mxu1  ;;  %3759 = vmatpush1.bf16.msra.mxu1 %v7901_v12  ;;  %7524 = vmatprep.subr.bf16.mxu0 %v7907_v39 }
 0xa54   : > { %v7156_v51 = vpop.f32.mrb[124].mxu0  ;;  %3391 = vadd.xlane.f32.xlu1 %v10346_v53  ;;  %v7093_v28 = vpop.f32.mrb[109].mxu1  ;;  %v10350_v49 = vadd.f32 %v3340_v55, %v12261_v18  ;;  %3760 = vmatprep.subr.bf16.mxu1 %v7906_v3  ;;  %v7910_v55 = vld [vmem:[#allocation5 + $0x13c] ss:$12 sps:$4 sm:$0xff]   ;;  %v7912_v18 = vld [vmem:[#allocation5 + $0xf8] ss:$12 sps:$4 sm:$0xff]  }
 0xa55   : > { %v7094_v41 = vadd.f32 %v7093_v28, %v7092_v35  ;;  %v7157_v50 = vpop.f32.mrb[125].mxu0  ;;  %v7095_v7 = vpop.f32.mrb[110].mxu1  ;;  %7525 = vmatpush3.bf16.msra.mxu0 %v7907_v39  ;;  %v7922_v3 = vld [vmem:[#allocation5 + $0x158] ss:$12 sps:$4 sm:$0xff]  }
 0xa56   : > { %v7158_v45 = vadd.f32 %v7157_v50, %v7156_v51  ;;  %v7159_v29 = vpop.f32.mrb[126].mxu0  ;;  %3393 = vadd.xlane.f32.xlu0 %v10350_v49  ;;  %v7096_v32 = vpop.f32.mrb[111].mxu1  ;;  %v7913_v50 = vld [vmem:[#allocation5 + $0x150] ss:$12 sps:$4 sm:$0xff]  }
 0xa57   : > { %v7097_v26 = vadd.f32 %v7096_v32, %v7095_v7  ;;  %v7160_v63 = vpop.f32.mrb[127].mxu0  ;;  %3761 = vmatpush1.bf16.msra.mxu1 %v7904_v4  ;;  %v7916_v7 = vld [vmem:[#allocation5 + $0x110] ss:$12 sps:$4 sm:$0xff]  }
 0xa58   : > { %v3345_v52 = vadd.f32 %v7158_v45, %v7094_v41  ;;  %v7161_v5 = vadd.f32 %v7160_v63, %v7159_v29  ;;  %3762 = vmatprep.subr.bf16.mxu1 %v7910_v55 }
 0xa5a   : > { %v3348_v19 = vadd.f32 %v7161_v5, %v7097_v26  ;;  %v10354_v0 = vadd.f32 %v3345_v52, %v12262_v46  ;;  %v7917_v5 = vld [vmem:[#allocation5 + $0x128] ss:$12 sps:$4 sm:$0xff]  }
 0xa5b   : > { %3763 = vmatpush1.bf16.msra.mxu1 %v7908_v10  ;;  %v7918_v46 = vld [vmem:[#allocation5 + $0x168] ss:$12 sps:$4 sm:$0xff]  }
 0xa5c   : > { %3395 = vadd.xlane.f32.xlu1 %v10354_v0  ;;  %v10358_v25 = vadd.f32 %v3348_v19, %v12263_v47  ;;  %v7920_v47 = vld [vmem:[#allocation5 + $0x16c] ss:$12 sps:$4 sm:$0xff]  }
 0xa5e   : > { %3397 = vadd.xlane.f32.xlu0 %v10358_v25 }
 0xa86   : > { %v3368_v48 = vpop.xlane.xlu1 %3367 }
 0xa87   : > { %v3399_v8 = vmul.f32 0.0078125, %v3368_v48 }
 0xa88   : > { %v3370_v58 = vpop.xlane.xlu0 %3369 }
 0xa89   : > { %v3400_v43 = vmul.f32 0.0078125, %v3370_v58  ;;  %v10362_v22 = vsub.f32 %v10298_v60, %v3399_v8  ;;  %v7923_v8 = vld [vmem:[#allocation5 + $0x170] ss:$12 sps:$4 sm:$0xff]  }
 0xa8b   : > { %v10365_v44 = vsub.f32 %v10302_v20, %v3400_v43  ;;  %v3431_v15 = vmul.f32 %v10362_v22, %v10362_v22 }
 0xa8d   : > { %3447 = vadd.xlane.f32.xlu1 %v3431_v15  ;;  %v3432_v2 = vmul.f32 %v10365_v44, %v10365_v44 }
 0xa8f   : > { %3449 = vadd.xlane.f32.xlu0 %v3432_v2 }
 0xa9a   : > { %v3372_v17 = vpop.xlane.xlu1 %3371 }
 0xa9b   : > { %v3401_v59 = vmul.f32 0.0078125, %v3372_v17 }
 0xa9c   : > { %v3374_v33 = vpop.xlane.xlu0 %3373 }
 0xa9d   : > { %v3402_v57 = vmul.f32 0.0078125, %v3374_v33  ;;  %v10372_v37 = vsub.f32 %v10306_v62, %v3401_v59  ;;  %v7911_v62 = vld [vmem:[#allocation5 + $0xe0] ss:$12 sps:$4 sm:$0xff]  }
 0xa9e   : > { %7526 = vmatprep.subr.bf16.mxu0 %v7911_v62 }
 0xa9f   : > { %v10375_v60 = vsub.f32 %v10310_v23, %v3402_v57  ;;  %v3433_v20 = vmul.f32 %v10372_v37, %v10372_v37  ;;  %7527 = vmatpush3.bf16.msra.mxu0 %v7911_v62 }
 0xaa0   : > { %7528 = vmatprep.subr.bf16.mxu0 %v7912_v18 }
 0xaa1   : > { %3451 = vadd.xlane.f32.xlu1 %v3433_v20  ;;  %v3434_v42 = vmul.f32 %v10375_v60, %v10375_v60 }
 0xaa3   : > { %3453 = vadd.xlane.f32.xlu0 %v3434_v42  ;;  %7529 = vmatpush3.bf16.msra.mxu0 %v7912_v18 }
 0xaa4   : > { %7530 = vmatprep.subr.bf16.mxu0 %v7916_v7 }
 0xaa7   : > { %7531 = vmatpush3.bf16.msra.mxu0 %v7916_v7 }
 0xaa8   : > { %7532 = vmatprep.subr.bf16.mxu0 %v7917_v5 }
 0xaab   : > { %7533 = vmatpush3.bf16.msra.mxu0 %v7917_v5 }
 0xaac   : > { %7534 = vmatprep.subr.bf16.mxu0 %v7921_v61 }
 0xaad   : > { %v3376_v9 = vpop.xlane.xlu1 %3375 }
 0xaae   : > { %v3403_v11 = vmul.f32 0.0078125, %v3376_v9 }
 0xaaf   : > { %v3378_v54 = vpop.xlane.xlu0 %3377  ;;  %7535 = vmatpush3.bf16.msra.mxu0 %v7921_v61 }
 0xab0   : > { %v10382_v23 = vsub.f32 %v10314_v1, %v3403_v11  ;;  %v3404_v35 = vmul.f32 0.0078125, %v3378_v54  ;;  %v7915_v1 = vld [vmem:[#allocation5 + $0x154] ss:$12 sps:$4 sm:$0xff]   ;;  %7536 = vmatprep.subr.bf16.mxu0 %v7922_v3 }
 0xab1   : > { %3764 = vmatprep.subr.bf16.mxu1 %v7915_v1 }
 0xab2   : > { %v10385_v51 = vsub.f32 %v10318_v21, %v3404_v35  ;;  %v3435_v28 = vmul.f32 %v10382_v23, %v10382_v23  ;;  %3765 = vmatpush1.bf16.msra.mxu1 %v7913_v50 }
 0xab3   : > { %3766 = vmatprep.subr.bf16.mxu1 %v7920_v47  ;;  %7537 = vmatpush3.bf16.msra.mxu0 %v7922_v3 }
 0xab4   : > { %3455 = vadd.xlane.f32.xlu1 %v3435_v28  ;;  %v3436_v41 = vmul.f32 %v10385_v51, %v10385_v51  ;;  %7538 = vmatprep.subr.bf16.mxu0 %v7923_v8 }
 0xab6   : > { %3457 = vadd.xlane.f32.xlu0 %v3436_v41  ;;  %3767 = vmatpush1.bf16.msra.mxu1 %v7918_v46  ;;  %v12264_v41 = vld [vmem:[#allocation19_spill] sm:$0xff] }
 0xab7   : > { %7539 = vmatpush3.bf16.msra.mxu0 %v7923_v8  ;;  %v3545_v50 = vsub.s32 2, %v12264_v41  ;;  %v3565_v7 = vsub.s32 3, %v12264_v41 }
 0xac0   : > { %v3380_v21 = vpop.xlane.xlu1 %3379 }
 0xac1   : > { %v3405_v45 = vmul.f32 0.0078125, %v3380_v21 }
 0xac2   : > { %v3382_v29 = vpop.xlane.xlu0 %3381 }
 0xac3   : > { %v10392_v32 = vsub.f32 %v10322_v24, %v3405_v45  ;;  %v3406_v26 = vmul.f32 0.0078125, %v3382_v29 }
 0xac5   : > { %v10395_v63 = vsub.f32 %v10326_v40, %v3406_v26  ;;  %v3437_v52 = vmul.f32 %v10392_v32, %v10392_v32 }
 0xac7   : > { %3459 = vadd.xlane.f32.xlu1 %v3437_v52  ;;  %v3438_v19 = vmul.f32 %v10395_v63, %v10395_v63 }
 0xac9   : > { %3461 = vadd.xlane.f32.xlu0 %v3438_v19 }
 0xad1   : > { %v3384_v24 = vpop.xlane.xlu1 %3383 }
 0xad2   : > { %v3407_v40 = vmul.f32 0.0078125, %v3384_v24 }
 0xad3   : > { %v3386_v14 = vpop.xlane.xlu0 %3385 }
 0xad4   : > { %v10402_v56 = vsub.f32 %v10330_v13, %v3407_v40  ;;  %v3408_v34 = vmul.f32 0.0078125, %v3386_v14 }
 0xad6   : > { %v10405_v30 = vsub.f32 %v10334_v31, %v3408_v34  ;;  %v3439_v6 = vmul.f32 %v10402_v56, %v10402_v56 }
 0xad8   : > { %3463 = vadd.xlane.f32.xlu1 %v3439_v6  ;;  %v3440_v38 = vmul.f32 %v10405_v30, %v10405_v30 }
 0xad9   : > { %v3388_v12 = vpop.xlane.xlu1 %3387 }
 0xada   : > { %v3409_v4 = vmul.f32 0.0078125, %v3388_v12  ;;  %3465 = vadd.xlane.f32.xlu0 %v3440_v38 }
 0xadb   : > { %v3390_v48 = vpop.xlane.xlu0 %3389 }
 0xadc   : > { %v10412_v13 = vsub.f32 %v10338_v27, %v3409_v4  ;;  %v3410_v58 = vmul.f32 0.0078125, %v3390_v48 }
 0xade   : > { %v10415_v31 = vsub.f32 %v10342_v36, %v3410_v58  ;;  %v3441_v43 = vmul.f32 %v10412_v13, %v10412_v13 }
 0xae0   : > { %3467 = vadd.xlane.f32.xlu1 %v3441_v43  ;;  %v3442_v15 = vmul.f32 %v10415_v31, %v10415_v31 }
 0xae1   : > { %v3392_v2 = vpop.xlane.xlu1 %3391 }
 0xae2   : > { %v3411_v17 = vmul.f32 0.0078125, %v3392_v2  ;;  %3469 = vadd.xlane.f32.xlu0 %v3442_v15 }
 0xae3   : > { %v3394_v59 = vpop.xlane.xlu0 %3393 }
 0xae4   : > { %v10422_v27 = vsub.f32 %v10346_v53, %v3411_v17  ;;  %v3412_v33 = vmul.f32 0.0078125, %v3394_v59 }
 0xae6   : > { %v10425_v57 = vsub.f32 %v10350_v49, %v3412_v33  ;;  %v3443_v36 = vmul.f32 %v10422_v27, %v10422_v27 }
 0xae8   : > { %3471 = vadd.xlane.f32.xlu1 %v3443_v36  ;;  %v3444_v20 = vmul.f32 %v10425_v57, %v10425_v57 }
 0xae9   : > { %v3396_v42 = vpop.xlane.xlu1 %3395 }
 0xaea   : > { %v3413_v39 = vmul.f32 0.0078125, %v3396_v42  ;;  %3473 = vadd.xlane.f32.xlu0 %v3444_v20 }
 0xaeb   : > { %v3398_v9 = vpop.xlane.xlu0 %3397 }
 0xaec   : > { %v10432_v11 = vsub.f32 %v10354_v0, %v3413_v39  ;;  %v3414_v53 = vmul.f32 0.0078125, %v3398_v9 }
 0xaee   : > { %v10435_v10 = vsub.f32 %v10358_v25, %v3414_v53  ;;  %v3445_v49 = vmul.f32 %v10432_v11, %v10432_v11  ;;  %v8524_v25 = vld [vmem:[%s11923_s7] sm:$0xff] }
 0xaef   : > { %v10445_v1 = vrot.slane %v8524_v25, %v3545_v50  ;;  %v10451_v5 = vrot.slane %v8524_v25, %v3565_v7 }
 0xaf0   : > { %3475 = vadd.xlane.f32.xlu1 %v3445_v49  ;;  %v3446_v55 = vmul.f32 %v10435_v10, %v10435_v10 }
 0xaf2   : > { %3477 = vadd.xlane.f32.xlu0 %v3446_v55 }
 0xb1a   : > { %v3448_v54 = vpop.xlane.xlu1 %3447 }
 0xb1b   : > { %v3479_v62 = vmul.f32 0.0078125, %v3448_v54 }
 0xb1c   : > { %v3450_v35 = vpop.xlane.xlu0 %3449 }
 0xb1d   : > { %v3495_v28 = vadd.f32 1e-12, %v3479_v62  ;;  %v3480_v18 = vmul.f32 0.0078125, %v3450_v35 }
 0xb1f   : > { %8236 = vrsqrt.f32 %v3495_v28  ;;  %v3496_v0 = vadd.f32 1e-12, %v3480_v18 }
 0xb21   : > { %8238 = vrsqrt.f32 %v3496_v0 }
 0xb29   : > { %v8237_v21 = vpop.eup %8236 }
 0xb2a   : > { %v3527_v45 = vmul.f32 %v8237_v21, %v10362_v22 }
 0xb2b   : > { %v8239_v29 = vpop.eup %8238 }
 0xb2c   : > { %v3547_v26 = vmul.f32 %v10445_v1, %v3527_v45  ;;  %v3528_v52 = vmul.f32 %v8239_v29, %v10365_v44 }
 0xb2e   : > { %v3548_v19 = vmul.f32 %v10445_v1, %v3528_v52  ;;  %v3452_v46 = vpop.xlane.xlu1 %3451  ;;  %v10455_v24 = vadd.f32 %v10451_v5, %v3547_v26 }
 0xb2f   : > { %v3481_v47 = vmul.f32 0.0078125, %v3452_v46 }
 0xb30   : > { %v3454_v61 = vpop.xlane.xlu0 %3453  ;;  %v10458_v40 = vadd.f32 %v10451_v5, %v3548_v19 }
 0xb31   : > { %v3497_v14 = vadd.f32 1e-12, %v3481_v47  ;;  %v3482_v22 = vmul.f32 0.0078125, %v3454_v61 }
 0xb32   : > { %v3583_v34 = vpack.c.bf16 %v10458_v40, %v10455_v24 }
 0xb33   : > { %8240 = vrsqrt.f32 %v3497_v14  ;;  %v3498_v44 = vadd.f32 1e-12, %v3482_v22 }
 0xb34   : > { %3785 = vmatmul.mubr.bf16.vlgmr.msra.gmra.mrb[112].mxu1 %v3583_v34  ;;  %7540 = vmatprep.mubr.bf16.mxu0 %v3583_v34 }
 0xb35   : > { %8242 = vrsqrt.f32 %v3498_v44  ;;  %3794 = vmatprep.mubr.bf16.mxu1 %v12247_v16 }
 0xb3d   : > { %v8241_v6 = vpop.eup %8240 }
 0xb3e   : > { %v3529_v38 = vmul.f32 %v8241_v6, %v10372_v37 }
 0xb3f   : > { %v8243_v12 = vpop.eup %8242 }
 0xb40   : > { %v3530_v3 = vmul.f32 %v8243_v12, %v10375_v60  ;;  %v3549_v4 = vmul.f32 %v10445_v1, %v3529_v38 }
 0xb41   : > { %v3456_v48 = vpop.xlane.xlu1 %3455 }
 0xb42   : > { %v3483_v8 = vmul.f32 0.0078125, %v3456_v48  ;;  %v3550_v58 = vmul.f32 %v10445_v1, %v3530_v3  ;;  %v10468_v17 = vadd.f32 %v10451_v5, %v3549_v4 }
 0xb43   : > { %v3458_v43 = vpop.xlane.xlu0 %3457 }
 0xb44   : > { %v3499_v15 = vadd.f32 1e-12, %v3483_v8  ;;  %v3484_v2 = vmul.f32 0.0078125, %v3458_v43  ;;  %v10471_v59 = vadd.f32 %v10451_v5, %v3550_v58 }
 0xb46   : > { %8244 = vrsqrt.f32 %v3499_v15  ;;  %v3500_v37 = vadd.f32 1e-12, %v3484_v2  ;;  %v3584_v60 = vpack.c.bf16 %v10471_v59, %v10468_v17 }
 0xb48   : > { %8246 = vrsqrt.f32 %v3500_v37  ;;  %3795 = vmatmul.mubr.bf16.gmra.mrb[116].mxu1 %v3584_v60  ;;  %7541 = vmatmul.mubr.bf16.vlgmr.msra.gmra.mrb[128].mxu0 %v3584_v60 }
 0xb49   : > { %3804 = vmatprep.mubr.bf16.mxu1 %v12247_v16 }
 0xb50   : > { %v8245_v33 = vpop.eup %8244 }
 0xb51   : > { %v3531_v36 = vmul.f32 %v8245_v33, %v10382_v23 }
 0xb52   : > { %v8247_v20 = vpop.eup %8246 }
 0xb53   : > { %v3532_v42 = vmul.f32 %v8247_v20, %v10385_v51  ;;  %v3551_v39 = vmul.f32 %v10445_v1, %v3531_v36 }
 0xb54   : > { %v3460_v9 = vpop.xlane.xlu1 %3459 }
 0xb55   : > { %v3485_v53 = vmul.f32 0.0078125, %v3460_v9  ;;  %v3552_v49 = vmul.f32 %v10445_v1, %v3532_v42  ;;  %v10481_v35 = vadd.f32 %v10451_v5, %v3551_v39 }
 0xb56   : > { %v3462_v55 = vpop.xlane.xlu0 %3461 }
 0xb57   : > { %v3501_v54 = vadd.f32 1e-12, %v3485_v53  ;;  %v3486_v62 = vmul.f32 0.0078125, %v3462_v55  ;;  %v10484_v28 = vadd.f32 %v10451_v5, %v3552_v49 }
 0xb59   : > { %8248 = vrsqrt.f32 %v3501_v54  ;;  %v3502_v23 = vadd.f32 1e-12, %v3486_v62  ;;  %v3585_v51 = vpack.c.bf16 %v10484_v28, %v10481_v35 }
 0xb5b   : > { %8250 = vrsqrt.f32 %v3502_v23  ;;  %3805 = vmatmul.mubr.bf16.gmra.mrb[120].mxu1 %v3585_v51  ;;  %7544 = vmatprep.mubr.bf16.mxu0 %v3585_v51 }
 0xb5c   : > { %3814 = vmatprep.mubr.bf16.mxu1 %v12247_v16 }
 0xb63   : > { %v8249_v18 = vpop.eup %8248 }
 0xb64   : > { %v3533_v0 = vmul.f32 %v8249_v18, %v10392_v32 }
 0xb65   : > { %v8251_v50 = vpop.eup %8250  ;;  %v3464_v25 = vpop.xlane.xlu1 %3463 }
 0xb66   : > { %v3487_v7 = vmul.f32 0.0078125, %v3464_v25  ;;  %v3534_v21 = vmul.f32 %v8251_v50, %v10395_v63  ;;  %v3553_v45 = vmul.f32 %v10445_v1, %v3533_v0 }
 0xb67   : > { %v3466_v29 = vpop.xlane.xlu0 %3465 }
 0xb68   : > { %v3503_v26 = vadd.f32 1e-12, %v3487_v7  ;;  %v3488_v52 = vmul.f32 0.0078125, %v3466_v29  ;;  %v3554_v19 = vmul.f32 %v10445_v1, %v3534_v21  ;;  %v10494_v47 = vadd.f32 %v10451_v5, %v3553_v45 }
 0xb6a   : > { %8252 = vrsqrt.f32 %v3503_v26  ;;  %v3504_v46 = vadd.f32 1e-12, %v3488_v52  ;;  %v10497_v61 = vadd.f32 %v10451_v5, %v3554_v19 }
 0xb6c   : > { %8254 = vrsqrt.f32 %v3504_v46  ;;  %v3586_v32 = vpack.c.bf16 %v10497_v61, %v10494_v47 }
 0xb6d   : > { %v3468_v63 = vpop.xlane.xlu1 %3467 }
 0xb6e   : > { %v3489_v14 = vmul.f32 0.0078125, %v3468_v63  ;;  %3815 = vmatmul.mubr.bf16.gmra.mrb[124].mxu1 %v3586_v32  ;;  %7545 = vmatmul.mubr.bf16.gmra.mrb[132].mxu0 %v3586_v32 }
 0xb6f   : > { %v3470_v22 = vpop.xlane.xlu0 %3469  ;;  %3824 = vmatprep.mubr.bf16.mxu1 %v12247_v16 }
 0xb70   : > { %v3505_v34 = vadd.f32 1e-12, %v3489_v14  ;;  %v3490_v44 = vmul.f32 0.0078125, %v3470_v22 }
 0xb72   : > { %8256 = vrsqrt.f32 %v3505_v34  ;;  %v3506_v6 = vadd.f32 1e-12, %v3490_v44 }
 0xb74   : > { %v8253_v38 = vpop.eup %8252  ;;  %8258 = vrsqrt.f32 %v3506_v6 }
 0xb75   : > { %v3472_v12 = vpop.xlane.xlu1 %3471  ;;  %v3535_v3 = vmul.f32 %v8253_v38, %v10402_v56 }
 0xb76   : > { %v8255_v4 = vpop.eup %8254  ;;  %v3491_v48 = vmul.f32 0.0078125, %v3472_v12 }
 0xb77   : > { %v3474_v8 = vpop.xlane.xlu0 %3473  ;;  %v3536_v58 = vmul.f32 %v8255_v4, %v10405_v30  ;;  %v3555_v43 = vmul.f32 %v10445_v1, %v3535_v3 }
 0xb78   : > { %v3507_v15 = vadd.f32 1e-12, %v3491_v48  ;;  %v3492_v2 = vmul.f32 0.0078125, %v3474_v8 }
 0xb79   : > { %v3556_v37 = vmul.f32 %v10445_v1, %v3536_v58  ;;  %v10507_v33 = vadd.f32 %v10451_v5, %v3555_v43 }
 0xb7a   : > { %8260 = vrsqrt.f32 %v3507_v15  ;;  %v3508_v60 = vadd.f32 1e-12, %v3492_v2 }
 0xb7b   : > { %v10510_v36 = vadd.f32 %v10451_v5, %v3556_v37 }
 0xb7c   : > { %v8257_v56 = vpop.eup %8256  ;;  %8262 = vrsqrt.f32 %v3508_v60 }
 0xb7d   : > { %v3476_v20 = vpop.xlane.xlu1 %3475  ;;  %v3587_v30 = vpack.c.bf16 %v10510_v36, %v10507_v33  ;;  %v3537_v42 = vmul.f32 %v8257_v56, %v10412_v13 }
 0xb7e   : > { %v8259_v39 = vpop.eup %8258  ;;  %v3493_v9 = vmul.f32 0.0078125, %v3476_v20 }
 0xb7f   : > { %v3478_v53 = vpop.xlane.xlu0 %3477  ;;  %3825 = vmatmul.mubr.bf16.gmra.mrb[128].mxu1 %v3587_v30  ;;  %7548 = vmatprep.mubr.bf16.mxu0 %v3587_v30  ;;  %v3538_v49 = vmul.f32 %v8259_v39, %v10415_v31  ;;  %v3557_v55 = vmul.f32 %v10445_v1, %v3537_v42 }
 0xb80   : > { %v3509_v54 = vadd.f32 1e-12, %v3493_v9  ;;  %v3494_v62 = vmul.f32 0.0078125, %v3478_v53  ;;  %3834 = vmatprep.mubr.bf16.mxu1 %v12247_v16 }
 0xb81   : > { %v3558_v23 = vmul.f32 %v10445_v1, %v3538_v49  ;;  %v10520_v18 = vadd.f32 %v10451_v5, %v3557_v55 }
 0xb82   : > { %8264 = vrsqrt.f32 %v3509_v54  ;;  %v3510_v51 = vadd.f32 1e-12, %v3494_v62 }
 0xb83   : > { %v10523_v13 = vadd.f32 %v10451_v5, %v3558_v23 }
 0xb84   : > { %v8261_v0 = vpop.eup %8260  ;;  %8266 = vrsqrt.f32 %v3510_v51 }
 0xb85   : > { %v3588_v31 = vpack.c.bf16 %v10523_v13, %v10520_v18  ;;  %v3539_v50 = vmul.f32 %v8261_v0, %v10422_v27 }
 0xb86   : > { %v8263_v25 = vpop.eup %8262 }
 0xb87   : > { %3835 = vmatmul.mubr.bf16.gmra.mrb[132].mxu1 %v3588_v31  ;;  %7549 = vmatmul.mubr.bf16.gmra.mrb[136].mxu0 %v3588_v31  ;;  %v3540_v7 = vmul.f32 %v8263_v25, %v10425_v57  ;;  %v3559_v21 = vmul.f32 %v10445_v1, %v3539_v50 }
 0xb88   : > { %3844 = vmatprep.mubr.bf16.mxu1 %v12247_v16 }
 0xb89   : > { %v3560_v45 = vmul.f32 %v10445_v1, %v3540_v7  ;;  %v10533_v29 = vadd.f32 %v10451_v5, %v3559_v21 }
 0xb8b   : > { %v10536_v26 = vadd.f32 %v10451_v5, %v3560_v45 }
 0xb8c   : > { %v8265_v52 = vpop.eup %8264 }
 0xb8d   : > { %v3589_v27 = vpack.c.bf16 %v10536_v26, %v10533_v29  ;;  %v3541_v19 = vmul.f32 %v8265_v52, %v10432_v11 }
 0xb8e   : > { %v8267_v46 = vpop.eup %8266 }
 0xb8f   : > { %3845 = vmatmul.mubr.bf16.gmra.mrb[136].mxu1 %v3589_v27  ;;  %7552 = vmatprep.mubr.bf16.mxu0 %v3589_v27  ;;  %v3542_v57 = vmul.f32 %v8267_v46, %v10435_v10  ;;  %v3561_v32 = vmul.f32 %v10445_v1, %v3541_v19 }
 0xb90   : > { %3854 = vmatprep.mubr.bf16.mxu1 %v12247_v16 }
 0xb91   : > { %v3562_v63 = vmul.f32 %v10445_v1, %v3542_v57  ;;  %v10546_v14 = vadd.f32 %v10451_v5, %v3561_v32 }
 0xb93   : > { %v10549_v22 = vadd.f32 %v10451_v5, %v3562_v63 }
 0xb95   : > { %v3590_v11 = vpack.c.bf16 %v10549_v22, %v10546_v14 }
 0xb97   : > { %3855 = vmatmul.mubr.bf16.gmra.mrb[140].mxu1 %v3590_v11  ;;  %7553 = vmatmul.mubr.bf16.gmra.mrb[140].mxu0 %v3590_v11 }
 0xc07   : > { %v3786_v34 = vpop.f32.mrb[112].mxu1 }
 0xc08   : > { %v3788_v44 = vpop.f32.mrb[113].mxu1 }
 0xc09   : > { %v3790_v10 = vpop.f32.mrb[114].mxu1 }
 0xc0a   : > { %v3962_v6 = vpack.c.bf16 %v3790_v10, %v3786_v34  ;;  %v3792_v38 = vpop.f32.mrb[115].mxu1 }
 0xc0b   : > { %v3970_v12 = vpack.c.bf16 %v3792_v38, %v3788_v44 }
 0xc0c   : > { %7572 = vmatprep.mubr.bf16.mxu1 %v3962_v6 }
 0xc0d   : > { %7556 = vmatprep.subr.bf16.mxu1 %v3970_v12 }
 0xc0e   : > { %7557 = vmatpush3.bf16.xpose.msra.mxu1 %v3970_v12 }
 0xc1b   : > { %v10553_v1 = vpop.f32.mrb[116].mxu1  ;;  %v7542_v3 = vpop.f32.mrb[128].mxu0 }
 0xc1c   : > { %v3798_v4 = vpop.f32.mrb[117].mxu1  ;;  %v3899_v5 = vpop.f32.mrb[129].mxu0 }
 0xc1d   : > { %v10555_v48 = vpop.f32.mrb[118].mxu1  ;;  %v7543_v8 = vpop.f32.mrb[130].mxu0 }
 0xc1e   : > { %v3963_v58 = vpack.c.bf16 %v10555_v48, %v10553_v1  ;;  %v4244_v43 = vpack.c.bf16 %v7543_v8, %v7542_v3  ;;  %v3802_v15 = vpop.f32.mrb[119].mxu1  ;;  %v3902_v2 = vpop.f32.mrb[131].mxu0 }
 0xc1f   : > { %v3971_v37 = vpack.c.bf16 %v3802_v15, %v3798_v4  ;;  %v4243_v60 = vpack.c.bf16 %v3902_v2, %v3899_v5 }
 0xc21   : > { %7558 = vmatprep.subr.bf16.mxu1 %v3971_v37  ;;  %7588 = vmatprep.subr.bf16.mxu0 %v4243_v60 }
 0xc22   : > { %7559 = vmatpush3.bf16.xpose.msra.mxu1 %v3971_v37  ;;  %7589 = vmatpush3.bf16.msra.mxu0 %v4243_v60 }
 0xc23   : > { %7590 = vmatprep.subr.bf16.mxu0 %v4244_v43 }
 0xc26   : > { %7591 = vmatpush3.bf16.msra.mxu0 %v4244_v43 }
 0xc2e   : > { %v10559_v56 = vpop.f32.mrb[120].mxu1 }
 0xc2f   : > { %v3808_v20 = vpop.f32.mrb[121].mxu1 }
 0xc30   : > { %v10561_v30 = vpop.f32.mrb[122].mxu1 }
 0xc31   : > { %v3964_v42 = vpack.c.bf16 %v10561_v30, %v10559_v56  ;;  %v3812_v39 = vpop.f32.mrb[123].mxu1 }
 0xc32   : > { %v3972_v9 = vpack.c.bf16 %v3812_v39, %v3808_v20 }
 0xc34   : > { %7560 = vmatprep.subr.bf16.mxu1 %v3972_v9 }
 0xc35   : > { %7561 = vmatpush3.bf16.xpose.msra.mxu1 %v3972_v9 }
 0xc41   : > { %v10565_v53 = vpop.f32.mrb[124].mxu1  ;;  %v7546_v49 = vpop.f32.mrb[132].mxu0 }
 0xc42   : > { %v3818_v55 = vpop.f32.mrb[125].mxu1  ;;  %v3915_v54 = vpop.f32.mrb[133].mxu0 }
 0xc43   : > { %v10567_v62 = vpop.f32.mrb[126].mxu1  ;;  %v7547_v23 = vpop.f32.mrb[134].mxu0 }
 0xc44   : > { %v3965_v51 = vpack.c.bf16 %v10567_v62, %v10565_v53  ;;  %v4246_v0 = vpack.c.bf16 %v7547_v23, %v7546_v49  ;;  %v3822_v31 = vpop.f32.mrb[127].mxu1  ;;  %v3918_v50 = vpop.f32.mrb[135].mxu0 }
 0xc45   : > { %v3973_v25 = vpack.c.bf16 %v3822_v31, %v3818_v55  ;;  %v4245_v7 = vpack.c.bf16 %v3918_v50, %v3915_v54 }
 0xc47   : > { %7562 = vmatprep.subr.bf16.mxu1 %v3973_v25  ;;  %7592 = vmatprep.subr.bf16.mxu0 %v4245_v7 }
 0xc48   : > { %7563 = vmatpush3.bf16.xpose.msra.mxu1 %v3973_v25  ;;  %7593 = vmatpush3.bf16.msra.mxu0 %v4245_v7 }
 0xc49   : > { %7594 = vmatprep.subr.bf16.mxu0 %v4246_v0 }
 0xc4c   : > { %7595 = vmatpush3.bf16.msra.mxu0 %v4246_v0 }
 0xc52   : > { %v3826_v21 = vpop.f32.mrb[128].mxu1 }
 0xc53   : > { %v3828_v45 = vpop.f32.mrb[129].mxu1 }
 0xc54   : > { %v3830_v52 = vpop.f32.mrb[130].mxu1 }
 0xc55   : > { %v3966_v27 = vpack.c.bf16 %v3830_v52, %v3826_v21  ;;  %v3832_v19 = vpop.f32.mrb[131].mxu1 }
 0xc56   : > { %v3974_v46 = vpack.c.bf16 %v3832_v19, %v3828_v45 }
 0xc58   : > { %7564 = vmatprep.subr.bf16.mxu1 %v3974_v46 }
 0xc59   : > { %7565 = vmatpush3.bf16.xpose.msra.mxu1 %v3974_v46 }
 0xc5a   : > { %v3836_v57 = vpop.f32.mrb[132].mxu1  ;;  %v7550_v32 = vpop.f32.mrb[136].mxu0 }
 0xc5b   : > { %v3838_v63 = vpop.f32.mrb[133].mxu1  ;;  %v3931_v11 = vpop.f32.mrb[137].mxu0 }
 0xc5c   : > { %v3840_v34 = vpop.f32.mrb[134].mxu1  ;;  %v7551_v44 = vpop.f32.mrb[138].mxu0 }
 0xc5d   : > { %v3967_v10 = vpack.c.bf16 %v3840_v34, %v3836_v57  ;;  %v4248_v6 = vpack.c.bf16 %v7551_v44, %v7550_v32  ;;  %v3842_v38 = vpop.f32.mrb[135].mxu1  ;;  %v3934_v12 = vpop.f32.mrb[139].mxu0 }
 0xc5e   : > { %v3975_v3 = vpack.c.bf16 %v3842_v38, %v3838_v63  ;;  %v4247_v4 = vpack.c.bf16 %v3934_v12, %v3931_v11 }
 0xc60   : > { %7566 = vmatprep.subr.bf16.mxu1 %v3975_v3  ;;  %7596 = vmatprep.subr.bf16.mxu0 %v4247_v4 }
 0xc61   : > { %7567 = vmatpush3.bf16.xpose.msra.mxu1 %v3975_v3  ;;  %7597 = vmatpush3.bf16.msra.mxu0 %v4247_v4 }
 0xc62   : > { %v3846_v5 = vpop.f32.mrb[136].mxu1  ;;  %7598 = vmatprep.subr.bf16.mxu0 %v4248_v6 }
 0xc63   : > { %v3848_v8 = vpop.f32.mrb[137].mxu1 }
 0xc64   : > { %v3850_v43 = vpop.f32.mrb[138].mxu1 }
 0xc65   : > { %v3968_v15 = vpack.c.bf16 %v3850_v43, %v3846_v5  ;;  %v3852_v2 = vpop.f32.mrb[139].mxu1  ;;  %7599 = vmatpush3.bf16.msra.mxu0 %v4248_v6 }
 0xc66   : > { %v3976_v37 = vpack.c.bf16 %v3852_v2, %v3848_v8 }
 0xc68   : > { %7568 = vmatprep.subr.bf16.mxu1 %v3976_v37 }
 0xc69   : > { %7569 = vmatpush3.bf16.xpose.msra.mxu1 %v3976_v37 }
 0xc6a   : > { %v3856_v60 = vpop.f32.mrb[140].mxu1  ;;  %v7554_v20 = vpop.f32.mrb[140].mxu0 }
 0xc6b   : > { %v3858_v39 = vpop.f32.mrb[141].mxu1  ;;  %v3947_v9 = vpop.f32.mrb[141].mxu0 }
 0xc6c   : > { %v3860_v49 = vpop.f32.mrb[142].mxu1  ;;  %v7555_v55 = vpop.f32.mrb[142].mxu0 }
 0xc6d   : > { %v3969_v54 = vpack.c.bf16 %v3860_v49, %v3856_v60  ;;  %v4250_v23 = vpack.c.bf16 %v7555_v55, %v7554_v20  ;;  %v3862_v0 = vpop.f32.mrb[143].mxu1  ;;  %v3950_v31 = vpop.f32.mrb[143].mxu0 }
 0xc6e   : > { %v3977_v50 = vpack.c.bf16 %v3862_v0, %v3858_v39  ;;  %v4249_v25 = vpack.c.bf16 %v3950_v31, %v3947_v9 }
 0xc70   : > { %7570 = vmatprep.subr.bf16.mxu1 %v3977_v50  ;;  %7600 = vmatprep.subr.bf16.mxu0 %v4249_v25 }
 0xc71   : > { %7571 = vmatpush3.bf16.xpose.msra.mxu1 %v3977_v50  ;;  %7601 = vmatpush3.bf16.msra.mxu0 %v4249_v25 }
 0xc72   : > { %7602 = vmatprep.subr.bf16.mxu0 %v4250_v23 }
 0xc75   : > { %7603 = vmatpush3.bf16.msra.mxu0 %v4250_v23 }
 0xc78   : > { %7573 = vmatmul.mubr.bf16.vlgmr.msra.gmra.mrb[144].mxu1 %v3963_v58 }
 0xc79   : > { %7576 = vmatprep.mubr.bf16.mxu1 %v3964_v42 }
 0xc80   : > { %7577 = vmatmul.mubr.bf16.gmra.mrb[148].mxu1 %v3965_v51 }
 0xc81   : > { %7580 = vmatprep.mubr.bf16.mxu1 %v3966_v27 }
 0xc88   : > { %7581 = vmatmul.mubr.bf16.gmra.mrb[152].mxu1 %v3967_v10 }
 0xc89   : > { %7584 = vmatprep.mubr.bf16.mxu1 %v3968_v15 }
 0xc90   : > { %7585 = vmatmul.mubr.bf16.gmra.mrb[156].mxu1 %v3969_v54 }
 0xc91   : > { %4983 = vmatprep.mubr.bf16.mxu1 %v12247_v16 }
 0xd4b   : > { %v7574_v7 = vpop.f32.mrb[144].mxu1 }
 0xd4c   : > { %v4012_v21 = vpop.f32.mrb[145].mxu1  ;;  %v4077_v53 = vsel %vm9152_vm10, %v7574_v7, -1e+30 }
 0xd4d   : > { %v4075_v1 = vsel %vm9133_vm8, %v4012_v21, -1e+30  ;;  %v7575_v48 = vpop.f32.mrb[146].mxu1 }
 0xd4e   : > { %4091 = vmax.xlane.f32.xlu1 %v4075_v1  ;;  %v4015_v58 = vpop.f32.mrb[147].mxu1  ;;  %v4078_v51 = vsel %vm9167_vm11, %v7575_v48, -1e+30 }
 0xd4f   : > { %v4076_v30 = vsel %vm9140_vm9, %v4015_v58, -1e+30 }
 0xd50   : > { %4093 = vmax.xlane.f32.xlu0 %v4076_v30 }
 0xd52   : > { %4095 = vmax.xlane.f32.xlu1 %v4077_v53 }
 0xd53   : > { %v7578_v52 = vpop.f32.mrb[148].mxu1 }
 0xd54   : > { %4097 = vmax.xlane.f32.xlu0 %v4078_v51  ;;  %v4028_v27 = vpop.f32.mrb[149].mxu1  ;;  %v4081_v44 = vsel %vm9188_vm13, %v7578_v52, -1e+30 }
 0xd55   : > { %v4079_v46 = vsel %vm9173_vm12, %v4028_v27, -1e+30  ;;  %v7579_v57 = vpop.f32.mrb[150].mxu1 }
 0xd56   : > { %4099 = vmax.xlane.f32.xlu1 %v4079_v46  ;;  %v4031_v32 = vpop.f32.mrb[151].mxu1  ;;  %v4082_v6 = vsel %vm9213_vm15, %v7579_v57, -1e+30 }
 0xd57   : > { %v4080_v11 = vsel %vm9196_vm14, %v4031_v32, -1e+30 }
 0xd58   : > { %4101 = vmax.xlane.f32.xlu0 %v4080_v11 }
 0xd5a   : > { %4103 = vmax.xlane.f32.xlu1 %v4081_v44 }
 0xd5b   : > { %v7582_v38 = vpop.f32.mrb[152].mxu1 }
 0xd5c   : > { %4105 = vmax.xlane.f32.xlu0 %v4082_v6  ;;  %v4044_v12 = vpop.f32.mrb[153].mxu1  ;;  %v10606_v37 = vsel %vm9232_vm1, %v7582_v38, -1e+30 }
 0xd5d   : > { %v4083_v4 = vsel %vm9218_vm0, %v4044_v12, -1e+30  ;;  %v7583_v5 = vpop.f32.mrb[154].mxu1 }
 0xd5e   : > { %4107 = vmax.xlane.f32.xlu1 %v4083_v4  ;;  %v4047_v8 = vpop.f32.mrb[155].mxu1  ;;  %v10611_v20 = vsel %vm9254_vm3, %v7583_v5, -1e+30 }
 0xd5f   : > { %v10601_v15 = vsel %vm9239_vm2, %v4047_v8, -1e+30 }
 0xd60   : > { %4109 = vmax.xlane.f32.xlu0 %v10601_v15 }
 0xd62   : > { %4111 = vmax.xlane.f32.xlu1 %v10606_v37 }
 0xd63   : > { %v7586_v39 = vpop.f32.mrb[156].mxu1 }
 0xd64   : > { %4113 = vmax.xlane.f32.xlu0 %v10611_v20  ;;  %v4060_v9 = vpop.f32.mrb[157].mxu1  ;;  %v10626_v25 = vsel %vm9277_vm5, %v7586_v39, -1e+30 }
 0xd65   : > { %v10616_v55 = vsel %vm9261_vm4, %v4060_v9, -1e+30  ;;  %v7587_v54 = vpop.f32.mrb[158].mxu1 }
 0xd66   : > { %4115 = vmax.xlane.f32.xlu1 %v10616_v55  ;;  %v4063_v23 = vpop.f32.mrb[159].mxu1  ;;  %v10631_v21 = vsel %vm9297_vm7, %v7587_v54, -1e+30 }
 0xd67   : > { %v10621_v31 = vsel %vm9282_vm6, %v4063_v23, -1e+30 }
 0xd68   : > { %4117 = vmax.xlane.f32.xlu0 %v10621_v31 }
 0xd6a   : > { %4119 = vmax.xlane.f32.xlu1 %v10626_v25 }
 0xd6c   : > { %4121 = vmax.xlane.f32.xlu0 %v10631_v21 }
 0xddb   : > { %v4092_v45 = vpop.xlane.xlu1 %4091 }
 0xddc   : > { %v4123_v48 = vsub.f32 %v4075_v1, %v4092_v45 }
 0xddd   : > { %v4094_v58 = vpop.xlane.xlu0 %4093 }
 0xdde   : > { %v4139_v56 = vmul.f32 1.442695, %v4123_v48  ;;  %v4124_v42 = vsub.f32 %v4076_v30, %v4094_v58 }
 0xddf   : > { %v4096_v62 = vpop.xlane.xlu1 %4095 }
 0xde0   : > { %8268 = vpow2.f32 %v4139_v56  ;;  %v4141_v52 = vmul.f32 1.442695, %v4124_v42  ;;  %v4125_v27 = vsub.f32 %v4077_v53, %v4096_v62 }
 0xde1   : > { %v4098_v19 = vpop.xlane.xlu0 %4097 }
 0xde2   : > { %8270 = vpow2.f32 %v4141_v52  ;;  %v4143_v57 = vmul.f32 1.442695, %v4125_v27  ;;  %v4126_v32 = vsub.f32 %v4078_v51, %v4098_v19 }
 0xde3   : > { %v4100_v63 = vpop.xlane.xlu1 %4099 }
 0xde4   : > { %8272 = vpow2.f32 %v4143_v57  ;;  %v4145_v34 = vmul.f32 1.442695, %v4126_v32  ;;  %v4127_v10 = vsub.f32 %v4079_v46, %v4100_v63 }
 0xde5   : > { %v4102_v38 = vpop.xlane.xlu0 %4101 }
 0xde6   : > { %8274 = vpow2.f32 %v4145_v34  ;;  %v4147_v12 = vmul.f32 1.442695, %v4127_v10  ;;  %v4128_v3 = vsub.f32 %v4080_v11, %v4102_v38 }
 0xde7   : > { %v4104_v1 = vpop.xlane.xlu1 %4103 }
 0xde8   : > { %8276 = vpow2.f32 %v4147_v12  ;;  %v4149_v5 = vmul.f32 1.442695, %v4128_v3  ;;  %v4129_v30 = vsub.f32 %v4081_v44, %v4104_v1 }
 0xde9   : > { %v4106_v8 = vpop.xlane.xlu0 %4105 }
 0xdea   : > { %v10634_v43 = vpop.eup %8268  ;;  %8278 = vpow2.f32 %v4149_v5  ;;  %v4151_v53 = vmul.f32 1.442695, %v4129_v30  ;;  %v4130_v2 = vsub.f32 %v4082_v6, %v4106_v8  ;;  %v7924_v5 = vld [vmem:[%s11920_s4 + $0x40] sm:$0xff]  }
 0xdeb   : > { %v4108_v60 = vpop.xlane.xlu1 %4107  ;;  %4171 = vadd.xlane.f32.xlu1 %v10634_v43  ;;  %7620 = vmatprep.subr.bf16.mxu0 %v7924_v5 }
 0xdec   : > { %v10637_v51 = vpop.eup %8270  ;;  %8280 = vpow2.f32 %v4151_v53  ;;  %v4153_v46 = vmul.f32 1.442695, %v4130_v2  ;;  %v4131_v39 = vsub.f32 %v4083_v4, %v4108_v60 }
 0xded   : > { %v4110_v9 = vpop.xlane.xlu0 %4109  ;;  %4173 = vadd.xlane.f32.xlu0 %v10637_v51 }
 0xdee   : > { %v10640_v11 = vpop.eup %8272  ;;  %8282 = vpow2.f32 %v4153_v46  ;;  %v4155_v44 = vmul.f32 1.442695, %v4131_v39  ;;  %v4132_v49 = vsub.f32 %v10601_v15, %v4110_v9 }
 0xdef   : > { %v4112_v54 = vpop.xlane.xlu1 %4111  ;;  %4175 = vadd.xlane.f32.xlu1 %v10640_v11 }
 0xdf0   : > { %v10644_v6 = vpop.eup %8274  ;;  %8284 = vpow2.f32 %v4155_v44  ;;  %v4157_v23 = vmul.f32 1.442695, %v4132_v49  ;;  %v4133_v0 = vsub.f32 %v10606_v37, %v4112_v54 }
 0xdf1   : > { %v4114_v50 = vpop.xlane.xlu0 %4113  ;;  %4177 = vadd.xlane.f32.xlu0 %v10644_v6 }
 0xdf2   : > { %v10648_v4 = vpop.eup %8276  ;;  %8286 = vpow2.f32 %v4157_v23  ;;  %v4159_v7 = vmul.f32 1.442695, %v4133_v0  ;;  %v4134_v45 = vsub.f32 %v10611_v20, %v4114_v50 }
 0xdf3   : > { %4179 = vadd.xlane.f32.xlu1 %v10648_v4  ;;  %v4116_v15 = vpop.xlane.xlu1 %4115 }
 0xdf4   : > { %v10652_v48 = vpop.eup %8278  ;;  %8288 = vpow2.f32 %v4159_v7  ;;  %v4161_v58 = vmul.f32 1.442695, %v4134_v45  ;;  %v4135_v56 = vsub.f32 %v10616_v55, %v4116_v15 }
 0xdf5   : > { %4181 = vadd.xlane.f32.xlu0 %v10652_v48  ;;  %v4118_v37 = vpop.xlane.xlu0 %4117 }
 0xdf6   : > { %v10656_v42 = vpop.eup %8280  ;;  %8290 = vpow2.f32 %v4161_v58  ;;  %v4163_v62 = vmul.f32 1.442695, %v4135_v56  ;;  %v4136_v52 = vsub.f32 %v10621_v31, %v4118_v37 }
 0xdf7   : > { %4183 = vadd.xlane.f32.xlu1 %v10656_v42  ;;  %v4120_v20 = vpop.xlane.xlu1 %4119 }
 0xdf8   : > { %v10660_v27 = vpop.eup %8282  ;;  %8292 = vpow2.f32 %v4163_v62  ;;  %v4165_v19 = vmul.f32 1.442695, %v4136_v52  ;;  %v4137_v57 = vsub.f32 %v10626_v25, %v4120_v20 }
 0xdf9   : > { %4185 = vadd.xlane.f32.xlu0 %v10660_v27  ;;  %v4122_v55 = vpop.xlane.xlu0 %4121 }
 0xdfa   : > { %v10664_v32 = vpop.eup %8284  ;;  %8294 = vpow2.f32 %v4165_v19  ;;  %v4167_v63 = vmul.f32 1.442695, %v4137_v57  ;;  %v4138_v34 = vsub.f32 %v10631_v21, %v4122_v55 }
 0xdfb   : > { %4187 = vadd.xlane.f32.xlu1 %v10664_v32 }
 0xdfc   : > { %v10668_v31 = vpop.eup %8286  ;;  %8296 = vpow2.f32 %v4167_v63  ;;  %v4169_v10 = vmul.f32 1.442695, %v4138_v34  ;;  %v7926_v63 = vld [vmem:[%s11920_s4 + $0x50] sm:$0xff]  }
 0xdfd   : > { %4189 = vadd.xlane.f32.xlu0 %v10668_v31 }
 0xdfe   : > { %v10671_v38 = vpop.eup %8288  ;;  %8298 = vpow2.f32 %v4169_v10 }
 0xdff   : > { %4191 = vadd.xlane.f32.xlu1 %v10671_v38 }
 0xe00   : > { %v10674_v25 = vpop.eup %8290 }
 0xe01   : > { %4193 = vadd.xlane.f32.xlu0 %v10674_v25 }
 0xe02   : > { %v10677_v12 = vpop.eup %8292 }
 0xe03   : > { %4195 = vadd.xlane.f32.xlu1 %v10677_v12 }
 0xe04   : > { %v10680_v21 = vpop.eup %8294 }
 0xe05   : > { %4197 = vadd.xlane.f32.xlu0 %v10680_v21 }
 0xe06   : > { %v10683_v3 = vpop.eup %8296 }
 0xe07   : > { %4199 = vadd.xlane.f32.xlu1 %v10683_v3 }
 0xe08   : > { %v10686_v1 = vpop.eup %8298 }
 0xe09   : > { %4201 = vadd.xlane.f32.xlu0 %v10686_v1 }
 0xe78   : > { %v4172_v30 = vpop.xlane.xlu1 %4171 }
 0xe79   : > { %8300 = vrcp.f32 %v4172_v30 }
 0xe7a   : > { %v4174_v8 = vpop.xlane.xlu0 %4173 }
 0xe7b   : > { %8302 = vrcp.f32 %v4174_v8 }
 0xe7c   : > { %v4176_v53 = vpop.xlane.xlu1 %4175 }
 0xe7d   : > { %8304 = vrcp.f32 %v4176_v53  ;;  %v7927_v53 = vld [vmem:[%s11920_s4 + $0x58] sm:$0xff]  }
 0xe7e   : > { %v4178_v2 = vpop.xlane.xlu0 %4177 }
 0xe7f   : > { %8306 = vrcp.f32 %v4178_v2 }
 0xe80   : > { %v4180_v60 = vpop.xlane.xlu1 %4179 }
 0xe81   : > { %8308 = vrcp.f32 %v4180_v60 }
 0xe82   : > { %v4182_v46 = vpop.xlane.xlu0 %4181 }
 0xe83   : > { %v8301_v39 = vpop.eup %8300  ;;  %8310 = vrcp.f32 %v4182_v46 }
 0xe84   : > { %v4184_v9 = vpop.xlane.xlu1 %4183  ;;  %v4219_v54 = vmul.f32 %v8301_v39, %v10634_v43  ;;  %v7925_v43 = vld [vmem:[%s11920_s4 + $0x48] sm:$0xff]  }
 0xe85   : > { %v8303_v44 = vpop.eup %8302  ;;  %8312 = vrcp.f32 %v4184_v9  ;;  %v7928_v9 = vld [vmem:[%s11920_s4 + $0x60] sm:$0xff]  }
 0xe86   : > { %v4186_v49 = vpop.xlane.xlu0 %4185  ;;  %v4220_v23 = vmul.f32 %v8303_v44, %v10637_v51 }
 0xe87   : > { %v8305_v0 = vpop.eup %8304  ;;  %8314 = vrcp.f32 %v4186_v49 }
 0xe88   : > { %v4188_v50 = vpop.xlane.xlu1 %4187  ;;  %v4235_v7 = vpack.c.bf16 %v4220_v23, %v4219_v54  ;;  %v4221_v15 = vmul.f32 %v8305_v0, %v10640_v11 }
 0xe89   : > { %v8307_v45 = vpop.eup %8306  ;;  %8316 = vrcp.f32 %v4188_v50 }
 0xe8a   : > { %v4222_v58 = vmul.f32 %v8307_v45, %v10644_v6  ;;  %7604 = vmatprep.mubr.bf16.mxu0 %v4235_v7  ;;  %v4190_v56 = vpop.xlane.xlu0 %4189 }
 0xe8b   : > { %v8309_v37 = vpop.eup %8308  ;;  %8318 = vrcp.f32 %v4190_v56 }
 0xe8c   : > { %v4192_v62 = vpop.xlane.xlu1 %4191  ;;  %v4236_v52 = vpack.c.bf16 %v4222_v58, %v4221_v15  ;;  %v4223_v19 = vmul.f32 %v8309_v37, %v10648_v4 }
 0xe8d   : > { %v8311_v51 = vpop.eup %8310  ;;  %8320 = vrcp.f32 %v4192_v62 }
 0xe8e   : > { %7605 = vmatmul.mubr.bf16.vlgmr.msra.gmra.mrb[144].mxu0 %v4236_v52  ;;  %v4194_v20 = vpop.xlane.xlu0 %4193  ;;  %v4224_v11 = vmul.f32 %v8311_v51, %v10652_v48 }
 0xe8f   : > { %v8313_v57 = vpop.eup %8312  ;;  %8322 = vrcp.f32 %v4194_v20  ;;  %7621 = vmatpush3.bf16.msra.mxu0 %v7924_v5 }
 0xe90   : > { %v4196_v6 = vpop.xlane.xlu1 %4195  ;;  %v4237_v55 = vpack.c.bf16 %v4224_v11, %v4223_v19  ;;  %7622 = vmatprep.subr.bf16.mxu0 %v7925_v43  ;;  %v4225_v30 = vmul.f32 %v8313_v57, %v10656_v42 }
 0xe91   : > { %v8315_v34 = vpop.eup %8314  ;;  %8324 = vrcp.f32 %v4196_v6 }
 0xe92   : > { %7608 = vmatprep.mubr.bf16.mxu0 %v4237_v55  ;;  %v4198_v10 = vpop.xlane.xlu0 %4197  ;;  %v4226_v4 = vmul.f32 %v8315_v34, %v10660_v27 }
 0xe93   : > { %v8317_v8 = vpop.eup %8316  ;;  %8326 = vrcp.f32 %v4198_v10  ;;  %7623 = vmatpush3.bf16.msra.mxu0 %v7925_v43 }
 0xe94   : > { %v4200_v48 = vpop.xlane.xlu1 %4199  ;;  %v4238_v5 = vpack.c.bf16 %v4226_v4, %v4225_v30  ;;  %7624 = vmatprep.subr.bf16.mxu0 %v7926_v63  ;;  %v4227_v46 = vmul.f32 %v8317_v8, %v10664_v32 }
 0xe95   : > { %v8319_v2 = vpop.eup %8318  ;;  %8328 = vrcp.f32 %v4200_v48 }
 0xe96   : > { %7609 = vmatmul.mubr.bf16.gmra.mrb[148].mxu0 %v4238_v5  ;;  %v4202_v60 = vpop.xlane.xlu0 %4201  ;;  %v4228_v42 = vmul.f32 %v8319_v2, %v10668_v31  ;;  %v7929_v31 = vld [vmem:[%s11920_s4 + $0x68] sm:$0xff]  }
 0xe97   : > { %v8321_v39 = vpop.eup %8320  ;;  %8330 = vrcp.f32 %v4202_v60  ;;  %7625 = vmatpush3.bf16.msra.mxu0 %v7926_v63 }
 0xe98   : > { %v4239_v27 = vpack.c.bf16 %v4228_v42, %v4227_v46  ;;  %7626 = vmatprep.subr.bf16.mxu0 %v7927_v53  ;;  %v4229_v49 = vmul.f32 %v8321_v39, %v10671_v38  ;;  %v7930_v38 = vld [vmem:[%s11920_s4 + $0x70] sm:$0xff]  }
 0xe99   : > { %v8323_v44 = vpop.eup %8322 }
 0xe9a   : > { %7612 = vmatprep.mubr.bf16.mxu0 %v4239_v27  ;;  %v4230_v54 = vmul.f32 %v8323_v44, %v10674_v25 }
 0xe9b   : > { %v8325_v23 = vpop.eup %8324  ;;  %7627 = vmatpush3.bf16.msra.mxu0 %v7927_v53 }
 0xe9c   : > { %v4240_v32 = vpack.c.bf16 %v4230_v54, %v4229_v49  ;;  %7628 = vmatprep.subr.bf16.mxu0 %v7928_v9  ;;  %v4231_v50 = vmul.f32 %v8325_v23, %v10677_v12  ;;  %v7931_v12 = vld [vmem:[%s11920_s4 + $0x78] sm:$0xff]  }
 0xe9d   : > { %v8327_v0 = vpop.eup %8326 }
 0xe9e   : > { %7613 = vmatmul.mubr.bf16.gmra.mrb[152].mxu0 %v4240_v32  ;;  %v4232_v7 = vmul.f32 %v8327_v0, %v10680_v21 }
 0xe9f   : > { %v8329_v45 = vpop.eup %8328  ;;  %7629 = vmatpush3.bf16.msra.mxu0 %v7928_v9 }
 0xea0   : > { %v4241_v15 = vpack.c.bf16 %v4232_v7, %v4231_v50  ;;  %7630 = vmatprep.subr.bf16.mxu0 %v7929_v31  ;;  %v4233_v58 = vmul.f32 %v8329_v45, %v10683_v3 }
 0xea1   : > { %v8331_v25 = vpop.eup %8330 }
 0xea2   : > { %7616 = vmatprep.mubr.bf16.mxu0 %v4241_v15  ;;  %v4234_v56 = vmul.f32 %v8331_v25, %v10686_v1 }
 0xea3   : > { %7631 = vmatpush3.bf16.msra.mxu0 %v7929_v31 }
 0xea4   : > { %v4242_v37 = vpack.c.bf16 %v4234_v56, %v4233_v58  ;;  %7632 = vmatprep.subr.bf16.mxu0 %v7930_v38 }
 0xea6   : > { %7617 = vmatmul.mubr.bf16.gmra.mrb[156].mxu0 %v4242_v37  ;;  %v7934_v37 = vld [vmem:[#allocation7 + $0x104] ss:$16 sps:$4 sm:$0xff]  }
 0xea7   : > { %7633 = vmatpush3.bf16.msra.mxu0 %v7930_v38  ;;  %4951 = vmatprep.subr.bf16.mxu1 %v7934_v37 }
 0xea8   : > { %7634 = vmatprep.subr.bf16.mxu0 %v7931_v12 }
 0xeab   : > { %7635 = vmatpush3.bf16.msra.mxu0 %v7931_v12  ;;  %v7935_v12 = vld [vmem:[#allocation7 + $0x108] ss:$16 sps:$4 sm:$0xff]  }
 0xf61   : > { %v7606_v21 = vpop.f32.mrb[144].mxu0 }
 0xf62   : > { %v4285_v62 = vpop.f32.mrb[145].mxu0 }
 0xf63   : > { %v7607_v52 = vpop.f32.mrb[146].mxu0 }
 0xf64   : > { %v4349_v43 = vpack.c.bf16 %v7607_v52, %v7606_v21  ;;  %v4288_v51 = vpop.f32.mrb[147].mxu0  ;;  %v7937_v21 = vld [vmem:[#allocation7 + $0x10c] ss:$16 sps:$4 sm:$0xff]   ;;  %v7941_v52 = vld [vmem:[#allocation7 + $0x128] ss:$16 sps:$4 sm:$0xff]  }
 0xf65   : > { %v4348_v20 = vpack.c.bf16 %v4288_v51, %v4285_v62  ;;  %v7943_v62 = vld [vmem:[#allocation7 + $0x12c] ss:$16 sps:$4 sm:$0xff]   ;;  %5064 = vmatprep.subr.bf16.mxu0 %v7937_v21 }
 0xf67   : > { %7636 = vmatprep.mubr.bf16.mxu0 %v4348_v20 }
 0xf68   : > { %7637 = vmatmul.mubr.bf16.vlgmr.msra.gmra.mrb[160].mxu0 %v4349_v43 }
 0xf69   : > { %v7610_v3 = vpop.f32.mrb[148].mxu0  ;;  %5065 = vmatpush1.bf16.msra.mxu0 %v7935_v12 }
 0xf6a   : > { %v4301_v1 = vpop.f32.mrb[149].mxu0  ;;  %5066 = vmatprep.subr.bf16.mxu0 %v7943_v62 }
 0xf6b   : > { %v7611_v19 = vpop.f32.mrb[150].mxu0 }
 0xf6c   : > { %v4351_v11 = vpack.c.bf16 %v7611_v19, %v7610_v3  ;;  %v4304_v57 = vpop.f32.mrb[151].mxu0 }
 0xf6d   : > { %v4350_v6 = vpack.c.bf16 %v4304_v57, %v4301_v1  ;;  %5067 = vmatpush1.bf16.msra.mxu0 %v7941_v52 }
 0xf6f   : > { %7640 = vmatprep.mubr.bf16.mxu0 %v4350_v6 }
 0xf70   : > { %7641 = vmatmul.mubr.bf16.gmra.mrb[164].mxu0 %v4351_v11 }
 0xf71   : > { %v7614_v55 = vpop.f32.mrb[152].mxu0 }
 0xf72   : > { %v4317_v63 = vpop.f32.mrb[153].mxu0 }
 0xf73   : > { %v7615_v34 = vpop.f32.mrb[154].mxu0 }
 0xf74   : > { %v4353_v10 = vpack.c.bf16 %v7615_v34, %v7614_v55  ;;  %v4320_v30 = vpop.f32.mrb[155].mxu0 }
 0xf75   : > { %v4352_v4 = vpack.c.bf16 %v4320_v30, %v4317_v63 }
 0xf77   : > { %7644 = vmatprep.mubr.bf16.mxu0 %v4352_v4 }
 0xf78   : > { %7645 = vmatmul.mubr.bf16.gmra.mrb[168].mxu0 %v4353_v10 }
 0xf79   : > { %v7618_v8 = vpop.f32.mrb[156].mxu0 }
 0xf7a   : > { %v4333_v48 = vpop.f32.mrb[157].mxu0 }
 0xf7b   : > { %v7619_v5 = vpop.f32.mrb[158].mxu0 }
 0xf7c   : > { %v4355_v53 = vpack.c.bf16 %v7619_v5, %v7618_v8  ;;  %v4336_v2 = vpop.f32.mrb[159].mxu0 }
 0xf7d   : > { %v4354_v60 = vpack.c.bf16 %v4336_v2, %v4333_v48 }
 0xf7f   : > { %7648 = vmatprep.mubr.bf16.mxu0 %v4354_v60 }
 0xf80   : > { %7649 = vmatmul.mubr.bf16.gmra.mrb[172].mxu0 %v4355_v53 }
 0xf81   : > { %5096 = vmatprep.mubr.bf16.mxu0 %v12247_v16 }
0x103b   : > { %v7638_v46 = vpop.f32.mrb[160].mxu0 }
0x103c   : > { %v4455_v42 = vpop.f32.mrb[161].mxu0  ;;  %v10738_v49 = vadd.f32 %v7638_v46, %v10468_v17 }
0x103d   : > { %v10731_v39 = vadd.f32 %v4455_v42, %v10455_v24  ;;  %v7639_v27 = vpop.f32.mrb[162].mxu0 }
0x103e   : > { %v4458_v9 = vpop.f32.mrb[163].mxu0  ;;  %v10742_v54 = vadd.f32 %v7639_v27, %v10471_v59 }
0x103f   : > { %v10734_v44 = vadd.f32 %v4458_v9, %v10458_v40  ;;  %4534 = vadd.xlane.f32.xlu1 %v10731_v39 }
0x1041   : > { %4536 = vadd.xlane.f32.xlu0 %v10734_v44 }
0x1043   : > { %4538 = vadd.xlane.f32.xlu1 %v10738_v49  ;;  %v7642_v23 = vpop.f32.mrb[164].mxu0 }
0x1044   : > { %v4471_v24 = vpop.f32.mrb[165].mxu0  ;;  %v10754_v17 = vadd.f32 %v7642_v23, %v10494_v47 }
0x1045   : > { %v10746_v32 = vadd.f32 %v4471_v24, %v10481_v35  ;;  %4540 = vadd.xlane.f32.xlu0 %v10742_v54  ;;  %v7643_v40 = vpop.f32.mrb[166].mxu0 }
0x1046   : > { %v4474_v31 = vpop.f32.mrb[167].mxu0  ;;  %v10758_v59 = vadd.f32 %v7643_v40, %v10497_v61 }
0x1047   : > { %v10750_v0 = vadd.f32 %v4474_v31, %v10484_v28  ;;  %4542 = vadd.xlane.f32.xlu1 %v10746_v32 }
0x1049   : > { %4544 = vadd.xlane.f32.xlu0 %v10750_v0 }
0x104b   : > { %4546 = vadd.xlane.f32.xlu1 %v10754_v17  ;;  %v7646_v35 = vpop.f32.mrb[168].mxu0 }
0x104c   : > { %v4487_v50 = vpop.f32.mrb[169].mxu0  ;;  %v10770_v47 = vadd.f32 %v7646_v35, %v10520_v18 }
0x104d   : > { %v10762_v7 = vadd.f32 %v4487_v50, %v10507_v33  ;;  %4548 = vadd.xlane.f32.xlu0 %v10758_v59  ;;  %v7647_v28 = vpop.f32.mrb[170].mxu0 }
0x104e   : > { %v4490_v45 = vpop.f32.mrb[171].mxu0  ;;  %v10774_v61 = vadd.f32 %v7647_v28, %v10523_v13 }
0x104f   : > { %v10766_v15 = vadd.f32 %v4490_v45, %v10510_v36  ;;  %4550 = vadd.xlane.f32.xlu1 %v10762_v7 }
0x1051   : > { %4552 = vadd.xlane.f32.xlu0 %v10766_v15 }
0x1053   : > { %4554 = vadd.xlane.f32.xlu1 %v10770_v47  ;;  %v7650_v33 = vpop.f32.mrb[172].mxu0 }
0x1054   : > { %v4503_v38 = vpop.f32.mrb[173].mxu0  ;;  %v10786_v18 = vadd.f32 %v7650_v33, %v10546_v14  ;;  %v7938_v14 = vld [vmem:[#allocation7 + $0x120] ss:$16 sps:$4 sm:$0xff]  }
0x1055   : > { %v10778_v25 = vadd.f32 %v4503_v38, %v10533_v29  ;;  %4556 = vadd.xlane.f32.xlu0 %v10774_v61  ;;  %v7651_v36 = vpop.f32.mrb[174].mxu0  ;;  %v7932_v29 = vld [vmem:[#allocation7 + $0x100] ss:$16 sps:$4 sm:$0xff]  }
0x1056   : > { %v4506_v58 = vpop.f32.mrb[175].mxu0  ;;  %v10790_v13 = vadd.f32 %v7651_v36, %v10549_v22  ;;  %4952 = vmatpush1.bf16.msra.mxu1 %v7932_v29 }
0x1057   : > { %v10782_v56 = vadd.f32 %v4506_v58, %v10536_v26  ;;  %4558 = vadd.xlane.f32.xlu1 %v10778_v25  ;;  %v7940_v26 = vld [vmem:[#allocation7 + $0x124] ss:$16 sps:$4 sm:$0xff]  }
0x1058   : > { %4953 = vmatprep.subr.bf16.mxu1 %v7940_v26 }
0x1059   : > { %4560 = vadd.xlane.f32.xlu0 %v10782_v56 }
0x105a   : > { %4954 = vmatpush1.bf16.msra.mxu1 %v7938_v14 }
0x105b   : > { %4562 = vadd.xlane.f32.xlu1 %v10786_v18 }
0x105d   : > { %4564 = vadd.xlane.f32.xlu0 %v10790_v13 }
0x10cc   : > { %v4535_v22 = vpop.xlane.xlu1 %4534 }
0x10cd   : > { %v4566_v43 = vmul.f32 0.0078125, %v4535_v22 }
0x10ce   : > { %v4537_v51 = vpop.xlane.xlu0 %4536 }
0x10cf   : > { %v10795_v20 = vsub.f32 %v10731_v39, %v4566_v43  ;;  %v4567_v3 = vmul.f32 0.0078125, %v4537_v51 }
0x10d0   : > { %v4539_v1 = vpop.xlane.xlu1 %4538 }
0x10d1   : > { %v10798_v19 = vsub.f32 %v10734_v44, %v4567_v3  ;;  %v4568_v11 = vmul.f32 0.0078125, %v4539_v1  ;;  %v4598_v57 = vmul.f32 %v10795_v20, %v10795_v20  ;;  %v7944_v1 = vld [vmem:[#allocation7 + $0x140] ss:$16 sps:$4 sm:$0xff]  }
0x10d2   : > { %v4541_v6 = vpop.xlane.xlu0 %4540 }
0x10d3   : > { %v10803_v55 = vsub.f32 %v10738_v49, %v4568_v11  ;;  %v4569_v63 = vmul.f32 0.0078125, %v4541_v6  ;;  %4614 = vadd.xlane.f32.xlu1 %v4598_v57  ;;  %v4599_v34 = vmul.f32 %v10798_v19, %v10798_v19  ;;  %v7947_v11 = vld [vmem:[#allocation7 + $0x148] ss:$16 sps:$4 sm:$0xff]   ;;  %v7949_v57 = vld [vmem:[#allocation7 + $0x14c] ss:$16 sps:$4 sm:$0xff]  }
0x10d4   : > { %v4543_v10 = vpop.xlane.xlu1 %4542  ;;  %v7952_v6 = vld [vmem:[#allocation7 + $0x164] ss:$16 sps:$4 sm:$0xff]   ;;  %5068 = vmatprep.subr.bf16.mxu0 %v7949_v57  ;;  %v4732_v57 = vsub.s32 5, %v12264_v41 }
0x10d5   : > { %v10808_v30 = vsub.f32 %v10742_v54, %v4569_v63  ;;  %v4570_v4 = vmul.f32 0.0078125, %v4543_v10  ;;  %4616 = vadd.xlane.f32.xlu0 %v4599_v34  ;;  %v4600_v8 = vmul.f32 %v10803_v55, %v10803_v55  ;;  %v7950_v63 = vld [vmem:[#allocation7 + $0x160] ss:$16 sps:$4 sm:$0xff]   ;;  %5069 = vmatpush1.bf16.msra.mxu0 %v7947_v11  ;;  %v7953_v34 = vld [vmem:[#allocation7 + $0x168] ss:$16 sps:$4 sm:$0xff]  }
0x10d6   : > { %v4545_v48 = vpop.xlane.xlu0 %4544  ;;  %v7958_v10 = vld [vmem:[#allocation7 + $0x184] ss:$16 sps:$4 sm:$0xff]  }
0x10d7   : > { %v10813_v5 = vsub.f32 %v10746_v32, %v4570_v4  ;;  %v4571_v53 = vmul.f32 0.0078125, %v4545_v48  ;;  %4618 = vadd.xlane.f32.xlu1 %v4600_v8  ;;  %v4601_v2 = vmul.f32 %v10808_v30, %v10808_v30  ;;  %v7961_v4 = vld [vmem:[#allocation7 + $0x18c] ss:$16 sps:$4 sm:$0xff]   ;;  %v7956_v8 = vld [vmem:[#allocation7 + $0x180] ss:$16 sps:$4 sm:$0xff]  }
0x10d8   : > { %v4547_v60 = vpop.xlane.xlu1 %4546  ;;  %v7959_v48 = vld [vmem:[#allocation7 + $0x188] ss:$16 sps:$4 sm:$0xff]  }
0x10d9   : > { %v10818_v46 = vsub.f32 %v10750_v0, %v4571_v53  ;;  %v4572_v42 = vmul.f32 0.0078125, %v4547_v60  ;;  %4620 = vadd.xlane.f32.xlu0 %v4601_v2  ;;  %v4602_v39 = vmul.f32 %v10813_v5, %v10813_v5  ;;  %v7964_v53 = vld [vmem:[#allocation7 + $0x1a4] ss:$16 sps:$4 sm:$0xff]   ;;  %v7967_v2 = vld [vmem:[#allocation7 + $0x1ac] ss:$16 sps:$4 sm:$0xff]  }
0x10da   : > { %v4549_v27 = vpop.xlane.xlu0 %4548  ;;  %v7962_v60 = vld [vmem:[#allocation7 + $0x1a0] ss:$16 sps:$4 sm:$0xff]  }
0x10db   : > { %v10823_v9 = vsub.f32 %v10754_v17, %v4572_v42  ;;  %v4573_v44 = vmul.f32 0.0078125, %v4549_v27  ;;  %4622 = vadd.xlane.f32.xlu1 %v4602_v39  ;;  %v4603_v49 = vmul.f32 %v10818_v46, %v10818_v46  ;;  %v7965_v42 = vld [vmem:[#allocation7 + $0x1a8] ss:$16 sps:$4 sm:$0xff]   ;;  %v7970_v39 = vld [vmem:[#allocation7 + $0x1c4] ss:$16 sps:$4 sm:$0xff]  }
0x10dc   : > { %v4551_v54 = vpop.xlane.xlu1 %4550  ;;  %v7973_v27 = vld [vmem:[#allocation7 + $0x1cc] ss:$16 sps:$4 sm:$0xff]  }
0x10dd   : > { %v10828_v23 = vsub.f32 %v10758_v59, %v4573_v44  ;;  %v4574_v24 = vmul.f32 0.0078125, %v4551_v54  ;;  %4624 = vadd.xlane.f32.xlu0 %v4603_v49  ;;  %v4604_v32 = vmul.f32 %v10823_v9, %v10823_v9  ;;  %v7968_v44 = vld [vmem:[#allocation7 + $0x1c0] ss:$16 sps:$4 sm:$0xff]   ;;  %v7971_v49 = vld [vmem:[#allocation7 + $0x1c8] ss:$16 sps:$4 sm:$0xff]  }
0x10de   : > { %v4553_v40 = vpop.xlane.xlu0 %4552  ;;  %v7976_v54 = vld [vmem:[#allocation7 + $0x1e4] ss:$16 sps:$4 sm:$0xff]  }
0x10df   : > { %v10833_v31 = vsub.f32 %v10762_v7, %v4574_v24  ;;  %v4575_v0 = vmul.f32 0.0078125, %v4553_v40  ;;  %4626 = vadd.xlane.f32.xlu1 %v4604_v32  ;;  %v4605_v17 = vmul.f32 %v10828_v23, %v10828_v23  ;;  %v7979_v24 = vld [vmem:[#allocation7 + $0x1ec] ss:$16 sps:$4 sm:$0xff]   ;;  %v7974_v32 = vld [vmem:[#allocation7 + $0x1e0] ss:$16 sps:$4 sm:$0xff]  }
0x10e0   : > { %v4555_v35 = vpop.xlane.xlu1 %4554  ;;  %v7977_v40 = vld [vmem:[#allocation7 + $0x1e8] ss:$16 sps:$4 sm:$0xff]  }
0x10e1   : > { %v10838_v50 = vsub.f32 %v10766_v15, %v4575_v0  ;;  %v4576_v59 = vmul.f32 0.0078125, %v4555_v35  ;;  %4628 = vadd.xlane.f32.xlu0 %v4605_v17  ;;  %v4606_v28 = vmul.f32 %v10833_v31, %v10833_v31  ;;  %v7980_v0 = vld [vmem:[#allocation8 + $0x140] sm:$0xff]  }
0x10e2   : > { %v4557_v45 = vpop.xlane.xlu0 %4556  ;;  %v7981_v17 = vld [vmem:[#allocation8 + $0x1c0] sm:$0xff]  }
0x10e3   : > { %v10843_v33 = vsub.f32 %v10770_v47, %v4576_v59  ;;  %v4577_v7 = vmul.f32 0.0078125, %v4557_v45  ;;  %4630 = vadd.xlane.f32.xlu1 %v4606_v28  ;;  %v4607_v38 = vmul.f32 %v10838_v50, %v10838_v50 }
0x10e4   : > { %v4559_v36 = vpop.xlane.xlu1 %4558 }
0x10e5   : > { %v10848_v58 = vsub.f32 %v10774_v61, %v4577_v7  ;;  %v4578_v15 = vmul.f32 0.0078125, %v4559_v36  ;;  %4632 = vadd.xlane.f32.xlu0 %v4607_v38  ;;  %v4608_v29 = vmul.f32 %v10843_v33, %v10843_v33 }
0x10e6   : > { %v4561_v37 = vpop.xlane.xlu0 %4560 }
0x10e7   : > { %v10853_v12 = vsub.f32 %v10778_v25, %v4578_v15  ;;  %v4579_v47 = vmul.f32 0.0078125, %v4561_v37  ;;  %4634 = vadd.xlane.f32.xlu1 %v4608_v29  ;;  %v4609_v21 = vmul.f32 %v10848_v58, %v10848_v58 }
0x10e8   : > { %v4563_v26 = vpop.xlane.xlu1 %4562 }
0x10e9   : > { %v10858_v62 = vsub.f32 %v10782_v56, %v4579_v47  ;;  %v4580_v61 = vmul.f32 0.0078125, %v4563_v26  ;;  %4636 = vadd.xlane.f32.xlu0 %v4609_v21  ;;  %v4610_v14 = vmul.f32 %v10853_v12, %v10853_v12 }
0x10ea   : > { %v4565_v52 = vpop.xlane.xlu0 %4564 }
0x10eb   : > { %v10863_v22 = vsub.f32 %v10786_v18, %v4580_v61  ;;  %v4581_v25 = vmul.f32 0.0078125, %v4565_v52  ;;  %4638 = vadd.xlane.f32.xlu1 %v4610_v14  ;;  %v4611_v43 = vmul.f32 %v10858_v62, %v10858_v62  ;;  %v7946_v18 = vld [vmem:[#allocation7 + $0x144] ss:$16 sps:$4 sm:$0xff]   ;;  %v4712_v14 = vsub.s32 4, %v12264_v41 }
0x10ec   : > { %4955 = vmatprep.subr.bf16.mxu1 %v7946_v18 }
0x10ed   : > { %v10868_v51 = vsub.f32 %v10790_v13, %v4581_v25  ;;  %4640 = vadd.xlane.f32.xlu0 %v4611_v43  ;;  %v4612_v56 = vmul.f32 %v10863_v22, %v10863_v22  ;;  %4956 = vmatpush1.bf16.msra.mxu1 %v7944_v1  ;;  %v7955_v13 = vld [vmem:[#allocation7 + $0x16c] ss:$16 sps:$4 sm:$0xff]  }
0x10ee   : > { %4957 = vmatprep.subr.bf16.mxu1 %v7952_v6  ;;  %5070 = vmatprep.subr.bf16.mxu0 %v7955_v13 }
0x10ef   : > { %4642 = vadd.xlane.f32.xlu1 %v4612_v56  ;;  %v4613_v3 = vmul.f32 %v10868_v51, %v10868_v51  ;;  %5071 = vmatpush1.bf16.msra.mxu0 %v7953_v34 }
0x10f0   : > { %5072 = vmatprep.subr.bf16.mxu0 %v7961_v4 }
0x10f1   : > { %4644 = vadd.xlane.f32.xlu0 %v4613_v3  ;;  %4958 = vmatpush1.bf16.msra.mxu1 %v7950_v63  ;;  %v8525_v3 = vld [vmem:[%s11923_s7] sm:$0xff] }
0x10f2   : > { %4959 = vmatprep.subr.bf16.mxu1 %v7958_v10  ;;  %v10878_v1 = vrot.slane %v8525_v3, %v4712_v14 }
0x10f3   : > { %5073 = vmatpush1.bf16.msra.mxu0 %v7959_v48  ;;  %v10884_v48 = vrot.slane %v8525_v3, %v4732_v57  ;;  %v7992_v57 = vld [vmem:[#allocation8 + $0x158] sm:$0xff]  }
0x10f4   : > { %5074 = vmatprep.subr.bf16.mxu0 %v7967_v2 }
0x10f5   : > { %4960 = vmatpush1.bf16.msra.mxu1 %v7956_v8 }
0x10f6   : > { %4961 = vmatprep.subr.bf16.mxu1 %v7964_v53 }
0x10f7   : > { %5075 = vmatpush1.bf16.msra.mxu0 %v7965_v42 }
0x10f8   : > { %5076 = vmatprep.subr.bf16.mxu0 %v7973_v27 }
0x10f9   : > { %4962 = vmatpush1.bf16.msra.mxu1 %v7962_v60 }
0x10fa   : > { %4963 = vmatprep.subr.bf16.mxu1 %v7970_v39 }
0x10fb   : > { %5077 = vmatpush1.bf16.msra.mxu0 %v7971_v49 }
0x10fc   : > { %5078 = vmatprep.subr.bf16.mxu0 %v7979_v24 }
0x10fd   : > { %4964 = vmatpush1.bf16.msra.mxu1 %v7968_v44 }
0x10fe   : > { %4965 = vmatprep.subr.bf16.mxu1 %v7976_v54 }
0x10ff   : > { %5079 = vmatpush1.bf16.msra.mxu0 %v7977_v40 }
0x1100   : > { %7290 = vmatprep.subr.bf16.mxu0 %v7981_v17 }
0x1101   : > { %4966 = vmatpush1.bf16.msra.mxu1 %v7974_v32 }
0x1102   : > { %7226 = vmatprep.subr.bf16.mxu1 %v7980_v0  ;;  %v7982_v0 = vld [vmem:[#allocation8 + $0x100] sm:$0xff]  }
0x1160   : > { %v4615_v35 = vpop.xlane.xlu1 %4614 }
0x1161   : > { %v4646_v59 = vmul.f32 0.0078125, %v4615_v35 }
0x1162   : > { %v4617_v28 = vpop.xlane.xlu0 %4616 }
0x1163   : > { %v4662_v45 = vadd.f32 1e-12, %v4646_v59  ;;  %v4647_v7 = vmul.f32 0.0078125, %v4617_v28  ;;  %v7983_v59 = vld [vmem:[#allocation8 + $0x180] sm:$0xff]   ;;  %v7984_v28 = vld [vmem:[#allocation8 + $0x148] sm:$0xff]  }
0x1164   : > { %v4619_v38 = vpop.xlane.xlu1 %4618 }
0x1165   : > { %8332 = vrsqrt.f32 %v4662_v45  ;;  %v4663_v36 = vadd.f32 1e-12, %v4647_v7  ;;  %v4648_v15 = vmul.f32 0.0078125, %v4619_v38 }
0x1166   : > { %v4621_v29 = vpop.xlane.xlu0 %4620 }
0x1167   : > { %8334 = vrsqrt.f32 %v4663_v36  ;;  %v4664_v37 = vadd.f32 1e-12, %v4648_v15  ;;  %v4649_v47 = vmul.f32 0.0078125, %v4621_v29  ;;  %v7986_v29 = vld [vmem:[#allocation8 + $0x108] sm:$0xff]  }
0x1168   : > { %v4623_v21 = vpop.xlane.xlu1 %4622 }
0x1169   : > { %8336 = vrsqrt.f32 %v4664_v37  ;;  %v4665_v26 = vadd.f32 1e-12, %v4649_v47  ;;  %v4650_v61 = vmul.f32 0.0078125, %v4623_v21  ;;  %v7987_v47 = vld [vmem:[#allocation8 + $0x188] sm:$0xff]   ;;  %v7988_v21 = vld [vmem:[#allocation8 + $0x150] sm:$0xff]  }
0x116a   : > { %v4625_v52 = vpop.xlane.xlu0 %4624 }
0x116b   : > { %8338 = vrsqrt.f32 %v4665_v26  ;;  %v4651_v25 = vmul.f32 0.0078125, %v4625_v52  ;;  %v4666_v43 = vadd.f32 1e-12, %v4650_v61 }
0x116c   : > { %v4627_v18 = vpop.xlane.xlu1 %4626 }
0x116d   : > { %v4667_v56 = vadd.f32 1e-12, %v4651_v25  ;;  %v4652_v10 = vmul.f32 0.0078125, %v4627_v18  ;;  %v7990_v18 = vld [vmem:[#allocation8 + $0x110] sm:$0xff]  }
0x116e   : > { %v4629_v11 = vpop.xlane.xlu0 %4628 }
0x116f   : > { %v8333_v6 = vpop.eup %8332  ;;  %8340 = vrsqrt.f32 %v4667_v56  ;;  %v4653_v63 = vmul.f32 0.0078125, %v4629_v11  ;;  %v4668_v27 = vadd.f32 1e-12, %v4652_v10  ;;  %v7991_v11 = vld [vmem:[#allocation8 + $0x190] sm:$0xff]  }
0x1170   : > { %v4694_v13 = vmul.f32 %v8333_v6, %v10795_v20  ;;  %8342 = vrsqrt.f32 %v4666_v43  ;;  %v4631_v44 = vpop.xlane.xlu1 %4630  ;;  %v7989_v43 = vld [vmem:[#allocation8 + $0x1d0] sm:$0xff]   ;;  %v7993_v6 = vld [vmem:[#allocation8 + $0x1d8] sm:$0xff]  }
0x1171   : > { %v8335_v34 = vpop.eup %8334  ;;  %v4669_v2 = vadd.f32 1e-12, %v4653_v63  ;;  %v4654_v35 = vmul.f32 0.0078125, %v4631_v44 }
0x1172   : > { %v4714_v4 = vmul.f32 %v10878_v1, %v4694_v13  ;;  %v4695_v8 = vmul.f32 %v8335_v34, %v10798_v19  ;;  %v4633_v42 = vpop.xlane.xlu0 %4632 }
0x1173   : > { %v8337_v53 = vpop.eup %8336  ;;  %8344 = vrsqrt.f32 %v4669_v2  ;;  %v4655_v24 = vmul.f32 0.0078125, %v4633_v42  ;;  %v4670_v37 = vadd.f32 1e-12, %v4654_v35  ;;  %v7995_v2 = vld [vmem:[#allocation8 + $0x198] sm:$0xff]  }
0x1174   : > { %v4715_v60 = vmul.f32 %v10878_v1, %v4695_v8  ;;  %v10888_v49 = vadd.f32 %v10884_v48, %v4714_v4  ;;  %v4696_v54 = vmul.f32 %v8337_v53, %v10803_v55  ;;  %8346 = vrsqrt.f32 %v4668_v27  ;;  %v7985_v55 = vld [vmem:[#allocation8 + $0x1c8] sm:$0xff]   ;;  %v4635_v26 = vpop.xlane.xlu1 %4634  ;;  %v7994_v53 = vld [vmem:[#allocation8 + $0x118] sm:$0xff]  }
0x1175   : > { %v8339_v39 = vpop.eup %8338  ;;  %v4656_v3 = vmul.f32 0.0078125, %v4635_v26 }
0x1176   : > { %12281 = vst [vmem:[#allocation75_spill] sm:$0xff] %v10888_v49  ;;  %v10891_v20 = vadd.f32 %v10884_v48, %v4715_v60  ;;  %v4697_v19 = vmul.f32 %v8339_v39, %v10808_v30  ;;  %v4716_v45 = vmul.f32 %v10878_v1, %v4696_v54  ;;  %v4671_v30 = vadd.f32 1e-12, %v4655_v24  ;;  %v4637_v38 = vpop.xlane.xlu0 %4636 }
0x1177   : > { %v4657_v52 = vmul.f32 0.0078125, %v4637_v38  ;;  %v4672_v8 = vadd.f32 1e-12, %v4656_v3 }
0x1178   : > { %12282 = vst [vmem:[#allocation76_spill] sm:$0xff] %v10891_v20  ;;  %v4750_v32 = vpack.c.bf16 %v10891_v20, %v10888_v49  ;;  %v4717_v40 = vmul.f32 %v10878_v1, %v4697_v19  ;;  %v10906_v61 = vadd.f32 %v10884_v48, %v4716_v45  ;;  %8348 = vrsqrt.f32 %v4671_v30  ;;  %v4639_v60 = vpop.xlane.xlu1 %4638 }
0x1179   : > { %v8341_v17 = vpop.eup %8340  ;;  %8350 = vrsqrt.f32 %v4670_v37  ;;  %v4673_v13 = vadd.f32 1e-12, %v4657_v52  ;;  %v4658_v19 = vmul.f32 0.0078125, %v4639_v60  ;;  %v7996_v60 = vld [vmem:[#allocation8 + $0x160] sm:$0xff]  }
0x117a   : > { %4984 = vmatmul.mubr.bf16.vlgmr.msra.gmra.mrb[160].mxu1 %v4750_v32  ;;  %5097 = vmatmul.mubr.bf16.vlgmr.msra.gmra.mrb[176].mxu0 %v4750_v32  ;;  %v8343_v7 = vpop.eup %8342  ;;  %v10902_v36 = vadd.f32 %v10884_v48, %v4717_v40  ;;  %v4699_v15 = vmul.f32 %v8341_v17, %v10818_v46  ;;  %12284 = vst [vmem:[#allocation79_spill] sm:$0xff] %v10906_v61  ;;  %v4641_v34 = vpop.xlane.xlu0 %4640 }
0x117b   : > { %4993 = vmatprep.mubr.bf16.mxu1 %v12247_v16  ;;  %5106 = vmatprep.mubr.bf16.mxu0 %v12247_v16  ;;  %v4698_v14 = vmul.f32 %v8343_v7, %v10813_v5  ;;  %8352 = vrsqrt.f32 %v4673_v13  ;;  %v4659_v27 = vmul.f32 0.0078125, %v4641_v34  ;;  %v4674_v35 = vadd.f32 1e-12, %v4658_v19  ;;  %v8005_v19 = vld [vmem:[#allocation8 + $0x1f0] sm:$0xff]  }
0x117c   : > { %12283 = vst [vmem:[#allocation78_spill] sm:$0xff] %v10902_v36  ;;  %7227 = vmatpush3.bf16.msra.mxu1 %v7982_v0  ;;  %7291 = vmatpush3.bf16.msra.mxu0 %v7983_v59  ;;  %v4751_v25 = vpack.c.bf16 %v10902_v36, %v10906_v61  ;;  %v4719_v46 = vmul.f32 %v10878_v1, %v4699_v15  ;;  %8354 = vrsqrt.f32 %v4672_v8  ;;  %v4643_v59 = vpop.xlane.xlu1 %4642 }
0x117d   : > { %7228 = vmatprep.subr.bf16.mxu1 %v7984_v28  ;;  %7292 = vmatprep.subr.bf16.mxu0 %v7985_v55  ;;  %v8345_v56 = vpop.eup %8344  ;;  %v4718_v5 = vmul.f32 %v10878_v1, %v4698_v14  ;;  %v4660_v15 = vmul.f32 0.0078125, %v4643_v59 }
0x117e   : > { %v8347_v63 = vpop.eup %8346  ;;  %v10916_v10 = vadd.f32 %v10884_v48, %v4719_v46  ;;  %v4701_v4 = vmul.f32 %v8345_v56, %v10828_v23  ;;  %v4645_v40 = vpop.xlane.xlu0 %4644 }
0x117f   : > { %v10920_v42 = vadd.f32 %v10884_v48, %v4718_v5  ;;  %v4700_v39 = vmul.f32 %v8347_v63, %v10823_v9  ;;  %v4675_v9 = vadd.f32 1e-12, %v4659_v27  ;;  %v4661_v55 = vmul.f32 0.0078125, %v4645_v40  ;;  %v7998_v27 = vld [vmem:[#allocation8 + $0x120] sm:$0xff]   ;;  %v8009_v40 = vld [vmem:[#allocation8 + $0x1f8] sm:$0xff]  }
0x1180   : > { %7229 = vmatpush3.bf16.msra.mxu1 %v7986_v29  ;;  %7293 = vmatpush3.bf16.msra.mxu0 %v7987_v47  ;;  %12285 = vst [vmem:[#allocation58_spill] sm:$0xff] %v10916_v10  ;;  %v4721_v23 = vmul.f32 %v10878_v1, %v4701_v4 }
0x1181   : > { %7230 = vmatprep.subr.bf16.mxu1 %v7988_v21  ;;  %7294 = vmatprep.subr.bf16.mxu0 %v7989_v43  ;;  %12286 = vst [vmem:[#allocation62_spill] sm:$0xff] %v10920_v42  ;;  %v4752_v44 = vpack.c.bf16 %v10916_v10, %v10920_v42  ;;  %v4720_v24 = vmul.f32 %v10878_v1, %v4700_v39  ;;  %8356 = vrsqrt.f32 %v4675_v9  ;;  %v4677_v37 = vadd.f32 1e-12, %v4661_v55  ;;  %v7997_v39 = vld [vmem:[#allocation8 + $0x1e0] sm:$0xff]   ;;  %v8008_v9 = vld [vmem:[#allocation8 + $0x178] sm:$0xff]  }
0x1182   : > { %4994 = vmatmul.mubr.bf16.gmra.mrb[164].mxu1 %v4751_v25  ;;  %5107 = vmatmul.mubr.bf16.gmra.mrb[180].mxu0 %v4751_v25  ;;  %v8349_v54 = vpop.eup %8348  ;;  %v10930_v0 = vadd.f32 %v10884_v48, %v4721_v23  ;;  %8358 = vrsqrt.f32 %v4674_v35  ;;  %v4676_v21 = vadd.f32 1e-12, %v4660_v15  ;;  %v8002_v23 = vld [vmem:[#allocation8 + $0x128] sm:$0xff]   ;;  %v8011_v35 = vld [vmem:[#allocation8 + $0x1b8] sm:$0xff]  }
0x1183   : > { %5003 = vmatprep.mubr.bf16.mxu1 %v12247_v16  ;;  %5116 = vmatprep.mubr.bf16.mxu0 %v12247_v16  ;;  %v8351_v32 = vpop.eup %8350  ;;  %v4703_v17 = vmul.f32 %v8349_v54, %v10838_v50  ;;  %v10934_v28 = vadd.f32 %v10884_v48, %v4720_v24  ;;  %8360 = vrsqrt.f32 %v4677_v37  ;;  %v8003_v54 = vld [vmem:[#allocation8 + $0x1a8] sm:$0xff]   ;;  %v8006_v24 = vld [vmem:[#allocation8 + $0x130] sm:$0xff]  }
0x1184   : > { %7231 = vmatpush3.bf16.msra.mxu1 %v7990_v18  ;;  %7295 = vmatpush3.bf16.msra.mxu0 %v7991_v11  ;;  %12287 = vst [vmem:[#allocation59_spill] sm:$0xff] %v10930_v0  ;;  %v4702_v45 = vmul.f32 %v8351_v32, %v10833_v31  ;;  %8362 = vrsqrt.f32 %v4676_v21  ;;  %v8007_v32 = vld [vmem:[#allocation8 + $0x1b0] sm:$0xff]  }
0x1185   : > { %7232 = vmatprep.subr.bf16.mxu1 %v7992_v57  ;;  %7296 = vmatprep.subr.bf16.mxu0 %v7993_v6  ;;  %12288 = vst [vmem:[#allocation63_spill] sm:$0xff] %v10934_v28  ;;  %v4753_v7 = vpack.c.bf16 %v10930_v0, %v10934_v28  ;;  %v4723_v30 = vmul.f32 %v10878_v1, %v4703_v17  ;;  %v8353_v38 = vpop.eup %8352  ;;  %v8010_v17 = vld [vmem:[#allocation8 + $0x138] sm:$0xff]  }
0x1186   : > { %v4722_v50 = vmul.f32 %v10878_v1, %v4702_v45  ;;  %v8355_v29 = vpop.eup %8354  ;;  %v4705_v47 = vmul.f32 %v8353_v38, %v10848_v58 }
0x1187   : > { %v10944_v31 = vadd.f32 %v10884_v48, %v4723_v30  ;;  %v4704_v14 = vmul.f32 %v8355_v29, %v10843_v33 }
0x1188   : > { %7233 = vmatpush3.bf16.msra.mxu1 %v7994_v53  ;;  %7297 = vmatpush3.bf16.msra.mxu0 %v7995_v2  ;;  %v10948_v26 = vadd.f32 %v10884_v48, %v4722_v50  ;;  %v4725_v25 = vmul.f32 %v10878_v1, %v4705_v47 }
0x1189   : > { %12289 = vst [vmem:[#allocation56_spill] sm:$0xff] %v10944_v31  ;;  %v4724_v43 = vmul.f32 %v10878_v1, %v4704_v14  ;;  %7234 = vmatprep.subr.bf16.mxu1 %v7996_v60  ;;  %7298 = vmatprep.subr.bf16.mxu0 %v7997_v39 }
0x118a   : > { %5004 = vmatmul.mubr.bf16.gmra.mrb[168].mxu1 %v4752_v44  ;;  %5117 = vmatmul.mubr.bf16.gmra.mrb[184].mxu0 %v4752_v44  ;;  %12290 = vst [vmem:[#allocation60_spill] sm:$0xff] %v10948_v26  ;;  %v4754_v52 = vpack.c.bf16 %v10944_v31, %v10948_v26  ;;  %v10958_v58 = vadd.f32 %v10884_v48, %v4725_v25  ;;  %v7999_v44 = vld [vmem:[#allocation8 + $0x1a0] sm:$0xff]  }
0x118b   : > { %5013 = vmatprep.mubr.bf16.mxu1 %v12247_v16  ;;  %5126 = vmatprep.mubr.bf16.mxu0 %v12247_v16  ;;  %v8357_v46 = vpop.eup %8356  ;;  %v10962_v3 = vadd.f32 %v10884_v48, %v4724_v43 }
0x118c   : > { %v8359_v56 = vpop.eup %8358  ;;  %12291 = vst [vmem:[#allocation57_spill] sm:$0xff] %v10958_v58  ;;  %v4707_v33 = vmul.f32 %v8357_v46, %v10858_v62  ;;  %7235 = vmatpush3.bf16.msra.mxu1 %v7998_v27  ;;  %7299 = vmatpush3.bf16.msra.mxu0 %v7999_v44 }
0x118d   : > { %12292 = vst [vmem:[#allocation61_spill] sm:$0xff] %v10962_v3  ;;  %v4706_v18 = vmul.f32 %v8359_v56, %v10853_v12  ;;  %v4755_v11 = vpack.c.bf16 %v10958_v58, %v10962_v3  ;;  %v8361_v57 = vpop.eup %8360 }
0x118e   : > { %v4727_v5 = vmul.f32 %v10878_v1, %v4707_v33  ;;  %v8363_v63 = vpop.eup %8362  ;;  %v4709_v12 = vmul.f32 %v8361_v57, %v10868_v51 }
0x118f   : > { %v4726_v6 = vmul.f32 %v10878_v1, %v4706_v18  ;;  %v4708_v34 = vmul.f32 %v8363_v63, %v10863_v22 }
0x1190   : > { %v10972_v62 = vadd.f32 %v10884_v48, %v4727_v5  ;;  %v4729_v8 = vmul.f32 %v10878_v1, %v4709_v12 }
0x1191   : > { %v10976_v13 = vadd.f32 %v10884_v48, %v4726_v6  ;;  %v4728_v53 = vmul.f32 %v10878_v1, %v4708_v34  ;;  %v8001_v1 = vld [vmem:[#allocation8 + $0x1e8] sm:$0xff]  }
0x1192   : > { %5014 = vmatmul.mubr.bf16.gmra.mrb[172].mxu1 %v4753_v7  ;;  %5127 = vmatmul.mubr.bf16.gmra.mrb[188].mxu0 %v4753_v7  ;;  %12293 = vst [vmem:[#allocation80_spill] sm:$0xff] %v10972_v62  ;;  %v10986_v51 = vadd.f32 %v10884_v48, %v4729_v8 }
0x1193   : > { %5023 = vmatprep.mubr.bf16.mxu1 %v12247_v16  ;;  %5136 = vmatprep.mubr.bf16.mxu0 %v12247_v16  ;;  %12294 = vst [vmem:[#allocation84_spill] sm:$0xff] %v10976_v13  ;;  %v4756_v4 = vpack.c.bf16 %v10972_v62, %v10976_v13  ;;  %v10989_v2 = vadd.f32 %v10884_v48, %v4728_v53  ;;  %v8004_v48 = vld [vmem:[#allocation8 + $0x170] sm:$0xff]  }
0x1194   : > { %12295 = vst [vmem:[#allocation85_spill] sm:$0xff] %v10986_v51  ;;  %7300 = vmatprep.subr.bf16.mxu0 %v8001_v1 }
0x1195   : > { %12296 = vst [vmem:[#allocation86_spill] sm:$0xff] %v10989_v2  ;;  %v4757_v22 = vpack.c.bf16 %v10986_v51, %v10989_v2  ;;  %7301 = vmatpush3.bf16.msra.mxu0 %v8003_v54 }
0x1196   : > { %7302 = vmatprep.subr.bf16.mxu0 %v8005_v19 }
0x1199   : > { %7303 = vmatpush3.bf16.msra.mxu0 %v8007_v32 }
0x119a   : > { %5024 = vmatmul.mubr.bf16.gmra.mrb[176].mxu1 %v4754_v52  ;;  %5137 = vmatmul.mubr.bf16.gmra.mrb[192].mxu0 %v4754_v52 }
0x119b   : > { %5033 = vmatprep.mubr.bf16.mxu1 %v12247_v16  ;;  %5146 = vmatprep.mubr.bf16.mxu0 %v12247_v16 }
0x119c   : > { %7304 = vmatprep.subr.bf16.mxu0 %v8009_v40 }
0x119d   : > { %7305 = vmatpush3.bf16.msra.mxu0 %v8011_v35 }
0x11a2   : > { %5034 = vmatmul.mubr.bf16.gmra.mrb[180].mxu1 %v4755_v11  ;;  %5147 = vmatmul.mubr.bf16.gmra.mrb[196].mxu0 %v4755_v11 }
0x11a3   : > { %5043 = vmatprep.mubr.bf16.mxu1 %v12247_v16  ;;  %5156 = vmatprep.mubr.bf16.mxu0 %v12247_v16 }
0x11aa   : > { %5044 = vmatmul.mubr.bf16.gmra.mrb[184].mxu1 %v4756_v4  ;;  %5157 = vmatmul.mubr.bf16.gmra.mrb[200].mxu0 %v4756_v4 }
0x11ab   : > { %5053 = vmatprep.mubr.bf16.mxu1 %v12247_v16  ;;  %5166 = vmatprep.mubr.bf16.mxu0 %v12247_v16  ;;  %v8000_v16 = vld [vmem:[#allocation8 + $0x168] sm:$0xff]  }
0x11ac   : > { %7236 = vmatprep.subr.bf16.mxu1 %v8000_v16 }
0x11ad   : > { %7237 = vmatpush3.bf16.msra.mxu1 %v8002_v23 }
0x11ae   : > { %7238 = vmatprep.subr.bf16.mxu1 %v8004_v48 }
0x11b1   : > { %7239 = vmatpush3.bf16.msra.mxu1 %v8006_v24 }
0x11b2   : > { %5054 = vmatmul.mubr.bf16.gmra.mrb[188].mxu1 %v4757_v22  ;;  %5167 = vmatmul.mubr.bf16.gmra.mrb[204].mxu0 %v4757_v22 }
0x11b3   : > { %7240 = vmatprep.subr.bf16.mxu1 %v8008_v9 }
0x11b5   : > { %7241 = vmatpush3.bf16.msra.mxu1 %v8010_v17 }
0x124d   : > { %v4985_v59 = vpop.f32.mrb[160].mxu1  ;;  %v5098_v45 = vpop.f32.mrb[176].mxu0 }
0x124e   : > { %v5241_v55 = vmul.f32 0.044715, %v4985_v59  ;;  %v5243_v7 = vmul.f32 0.044715, %v5098_v45  ;;  %v10993_v30 = vmul.f32 0.5, %v4985_v59  ;;  %v10995_v38 = vpop.f32.mrb[161].mxu1 }
0x124f   : > { %v10997_v15 = vpop.f32.mrb[177].mxu0  ;;  %v5242_v37 = vmul.f32 0.044715, %v10995_v38  ;;  %v4989_v21 = vpop.f32.mrb[162].mxu1  ;;  %v11003_v52 = vmul.f32 0.5, %v5098_v45 }
0x1250   : > { %v5305_v50 = vmul.f32 %v5241_v55, %v4985_v59  ;;  %v5307_v29 = vmul.f32 %v5243_v7, %v5098_v45  ;;  %v5244_v47 = vmul.f32 0.044715, %v10997_v15  ;;  %v11001_v14 = vpop.f32.mrb[178].mxu0  ;;  %v11005_v25 = vmul.f32 0.5, %v4989_v21  ;;  %v11010_v5 = vpop.f32.mrb[163].mxu1 }
0x1251   : > { %v5245_v46 = vmul.f32 0.044715, %v4989_v21  ;;  %v5247_v43 = vmul.f32 0.044715, %v11001_v14  ;;  %v5306_v18 = vmul.f32 %v5242_v37, %v10995_v38  ;;  %v11012_v57 = vpop.f32.mrb[179].mxu0 }
0x1252   : > { %v5369_v56 = vmul.f32 %v5305_v50, %v4985_v59  ;;  %v5371_v33 = vmul.f32 %v5307_v29, %v5098_v45  ;;  %v5308_v11 = vmul.f32 %v5244_v47, %v10997_v15  ;;  %v5246_v12 = vmul.f32 0.044715, %v11010_v5 }
0x1253   : > { %v5309_v6 = vmul.f32 %v5245_v46, %v4989_v21  ;;  %v5311_v63 = vmul.f32 %v5247_v43, %v11001_v14  ;;  %v5248_v34 = vmul.f32 0.044715, %v11012_v57  ;;  %v5370_v53 = vmul.f32 %v5306_v18, %v10995_v38 }
0x1254   : > { %v5433_v4 = vadd.f32 %v5369_v56, %v4985_v59  ;;  %v5435_v8 = vadd.f32 %v5371_v33, %v5098_v45  ;;  %v5372_v22 = vmul.f32 %v5308_v11, %v10997_v15  ;;  %v5310_v27 = vmul.f32 %v5246_v12, %v11010_v5 }
0x1255   : > { %v5373_v60 = vmul.f32 %v5309_v6, %v4989_v21  ;;  %v5375_v39 = vmul.f32 %v5311_v63, %v11001_v14  ;;  %v5312_v44 = vmul.f32 %v5248_v34, %v11012_v57  ;;  %v11022_v16 = vpop.f32.mrb[164].mxu1  ;;  %v11024_v1 = vpop.f32.mrb[180].mxu0  ;;  %v5434_v48 = vadd.f32 %v5370_v53, %v10995_v38 }
0x1256   : > { %v5497_v23 = vmul.f32 0.7978846, %v5433_v4  ;;  %v5499_v54 = vmul.f32 0.7978846, %v5435_v8  ;;  %v5436_v19 = vadd.f32 %v5372_v22, %v10997_v15  ;;  %v11028_v24 = vpop.f32.mrb[165].mxu1  ;;  %v11030_v32 = vpop.f32.mrb[181].mxu0  ;;  %v5374_v17 = vmul.f32 %v5310_v27, %v11010_v5 }
0x1257   : > { %v5437_v9 = vadd.f32 %v5373_v60, %v4989_v21  ;;  %v5439_v40 = vadd.f32 %v5375_v39, %v11001_v14  ;;  %v5376_v35 = vmul.f32 %v5312_v44, %v11012_v57  ;;  %v11035_v59 = vpop.f32.mrb[166].mxu1  ;;  %v11037_v45 = vpop.f32.mrb[182].mxu0  ;;  %v5498_v55 = vmul.f32 0.7978846, %v5434_v48 }
0x1258   : > { %8364 = vtanh.f32 %v5497_v23  ;;  %v5500_v7 = vmul.f32 0.7978846, %v5436_v19  ;;  %v5249_v50 = vmul.f32 0.044715, %v11022_v16  ;;  %v5438_v47 = vadd.f32 %v5374_v17, %v11010_v5  ;;  %v11041_v21 = vpop.f32.mrb[167].mxu1  ;;  %v11043_v46 = vpop.f32.mrb[183].mxu0 }
0x1259   : > { %8366 = vtanh.f32 %v5499_v54  ;;  %v5501_v29 = vmul.f32 0.7978846, %v5437_v9  ;;  %v5503_v37 = vmul.f32 0.7978846, %v5439_v40  ;;  %v5440_v43 = vadd.f32 %v5376_v35, %v11012_v57 }
0x125a   : > { %8368 = vtanh.f32 %v5498_v55  ;;  %v5313_v56 = vmul.f32 %v5249_v50, %v11022_v16  ;;  %v5251_v33 = vmul.f32 0.044715, %v11024_v1  ;;  %v5502_v18 = vmul.f32 0.7978846, %v5438_v47 }
0x125b   : > { %8370 = vtanh.f32 %v5500_v7  ;;  %v5250_v11 = vmul.f32 0.044715, %v11028_v24  ;;  %v5252_v6 = vmul.f32 0.044715, %v11030_v32  ;;  %v5504_v63 = vmul.f32 0.7978846, %v5440_v43 }
0x125c   : > { %8372 = vtanh.f32 %v5501_v29  ;;  %v5377_v12 = vmul.f32 %v5313_v56, %v11022_v16  ;;  %v5315_v34 = vmul.f32 %v5251_v33, %v11024_v1  ;;  %v5253_v53 = vmul.f32 0.044715, %v11035_v59 }
0x125d   : > { %8374 = vtanh.f32 %v5503_v37  ;;  %v5314_v4 = vmul.f32 %v5250_v11, %v11028_v24  ;;  %v5316_v8 = vmul.f32 %v5252_v6, %v11030_v32  ;;  %v11055_v22 = vpop.f32.mrb[168].mxu1  ;;  %v11057_v60 = vpop.f32.mrb[184].mxu0  ;;  %v5255_v44 = vmul.f32 0.044715, %v11037_v45 }
0x125e   : > { %12297 = vst [vmem:[#allocation87_spill] sm:$0xff] %v11055_v22  ;;  %12298 = vst [vmem:[#allocation66_spill] sm:$0xff] %v11057_v60  ;;  %8376 = vtanh.f32 %v5502_v18  ;;  %v5441_v39 = vadd.f32 %v5377_v12, %v11022_v16  ;;  %v5379_v27 = vmul.f32 %v5315_v34, %v11024_v1  ;;  %v11062_v23 = vpop.f32.mrb[169].mxu1  ;;  %v11064_v54 = vpop.f32.mrb[185].mxu0  ;;  %v5317_v9 = vmul.f32 %v5253_v53, %v11035_v59 }
0x125f   : > { %12299 = vst [vmem:[#allocation70_spill] sm:$0xff] %v11062_v23  ;;  %12300 = vst [vmem:[#allocation67_spill] sm:$0xff] %v11064_v54  ;;  %8378 = vtanh.f32 %v5504_v63  ;;  %v5378_v48 = vmul.f32 %v5314_v4, %v11028_v24  ;;  %v5380_v19 = vmul.f32 %v5316_v8, %v11030_v32  ;;  %v11069_v40 = vpop.f32.mrb[170].mxu1  ;;  %v11071_v17 = vpop.f32.mrb[186].mxu0  ;;  %v5319_v7 = vmul.f32 %v5255_v44, %v11037_v45 }
0x1260   : > { %12301 = vst [vmem:[#allocation64_spill] sm:$0xff] %v11069_v40  ;;  %12302 = vst [vmem:[#allocation68_spill] sm:$0xff] %v11071_v17  ;;  %v5505_v35 = vmul.f32 0.7978846, %v5441_v39  ;;  %v5443_v55 = vadd.f32 %v5379_v27, %v11024_v1  ;;  %v5254_v50 = vmul.f32 0.044715, %v11041_v21  ;;  %v5381_v56 = vmul.f32 %v5317_v9, %v11035_v59 }
0x1261   : > { %v11076_v29 = vpop.f32.mrb[171].mxu1  ;;  %v11078_v37 = vpop.f32.mrb[187].mxu0  ;;  %v5442_v47 = vadd.f32 %v5378_v48, %v11028_v24  ;;  %v5444_v43 = vadd.f32 %v5380_v19, %v11030_v32  ;;  %v5256_v33 = vmul.f32 0.044715, %v11043_v46  ;;  %v5383_v6 = vmul.f32 %v5319_v7, %v11037_v45 }
0x1262   : > { %12303 = vst [vmem:[#allocation65_spill] sm:$0xff] %v11076_v29  ;;  %12304 = vst [vmem:[#allocation69_spill] sm:$0xff] %v11078_v37  ;;  %v8365_v18 = vpop.eup %8364  ;;  %8380 = vtanh.f32 %v5505_v35  ;;  %v5507_v11 = vmul.f32 0.7978846, %v5443_v55  ;;  %v5318_v63 = vmul.f32 %v5254_v50, %v11041_v21  ;;  %v5445_v53 = vadd.f32 %v5381_v56, %v11035_v59 }
0x1263   : > { %v8367_v12 = vpop.eup %8366  ;;  %v5625_v34 = vadd.f32 1.0, %v8365_v18  ;;  %v5506_v4 = vmul.f32 0.7978846, %v5442_v47  ;;  %v5508_v8 = vmul.f32 0.7978846, %v5444_v43  ;;  %v5183_v27 = vmul.f32 0.5, %v11001_v14 }
0x1264   : > { %v11087_v39 = vpop.eup %8368  ;;  %8382 = vtanh.f32 %v5507_v11  ;;  %v5447_v44 = vadd.f32 %v5383_v6, %v11037_v45  ;;  %v5382_v48 = vmul.f32 %v5318_v63, %v11041_v21  ;;  %v11094_v9 = vadd.f32 1.0, %v8367_v12 }
0x1265   : > { %v11092_v19 = vpop.eup %8370  ;;  %8384 = vtanh.f32 %v5506_v4  ;;  %v5509_v35 = vmul.f32 0.7978846, %v5445_v53  ;;  %v5320_v55 = vmul.f32 %v5256_v33, %v11043_v46  ;;  %v11097_v7 = vpop.f32.mrb[172].mxu1  ;;  %v11102_v14 = vmul.f32 %v5625_v34, %v10993_v30 }
0x1266   : > { %12305 = vst [vmem:[#allocation90_spill] sm:$0xff] %v11097_v7  ;;  %v11099_v50 = vpop.f32.mrb[188].mxu0  ;;  %v8373_v47 = vpop.eup %8372  ;;  %8386 = vtanh.f32 %v5508_v8  ;;  %v5511_v43 = vmul.f32 0.7978846, %v5447_v44  ;;  %v5446_v56 = vadd.f32 %v5382_v48, %v11041_v21  ;;  %v5257_v12 = vmul.f32 0.044715, %v11055_v22 }
0x1267   : > { %12306 = vst [vmem:[#allocation91_spill] sm:$0xff] %v11099_v50  ;;  %v11105_v18 = vpop.f32.mrb[173].mxu1  ;;  %v11107_v11 = vpop.f32.mrb[189].mxu0  ;;  %v5629_v63 = vadd.f32 1.0, %v8373_v47  ;;  %8388 = vtanh.f32 %v5509_v35  ;;  %v5384_v33 = vmul.f32 %v5320_v55, %v11043_v46  ;;  %v5259_v44 = vmul.f32 0.044715, %v11057_v60 }
0x1268   : > { %12307 = vst [vmem:[#allocation92_spill] sm:$0xff] %v11105_v18  ;;  %12308 = vst [vmem:[#allocation93_spill] sm:$0xff] %v11107_v11  ;;  %v8375_v6 = vpop.eup %8374  ;;  %v11111_v4 = vpop.f32.mrb[174].mxu1  ;;  %8390 = vtanh.f32 %v5511_v43  ;;  %v5510_v8 = vmul.f32 0.7978846, %v5446_v56  ;;  %v5321_v47 = vmul.f32 %v5257_v12, %v11055_v22 }
0x1269   : > { %12309 = vst [vmem:[#allocation94_spill] sm:$0xff] %v11111_v4  ;;  %v11113_v53 = vpop.f32.mrb[190].mxu0  ;;  %v11115_v30 = vpop.eup %8376  ;;  %v5631_v34 = vadd.f32 1.0, %v8375_v6  ;;  %v11123_v35 = vmul.f32 %v5629_v63, %v11005_v25  ;;  %v5448_v55 = vadd.f32 %v5384_v33, %v11043_v46  ;;  %v5258_v51 = vmul.f32 0.044715, %v11062_v23 }
0x126a   : > { %12310 = vst [vmem:[#allocation71_spill] sm:$0xff] %v11113_v53  ;;  %v11118_v48 = vpop.f32.mrb[175].mxu1  ;;  %v11120_v41 = vpop.eup %8378  ;;  %8392 = vtanh.f32 %v5510_v8  ;;  %v5323_v43 = vmul.f32 %v5259_v44, %v11057_v60  ;;  %v5260_v56 = vmul.f32 0.044715, %v11064_v54  ;;  %v5385_v13 = vmul.f32 %v5321_v47, %v11055_v22 }
0x126b   : > { %12311 = vst [vmem:[#allocation72_spill] sm:$0xff] %v11118_v48  ;;  %v11128_v2 = vpop.f32.mrb[191].mxu0  ;;  %v11130_v6 = vmul.f32 %v5631_v34, %v5183_v27  ;;  %v5512_v62 = vmul.f32 0.7978846, %v5448_v55  ;;  %v5322_v25 = vmul.f32 %v5258_v51, %v11062_v23  ;;  %v5261_v63 = vmul.f32 0.044715, %v11069_v40 }
0x126c   : > { %v11137_v33 = vpop.eup %8380  ;;  %v5387_v12 = vmul.f32 %v5323_v43, %v11057_v60  ;;  %v5324_v58 = vmul.f32 %v5260_v56, %v11064_v54  ;;  %v5263_v27 = vmul.f32 0.044715, %v11071_v17  ;;  %v5262_v34 = vmul.f32 0.044715, %v11076_v29 }
0x126d   : > { %8394 = vtanh.f32 %v5512_v62  ;;  %v5449_v8 = vadd.f32 %v5385_v13, %v11055_v22  ;;  %v5386_v44 = vmul.f32 %v5322_v25, %v11062_v23  ;;  %v5325_v55 = vmul.f32 %v5261_v63, %v11069_v40  ;;  %v11146_v51 = vpop.f32.mrb[176].mxu1  ;;  %v11148_v47 = vpop.f32.mrb[192].mxu0 }
0x126e   : > { %12312 = vst [vmem:[#allocation73_spill] sm:$0xff] %v11146_v51  ;;  %12313 = vst [vmem:[#allocation77_spill] sm:$0xff] %v11148_v47  ;;  %v11150_v3 = vpop.eup %8382  ;;  %v5451_v43 = vadd.f32 %v5387_v12, %v11057_v60  ;;  %v5388_v56 = vmul.f32 %v5324_v58, %v11064_v54  ;;  %v5327_v31 = vmul.f32 %v5263_v27, %v11071_v17  ;;  %v11156_v26 = vpop.f32.mrb[177].mxu1  ;;  %v5264_v10 = vmul.f32 0.044715, %v11078_v37 }
0x126f   : > { %v5326_v62 = vmul.f32 %v5262_v34, %v11076_v29  ;;  %v11158_v13 = vpop.f32.mrb[193].mxu0  ;;  %v11160_v25 = vpop.eup %8384  ;;  %v5513_v63 = vmul.f32 0.7978846, %v5449_v8  ;;  %v5450_v0 = vadd.f32 %v5386_v44, %v11062_v23  ;;  %v5389_v28 = vmul.f32 %v5325_v55, %v11069_v40 }
0x1270   : > { %v11165_v12 = vpop.f32.mrb[178].mxu1  ;;  %v11167_v58 = vpop.f32.mrb[194].mxu0  ;;  %v5515_v34 = vmul.f32 0.7978846, %v5451_v43  ;;  %v5452_v42 = vadd.f32 %v5388_v56, %v11064_v54  ;;  %v5391_v36 = vmul.f32 %v5327_v31, %v11071_v17  ;;  %v5328_v60 = vmul.f32 %v5264_v10, %v11078_v37 }
0x1271   : > { %v11169_v27 = vpop.eup %8386  ;;  %v5390_v61 = vmul.f32 %v5326_v62, %v11076_v29  ;;  %v11174_v8 = vpop.f32.mrb[179].mxu1  ;;  %8396 = vtanh.f32 %v5513_v63  ;;  %v5514_v20 = vmul.f32 0.7978846, %v5450_v0  ;;  %v5453_v49 = vadd.f32 %v5389_v28, %v11069_v40 }
0x1272   : > { %v11176_v44 = vpop.f32.mrb[195].mxu0  ;;  %v11178_v55 = vpop.eup %8388  ;;  %8398 = vtanh.f32 %v5515_v34  ;;  %v5516_v43 = vmul.f32 0.7978846, %v5452_v42  ;;  %v5455_v31 = vadd.f32 %v5391_v36, %v11071_v17  ;;  %v5392_v54 = vmul.f32 %v5328_v60, %v11078_v37 }
0x1273   : > { %v11182_v22 = vpop.eup %8390  ;;  %v5454_v56 = vadd.f32 %v5390_v61, %v11076_v29  ;;  %8400 = vtanh.f32 %v5514_v20  ;;  %v5517_v62 = vmul.f32 0.7978846, %v5453_v49  ;;  %v5265_v23 = vmul.f32 0.044715, %v11097_v7 }
0x1274   : > { %v11188_v63 = vpop.eup %8392  ;;  %8402 = vtanh.f32 %v5516_v43  ;;  %v5519_v0 = vmul.f32 0.7978846, %v5455_v31  ;;  %v5267_v10 = vmul.f32 0.044715, %v11099_v50  ;;  %v5456_v42 = vadd.f32 %v5392_v54, %v11078_v37 }
0x1275   : > { %v5518_v28 = vmul.f32 0.7978846, %v5454_v56  ;;  %8404 = vtanh.f32 %v5517_v62  ;;  %v5329_v36 = vmul.f32 %v5265_v23, %v11097_v7  ;;  %v5266_v61 = vmul.f32 0.044715, %v11105_v18  ;;  %v11194_v20 = vpop.f32.mrb[180].mxu1  ;;  %v11196_v49 = vpop.f32.mrb[196].mxu0 }
0x1276   : > { %12314 = vst [vmem:[#allocation74_spill] sm:$0xff] %v11196_v49  ;;  %8406 = vtanh.f32 %v5519_v0  ;;  %v5331_v60 = vmul.f32 %v5267_v10, %v11099_v50  ;;  %v5268_v34 = vmul.f32 0.044715, %v11107_v11  ;;  %v5269_v43 = vmul.f32 0.044715, %v11111_v4  ;;  %v11201_v31 = vpop.f32.mrb[181].mxu1 }
0x1277   : > { %12315 = vst [vmem:[#allocation83_spill] sm:$0xff] %v11201_v31  ;;  %v11203_v56 = vpop.f32.mrb[197].mxu0  ;;  %v11205_v54 = vpop.eup %8394  ;;  %8408 = vtanh.f32 %v5518_v28  ;;  %v5520_v23 = vmul.f32 0.7978846, %v5456_v42  ;;  %v5393_v62 = vmul.f32 %v5329_v36, %v11097_v7  ;;  %v5330_v17 = vmul.f32 %v5266_v61, %v11105_v18 }
0x1278   : > { %12316 = vst [vmem:[#allocation81_spill] sm:$0xff] %v11203_v56  ;;  %v11209_v40 = vpop.f32.mrb[182].mxu1  ;;  %v11211_v0 = vpop.f32.mrb[198].mxu0  ;;  %v5395_v10 = vmul.f32 %v5331_v60, %v11099_v50  ;;  %v5332_v37 = vmul.f32 %v5268_v34, %v11107_v11  ;;  %v5333_v29 = vmul.f32 %v5269_v43, %v11111_v4  ;;  %v5271_v56 = vmul.f32 0.044715, %v11113_v53 }
0x1279   : > { %12317 = vst [vmem:[#allocation82_spill] sm:$0xff] %v11209_v40  ;;  %12318 = vst [vmem:[#allocation88_spill] sm:$0xff] %v11211_v0  ;;  %v11217_v31 = vpop.f32.mrb[183].mxu1  ;;  %v11219_v28 = vpop.f32.mrb[199].mxu0  ;;  %8410 = vtanh.f32 %v5520_v23  ;;  %v5457_v42 = vadd.f32 %v5393_v62, %v11097_v7  ;;  %v5394_v36 = vmul.f32 %v5330_v17, %v11105_v18  ;;  %v5270_v61 = vmul.f32 0.044715, %v11118_v48 }
0x127a   : > { %12319 = vst [vmem:[#allocation89_spill] sm:$0xff] %v11217_v31  ;;  %12320 = vst [vmem:[#allocation40_spill] sm:$0xff] %v11219_v28  ;;  %v5459_v0 = vadd.f32 %v5395_v10, %v11099_v50  ;;  %v5396_v60 = vmul.f32 %v5332_v37, %v11107_v11  ;;  %v5397_v34 = vmul.f32 %v5333_v29, %v11111_v4  ;;  %v5272_v62 = vmul.f32 0.044715, %v11128_v2 }
0x127b   : > { %v5335_v43 = vmul.f32 %v5271_v56, %v11113_v53  ;;  %v11228_v40 = vpop.eup %8396  ;;  %v5521_v31 = vmul.f32 0.7978846, %v5457_v42  ;;  %v5458_v28 = vadd.f32 %v5394_v36, %v11105_v18  ;;  %v5334_v23 = vmul.f32 %v5270_v61, %v11118_v48 }
0x127c   : > { %v11233_v17 = vpop.eup %8398  ;;  %v5523_v7 = vmul.f32 0.7978846, %v5459_v0  ;;  %v5460_v10 = vadd.f32 %v5396_v60, %v11107_v11  ;;  %v5461_v37 = vadd.f32 %v5397_v34, %v11111_v4  ;;  %v5336_v36 = vmul.f32 %v5272_v62, %v11128_v2 }
0x127d   : > { %12321 = vst [vmem:[#allocation41_spill] sm:$0xff] %v11233_v17  ;;  %v5399_v29 = vmul.f32 %v5335_v43, %v11113_v53  ;;  %v11238_v50 = vpop.eup %8400  ;;  %8412 = vtanh.f32 %v5521_v31  ;;  %v5522_v56 = vmul.f32 0.7978846, %v5458_v28  ;;  %v5398_v42 = vmul.f32 %v5334_v23, %v11118_v48  ;;  %v11242_v61 = vpop.f32.mrb[184].mxu1 }
0x127e   : > { %12322 = vst [vmem:[#allocation43_spill] sm:$0xff] %v11242_v61  ;;  %v11244_v18 = vpop.f32.mrb[200].mxu0  ;;  %v11246_v17 = vpop.eup %8402  ;;  %8414 = vtanh.f32 %v5523_v7  ;;  %v5524_v0 = vmul.f32 0.7978846, %v5460_v10  ;;  %v5525_v60 = vmul.f32 0.7978846, %v5461_v37  ;;  %v5400_v23 = vmul.f32 %v5336_v36, %v11128_v2 }
0x127f   : > { %12323 = vst [vmem:[#allocation42_spill] sm:$0xff] %v11244_v18  ;;  %v5463_v34 = vadd.f32 %v5399_v29, %v11113_v53  ;;  %v11249_v43 = vpop.f32.mrb[185].mxu1  ;;  %v11251_v4 = vpop.f32.mrb[201].mxu0  ;;  %8416 = vtanh.f32 %v5522_v56  ;;  %v5462_v28 = vadd.f32 %v5398_v42, %v11118_v48  ;;  %v5178_v62 = vmul.f32 0.5, %v10995_v38 }
0x1280   : > { %12324 = vst [vmem:[#allocation45_spill] sm:$0xff] %v11249_v43  ;;  %12325 = vst [vmem:[#allocation44_spill] sm:$0xff] %v11251_v4  ;;  %v11253_v31 = vpop.eup %8404  ;;  %v11258_v11 = vpop.f32.mrb[186].mxu1  ;;  %8418 = vtanh.f32 %v5524_v0  ;;  %v5182_v29 = vmul.f32 0.5, %v11010_v5  ;;  %v5626_v53 = vadd.f32 1.0, %v11087_v39  ;;  %v5464_v36 = vadd.f32 %v5400_v23, %v11128_v2 }
0x1281   : > { %v11260_v7 = vpop.f32.mrb[202].mxu0  ;;  %v11262_v10 = vpop.eup %8406  ;;  %v5527_v37 = vmul.f32 0.7978846, %v5463_v34  ;;  %8420 = vtanh.f32 %v5525_v60  ;;  %v5526_v38 = vmul.f32 0.7978846, %v5462_v28  ;;  %v5630_v48 = vadd.f32 1.0, %v11115_v30 }
0x1282   : > { %12326 = vst [vmem:[#allocation47_spill] sm:$0xff] %v11260_v7  ;;  %v11266_v4 = vpop.f32.mrb[187].mxu1  ;;  %v11268_v56 = vpop.f32.mrb[203].mxu0  ;;  %v5691_v0 = vmul.f32 %v11094_v9, %v11003_v52  ;;  %v5690_v34 = vmul.f32 %v5626_v53, %v5178_v62  ;;  %v5180_v5 = vmul.f32 0.5, %v10997_v15  ;;  %v5628_v60 = vadd.f32 1.0, %v11092_v19 }
0x1283   : > { %12327 = vst [vmem:[#allocation46_spill] sm:$0xff] %v11266_v4  ;;  %12328 = vst [vmem:[#allocation49_spill] sm:$0xff] %v11268_v56  ;;  %v11270_v42 = vpop.eup %8408  ;;  %8422 = vtanh.f32 %v5527_v37  ;;  %v5528_v4 = vmul.f32 0.7978846, %v5464_v36  ;;  %v5694_v7 = vmul.f32 %v5630_v48, %v5182_v29  ;;  %v5184_v56 = vmul.f32 0.5, %v11012_v57 }
0x1284   : > { %v11277_v39 = vpop.eup %8410  ;;  %v5632_v28 = vadd.f32 1.0, %v11120_v41  ;;  %v5273_v23 = vmul.f32 0.044715, %v11146_v51  ;;  %v5275_v30 = vmul.f32 0.044715, %v11148_v47  ;;  %v5753_v52 = vpack.c.bf16 %v11123_v35, %v11102_v14 }
0x1285   : > { %8424 = vtanh.f32 %v5526_v38  ;;  %v5754_v9 = vpack.c.bf16 %v5694_v7, %v5690_v34  ;;  %v5692_v15 = vmul.f32 %v5628_v60, %v5180_v5  ;;  %v5755_v53 = vpack.c.bf16 %v11130_v6, %v5691_v0  ;;  %v11287_v62 = vpop.f32.mrb[188].mxu1  ;;  %v11289_v48 = vpop.f32.mrb[204].mxu0 }
0x1286   : > { %12329 = vst [vmem:[#allocation48_spill] sm:$0xff] %v11287_v62  ;;  %12330 = vst [vmem:[#allocation51_spill] sm:$0xff] %v11289_v48  ;;  %v5696_v57 = vmul.f32 %v5632_v28, %v5184_v56  ;;  %v5337_v19 = vmul.f32 %v5273_v23, %v11146_v51  ;;  %v5339_v41 = vmul.f32 %v5275_v30, %v11148_v47  ;;  %v5274_v37 = vmul.f32 0.044715, %v11156_v26  ;;  %v11294_v29 = vpop.f32.mrb[189].mxu1  ;;  %v11296_v36 = vpop.f32.mrb[205].mxu0 }
0x1287   : > { %12331 = vst [vmem:[#allocation50_spill] sm:$0xff] %v11296_v36  ;;  %v11298_v14 = vpop.eup %8412  ;;  %8426 = vtanh.f32 %v5528_v4  ;;  %6074 = vmatprep.mubr.bf16.mxu1 %v5754_v9  ;;  %v5276_v35 = vmul.f32 0.044715, %v11158_v13  ;;  %v5277_v6 = vmul.f32 0.044715, %v11165_v12  ;;  %v11308_v60 = vpop.f32.mrb[190].mxu1 }
0x1288   : > { %v5279_v7 = vmul.f32 0.044715, %v11167_v58  ;;  %v11303_v56 = vpop.eup %8414  ;;  %v5756_v38 = vpack.c.bf16 %v5696_v57, %v5692_v15  ;;  %v5401_v0 = vmul.f32 %v5337_v19, %v11146_v51  ;;  %v5403_v34 = vmul.f32 %v5339_v41, %v11148_v47  ;;  %6075 = vmatmul.mubr.bf16.vlgmr.msra.gmra.mrb[192].mxu1 %v5753_v52  ;;  %12332 = vst [vmem:[#allocation53_spill] sm:$0xff] %v11308_v60  ;;  %v11310_v4 = vpop.f32.mrb[206].mxu0 }
0x1289   : > { %v5338_v5 = vmul.f32 %v5274_v37, %v11156_v26  ;;  %12333 = vst [vmem:[#allocation52_spill] sm:$0xff] %v11310_v4  ;;  %v11312_v28 = vpop.eup %8416  ;;  %v5340_v23 = vmul.f32 %v5276_v35, %v11158_v13  ;;  %v5341_v30 = vmul.f32 %v5277_v6, %v11165_v12  ;;  %v5278_v15 = vmul.f32 0.044715, %v11174_v8  ;;  %v11318_v57 = vpop.f32.mrb[191].mxu1 }
0x128a   : > { %v5343_v9 = vmul.f32 %v5279_v7, %v11167_v58  ;;  %12334 = vst [vmem:[#allocation55_spill] sm:$0xff] %v11318_v57  ;;  %v11320_v19 = vpop.f32.mrb[207].mxu0  ;;  %v11322_v52 = vpop.eup %8418  ;;  %6171 = vmatprep.mubr.bf16.mxu0 %v5756_v38  ;;  %v5465_v41 = vadd.f32 %v5401_v0, %v11146_v51  ;;  %v5467_v37 = vadd.f32 %v5403_v34, %v11148_v47  ;;  %v5280_v35 = vmul.f32 0.044715, %v11176_v44 }
0x128b   : > { %12335 = vst [vmem:[#allocation54_spill] sm:$0xff] %v11320_v19  ;;  %v5402_v4 = vmul.f32 %v5338_v5, %v11156_v26  ;;  %v11328_v6 = vpop.eup %8420  ;;  %6172 = vmatmul.mubr.bf16.vlgmr.msra.gmra.mrb[208].mxu0 %v5755_v53  ;;  %v5404_v7 = vmul.f32 %v5340_v23, %v11158_v13  ;;  %v5405_v57 = vmul.f32 %v5341_v30, %v11165_v12  ;;  %v5186_v36 = vmul.f32 0.5, %v11028_v24 }
0x128c   : > { %v5407_v19 = vmul.f32 %v5343_v9, %v11167_v58  ;;  %v5342_v60 = vmul.f32 %v5278_v15, %v11174_v8  ;;  %v5529_v0 = vmul.f32 0.7978846, %v5465_v41  ;;  %v5531_v51 = vmul.f32 0.7978846, %v5467_v37 }
0x128d   : > { %v11334_v38 = vpop.eup %8422  ;;  %v5466_v34 = vadd.f32 %v5402_v4, %v11156_v26  ;;  %v5344_v5 = vmul.f32 %v5280_v35, %v11176_v44  ;;  %v5468_v47 = vadd.f32 %v5404_v7, %v11158_v13  ;;  %v5469_v53 = vadd.f32 %v5405_v57, %v11165_v12 }
0x128e   : > { %v5471_v23 = vadd.f32 %v5407_v19, %v11167_v58  ;;  %v5406_v30 = vmul.f32 %v5342_v60, %v11174_v8  ;;  %8428 = vtanh.f32 %v5529_v0  ;;  %v5190_v19 = vmul.f32 0.5, %v11041_v21 }
0x128f   : > { %v5530_v9 = vmul.f32 0.7978846, %v5466_v34  ;;  %v5408_v15 = vmul.f32 %v5344_v5, %v11176_v44  ;;  %v11344_v41 = vpop.eup %8424  ;;  %8430 = vtanh.f32 %v5531_v51  ;;  %v5532_v4 = vmul.f32 0.7978846, %v5468_v47 }
0x1290   : > { %v5533_v37 = vmul.f32 0.7978846, %v5469_v53  ;;  %v5535_v35 = vmul.f32 0.7978846, %v5471_v23  ;;  %v5470_v7 = vadd.f32 %v5406_v30, %v11174_v8  ;;  %v5634_v0 = vadd.f32 1.0, %v11160_v25 }
0x1291   : > { %8432 = vtanh.f32 %v5530_v9  ;;  %v5472_v57 = vadd.f32 %v5408_v15, %v11176_v44  ;;  %v11349_v60 = vpop.eup %8426  ;;  %v5638_v24 = vadd.f32 1.0, %v11188_v63  ;;  %v5188_v34 = vmul.f32 0.5, %v11030_v32 }
0x1292   : > { %8434 = vtanh.f32 %v5532_v4  ;;  %v5534_v51 = vmul.f32 0.7978846, %v5470_v7  ;;  %v5192_v5 = vmul.f32 0.5, %v11043_v46  ;;  %v5698_v53 = vmul.f32 %v5634_v0, %v5186_v36 }
0x1293   : > { %8436 = vtanh.f32 %v5533_v37  ;;  %v5536_v47 = vmul.f32 0.7978846, %v5472_v57  ;;  %v5702_v23 = vmul.f32 %v5638_v24, %v5190_v19  ;;  %v5636_v30 = vadd.f32 1.0, %v11169_v27 }
0x1294   : > { %8438 = vtanh.f32 %v5535_v35  ;;  %v5640_v21 = vadd.f32 1.0, %v11205_v54  ;;  %v5281_v9 = vmul.f32 0.044715, %v11194_v20  ;;  %v5283_v25 = vmul.f32 0.044715, %v11196_v49 }
0x1295   : > { %8440 = vtanh.f32 %v5534_v51  ;;  %v5758_v63 = vpack.c.bf16 %v5702_v23, %v5698_v53  ;;  %v5700_v32 = vmul.f32 %v5636_v30, %v5188_v34  ;;  %v5185_v15 = vmul.f32 0.5, %v11022_v16  ;;  %v12337_v23 = vld [vmem:[#allocation81_spill] sm:$0xff] }
0x1296   : > { %8442 = vtanh.f32 %v5536_v47  ;;  %v5704_v4 = vmul.f32 %v5640_v21, %v5192_v5  ;;  %v5345_v46 = vmul.f32 %v5281_v9, %v11194_v20  ;;  %v5347_v36 = vmul.f32 %v5283_v25, %v11196_v49 }
0x1297   : > { %v5189_v37 = vmul.f32 0.5, %v11035_v59  ;;  %6082 = vmatprep.mubr.bf16.mxu1 %v5758_v63  ;;  %v5633_v27 = vadd.f32 1.0, %v11137_v33  ;;  %v5637_v54 = vadd.f32 1.0, %v11178_v55  ;;  %v5187_v35 = vmul.f32 0.5, %v11024_v1  ;;  %v12336_v55 = vld [vmem:[#allocation83_spill] sm:$0xff]  ;;  %v12338_v63 = vld [vmem:[#allocation82_spill] sm:$0xff] }
0x1298   : > { %v5191_v7 = vmul.f32 0.5, %v11037_v45  ;;  %v11367_v57 = vpop.eup %8428  ;;  %v5760_v19 = vpack.c.bf16 %v5704_v4, %v5700_v32  ;;  %v5409_v16 = vmul.f32 %v5345_v46, %v11194_v20  ;;  %v5411_v0 = vmul.f32 %v5347_v36, %v11196_v49  ;;  %v12339_v36 = vld [vmem:[#allocation88_spill] sm:$0xff] }
0x1299   : > { %v5635_v24 = vadd.f32 1.0, %v11150_v3  ;;  %v11372_v34 = vpop.eup %8430  ;;  %v5697_v59 = vmul.f32 %v5633_v27, %v5185_v15  ;;  %v5701_v51 = vmul.f32 %v5637_v54, %v5189_v37  ;;  %v5639_v33 = vadd.f32 1.0, %v11182_v22 }
0x129a   : > { %v5282_v47 = vmul.f32 0.044715, %v12336_v55  ;;  %6179 = vmatprep.mubr.bf16.mxu0 %v5760_v19  ;;  %v5473_v45 = vadd.f32 %v5409_v16, %v11194_v20  ;;  %v5475_v5 = vadd.f32 %v5411_v0, %v11196_v49  ;;  %v5284_v30 = vmul.f32 0.044715, %v12337_v23  ;;  %v12340_v19 = vld [vmem:[#allocation89_spill] sm:$0xff]  ;;  %v12344_v49 = vld [vmem:[#allocation67_spill] sm:$0xff] }
0x129b   : > { %v11376_v1 = vpop.eup %8432  ;;  %v5699_v53 = vmul.f32 %v5635_v24, %v5187_v35  ;;  %v5757_v3 = vpack.c.bf16 %v5701_v51, %v5697_v59  ;;  %v5703_v9 = vmul.f32 %v5639_v33, %v5191_v7  ;;  %v5285_v22 = vmul.f32 0.044715, %v12338_v63  ;;  %v12341_v51 = vld [vmem:[#allocation40_spill] sm:$0xff] }
0x129c   : > { %v11381_v21 = vpop.eup %8434  ;;  %v5346_v25 = vmul.f32 %v5282_v47, %v12336_v55  ;;  %v5537_v15 = vmul.f32 0.7978846, %v5473_v45  ;;  %v5539_v4 = vmul.f32 0.7978846, %v5475_v5  ;;  %v5348_v46 = vmul.f32 %v5284_v30, %v12337_v23 }
0x129d   : > { %v11385_v32 = vpop.eup %8436  ;;  %v5287_v37 = vmul.f32 0.044715, %v12339_v36  ;;  %6083 = vmatmul.mubr.bf16.gmra.mrb[196].mxu1 %v5757_v3  ;;  %v5759_v54 = vpack.c.bf16 %v5703_v9, %v5699_v53  ;;  %v5349_v7 = vmul.f32 %v5285_v22, %v12338_v63  ;;  %v5286_v16 = vmul.f32 0.044715, %v12340_v19 }
0x129e   : > { %v11389_v27 = vpop.eup %8438  ;;  %v5410_v35 = vmul.f32 %v5346_v25, %v12336_v55  ;;  %8444 = vtanh.f32 %v5537_v15  ;;  %v5412_v24 = vmul.f32 %v5348_v46, %v12337_v23  ;;  %v5288_v33 = vmul.f32 0.044715, %v12341_v51  ;;  %v12342_v25 = vld [vmem:[#allocation70_spill] sm:$0xff] }
0x129f   : > { %v11394_v0 = vpop.eup %8440  ;;  %v5351_v59 = vmul.f32 %v5287_v37, %v12339_v36  ;;  %8446 = vtanh.f32 %v5539_v4  ;;  %6180 = vmatmul.mubr.bf16.gmra.mrb[212].mxu0 %v5759_v54  ;;  %v5413_v5 = vmul.f32 %v5349_v7, %v12338_v63  ;;  %v5350_v53 = vmul.f32 %v5286_v16, %v12340_v19  ;;  %v12343_v37 = vld [vmem:[#allocation65_spill] sm:$0xff] }
0x12a0   : > { %v11399_v47 = vpop.eup %8442  ;;  %v5474_v45 = vadd.f32 %v5410_v35, %v12336_v55  ;;  %v5476_v30 = vadd.f32 %v5412_v24, %v12337_v23  ;;  %v5352_v9 = vmul.f32 %v5288_v33, %v12341_v51  ;;  %v5194_v22 = vmul.f32 0.5, %v12342_v25 }
0x12a1   : > { %v5415_v3 = vmul.f32 %v5351_v59, %v12339_v36  ;;  %v5477_v46 = vadd.f32 %v5413_v5, %v12338_v63  ;;  %v5414_v4 = vmul.f32 %v5350_v53, %v12340_v19  ;;  %v5198_v54 = vmul.f32 0.5, %v12343_v37 }
0x12a2   : > { %v5538_v15 = vmul.f32 0.7978846, %v5474_v45  ;;  %v5540_v35 = vmul.f32 0.7978846, %v5476_v30  ;;  %v5416_v16 = vmul.f32 %v5352_v9, %v12341_v51  ;;  %v5642_v24 = vadd.f32 1.0, %v11238_v50 }
0x12a3   : > { %v5479_v7 = vadd.f32 %v5415_v3, %v12339_v36  ;;  %v5541_v59 = vmul.f32 0.7978846, %v5477_v46  ;;  %v5478_v33 = vadd.f32 %v5414_v4, %v12340_v19  ;;  %v5646_v25 = vadd.f32 1.0, %v11270_v42  ;;  %v12345_v36 = vld [vmem:[#allocation69_spill] sm:$0xff] }
0x12a4   : > { %8448 = vtanh.f32 %v5538_v15  ;;  %v5480_v5 = vadd.f32 %v5416_v16, %v12341_v51  ;;  %v5706_v53 = vmul.f32 %v5642_v24, %v5194_v22  ;;  %v5196_v3 = vmul.f32 0.5, %v12344_v49  ;;  %v12347_v24 = vld [vmem:[#allocation64_spill] sm:$0xff] }
0x12a5   : > { %8450 = vtanh.f32 %v5540_v35  ;;  %v5543_v45 = vmul.f32 0.7978846, %v5479_v7  ;;  %v5542_v37 = vmul.f32 0.7978846, %v5478_v33  ;;  %v5710_v30 = vmul.f32 %v5646_v25, %v5198_v54  ;;  %v12346_v7 = vld [vmem:[#allocation87_spill] sm:$0xff] }
0x12a6   : > { %8452 = vtanh.f32 %v5541_v59  ;;  %v5544_v9 = vmul.f32 0.7978846, %v5480_v5  ;;  %v5200_v50 = vmul.f32 0.5, %v12345_v36  ;;  %v5644_v15 = vadd.f32 1.0, %v11246_v17 }
0x12a7   : > { %8454 = vtanh.f32 %v5543_v45  ;;  %v5762_v46 = vpack.c.bf16 %v5710_v30, %v5706_v53  ;;  %v5648_v42 = vadd.f32 1.0, %v11277_v39  ;;  %v5289_v4 = vmul.f32 0.044715, %v11242_v61  ;;  %v12348_v45 = vld [vmem:[#allocation66_spill] sm:$0xff]  ;;  %v12349_v53 = vld [vmem:[#allocation68_spill] sm:$0xff] }
0x12a8   : > { %8456 = vtanh.f32 %v5542_v37  ;;  %v11422_v35 = vpop.eup %8444  ;;  %v5708_v22 = vmul.f32 %v5644_v15, %v5196_v3  ;;  %v5291_v54 = vmul.f32 0.044715, %v11244_v18  ;;  %v5193_v49 = vmul.f32 0.5, %v12346_v7  ;;  %v12350_v15 = vld [vmem:[#allocation41_spill] sm:$0xff] }
0x12a9   : > { %8458 = vtanh.f32 %v5544_v9  ;;  %v11426_v16 = vpop.eup %8446  ;;  %6090 = vmatprep.mubr.bf16.mxu1 %v5762_v46  ;;  %v5712_v36 = vmul.f32 %v5648_v42, %v5200_v50  ;;  %v5353_v17 = vmul.f32 %v5289_v4, %v11242_v61  ;;  %v5197_v59 = vmul.f32 0.5, %v12347_v24  ;;  %v12351_v24 = vld [vmem:[#allocation44_spill] sm:$0xff] }
0x12aa   : > { %v5641_v39 = vadd.f32 1.0, %v11228_v40  ;;  %v5355_v33 = vmul.f32 %v5291_v54, %v11244_v18  ;;  %v5645_v25 = vadd.f32 1.0, %v11253_v31  ;;  %v5195_v5 = vmul.f32 0.5, %v12348_v45 }
0x12ab   : > { %v5199_v37 = vmul.f32 0.5, %v12349_v53  ;;  %v5764_v30 = vpack.c.bf16 %v5712_v36, %v5708_v22  ;;  %v5417_v3 = vmul.f32 %v5353_v17, %v11242_v61  ;;  %v5643_v50 = vadd.f32 1.0, %v12350_v15 }
0x12ac   : > { %v5705_v9 = vmul.f32 %v5641_v39, %v5193_v49  ;;  %v5419_v46 = vmul.f32 %v5355_v33, %v11244_v18  ;;  %v5709_v42 = vmul.f32 %v5645_v25, %v5197_v59  ;;  %v5647_v4 = vadd.f32 1.0, %v11262_v10 }
0x12ad   : > { %v5290_v40 = vmul.f32 0.044715, %v11249_v43  ;;  %6187 = vmatprep.mubr.bf16.mxu0 %v5764_v30  ;;  %v5481_v31 = vadd.f32 %v5417_v3, %v11242_v61  ;;  %v5707_v7 = vmul.f32 %v5643_v50, %v5195_v5  ;;  %v5292_v22 = vmul.f32 0.044715, %v12351_v24  ;;  %v12352_v5 = vld [vmem:[#allocation47_spill] sm:$0xff] }
0x12ae   : > { %v11440_v54 = vpop.eup %8448  ;;  %v5293_v36 = vmul.f32 0.044715, %v11258_v11  ;;  %v5483_v17 = vadd.f32 %v5419_v46, %v11244_v18  ;;  %v5761_v39 = vpack.c.bf16 %v5709_v42, %v5705_v9  ;;  %v5711_v59 = vmul.f32 %v5647_v4, %v5199_v37  ;;  %v12354_v9 = vld [vmem:[#allocation46_spill] sm:$0xff] }
0x12af   : > { %v11445_v49 = vpop.eup %8450  ;;  %v5354_v10 = vmul.f32 %v5290_v40, %v11249_v43  ;;  %v5545_v25 = vmul.f32 0.7978846, %v5481_v31  ;;  %v5356_v45 = vmul.f32 %v5292_v22, %v12351_v24  ;;  %v5295_v30 = vmul.f32 0.044715, %v12352_v5 }
0x12b0   : > { %v11449_v33 = vpop.eup %8452  ;;  %v5357_v53 = vmul.f32 %v5293_v36, %v11258_v11  ;;  %v5547_v15 = vmul.f32 0.7978846, %v5483_v17  ;;  %6091 = vmatmul.mubr.bf16.gmra.mrb[200].mxu1 %v5761_v39  ;;  %v5763_v50 = vpack.c.bf16 %v5711_v59, %v5707_v7  ;;  %v5294_v37 = vmul.f32 0.044715, %v12354_v9  ;;  %v12355_v17 = vld [vmem:[#allocation49_spill] sm:$0xff] }
0x12b1   : > { %v11454_v3 = vpop.eup %8454  ;;  %v5418_v46 = vmul.f32 %v5354_v10, %v11249_v43  ;;  %8460 = vtanh.f32 %v5545_v25  ;;  %v5420_v4 = vmul.f32 %v5356_v45, %v12351_v24  ;;  %v5359_v31 = vmul.f32 %v5295_v30, %v12352_v5  ;;  %v12356_v45 = vld [vmem:[#allocation92_spill] sm:$0xff] }
0x12b2   : > { %12353 = vst [vmem:[#allocation24_spill] sm:$0xff] %v11454_v3  ;;  %v11458_v42 = vpop.eup %8456  ;;  %v5421_v40 = vmul.f32 %v5357_v53, %v11258_v11  ;;  %8462 = vtanh.f32 %v5547_v15  ;;  %6188 = vmatmul.mubr.bf16.gmra.mrb[216].mxu0 %v5763_v50  ;;  %v5358_v7 = vmul.f32 %v5294_v37, %v12354_v9  ;;  %v5296_v39 = vmul.f32 0.044715, %v12355_v17  ;;  %v12357_v50 = vld [vmem:[#allocation72_spill] sm:$0xff] }
0x12b3   : > { %v11463_v22 = vpop.eup %8458  ;;  %v5482_v36 = vadd.f32 %v5418_v46, %v11249_v43  ;;  %v5484_v59 = vadd.f32 %v5420_v4, %v12351_v24  ;;  %v5423_v25 = vmul.f32 %v5359_v31, %v12352_v5  ;;  %v5202_v53 = vmul.f32 0.5, %v12356_v45  ;;  %v12358_v45 = vld [vmem:[#allocation93_spill] sm:$0xff] }
0x12b4   : > { %v5485_v10 = vadd.f32 %v5421_v40, %v11258_v11  ;;  %v5422_v30 = vmul.f32 %v5358_v7, %v12354_v9  ;;  %v5360_v15 = vmul.f32 %v5296_v39, %v12355_v17  ;;  %v5206_v61 = vmul.f32 0.5, %v12357_v50 }
0x12b5   : > { %v5546_v18 = vmul.f32 0.7978846, %v5482_v36  ;;  %v5548_v46 = vmul.f32 0.7978846, %v5484_v59  ;;  %v5487_v37 = vadd.f32 %v5423_v25, %v12352_v5  ;;  %v5650_v3 = vadd.f32 1.0, %v11312_v28 }
0x12b6   : > { %v5549_v43 = vmul.f32 0.7978846, %v5485_v10  ;;  %v5486_v4 = vadd.f32 %v5422_v30, %v12354_v9  ;;  %v5424_v40 = vmul.f32 %v5360_v15, %v12355_v17  ;;  %v5654_v31 = vadd.f32 1.0, %v11344_v41 }
0x12b7   : > { %8464 = vtanh.f32 %v5546_v18  ;;  %v5551_v36 = vmul.f32 0.7978846, %v5487_v37  ;;  %v5714_v7 = vmul.f32 %v5650_v3, %v5202_v53  ;;  %v5204_v39 = vmul.f32 0.5, %v12358_v45  ;;  %v12359_v37 = vld [vmem:[#allocation90_spill] sm:$0xff]  ;;  %v12361_v45 = vld [vmem:[#allocation91_spill] sm:$0xff] }
0x12b8   : > { %8466 = vtanh.f32 %v5548_v46  ;;  %v5550_v50 = vmul.f32 0.7978846, %v5486_v4  ;;  %v5488_v59 = vadd.f32 %v5424_v40, %v12355_v17  ;;  %v5718_v10 = vmul.f32 %v5654_v31, %v5206_v61 }
0x12b9   : > { %8468 = vtanh.f32 %v5549_v43  ;;  %v5208_v28 = vmul.f32 0.5, %v11128_v2  ;;  %v5652_v18 = vadd.f32 1.0, %v11322_v52  ;;  %v5656_v25 = vadd.f32 1.0, %v11349_v60  ;;  %v12360_v52 = vld [vmem:[#allocation94_spill] sm:$0xff] }
0x12ba   : > { %8470 = vtanh.f32 %v5551_v36  ;;  %v5552_v30 = vmul.f32 0.7978846, %v5488_v59  ;;  %v5766_v41 = vpack.c.bf16 %v5718_v10, %v5714_v7  ;;  %v5297_v15 = vmul.f32 0.044715, %v11287_v62  ;;  %v12362_v10 = vld [vmem:[#allocation71_spill] sm:$0xff] }
0x12bb   : > { %8472 = vtanh.f32 %v5550_v50  ;;  %v11486_v3 = vpop.eup %8460  ;;  %v5716_v53 = vmul.f32 %v5652_v18, %v5204_v39  ;;  %v5720_v43 = vmul.f32 %v5656_v25, %v5208_v28  ;;  %v5299_v46 = vmul.f32 0.044715, %v11289_v48 }
0x12bc   : > { %v5201_v61 = vmul.f32 0.5, %v12359_v37  ;;  %v11490_v4 = vpop.eup %8462  ;;  %8474 = vtanh.f32 %v5552_v30  ;;  %6098 = vmatprep.mubr.bf16.mxu1 %v5766_v41  ;;  %v5361_v2 = vmul.f32 %v5297_v15, %v11287_v62  ;;  %v5205_v60 = vmul.f32 0.5, %v12360_v52  ;;  %v12364_v37 = vld [vmem:[#allocation53_spill] sm:$0xff] }
0x12bd   : > { %v5649_v40 = vadd.f32 1.0, %v11298_v14  ;;  %v5768_v31 = vpack.c.bf16 %v5720_v43, %v5716_v53  ;;  %v5363_v36 = vmul.f32 %v5299_v46, %v11289_v48  ;;  %v5653_v7 = vadd.f32 1.0, %v11328_v6  ;;  %v12363_v43 = vld [vmem:[#allocation50_spill] sm:$0xff] }
0x12be   : > { %v5203_v39 = vmul.f32 0.5, %v12361_v45  ;;  %v5425_v50 = vmul.f32 %v5361_v2, %v11287_v62  ;;  %v5207_v28 = vmul.f32 0.5, %v12362_v10  ;;  %v5651_v18 = vadd.f32 1.0, %v11303_v56  ;;  %v12365_v45 = vld [vmem:[#allocation52_spill] sm:$0xff] }
0x12bf   : > { %v5713_v59 = vmul.f32 %v5649_v40, %v5201_v61  ;;  %6195 = vmatprep.mubr.bf16.mxu0 %v5768_v31  ;;  %v5427_v25 = vmul.f32 %v5363_v36, %v11289_v48  ;;  %v5717_v30 = vmul.f32 %v5653_v7, %v5205_v60  ;;  %v5655_v14 = vadd.f32 1.0, %v11334_v38 }
0x12c0   : > { %v5298_v41 = vmul.f32 0.044715, %v11294_v29  ;;  %v5489_v6 = vadd.f32 %v5425_v50, %v11287_v62  ;;  %v5715_v53 = vmul.f32 %v5651_v18, %v5203_v39  ;;  %v5300_v46 = vmul.f32 0.044715, %v12363_v43 }
0x12c1   : > { %v11504_v15 = vpop.eup %8464  ;;  %v5301_v61 = vmul.f32 0.044715, %v12364_v37  ;;  %v5491_v56 = vadd.f32 %v5427_v25, %v11289_v48  ;;  %v5765_v52 = vpack.c.bf16 %v5717_v30, %v5713_v59  ;;  %v5719_v40 = vmul.f32 %v5655_v14, %v5207_v28  ;;  %v12366_v59 = vld [vmem:[#allocation55_spill] sm:$0xff] }
0x12c2   : > { %v11509_v2 = vpop.eup %8466  ;;  %v5362_v60 = vmul.f32 %v5298_v41, %v11294_v29  ;;  %v5553_v31 = vmul.f32 0.7978846, %v5489_v6  ;;  %v5364_v36 = vmul.f32 %v5300_v46, %v12363_v43  ;;  %v5303_v39 = vmul.f32 0.044715, %v12365_v45 }
0x12c3   : > { %v11513_v38 = vpop.eup %8468  ;;  %v5365_v7 = vmul.f32 %v5301_v61, %v12364_v37  ;;  %v5555_v10 = vmul.f32 0.7978846, %v5491_v56  ;;  %6099 = vmatmul.mubr.bf16.gmra.mrb[204].mxu1 %v5765_v52  ;;  %v5767_v18 = vpack.c.bf16 %v5719_v40, %v5715_v53  ;;  %v5302_v28 = vmul.f32 0.044715, %v12366_v59  ;;  %v12367_v53 = vld [vmem:[#allocation54_spill] sm:$0xff] }
0x12c4   : > { %v11518_v50 = vpop.eup %8470  ;;  %v5426_v25 = vmul.f32 %v5362_v60, %v11294_v29  ;;  %8476 = vtanh.f32 %v5553_v31  ;;  %v5428_v14 = vmul.f32 %v5364_v36, %v12363_v43  ;;  %v5367_v6 = vmul.f32 %v5303_v39, %v12365_v45 }
0x12c5   : > { %v11522_v30 = vpop.eup %8472  ;;  %v5429_v41 = vmul.f32 %v5365_v7, %v12364_v37  ;;  %8478 = vtanh.f32 %v5555_v10  ;;  %6196 = vmatmul.mubr.bf16.gmra.mrb[220].mxu0 %v5767_v18  ;;  %v5366_v61 = vmul.f32 %v5302_v28, %v12366_v59  ;;  %v5304_v56 = vmul.f32 0.044715, %v12367_v53 }
0x12c6   : > { %v5490_v46 = vadd.f32 %v5426_v25, %v11294_v29  ;;  %v11530_v52 = vpop.eup %8474  ;;  %v5492_v40 = vadd.f32 %v5428_v14, %v12363_v43  ;;  %v5431_v31 = vmul.f32 %v5367_v6, %v12365_v45  ;;  %v5210_v36 = vmul.f32 0.5, %v11156_v26 }
0x12c7   : > { %v5493_v60 = vadd.f32 %v5429_v41, %v12364_v37  ;;  %v5430_v39 = vmul.f32 %v5366_v61, %v12366_v59  ;;  %v5368_v10 = vmul.f32 %v5304_v56, %v12367_v53  ;;  %v5214_v18 = vmul.f32 0.5, %v11174_v8 }
0x12c8   : > { %v5554_v7 = vmul.f32 0.7978846, %v5490_v46  ;;  %v5556_v25 = vmul.f32 0.7978846, %v5492_v40  ;;  %v5495_v48 = vadd.f32 %v5431_v31, %v12365_v45  ;;  %v5658_v62 = vadd.f32 1.0, %v11376_v1 }
0x12c9   : > { %v5557_v28 = vmul.f32 0.7978846, %v5493_v60  ;;  %v5494_v14 = vadd.f32 %v5430_v39, %v12366_v59  ;;  %v5432_v41 = vmul.f32 %v5368_v10, %v12367_v53  ;;  %v5662_v26 = vadd.f32 1.0, %v11394_v0  ;;  %v12368_v39 = vld [vmem:[#allocation73_spill] sm:$0xff] }
0x12ca   : > { %8480 = vtanh.f32 %v5554_v7  ;;  %v5559_v6 = vmul.f32 0.7978846, %v5495_v48  ;;  %v5722_v46 = vmul.f32 %v5658_v62, %v5210_v36  ;;  %v5212_v61 = vmul.f32 0.5, %v11158_v13 }
0x12cb   : > { %8482 = vtanh.f32 %v5556_v25  ;;  %v5558_v8 = vmul.f32 0.7978846, %v5494_v14  ;;  %v5496_v56 = vadd.f32 %v5432_v41, %v12367_v53  ;;  %v5726_v40 = vmul.f32 %v5662_v26, %v5214_v18 }
0x12cc   : > { %8484 = vtanh.f32 %v5557_v28  ;;  %v5216_v1 = vmul.f32 0.5, %v11176_v44  ;;  %v5660_v60 = vadd.f32 1.0, %v11381_v21  ;;  %v5664_v31 = vadd.f32 1.0, %v11399_v47  ;;  %v12369_v21 = vld [vmem:[#allocation77_spill] sm:$0xff] }
0x12cd   : > { %8486 = vtanh.f32 %v5559_v6  ;;  %v5560_v7 = vmul.f32 0.7978846, %v5496_v56  ;;  %v5770_v0 = vpack.c.bf16 %v5726_v40, %v5722_v46  ;;  %v5209_v48 = vmul.f32 0.5, %v12368_v39 }
0x12ce   : > { %8488 = vtanh.f32 %v5558_v8  ;;  %v11550_v62 = vpop.eup %8476  ;;  %v5724_v13 = vmul.f32 %v5660_v60, %v5212_v61  ;;  %v5728_v36 = vmul.f32 %v5664_v31, %v5216_v1  ;;  %v5213_v10 = vmul.f32 0.5, %v11165_v12 }
0x12cf   : > { %v5657_v18 = vadd.f32 1.0, %v11367_v57  ;;  %v11554_v25 = vpop.eup %8478  ;;  %8490 = vtanh.f32 %v5560_v7  ;;  %6106 = vmatprep.mubr.bf16.mxu1 %v5770_v0  ;;  %v5661_v44 = vadd.f32 1.0, %v11385_v32  ;;  %v5211_v47 = vmul.f32 0.5, %v12369_v21 }
0x12d0   : > { %v5215_v28 = vmul.f32 0.5, %v11167_v58  ;;  %v5772_v14 = vpack.c.bf16 %v5728_v36, %v5724_v13  ;;  %v5659_v26 = vadd.f32 1.0, %v11372_v34  ;;  %v5663_v6 = vadd.f32 1.0, %v11389_v27  ;;  %v12370_v36 = vld [vmem:[#allocation74_spill] sm:$0xff] }
0x12d1   : > { %v5721_v41 = vmul.f32 %v5657_v18, %v5209_v48  ;;  %v5725_v46 = vmul.f32 %v5661_v44, %v5213_v10  ;;  %v5218_v12 = vmul.f32 0.5, %v12336_v55  ;;  %v5222_v57 = vmul.f32 0.5, %v12340_v19 }
0x12d2   : > { %v5666_v61 = vadd.f32 1.0, %v11440_v54  ;;  %6203 = vmatprep.mubr.bf16.mxu0 %v5772_v14  ;;  %v5723_v8 = vmul.f32 %v5659_v26, %v5211_v47  ;;  %v5727_v32 = vmul.f32 %v5663_v6, %v5215_v28  ;;  %v5670_v56 = vadd.f32 1.0, %v11458_v42  ;;  %v12372_v28 = vld [vmem:[#allocation24_spill] sm:$0xff]  ;;  %v12373_v14 = vld [vmem:[#allocation45_spill] sm:$0xff] }
0x12d3   : > { %v5220_v58 = vmul.f32 0.5, %v12337_v23  ;;  %v5769_v1 = vpack.c.bf16 %v5725_v46, %v5721_v41  ;;  %v5224_v27 = vmul.f32 0.5, %v12341_v51  ;;  %v5668_v60 = vadd.f32 1.0, %v11445_v49 }
0x12d4   : > { %v11566_v40 = vpop.eup %8480  ;;  %v5730_v34 = vmul.f32 %v5666_v61, %v5218_v12  ;;  %v5771_v19 = vpack.c.bf16 %v5727_v32, %v5723_v8  ;;  %v5734_v31 = vmul.f32 %v5670_v56, %v5222_v57  ;;  %v5672_v54 = vadd.f32 1.0, %v11463_v22  ;;  %v12371_v22 = vld [vmem:[#allocation88_spill] sm:$0xff] }
0x12d5   : > { %v11570_v55 = vpop.eup %8482  ;;  %v5217_v7 = vmul.f32 0.5, %v11194_v20  ;;  %6107 = vmatmul.mubr.bf16.gmra.mrb[208].mxu1 %v5769_v1  ;;  %v5732_v23 = vmul.f32 %v5668_v60, %v5220_v58  ;;  %v5221_v42 = vmul.f32 0.5, %v12338_v63  ;;  %v5665_v39 = vadd.f32 1.0, %v11422_v35 }
0x12d6   : > { %v11574_v0 = vpop.eup %8484  ;;  %v5669_v51 = vadd.f32 1.0, %v11449_v33  ;;  %6204 = vmatmul.mubr.bf16.gmra.mrb[224].mxu0 %v5771_v19  ;;  %v5774_v49 = vpack.c.bf16 %v5734_v31, %v5730_v34  ;;  %v5736_v13 = vmul.f32 %v5672_v54, %v5224_v27  ;;  %v5219_v10 = vmul.f32 0.5, %v12370_v36  ;;  %v12374_v34 = vld [vmem:[#allocation43_spill] sm:$0xff]  ;;  %v12375_v54 = vld [vmem:[#allocation42_spill] sm:$0xff] }
0x12d7   : > { %v11579_v48 = vpop.eup %8486  ;;  %v5223_v18 = vmul.f32 0.5, %v12371_v22  ;;  %v5729_v44 = vmul.f32 %v5665_v39, %v5217_v7  ;;  %v5667_v47 = vadd.f32 1.0, %v11426_v16  ;;  %v5671_v63 = vadd.f32 1.0, %v12372_v28 }
0x12d8   : > { %v8489_v20 = vpop.eup %8488  ;;  %v5733_v21 = vmul.f32 %v5669_v51, %v5221_v42  ;;  %6114 = vmatprep.mubr.bf16.mxu1 %v5774_v49  ;;  %v5776_v35 = vpack.c.bf16 %v5736_v13, %v5732_v23  ;;  %v5226_v33 = vmul.f32 0.5, %v12373_v14  ;;  %v5230_v41 = vmul.f32 0.5, %v12354_v9 }
0x12d9   : > { %v5674_v26 = vadd.f32 1.0, %v11504_v15  ;;  %v8491_v6 = vpop.eup %8490  ;;  %v5731_v12 = vmul.f32 %v5667_v47, %v5219_v10  ;;  %v5735_v57 = vmul.f32 %v5671_v63, %v5223_v18  ;;  %v5678_v61 = vadd.f32 1.0, %v11522_v30 }
0x12da   : > { %v5773_v46 = vpack.c.bf16 %v5733_v21, %v5729_v44  ;;  %6211 = vmatprep.mubr.bf16.mxu0 %v5776_v35  ;;  %v5228_v16 = vmul.f32 0.5, %v12351_v24  ;;  %v5232_v32 = vmul.f32 0.5, %v12355_v17  ;;  %v5676_v56 = vadd.f32 1.0, %v11509_v2  ;;  %v12377_v35 = vld [vmem:[#allocation51_spill] sm:$0xff] }
0x12db   : > { %v5738_v8 = vmul.f32 %v5674_v26, %v5226_v33  ;;  %v5775_v58 = vpack.c.bf16 %v5735_v57, %v5731_v12  ;;  %v5742_v1 = vmul.f32 %v5678_v61, %v5230_v41  ;;  %v5680_v9 = vadd.f32 1.0, %v11530_v52 }
0x12dc   : > { %v5225_v15 = vmul.f32 0.5, %v12374_v34  ;;  %v5740_v27 = vmul.f32 %v5676_v56, %v5228_v16  ;;  %v5229_v60 = vmul.f32 0.5, %v11258_v11  ;;  %v5673_v19 = vadd.f32 1.0, %v11486_v3  ;;  %v12378_v34 = vld [vmem:[#allocation75_spill] sm:$0xff] }
0x12dd   : > { %v5677_v30 = vadd.f32 1.0, %v11513_v38  ;;  %6115 = vmatmul.mubr.bf16.gmra.mrb[212].mxu1 %v5773_v46  ;;  %v5778_v31 = vpack.c.bf16 %v5742_v1, %v5738_v8  ;;  %v5744_v24 = vmul.f32 %v5680_v9, %v5232_v32  ;;  %v5227_v17 = vmul.f32 0.5, %v12375_v54 }
0x12de   : > { %v5231_v2 = vmul.f32 0.5, %v12352_v5  ;;  %6212 = vmatmul.mubr.bf16.gmra.mrb[228].mxu0 %v5775_v58  ;;  %v5737_v7 = vmul.f32 %v5673_v19, %v5225_v15  ;;  %v5675_v52 = vadd.f32 1.0, %v11490_v4  ;;  %v5679_v42 = vadd.f32 1.0, %v11518_v50 }
0x12df   : > { %v5741_v23 = vmul.f32 %v5677_v30, %v5229_v60  ;;  %6122 = vmatprep.mubr.bf16.mxu1 %v5778_v31  ;;  %v5780_v11 = vpack.c.bf16 %v5744_v24, %v5740_v27  ;;  %v5234_v3 = vmul.f32 0.5, %v11294_v29  ;;  %v5238_v38 = vmul.f32 0.5, %v12366_v59  ;;  %v12376_v29 = vld [vmem:[#allocation48_spill] sm:$0xff] }
0x12e0   : > { %v5682_v39 = vadd.f32 1.0, %v11566_v40  ;;  %v5739_v49 = vmul.f32 %v5675_v52, %v5227_v17  ;;  %v5743_v13 = vmul.f32 %v5679_v42, %v5231_v2  ;;  %v5686_v36 = vadd.f32 1.0, %v8489_v20  ;;  %v12379_v27 = vld [vmem:[#allocation76_spill] sm:$0xff] }
0x12e1   : > { %v5777_v51 = vpack.c.bf16 %v5741_v23, %v5737_v7  ;;  %6219 = vmatprep.mubr.bf16.mxu0 %v5780_v11  ;;  %v5236_v10 = vmul.f32 0.5, %v12363_v43  ;;  %v5240_v4 = vmul.f32 0.5, %v12367_v53  ;;  %v5684_v50 = vadd.f32 1.0, %v11570_v55 }
0x12e2   : > { %v5746_v5 = vmul.f32 %v5682_v39, %v5234_v3  ;;  %v5779_v22 = vpack.c.bf16 %v5743_v13, %v5739_v49  ;;  %v5750_v18 = vmul.f32 %v5686_v36, %v5238_v38  ;;  %v5688_v44 = vadd.f32 1.0, %v8491_v6  ;;  %v12380_v39 = vld [vmem:[#allocation79_spill] sm:$0xff]  ;;  %v12381_v49 = vld [vmem:[#allocation78_spill] sm:$0xff] }
0x12e3   : > { %v5233_v21 = vmul.f32 0.5, %v12376_v29  ;;  %v5748_v59 = vmul.f32 %v5684_v50, %v5236_v10  ;;  %v5237_v40 = vmul.f32 0.5, %v12364_v37  ;;  %v5681_v47 = vadd.f32 1.0, %v11550_v62 }
0x12e4   : > { %v5685_v20 = vadd.f32 1.0, %v11574_v0  ;;  %v5782_v28 = vpack.c.bf16 %v5750_v18, %v5746_v5  ;;  %v5752_v63 = vmul.f32 %v5688_v44, %v5240_v4  ;;  %v5235_v43 = vmul.f32 0.5, %v12377_v35  ;;  %v12383_v35 = vld [vmem:[#allocation58_spill] sm:$0xff] }
0x12e5   : > { %v5239_v53 = vmul.f32 0.5, %v12365_v45  ;;  %6123 = vmatmul.mubr.bf16.gmra.mrb[216].mxu1 %v5777_v51  ;;  %v5745_v55 = vmul.f32 %v5681_v47, %v5233_v21  ;;  %v5683_v33 = vadd.f32 1.0, %v11554_v25  ;;  %v5687_v41 = vadd.f32 1.0, %v11579_v48 }
0x12e6   : > { %v5749_v14 = vmul.f32 %v5685_v20, %v5237_v40  ;;  %6220 = vmatmul.mubr.bf16.gmra.mrb[232].mxu0 %v5779_v22  ;;  %6130 = vmatprep.mubr.bf16.mxu1 %v5782_v28  ;;  %v5784_v37 = vpack.c.bf16 %v5752_v63, %v5748_v59  ;;  %v12382_v28 = vld [vmem:[#allocation62_spill] sm:$0xff] }
0x12e7   : > { %v5747_v62 = vmul.f32 %v5683_v33, %v5235_v43  ;;  %v5751_v6 = vmul.f32 %v5687_v41, %v5239_v53 }
0x12e8   : > { %v5781_v26 = vpack.c.bf16 %v5749_v14, %v5745_v55  ;;  %6227 = vmatprep.mubr.bf16.mxu0 %v5784_v37 }
0x12e9   : > { %v5783_v0 = vpack.c.bf16 %v5751_v6, %v5747_v62 }
0x12ed   : > { %6131 = vmatmul.mubr.bf16.gmra.mrb[220].mxu1 %v5781_v26 }
0x12ee   : > { %6228 = vmatmul.mubr.bf16.gmra.mrb[236].mxu0 %v5783_v0 }
0x135b   : > { %v7242_v46 = vpop.f32.mrb[192].mxu1 }
0x135c   : > { %v7243_v12 = vpop.f32.mrb[193].mxu1 }
0x135d   : > { %v7244_v45 = vadd.f32 %v7243_v12, %v7242_v46  ;;  %v7245_v57 = vpop.f32.mrb[194].mxu1 }
0x135e   : > { %v7306_v61 = vpop.f32.mrb[208].mxu0  ;;  %v7246_v8 = vpop.f32.mrb[195].mxu1 }
0x135f   : > { %v7307_v16 = vpop.f32.mrb[209].mxu0  ;;  %v7247_v25 = vadd.f32 %v7246_v8, %v7245_v57 }
0x1360   : > { %v7308_v32 = vadd.f32 %v7307_v16, %v7306_v61  ;;  %v7309_v48 = vpop.f32.mrb[210].mxu0  ;;  %v12384_v61 = vld [vmem:[#allocation63_spill] sm:$0xff] }
0x1361   : > { %v7310_v56 = vpop.f32.mrb[211].mxu0  ;;  %v12385_v16 = vld [vmem:[#allocation59_spill] sm:$0xff] }
0x1362   : > { %v6174_v58 = vadd.f32 %v7308_v32, %v7244_v45  ;;  %v7311_v1 = vadd.f32 %v7310_v56, %v7309_v48 }
0x1364   : > { %v6177_v9 = vadd.f32 %v7311_v1, %v7247_v25  ;;  %v11616_v15 = vadd.f32 %v6174_v58, %v12378_v34 }
0x1366   : > { %6252 = vadd.xlane.f32.xlu1 %v11616_v15  ;;  %v11620_v60 = vadd.f32 %v6177_v9, %v12379_v27 }
0x1368   : > { %6254 = vadd.xlane.f32.xlu0 %v11620_v60 }
0x1370   : > { %v7248_v19 = vpop.f32.mrb[196].mxu1 }
0x1371   : > { %v7249_v30 = vpop.f32.mrb[197].mxu1 }
0x1372   : > { %v7312_v31 = vpop.f32.mrb[212].mxu0  ;;  %v7250_v24 = vadd.f32 %v7249_v30, %v7248_v19  ;;  %v7251_v54 = vpop.f32.mrb[198].mxu1 }
0x1373   : > { %v7313_v17 = vpop.f32.mrb[213].mxu0  ;;  %v7252_v2 = vpop.f32.mrb[199].mxu1 }
0x1374   : > { %v7314_v7 = vadd.f32 %v7313_v17, %v7312_v31  ;;  %v7315_v23 = vpop.f32.mrb[214].mxu0  ;;  %v7253_v52 = vadd.f32 %v7252_v2, %v7251_v54  ;;  %v12386_v2 = vld [vmem:[#allocation60_spill] sm:$0xff] }
0x1375   : > { %v7316_v42 = vpop.f32.mrb[215].mxu0 }
0x1376   : > { %v6182_v11 = vadd.f32 %v7314_v7, %v7250_v24  ;;  %v7317_v3 = vadd.f32 %v7316_v42, %v7315_v23 }
0x1378   : > { %v6185_v38 = vadd.f32 %v7317_v3, %v7253_v52  ;;  %v11624_v51 = vadd.f32 %v6182_v11, %v12380_v39  ;;  %v12387_v11 = vld [vmem:[#allocation56_spill] sm:$0xff] }
0x137a   : > { %6256 = vadd.xlane.f32.xlu1 %v11624_v51  ;;  %v11628_v13 = vadd.f32 %v6185_v38, %v12381_v49 }
0x137c   : > { %6258 = vadd.xlane.f32.xlu0 %v11628_v13 }
0x1383   : > { %v7254_v36 = vpop.f32.mrb[200].mxu1 }
0x1384   : > { %v7255_v5 = vpop.f32.mrb[201].mxu1 }
0x1385   : > { %v7318_v10 = vpop.f32.mrb[216].mxu0  ;;  %v7256_v4 = vadd.f32 %v7255_v5, %v7254_v36  ;;  %v7257_v50 = vpop.f32.mrb[202].mxu1 }
0x1386   : > { %v7319_v22 = vpop.f32.mrb[217].mxu0  ;;  %v7258_v18 = vpop.f32.mrb[203].mxu1 }
0x1387   : > { %v7320_v44 = vadd.f32 %v7319_v22, %v7318_v10  ;;  %v7321_v29 = vpop.f32.mrb[218].mxu0  ;;  %v7259_v21 = vadd.f32 %v7258_v18, %v7257_v50 }
0x1388   : > { %v7322_v59 = vpop.f32.mrb[219].mxu0 }
0x1389   : > { %v6190_v40 = vadd.f32 %v7320_v44, %v7256_v4  ;;  %v7323_v47 = vadd.f32 %v7322_v59, %v7321_v29  ;;  %v12388_v29 = vld [vmem:[#allocation61_spill] sm:$0xff] }
0x138b   : > { %v6193_v20 = vadd.f32 %v7323_v47, %v7259_v21  ;;  %v11632_v63 = vadd.f32 %v6190_v40, %v12382_v28 }
0x138d   : > { %6260 = vadd.xlane.f32.xlu1 %v11632_v63  ;;  %v11636_v43 = vadd.f32 %v6193_v20, %v12383_v35  ;;  %v12389_v20 = vld [vmem:[#allocation57_spill] sm:$0xff] }
0x138f   : > { %6262 = vadd.xlane.f32.xlu0 %v11636_v43 }
0x1396   : > { %v7260_v53 = vpop.f32.mrb[204].mxu1 }
0x1397   : > { %v7261_v55 = vpop.f32.mrb[205].mxu1 }
0x1398   : > { %v7324_v14 = vpop.f32.mrb[220].mxu0  ;;  %v7262_v33 = vadd.f32 %v7261_v55, %v7260_v53  ;;  %v7263_v41 = vpop.f32.mrb[206].mxu1 }
0x1399   : > { %v7325_v37 = vpop.f32.mrb[221].mxu0  ;;  %v7264_v26 = vpop.f32.mrb[207].mxu1 }
0x139a   : > { %v7326_v62 = vadd.f32 %v7325_v37, %v7324_v14  ;;  %v7327_v6 = vpop.f32.mrb[222].mxu0  ;;  %v7265_v0 = vadd.f32 %v7264_v26, %v7263_v41 }
0x139b   : > { %v7328_v46 = vpop.f32.mrb[223].mxu0 }
0x139c   : > { %v6198_v12 = vadd.f32 %v7326_v62, %v7262_v33  ;;  %v7329_v45 = vadd.f32 %v7328_v46, %v7327_v6  ;;  %v12390_v46 = vld [vmem:[#allocation84_spill] sm:$0xff] }
0x139e   : > { %v6201_v57 = vadd.f32 %v7329_v45, %v7265_v0  ;;  %v11640_v8 = vadd.f32 %v6198_v12, %v12384_v61 }
0x13a0   : > { %6264 = vadd.xlane.f32.xlu1 %v11640_v8  ;;  %v11644_v25 = vadd.f32 %v6201_v57, %v12385_v16  ;;  %v12391_v16 = vld [vmem:[#allocation80_spill] sm:$0xff] }
0x13a2   : > { %6266 = vadd.xlane.f32.xlu0 %v11644_v25 }
0x13a8   : > { %v7266_v32 = vpop.f32.mrb[208].mxu1 }
0x13a9   : > { %v7330_v48 = vpop.f32.mrb[224].mxu0  ;;  %v7267_v56 = vpop.f32.mrb[209].mxu1 }
0x13aa   : > { %v7268_v58 = vadd.f32 %v7267_v56, %v7266_v32  ;;  %v7331_v1 = vpop.f32.mrb[225].mxu0  ;;  %v7269_v9 = vpop.f32.mrb[210].mxu1 }
0x13ab   : > { %v7332_v34 = vadd.f32 %v7331_v1, %v7330_v48  ;;  %v7333_v27 = vpop.f32.mrb[226].mxu0  ;;  %v7270_v19 = vpop.f32.mrb[211].mxu1 }
0x13ac   : > { %v7271_v30 = vadd.f32 %v7270_v19, %v7269_v9  ;;  %v7334_v31 = vpop.f32.mrb[227].mxu0 }
0x13ad   : > { %v6206_v24 = vadd.f32 %v7332_v34, %v7268_v58  ;;  %v7335_v54 = vadd.f32 %v7334_v31, %v7333_v27 }
0x13af   : > { %v6209_v17 = vadd.f32 %v7335_v54, %v7271_v30  ;;  %v11648_v7 = vadd.f32 %v6206_v24, %v12386_v2  ;;  %v12392_v54 = vld [vmem:[#allocation86_spill] sm:$0xff]  ;;  %v12393_v2 = vld [vmem:[#allocation85_spill] sm:$0xff] }
0x13b0   : > { %v7272_v23 = vpop.f32.mrb[212].mxu1 }
0x13b1   : > { %v7336_v52 = vpop.f32.mrb[228].mxu0  ;;  %6268 = vadd.xlane.f32.xlu1 %v11648_v7  ;;  %v7273_v42 = vpop.f32.mrb[213].mxu1  ;;  %v11652_v3 = vadd.f32 %v6209_v17, %v12387_v11 }
0x13b2   : > { %v7274_v38 = vadd.f32 %v7273_v42, %v7272_v23  ;;  %v7337_v39 = vpop.f32.mrb[229].mxu0  ;;  %v7275_v49 = vpop.f32.mrb[214].mxu1 }
0x13b3   : > { %v7338_v36 = vadd.f32 %v7337_v39, %v7336_v52  ;;  %v7339_v5 = vpop.f32.mrb[230].mxu0  ;;  %6270 = vadd.xlane.f32.xlu0 %v11652_v3  ;;  %v7276_v10 = vpop.f32.mrb[215].mxu1 }
0x13b4   : > { %v7277_v4 = vadd.f32 %v7276_v10, %v7275_v49  ;;  %v7340_v50 = vpop.f32.mrb[231].mxu0 }
0x13b5   : > { %v6214_v22 = vadd.f32 %v7338_v36, %v7274_v38  ;;  %v7341_v18 = vadd.f32 %v7340_v50, %v7339_v5 }
0x13b7   : > { %v6217_v44 = vadd.f32 %v7341_v18, %v7277_v4  ;;  %v11656_v21 = vadd.f32 %v6214_v22, %v12388_v29 }
0x13b8   : > { %v7278_v59 = vpop.f32.mrb[216].mxu1 }
0x13b9   : > { %v7342_v40 = vpop.f32.mrb[232].mxu0  ;;  %6272 = vadd.xlane.f32.xlu1 %v11656_v21  ;;  %v7279_v47 = vpop.f32.mrb[217].mxu1  ;;  %v11660_v28 = vadd.f32 %v6217_v44, %v12389_v20 }
0x13ba   : > { %v7280_v35 = vadd.f32 %v7279_v47, %v7278_v59  ;;  %v7343_v53 = vpop.f32.mrb[233].mxu0  ;;  %v7281_v55 = vpop.f32.mrb[218].mxu1 }
0x13bb   : > { %v7344_v14 = vadd.f32 %v7343_v53, %v7342_v40  ;;  %v7345_v33 = vpop.f32.mrb[234].mxu0  ;;  %6274 = vadd.xlane.f32.xlu0 %v11660_v28  ;;  %v7282_v41 = vpop.f32.mrb[219].mxu1 }
0x13bc   : > { %v7283_v37 = vadd.f32 %v7282_v41, %v7281_v55  ;;  %v7346_v26 = vpop.f32.mrb[235].mxu0 }
0x13bd   : > { %v6222_v62 = vadd.f32 %v7344_v14, %v7280_v35  ;;  %v7347_v6 = vadd.f32 %v7346_v26, %v7345_v33 }
0x13bf   : > { %v6225_v0 = vadd.f32 %v7347_v6, %v7283_v37  ;;  %v11664_v12 = vadd.f32 %v6222_v62, %v12390_v46 }
0x13c0   : > { %v7284_v45 = vpop.f32.mrb[220].mxu1 }
0x13c1   : > { %v7348_v57 = vpop.f32.mrb[236].mxu0  ;;  %6276 = vadd.xlane.f32.xlu1 %v11664_v12  ;;  %v7285_v61 = vpop.f32.mrb[221].mxu1  ;;  %v11668_v32 = vadd.f32 %v6225_v0, %v12391_v16 }
0x13c2   : > { %v7286_v48 = vadd.f32 %v7285_v61, %v7284_v45  ;;  %v7349_v56 = vpop.f32.mrb[237].mxu0  ;;  %v7287_v58 = vpop.f32.mrb[222].mxu1 }
0x13c3   : > { %v7350_v1 = vadd.f32 %v7349_v56, %v7348_v57  ;;  %v7351_v9 = vpop.f32.mrb[238].mxu0  ;;  %6278 = vadd.xlane.f32.xlu0 %v11668_v32  ;;  %v7288_v34 = vpop.f32.mrb[223].mxu1 }
0x13c4   : > { %v7289_v27 = vadd.f32 %v7288_v34, %v7287_v58  ;;  %v7352_v19 = vpop.f32.mrb[239].mxu0 }
0x13c5   : > { %v6230_v30 = vadd.f32 %v7350_v1, %v7286_v48  ;;  %v7353_v31 = vadd.f32 %v7352_v19, %v7351_v9 }
0x13c7   : > { %v6233_v24 = vadd.f32 %v7353_v31, %v7289_v27  ;;  %v11672_v17 = vadd.f32 %v6230_v30, %v12392_v54 }
0x13c9   : > { %6280 = vadd.xlane.f32.xlu1 %v11672_v17  ;;  %v11676_v23 = vadd.f32 %v6233_v24, %v12393_v2 }
0x13cb   : > { %6282 = vadd.xlane.f32.xlu0 %v11676_v23 }
0x13f3   : > { %v6253_v52 = vpop.xlane.xlu1 %6252 }
0x13f4   : > { %v6284_v42 = vmul.f32 0.0078125, %v6253_v52 }
0x13f5   : > { %v6255_v11 = vpop.xlane.xlu0 %6254 }
0x13f6   : > { %v11680_v38 = vsub.f32 %v11616_v15, %v6284_v42  ;;  %v6285_v39 = vmul.f32 0.0078125, %v6255_v11  ;;  %v12394_v11 = vld [vmem:[#allocation22_spill] sm:$0xff] }
0x13f8   : > { %v11683_v49 = vsub.f32 %v11620_v60, %v6285_v39  ;;  %v6316_v36 = vmul.f32 %v11680_v38, %v11680_v38  ;;  %v6474_v39 = vand.u32 7, %v12394_v11 }
0x13fa   : > { %6332 = vadd.xlane.f32.xlu1 %v6316_v36  ;;  %v6317_v5 = vmul.f32 %v11683_v49, %v11683_v49  ;;  %v12395_v36 = vld [vmem:[#allocation23_spill] sm:$0xff] }
0x13fc   : > { %6334 = vadd.xlane.f32.xlu0 %v6317_v5  ;;  %v6475_v5 = vand.u32 7, %v12395_v36 }
0x1407   : > { %v6257_v10 = vpop.xlane.xlu1 %6256 }
0x1408   : > { %v6286_v4 = vmul.f32 0.0078125, %v6257_v10  ;;  %v6470_v10 = vshra.s32 %v12394_v11, 3 }
0x1409   : > { %v6259_v50 = vpop.xlane.xlu0 %6258 }
0x140a   : > { %v11690_v22 = vsub.f32 %v11624_v51, %v6286_v4  ;;  %v6287_v15 = vmul.f32 0.0078125, %v6259_v50  ;;  %v6480_v4 = vmul.u32 6, %v6475_v5  ;;  %v6471_v50 = vshra.s32 %v12395_v36, 3 }
0x140c   : > { %v11693_v18 = vsub.f32 %v11628_v13, %v6287_v15  ;;  %v6318_v60 = vmul.f32 %v11690_v22, %v11690_v22 }
0x140e   : > { %6336 = vadd.xlane.f32.xlu1 %v6318_v60  ;;  %v6319_v44 = vmul.f32 %v11693_v18, %v11693_v18  ;;  %v12397_v60 = vld [vmem:[#allocation20_spill] sm:$0xff] }
0x1410   : > { %6338 = vadd.xlane.f32.xlu0 %v6319_v44  ;;  %v6469_v44 = vshra.s32 %v12397_v60, 3 }
0x141a   : > { %v6261_v29 = vpop.xlane.xlu1 %6260 }
0x141b   : > { %v6288_v59 = vmul.f32 0.0078125, %v6261_v29 }
0x141c   : > { %v6263_v40 = vpop.xlane.xlu0 %6262 }
0x141d   : > { %v11700_v47 = vsub.f32 %v11632_v63, %v6288_v59  ;;  %v6289_v51 = vmul.f32 0.0078125, %v6263_v40  ;;  %v6473_v59 = vand.u32 7, %v12397_v60  ;;  %v12398_v40 = vld [vmem:[#allocation18_spill] sm:$0xff] }
0x141f   : > { %v11703_v20 = vsub.f32 %v11636_v43, %v6289_v51  ;;  %v6320_v13 = vmul.f32 %v11700_v47, %v11700_v47  ;;  %v6476_v51 = vand.u32 31, %v12398_v40 }
0x1421   : > { %6340 = vadd.xlane.f32.xlu1 %v6320_v13  ;;  %v6321_v35 = vmul.f32 %v11703_v20, %v11703_v20 }
0x1423   : > { %6342 = vadd.xlane.f32.xlu0 %v6321_v35  ;;  %v6484_v35 = vadd.s32 8, %v6480_v4 }
0x1425   : > { %vm6492_vm12 = vcmp.ge.s32.totalorder %v6476_v51, %v6484_v35 }
0x142d   : > { %v6265_v53 = vpop.xlane.xlu1 %6264 }
0x142e   : > { %v6290_v55 = vmul.f32 0.0078125, %v6265_v53  ;;  %v12399_v53 = vld [vmem:[#allocation21_spill] sm:$0xff] }
0x142f   : > { %v6267_v14 = vpop.xlane.xlu0 %6266  ;;  %vm6487_vm8 = vcmp.eq.s32.totalorder %v6470_v10, %v12399_v53  ;;  %vm6488_vm10 = vcmp.eq.s32.totalorder %v6471_v50, %v12399_v53  ;;  %vm6486_vm14 = vcmp.eq.s32.totalorder %v6469_v44, %v12399_v53 }
0x1430   : > { %v11710_v33 = vsub.f32 %v11640_v8, %v6290_v55  ;;  %v6291_v63 = vmul.f32 0.0078125, %v6267_v14  ;;  %vm11780_vm15 = vmand %vm6488_vm10, %vm6492_vm12 }
0x1432   : > { %v11713_v41 = vsub.f32 %v11644_v25, %v6291_v63  ;;  %v6322_v43 = vmul.f32 %v11710_v33, %v11710_v33  ;;  %v6478_v63 = vmul.u32 6, %v6473_v59 }
0x1434   : > { %6344 = vadd.xlane.f32.xlu1 %v6322_v43  ;;  %v6323_v37 = vmul.f32 %v11713_v41, %v11713_v41 }
0x1436   : > { %6346 = vadd.xlane.f32.xlu0 %v6323_v37 }
0x143e   : > { %v6269_v26 = vpop.xlane.xlu1 %6268 }
0x143f   : > { %v6292_v62 = vmul.f32 0.0078125, %v6269_v26 }
0x1440   : > { %v6271_v6 = vpop.xlane.xlu0 %6270 }
0x1441   : > { %v11720_v0 = vsub.f32 %v11648_v7, %v6292_v62  ;;  %v6293_v8 = vmul.f32 0.0078125, %v6271_v6  ;;  %v6482_v6 = vadd.s32 8, %v6478_v63 }
0x1443   : > { %v11723_v46 = vsub.f32 %v11652_v3, %v6293_v8  ;;  %v6324_v25 = vmul.f32 %v11720_v0, %v11720_v0  ;;  %vm6490_vm1 = vcmp.ge.s32.totalorder %v6476_v51, %v6482_v6 }
0x1444   : > { %vm6494_vm5 = vmand %vm6486_vm14, %vm6490_vm1 }
0x1445   : > { %6348 = vadd.xlane.f32.xlu1 %v6324_v25  ;;  %v6325_v45 = vmul.f32 %v11723_v46, %v11723_v46 }
0x1446   : > { %v6273_v57 = vpop.xlane.xlu1 %6272 }
0x1447   : > { %v6294_v61 = vmul.f32 0.0078125, %v6273_v57  ;;  %6350 = vadd.xlane.f32.xlu0 %v6325_v45  ;;  %v6500_v45 = vadd.s32 6, %v6484_v35 }
0x1448   : > { %v6275_v16 = vpop.xlane.xlu0 %6274 }
0x1449   : > { %v11730_v48 = vsub.f32 %v11656_v21, %v6294_v61  ;;  %v6295_v7 = vmul.f32 0.0078125, %v6275_v16  ;;  %vm6504_vm4 = vcmp.lt.s32.totalorder %v6476_v51, %v6500_v45 }
0x144b   : > { %v11733_v56 = vsub.f32 %v11660_v28, %v6295_v7  ;;  %v6326_v3 = vmul.f32 %v11730_v48, %v11730_v48 }
0x144d   : > { %6352 = vadd.xlane.f32.xlu1 %v6326_v3  ;;  %v6327_v58 = vmul.f32 %v11733_v56, %v11733_v56  ;;  %v6498_v3 = vadd.s32 6, %v6482_v6 }
0x144e   : > { %v6277_v1 = vpop.xlane.xlu1 %6276 }
0x144f   : > { %v6296_v9 = vmul.f32 0.0078125, %v6277_v1  ;;  %6354 = vadd.xlane.f32.xlu0 %v6327_v58  ;;  %vm6502_vm7 = vcmp.lt.s32.totalorder %v6476_v51, %v6498_v3 }
0x1450   : > { %v6279_v34 = vpop.xlane.xlu0 %6278  ;;  %vm6506_vm10 = vmand %vm6494_vm5, %vm6502_vm7 }
0x1451   : > { %v11740_v27 = vsub.f32 %v11664_v12, %v6296_v9  ;;  %v6297_v21 = vmul.f32 0.0078125, %v6279_v34  ;;  %v12406_v9 = vmov 1.0|1.0  }
0x1453   : > { %v11743_v19 = vsub.f32 %v11668_v32, %v6297_v21  ;;  %v6328_v28 = vmul.f32 %v11740_v27, %v11740_v27 }
0x1455   : > { %6356 = vadd.xlane.f32.xlu1 %v6328_v28  ;;  %v6329_v30 = vmul.f32 %v11743_v19, %v11743_v19  ;;  %v8526_v28 = vld [vmem:[%s11923_s7] sm:$0xff] }
0x1456   : > { %v6281_v31 = vpop.xlane.xlu1 %6280 }
0x1457   : > { %v6298_v24 = vmul.f32 0.0078125, %v6281_v31  ;;  %6358 = vadd.xlane.f32.xlu0 %v6329_v30 }
0x1458   : > { %v6283_v54 = vpop.xlane.xlu0 %6282 }
0x1459   : > { %v11750_v2 = vsub.f32 %v11672_v17, %v6298_v24  ;;  %v6299_v12 = vmul.f32 0.0078125, %v6283_v54  ;;  %v6479_v17 = vmul.u32 6, %v6474_v39 }
0x145b   : > { %v11753_v52 = vsub.f32 %v11676_v23, %v6299_v12  ;;  %v6330_v32 = vmul.f32 %v11750_v2, %v11750_v2  ;;  %v12396_v23 = vld [vmem:[#allocation19_spill] sm:$0xff]  ;;  %v6483_v13 = vadd.s32 8, %v6479_v17 }
0x145c   : > { %v6468_v15 = vshra.s32 %v12396_v23, 3  ;;  %v6472_v29 = vand.u32 7, %v12396_v23  ;;  %v6430_v1 = vsub.s32 6, %v12396_v23  ;;  %v6450_v31 = vsub.s32 7, %v12396_v23 }
0x145d   : > { %6360 = vadd.xlane.f32.xlu1 %v6330_v32  ;;  %v6331_v42 = vmul.f32 %v11753_v52, %v11753_v52  ;;  %vm6491_vm11 = vcmp.ge.s32.totalorder %v6476_v51, %v6483_v13  ;;  %v6499_v25 = vadd.s32 6, %v6483_v13 }
0x145e   : > { %v6477_v14 = vmul.u32 6, %v6472_v29  ;;  %vm11770_vm9 = vcmp.eq.s32.totalorder %v6468_v15, %v12399_v53  ;;  %vm11775_vm13 = vmand %vm6487_vm8, %vm6491_vm11  ;;  %v11807_v30 = vrot.slane %v8526_v28, %v6430_v1  ;;  %v11813_v11 = vrot.slane %v8526_v28, %v6450_v31 }
0x145f   : > { %6362 = vadd.xlane.f32.xlu0 %v6331_v42  ;;  %vm6503_vm3 = vcmp.lt.s32.totalorder %v6476_v51, %v6499_v25 }
0x1460   : > { %v6481_v62 = vadd.s32 8, %v6477_v14  ;;  %vm11790_vm12 = vmand %vm11775_vm13, %vm6503_vm3 }
0x1462   : > { %vm6489_vm0 = vcmp.ge.s32.totalorder %v6476_v51, %v6481_v62  ;;  %v6497_v7 = vadd.s32 6, %v6481_v62 }
0x1463   : > { %vm6493_vm2 = vmand %vm11770_vm9, %vm6489_vm0 }
0x1464   : > { %vm6501_vm6 = vcmp.lt.s32.totalorder %v6476_v51, %v6497_v7  ;;  %vm11796_vm9 = vmand %vm11780_vm15, %vm6504_vm4 }
0x1465   : > { %vm6505_vm8 = vmand %vm6493_vm2, %vm6501_vm6 }
0x1466   : > { %vm6944_vm11 = vmpackc.low %vm6506_vm10, %vm6505_vm8 }
0x1467   : > { %7668 = vmatprep.mubr.msk.bf16.mxu1 %vm6944_vm11, %v12406_v9  ;;  %vm6946_vm14 = vmpackc.low %vm11796_vm9, %vm11790_vm12 }
0x1487   : > { %v6333_v55 = vpop.xlane.xlu1 %6332 }
0x1488   : > { %v6364_v37 = vmul.f32 0.0078125, %v6333_v55 }
0x1489   : > { %v6335_v26 = vpop.xlane.xlu0 %6334 }
0x148a   : > { %v6380_v57 = vadd.f32 1e-12, %v6364_v37  ;;  %v6365_v61 = vmul.f32 0.0078125, %v6335_v26 }
0x148c   : > { %8492 = vrsqrt.f32 %v6380_v57  ;;  %v6381_v58 = vadd.f32 1e-12, %v6365_v61 }
0x148e   : > { %8494 = vrsqrt.f32 %v6381_v58 }
0x1496   : > { %v8493_v24 = vpop.eup %8492 }
0x1497   : > { %v6412_v54 = vmul.f32 %v8493_v24, %v11680_v38 }
0x1498   : > { %v8495_v12 = vpop.eup %8494 }
0x1499   : > { %v6413_v32 = vmul.f32 %v8495_v12, %v11683_v49  ;;  %v6432_v42 = vmul.f32 %v11807_v30, %v6412_v54 }
0x149b   : > { %v6337_v39 = vpop.xlane.xlu1 %6336  ;;  %v6433_v36 = vmul.f32 %v11807_v30, %v6413_v32  ;;  %v6452_v17 = vadd.f32 %v11813_v11, %v6432_v42 }
0x149c   : > { %v6366_v5 = vmul.f32 0.0078125, %v6337_v39 }
0x149d   : > { %v6339_v10 = vpop.xlane.xlu0 %6338  ;;  %v6453_v4 = vadd.f32 %v11813_v11, %v6433_v36 }
0x149e   : > { %v6382_v50 = vadd.f32 1e-12, %v6366_v5  ;;  %v6367_v23 = vmul.f32 0.0078125, %v6339_v10 }
0x149f   : > { %v6515_v15 = vpack.c.bf16 %v6453_v4, %v6452_v17 }
0x14a0   : > { %8496 = vrsqrt.f32 %v6382_v50  ;;  %v6383_v38 = vadd.f32 1e-12, %v6367_v23 }
0x14a1   : > { %7652 = vmatprep.subr.bf16.mxu1 %v6515_v15 }
0x14a2   : > { %8498 = vrsqrt.f32 %v6383_v38  ;;  %7653 = vmatpush3.bf16.msra.mxu1 %v6515_v15 }
0x14aa   : > { %v8497_v49 = vpop.eup %8496 }
0x14ab   : > { %v6414_v60 = vmul.f32 %v8497_v49, %v11690_v22 }
0x14ac   : > { %v8499_v44 = vpop.eup %8498 }
0x14ad   : > { %v6415_v29 = vmul.f32 %v8499_v44, %v11693_v18  ;;  %v6434_v59 = vmul.f32 %v11807_v30, %v6414_v60 }
0x14ae   : > { %v6341_v40 = vpop.xlane.xlu1 %6340 }
0x14af   : > { %v6368_v51 = vmul.f32 0.0078125, %v6341_v40  ;;  %v6435_v13 = vmul.f32 %v11807_v30, %v6415_v29  ;;  %v6454_v14 = vadd.f32 %v11813_v11, %v6434_v59 }
0x14b0   : > { %v6343_v35 = vpop.xlane.xlu0 %6342 }
0x14b1   : > { %v6384_v53 = vadd.f32 1e-12, %v6368_v51  ;;  %v6369_v55 = vmul.f32 0.0078125, %v6343_v35  ;;  %v6455_v63 = vadd.f32 %v11813_v11, %v6435_v13 }
0x14b3   : > { %8500 = vrsqrt.f32 %v6384_v53  ;;  %v6385_v43 = vadd.f32 1e-12, %v6369_v55  ;;  %v6516_v37 = vpack.c.bf16 %v6455_v63, %v6454_v14 }
0x14b5   : > { %8502 = vrsqrt.f32 %v6385_v43  ;;  %7654 = vmatprep.subr.bf16.mxu1 %v6516_v37 }
0x14b6   : > { %7655 = vmatpush3.bf16.msra.mxu1 %v6516_v37 }
0x14bd   : > { %v8501_v22 = vpop.eup %8500 }
0x14be   : > { %v6416_v18 = vmul.f32 %v8501_v22, %v11700_v47 }
0x14bf   : > { %v8503_v26 = vpop.eup %8502 }
0x14c0   : > { %v6417_v62 = vmul.f32 %v8503_v26, %v11703_v20  ;;  %v6436_v6 = vmul.f32 %v11807_v30, %v6416_v18 }
0x14c1   : > { %v6345_v8 = vpop.xlane.xlu1 %6344 }
0x14c2   : > { %v6370_v25 = vmul.f32 0.0078125, %v6345_v8  ;;  %v6437_v45 = vmul.f32 %v11807_v30, %v6417_v62  ;;  %v6456_v7 = vadd.f32 %v11813_v11, %v6436_v6 }
0x14c3   : > { %v6347_v57 = vpop.xlane.xlu0 %6346 }
0x14c4   : > { %v6386_v61 = vadd.f32 1e-12, %v6370_v25  ;;  %v6371_v16 = vmul.f32 0.0078125, %v6347_v57  ;;  %v6457_v3 = vadd.f32 %v11813_v11, %v6437_v45 }
0x14c6   : > { %8504 = vrsqrt.f32 %v6386_v61  ;;  %v6387_v58 = vadd.f32 1e-12, %v6371_v16  ;;  %v6517_v1 = vpack.c.bf16 %v6457_v3, %v6456_v7 }
0x14c8   : > { %8506 = vrsqrt.f32 %v6387_v58  ;;  %7656 = vmatprep.subr.bf16.mxu1 %v6517_v1 }
0x14c9   : > { %7657 = vmatpush3.bf16.msra.mxu1 %v6517_v1 }
0x14d0   : > { %v8505_v47 = vpop.eup %8504 }
0x14d1   : > { %v6418_v20 = vmul.f32 %v8505_v47, %v11710_v33 }
0x14d2   : > { %v8507_v28 = vpop.eup %8506  ;;  %v6349_v31 = vpop.xlane.xlu1 %6348 }
0x14d3   : > { %v6372_v24 = vmul.f32 0.0078125, %v6349_v31  ;;  %v6419_v54 = vmul.f32 %v8507_v28, %v11713_v41  ;;  %v6438_v12 = vmul.f32 %v11807_v30, %v6418_v20 }
0x14d4   : > { %v6351_v32 = vpop.xlane.xlu0 %6350 }
0x14d5   : > { %v6388_v42 = vadd.f32 1e-12, %v6372_v24  ;;  %v6373_v39 = vmul.f32 0.0078125, %v6351_v32  ;;  %v6439_v36 = vmul.f32 %v11807_v30, %v6419_v54  ;;  %v6458_v10 = vadd.f32 %v11813_v11, %v6438_v12 }
0x14d7   : > { %8508 = vrsqrt.f32 %v6388_v42  ;;  %v6389_v5 = vadd.f32 1e-12, %v6373_v39  ;;  %v6459_v17 = vadd.f32 %v11813_v11, %v6439_v36 }
0x14d9   : > { %8510 = vrsqrt.f32 %v6389_v5  ;;  %v6518_v33 = vpack.c.bf16 %v6459_v17, %v6458_v10 }
0x14da   : > { %v6353_v4 = vpop.xlane.xlu1 %6352 }
0x14db   : > { %v6374_v50 = vmul.f32 0.0078125, %v6353_v4  ;;  %7658 = vmatprep.subr.bf16.mxu1 %v6518_v33 }
0x14dc   : > { %v6355_v23 = vpop.xlane.xlu0 %6354  ;;  %7659 = vmatpush3.bf16.msra.mxu1 %v6518_v33 }
0x14dd   : > { %v6390_v41 = vadd.f32 1e-12, %v6374_v50  ;;  %v6375_v15 = vmul.f32 0.0078125, %v6355_v23 }
0x14df   : > { %8512 = vrsqrt.f32 %v6390_v41  ;;  %v6391_v38 = vadd.f32 1e-12, %v6375_v15 }
0x14e1   : > { %v8509_v49 = vpop.eup %8508  ;;  %8514 = vrsqrt.f32 %v6391_v38 }
0x14e2   : > { %v6357_v60 = vpop.xlane.xlu1 %6356  ;;  %v6420_v44 = vmul.f32 %v8509_v49, %v11720_v0 }
0x14e3   : > { %v8511_v29 = vpop.eup %8510  ;;  %v6376_v59 = vmul.f32 0.0078125, %v6357_v60 }
0x14e4   : > { %v6359_v40 = vpop.xlane.xlu0 %6358  ;;  %v6421_v51 = vmul.f32 %v8511_v29, %v11723_v46  ;;  %v6440_v13 = vmul.f32 %v11807_v30, %v6420_v44 }
0x14e5   : > { %v6392_v35 = vadd.f32 1e-12, %v6376_v59  ;;  %v6377_v53 = vmul.f32 0.0078125, %v6359_v40 }
0x14e6   : > { %v6441_v55 = vmul.f32 %v11807_v30, %v6421_v51  ;;  %v6460_v63 = vadd.f32 %v11813_v11, %v6440_v13 }
0x14e7   : > { %8516 = vrsqrt.f32 %v6392_v35  ;;  %v6393_v14 = vadd.f32 1e-12, %v6377_v53 }
0x14e8   : > { %v6461_v43 = vadd.f32 %v11813_v11, %v6441_v55 }
0x14e9   : > { %v8513_v37 = vpop.eup %8512  ;;  %8518 = vrsqrt.f32 %v6393_v14 }
0x14ea   : > { %v6361_v0 = vpop.xlane.xlu1 %6360  ;;  %v6519_v22 = vpack.c.bf16 %v6461_v43, %v6460_v63  ;;  %v6422_v18 = vmul.f32 %v8513_v37, %v11730_v48 }
0x14eb   : > { %v8515_v26 = vpop.eup %8514  ;;  %v6378_v46 = vmul.f32 0.0078125, %v6361_v0 }
0x14ec   : > { %v6363_v62 = vpop.xlane.xlu0 %6362  ;;  %7660 = vmatprep.subr.bf16.mxu1 %v6519_v22  ;;  %v6423_v6 = vmul.f32 %v8515_v26, %v11733_v56  ;;  %v6442_v8 = vmul.f32 %v11807_v30, %v6422_v18 }
0x14ed   : > { %v6394_v25 = vadd.f32 1e-12, %v6378_v46  ;;  %v6379_v45 = vmul.f32 0.0078125, %v6363_v62  ;;  %7661 = vmatpush3.bf16.msra.mxu1 %v6519_v22 }
0x14ee   : > { %v6443_v57 = vmul.f32 %v11807_v30, %v6423_v6  ;;  %v6462_v16 = vadd.f32 %v11813_v11, %v6442_v8 }
0x14ef   : > { %8520 = vrsqrt.f32 %v6394_v25  ;;  %v6395_v61 = vadd.f32 1e-12, %v6379_v45 }
0x14f0   : > { %v6463_v7 = vadd.f32 %v11813_v11, %v6443_v57 }
0x14f1   : > { %v8517_v48 = vpop.eup %8516  ;;  %8522 = vrsqrt.f32 %v6395_v61 }
0x14f2   : > { %v6520_v3 = vpack.c.bf16 %v6463_v7, %v6462_v16  ;;  %v6424_v58 = vmul.f32 %v8517_v48, %v11740_v27 }
0x14f3   : > { %v8519_v1 = vpop.eup %8518 }
0x14f4   : > { %7662 = vmatprep.subr.bf16.mxu1 %v6520_v3  ;;  %v6425_v56 = vmul.f32 %v8519_v1, %v11743_v19  ;;  %v6444_v47 = vmul.f32 %v11807_v30, %v6424_v58 }
0x14f5   : > { %7663 = vmatpush3.bf16.msra.mxu1 %v6520_v3 }
0x14f6   : > { %v6445_v20 = vmul.f32 %v11807_v30, %v6425_v56  ;;  %v6464_v28 = vadd.f32 %v11813_v11, %v6444_v47 }
0x14f8   : > { %v6465_v31 = vadd.f32 %v11813_v11, %v6445_v20 }
0x14f9   : > { %v8521_v24 = vpop.eup %8520 }
0x14fa   : > { %v6521_v54 = vpack.c.bf16 %v6465_v31, %v6464_v28  ;;  %v6426_v12 = vmul.f32 %v8521_v24, %v11750_v2 }
0x14fb   : > { %v8523_v32 = vpop.eup %8522 }
0x14fc   : > { %7664 = vmatprep.subr.bf16.mxu1 %v6521_v54  ;;  %v6427_v27 = vmul.f32 %v8523_v32, %v11753_v52  ;;  %v6446_v19 = vmul.f32 %v11807_v30, %v6426_v12 }
0x14fd   : > { %7665 = vmatpush3.bf16.msra.mxu1 %v6521_v54 }
0x14fe   : > { %v6447_v42 = vmul.f32 %v11807_v30, %v6427_v27  ;;  %v6466_v39 = vadd.f32 %v11813_v11, %v6446_v19 }
0x1500   : > { %v6467_v36 = vadd.f32 %v11813_v11, %v6447_v42 }
0x1502   : > { %v6522_v5 = vpack.c.bf16 %v6467_v36, %v6466_v39 }
0x1504   : > { %7666 = vmatprep.subr.bf16.mxu1 %v6522_v5 }
0x1505   : > { %7667 = vmatpush3.bf16.msra.mxu1 %v6522_v5 }
0x1508   : > { %7669 = vmatmul.mubr.msk.bf16.vlgmr.msra.gmra.mrb[224].mxu1 %vm6946_vm14, %v12406_v9 }
0x15db   : > { %v7670_v2 = vpop.f32.mrb[224].mxu1 }
0x15dc   : > { %v6574_v52 = vmul.f32 0.16666667, %v7670_v2  ;;  %v6557_v30 = vpop.f32.mrb[225].mxu1 }
0x15dd   : > { %v6572_v11 = vmul.f32 0.16666667, %v6557_v30  ;;  %v7671_v10 = vpop.f32.mrb[226].mxu1 }
0x15de   : > { %6578 = vst [vmem:[%s358_s22 + $0x10] sm:$0xff] %v6574_v52  ;;  %v6575_v21 = vmul.f32 0.16666667, %v7671_v10  ;;  %v6560_v34 = vpop.f32.mrb[227].mxu1 }
0x15df   : > { %6576 = vst [vmem:[%s358_s22] sm:$0xff] %v6572_v11  ;;  %v6573_v9 = vmul.f32 0.16666667, %v6560_v34 }
0x15e0   : > { %6579 = vst [vmem:[%s358_s22 + $0x18] sm:$0xff] %v6575_v21 }
0x15e1   : > { %6577 = vst [vmem:[%s358_s22 + $0x8] sm:$0xff] %v6573_v9 }
0x15e2   : > { %8652 = shalt.err (!%p8649_p0)
}
0x15e3   : > { %s8653_s24 = scalar_lea.hbm %s11873_s11, 512  ;;  %s8657_s13 = scalar_lea.hbm %s11924_s8, 1024 }
0x15e4   : > { %p8654_p5 = scmp.ne.s32.totalorder %s11873_s11, %s8653_s24  ;;  %p8658_p10 = scmp.lt.u32.totalorder %s11873_s11, %s11924_s8 }
0x15e5   : > { %p8659_p12 = scmp.lt.u32.totalorder %s8657_s13, %s8653_s24  ;;  %p8661_p2 = scmp.lt.u32.totalorder %s8653_s24, %s11873_s11 }
0x15e6   : > { %p8655_p6 = pnand %p8654_p5, %p12411_p3 }
0x15e7   : > { %p8660_p1 = por %p8659_p12, %p8658_p10 }
0x15e8   : > { %p8656_p9 = pneg %p8655_p6 }
0x15e9   : > { %p8662_p4 = por %p8661_p2, %p8660_p1 }
0x15eb   : > { %p8663_p7 = pnand %p8662_p4, %p8656_p9 }
0x15ed   : > { %8666 = shalt.err (!%p8663_p7)
}
0x15ee   : > { %s8728_s19 = smov 128   ;;  %s8729_s22 = smov 8  }
0x15ef   : > { %7688 = dma.vmem_to_hbm [thread:$0]  (%p12411_p3), %s11868_s26, 512, %s11873_s11, %s11875_s9, %s8728_s19, %s8728_s19, %s8729_s22  }
0x15f0 PF: > { %p7715_p8 = scmp.ge.s32.totalorder %s8713_s30, 2  ;;  %s6609_s14 = sand.u32 1, %s8701_s27  }
0x15f1   : > { %p12412_p11 = scmp.ne.s32.totalorder %s12081_s16, 0  ;;  %s6610_s23 = scalar_lea.sflag [#allocation4], %s6609_s14 }
0x15f3   : > { %p7704_p13 = pnand %p7715_p8, %p12412_p11 }
0x15f5   : > { %8696 = dma.done.wait (!%p7704_p13), %s6610_s23, 512  }
0x15f6   : > { %8698 = vsyncadd (!%p7704_p13), %s6610_s23, 4294966784  ;;  %s12413_s30 = sld [smem:[#allocation16_spill]]  ;;  %s12414_s29 = sld [smem:[#allocation15_spill]] }
0x15f7   : > { %s12415_s17 = sld [smem:[#allocation17_spill]]  ;;  %s12416_s27 = smov %s8705_s28 }
0x15fc   : > { %p21_p0 = scmp.ge.s32.totalorder %s12413_s30, 4   ;;  %s12417_s28 = smov %s12414_s29 }
0x15fd   : > { %s12418_s29 = smov %s12415_s17 }
0x15fe   :  { %23 = sbr.rel (!%p21_p0) target bundleno = 8 (0x8), region = 108 }
0x1605   :  { %6615 = vsyncpa [#allocation3], 1 }
0x1606   :  { %6617 = vsyncpa [#allocation3 + $0x1], 1 }
0x1607   :  { %6618 = vsyncpa [#allocation6], 1 }
0x1608   :  { %6619 = vsyncpa [#allocation9], 1 }
0x1609   :  { %6620 = vsyncpa [#allocation4], 1 }
0x160a   :  { %6622 = vsyncpa [#allocation4 + $0x1], 1 }

</bundles_post_ra>
